<compile_context>
chip_gen: v6e
topology: v6e:2x2x1
jax: 0.10.0
libtpu: 0.0.40
codegen_flags: <defaults>
</compile_context>

<pallas_src>
import functools

import jax
import jax.numpy as jnp
from jax import lax
from jax.experimental import pallas as pl
from jax.experimental.pallas import tpu as pltpu

EPS = 1e-5
LANE = 128


def _round_up(a, b):
    return (a + b - 1) // b * b


def _vmem_limit_bytes():
    # v5e/v6e: 128 MiB physical -> ~96 MiB; v7x: 64 MiB physical -> ~48 MiB.
    try:
        cap = pltpu.get_tpu_info().vmem_capacity_bytes
    except Exception:
        cap = 64 << 20
    return int(min(0.75 * cap, 100 << 20))


# ---------------------------------------------------------------------------
# Fused forward
# ---------------------------------------------------------------------------
def expansive_block_forward(x_nchw, params):
    N, Cin, H, W = x_nchw.shape
    Cm = params["b1"].shape[0]
    Cout = params["b_de"].shape[0]
    CMP = _round_up(Cm, LANE)        # padded mid channels  (lane-dense)
    COP = _round_up(Cout, LANE)      # padded out channels
    CIP = _round_up(Cin, LANE)       # padded in channels
    M = N * H * W
    HW = H * W
    assert W % 8 == 0, "W must be a multiple of 8 (sublane-friendly reshapes)"

    f32, bf16 = jnp.float32, jnp.bfloat16
    cparams = functools.partial(pltpu.CompilerParams,
                                vmem_limit_bytes=_vmem_limit_bytes())

    # ---------------- parameter packing (tiny host/XLA glue) ----------------
    # Fused skip+conv_1 weights: rows = (tap, channel), cols = [skip | conv_1].
    wa = jnp.zeros((3, 3, CIP, 2, CMP), f32)
    wa = wa.at[:, :, :Cin, 0, :Cm].set(params["w_skip"])
    wa = wa.at[:, :, :Cin, 1, :Cm].set(params["w1"])
    wa = wa.reshape(9 * CIP, 2 * CMP).astype(bf16)
    ba = jnp.zeros((1, 2 * CMP), f32)
    ba = ba.at[0, :Cm].set(params["b_skip"])
    ba = ba.at[0, CMP:CMP + Cm].set(params["b1"])

    # conv_2 weights: rows = (tap, channel).
    w2 = jnp.zeros((3, 3, CMP, CMP), f32)
    w2 = w2.at[:, :, :Cm, :Cm].set(params["w2"])
    w2 = w2.reshape(9 * CMP, CMP).astype(bf16)
    b2 = jnp.zeros((1, CMP), f32).at[0, :Cm].set(params["b2"])

    # ConvTranspose2d(k=3,s=2,p=1,op=1) as a (4*CMP, 4*COP) matrix:
    #   rows: input tap (di,dj) in {0,1}^2 (channel-major inside the tap)
    #   cols: output sub-pixel phase (a,b) in {0,1}^2 (channel-major)
    #   W_pt[c, o, ky, kx] lands at (tap, phase) with ky=a+1-2di, kx=b+1-2dj.
    w_de = params["w_de"]                                 # (Cm, Cout, 3, 3)
    wde = jnp.zeros((4, CMP, 4, COP), f32)
    for di in range(2):
        for dj in range(2):
            for a in range(2):
                for b in range(2):
                    ky, kx = a + 1 - 2 * di, b + 1 - 2 * dj
                    if 0 <= ky <= 2 and 0 <= kx <= 2:
                        wde = wde.at[di * 2 + dj, :Cm, a * 2 + b, :Cout].set(
                            w_de[:, :, ky, kx])
    wde = wde.reshape(4 * CMP, 4 * COP).astype(bf16)
    bde = jnp.zeros((1, 4 * COP), f32)
    for ph in range(4):
        bde = bde.at[0, ph * COP:ph * COP + Cout].set(params["b_de"])

    g1 = jnp.zeros((CMP,), f32).at[:Cm].set(params["g1"])
    be1 = jnp.zeros((CMP,), f32).at[:Cm].set(params["be1"])
    g2 = jnp.zeros((CMP,), f32).at[:Cm].set(params["g2"])
    be2 = jnp.zeros((CMP,), f32).at[:Cm].set(params["be2"])

    def bn_scale_shift(stats, gamma, beta):
        # stats[n] = (per-image sum, per-image centered sum of squares).
        s = stats[:, 0, :]                                # (N, CMP)
        ssc = stats[:, 1, :]
        mean = jnp.sum(s, axis=0) / M
        m_t = s / HW
        var = (jnp.sum(ssc, axis=0)
               + HW * jnp.sum(jnp.square(m_t - mean[None, :]), axis=0)) / M
        var = jnp.maximum(var, 0.0)
        scale = gamma * lax.rsqrt(var + EPS)
        shift = beta - mean * scale
        return scale.reshape(1, CMP), shift.reshape(1, CMP)

    # Input: NCHW -> NHWC, spatial halo + channel pad, bf16 (one fused XLA op).
    x_nhwc = jnp.transpose(x_nchw, (0, 2, 3, 1)).astype(bf16)
    xpad = jnp.pad(x_nhwc, ((0, 0), (1, 1), (1, 1), (0, CIP - Cin)))

    # ------------- stage A: skip/conv_1 + ReLU + BN1 partial stats ----------
    def stage_a_kernel(xw_ref, wa_ref, ba_ref, skip_ref, a1_ref, st_ref):
        xw = xw_ref[0]                                    # (H+2, W+2, CIP) bf16
        taps = [xw[ky:ky + H, kx:kx + W, :].reshape(HW, CIP)
                for ky in range(3) for kx in range(3)]
        patches = jnp.concatenate(taps, axis=-1)          # (HW, 9*CIP) bf16
        y = jnp.dot(patches, wa_ref[...],
                    preferred_element_type=jnp.float32) + ba_ref[...]
        skip = y[:, :CMP]                                 # skip conv
        a1 = jnp.maximum(y[:, CMP:], 0.0)                 # relu_1
        skip_ref[0] = skip.reshape(H, W, CMP).astype(jnp.bfloat16)
        a1_ref[0] = a1.reshape(H, W, CMP).astype(jnp.bfloat16)
        s = jnp.sum(a1, axis=0, keepdims=True)            # BN1 partial stats
        m = s * (1.0 / HW)
        d = a1 - m
        ssc = jnp.sum(d * d, axis=0, keepdims=True)
        st_ref[0] = jnp.concatenate([s, ssc], axis=0)

    skip_b, a1_b, st1 = pl.pallas_call(
        stage_a_kernel,
        grid=(N,),
        in_specs=[
            pl.BlockSpec((1, H + 2, W + 2, CIP), lambda n: (n, 0, 0, 0)),
            pl.BlockSpec((9 * CIP, 2 * CMP), lambda n: (0, 0)),
            pl.BlockSpec((1, 2 * CMP), lambda n: (0, 0)),
        ],
        out_specs=(
            pl.BlockSpec((1, H, W, CMP), lambda n: (n, 0, 0, 0)),
            pl.BlockSpec((1, H, W, CMP), lambda n: (n, 0, 0, 0)),
            pl.BlockSpec((1, 2, CMP), lambda n: (n, 0, 0)),
        ),
        out_shape=(
            jax.ShapeDtypeStruct((N, H, W, CMP), bf16),
            jax.ShapeDtypeStruct((N, H, W, CMP), bf16),
            jax.ShapeDtypeStruct((N, 2, CMP), f32),
        ),
        compiler_params=cparams(dimension_semantics=("parallel",)),
    )(xpad, wa, ba)

    s1, t1 = bn_scale_shift(st1, g1, be1)

    # ---- stage B: BN1 affine + conv_2 + residual ReLU + BN2 partial stats ---
    def stage_b_kernel(a1_ref, skip_ref, w2_ref, b2_ref, s1_ref, t1_ref,
                       a2_ref, st_ref):
        a1 = a1_ref[0].astype(jnp.float32)                # (H, W, CMP)
        out1 = (a1 * s1_ref[...] + t1_ref[...]).astype(jnp.bfloat16)
        # zero halo in-register (conv padding must be exactly zero)
        zc = jnp.zeros((H, 1, CMP), jnp.bfloat16)
        zr = jnp.zeros((1, W + 2, CMP), jnp.bfloat16)
        p = jnp.concatenate([zc, out1, zc], axis=1)
        p = jnp.concatenate([zr, p, zr], axis=0)          # (H+2, W+2, CMP)
        taps = [p[ky:ky + H, kx:kx + W, :].reshape(HW, CMP)
                for ky in range(3) for kx in range(3)]
        patches = jnp.concatenate(taps, axis=-1)          # (HW, 9*CMP) bf16
        conv2 = jnp.dot(patches, w2_ref[...],
                        preferred_element_type=jnp.float32) + b2_ref[...]
        skip = skip_ref[0].astype(jnp.float32).reshape(HW, CMP)
        a2 = jnp.maximum(conv2 + skip, 0.0)               # relu_2
        a2_ref[0] = a2.reshape(H, W, CMP).astype(jnp.bfloat16)
        s = jnp.sum(a2, axis=0, keepdims=True)            # BN2 partial stats
        m = s * (1.0 / HW)
        d = a2 - m
        ssc = jnp.sum(d * d, axis=0, keepdims=True)
        st_ref[0] = jnp.concatenate([s, ssc], axis=0)

    a2_b, st2 = pl.pallas_call(
        stage_b_kernel,
        grid=(N,),
        in_specs=[
            pl.BlockSpec((1, H, W, CMP), lambda n: (n, 0, 0, 0)),
            pl.BlockSpec((1, H, W, CMP), lambda n: (n, 0, 0, 0)),
            pl.BlockSpec((9 * CMP, CMP), lambda n: (0, 0)),
            pl.BlockSpec((1, CMP), lambda n: (0, 0)),
            pl.BlockSpec((1, CMP), lambda n: (0, 0)),
            pl.BlockSpec((1, CMP), lambda n: (0, 0)),
        ],
        out_specs=(
            pl.BlockSpec((1, H, W, CMP), lambda n: (n, 0, 0, 0)),
            pl.BlockSpec((1, 2, CMP), lambda n: (n, 0, 0)),
        ),
        out_shape=(
            jax.ShapeDtypeStruct((N, H, W, CMP), bf16),
            jax.ShapeDtypeStruct((N, 2, CMP), f32),
        ),
        compiler_params=cparams(dimension_semantics=("parallel",)),
    )(a1_b, skip_b, w2, b2, s1, t1)

    s2, t2 = bn_scale_shift(st2, g2, be2)

    # ------- stage C: BN2 affine + stride-2 transposed conv (4 phases) -------
    def stage_c_kernel(a2_ref, wde_ref, bde_ref, s2_ref, t2_ref, y_ref):
        a2 = a2_ref[0].astype(jnp.float32)                # (H, W, CMP)
        out2 = (a2 * s2_ref[...] + t2_ref[...]).astype(jnp.bfloat16)
        zc = jnp.zeros((H, 1, CMP), jnp.bfloat16)
        zr = jnp.zeros((1, W + 1, CMP), jnp.bfloat16)
        p = jnp.concatenate([out2, zc], axis=1)
        p = jnp.concatenate([p, zr], axis=0)              # (H+1, W+1, CMP)
        taps = [p[dy:dy + H, dx:dx + W, :].reshape(HW, CMP)
                for dy in range(2) for dx in range(2)]
        patches = jnp.concatenate(taps, axis=-1)          # (HW, 4*CMP) bf16
        for ph in range(4):                               # 4 output phases
            yph = jnp.dot(patches, wde_ref[:, ph * COP:(ph + 1) * COP],
                          preferred_element_type=jnp.float32) \
                  + bde_ref[:, ph * COP:(ph + 1) * COP]
            y_ref[0, ph] = yph.reshape(H, W, COP)

    y5 = pl.pallas_call(
        stage_c_kernel,
        grid=(N,),
        in_specs=[
            pl.BlockSpec((1, H, W, CMP), lambda n: (n, 0, 0, 0)),
            pl.BlockSpec((4 * CMP, 4 * COP), lambda n: (0, 0)),
            pl.BlockSpec((1, 4 * COP), lambda n: (0, 0)),
            pl.BlockSpec((1, CMP), lambda n: (0, 0)),
            pl.BlockSpec((1, CMP), lambda n: (0, 0)),
        ],
        out_specs=pl.BlockSpec((1, 4, H, W, COP), lambda n: (n, 0, 0, 0, 0)),
        out_shape=jax.ShapeDtypeStruct((N, 4, H, W, COP), f32),
        compiler_params=cparams(dimension_semantics=("parallel",)),
    )(a2_b, wde, bde, s2, t2)

    # Epilogue: phase interleave + channel slice + NCHW, fused into the single
    # XLA transpose that is needed anyway for the module's NCHW output.
    y6 = y5.reshape(N, 2, 2, H, W, COP)                   # (n, a, b, i, j, c)
    y = jnp.transpose(y6, (0, 5, 3, 1, 4, 2))             # (n, c, i, a, j, b)
    y = y.reshape(N, COP, 2 * H, 2 * W)
    return y[:, :Cout]


# ---------------------------------------------------------------------------
# Pure-JAX reference (mirrors the kernel's mixed precision: bf16 MXU operands,
# bf16 inter-stage activation storage, f32 accumulation and BN statistics)
# ---------------------------------------------------------------------------
def _conv3x3_ref(x, w, b):
    y = lax.conv_general_dilated(
        x.astype(jnp.bfloat16), w.astype(jnp.bfloat16), (1, 1), "SAME",
        dimension_numbers=("NHWC", "HWIO", "NHWC"),
        preferred_element_type=jnp.float32)
    return y + b.reshape(1, 1, 1, -1)


def _deconv_ref(x, w_pt, b):
    # ConvTranspose2d(k=3, s=2, p=1, output_padding=1) == conv with
    # lhs_dilation=2, padding=((1,2),(1,2)) and the spatially flipped kernel.
    w = jnp.transpose(w_pt, (2, 3, 0, 1))[::-1, ::-1]
    y = lax.conv_general_dilated(
        x.astype(jnp.bfloat16), w.astype(jnp.bfloat16), (1, 1),
        padding=((1, 2), (1, 2)), lhs_dilation=(2, 2),
        dimension_numbers=("NHWC", "HWIO", "NHWC"),
        preferred_element_type=jnp.float32)
    return y + b.reshape(1, 1, 1, -1)


def _bn_scale_shift_ref(x_f32, g, b):
    mean = jnp.mean(x_f32, axis=(0, 1, 2))
    var = jnp.mean(jnp.square(x_f32 - mean), axis=(0, 1, 2))
    scale = g * lax.rsqrt(var + EPS)
    shift = b - mean * scale
    return scale.reshape(1, 1, 1, -1), shift.reshape(1, 1, 1, -1)


def reference_forward(x_nchw, p):
    bf16, f32 = jnp.bfloat16, jnp.float32
    x = jnp.transpose(x_nchw, (0, 2, 3, 1)).astype(f32)
    skip = _conv3x3_ref(x, p["w_skip"], p["b_skip"])
    skip = skip.astype(bf16).astype(f32)                  # bf16 storage mirror
    a1 = jnp.maximum(_conv3x3_ref(x, p["w1"], p["b1"]), 0.0)
    s1, t1 = _bn_scale_shift_ref(a1, p["g1"], p["be1"])   # stats on f32 a1
    out1 = a1.astype(bf16).astype(f32) * s1 + t1
    conv2 = _conv3x3_ref(out1, p["w2"], p["b2"])
    a2 = jnp.maximum(conv2 + skip, 0.0)
    s2, t2 = _bn_scale_shift_ref(a2, p["g2"], p["be2"])
    out2 = a2.astype(bf16).astype(f32) * s2 + t2
    y = _deconv_ref(out2, p["w_de"], p["b_de"])
    return jnp.transpose(y, (0, 3, 1, 2))


# ---------------------------------------------------------------------------
# Deterministic parameter init (shapes follow the module's __init__)
# ---------------------------------------------------------------------------
def init_params(key, in_channels, mid_channel, out_channels):
    ks = jax.random.split(key, 12)

    def w(k, shape, fan_in):
        return jax.random.normal(k, shape, jnp.float32) / jnp.sqrt(fan_in)

    Cin, Cm, Co = in_channels, mid_channel, out_channels
    # TODO(synk): BatchNorm running_mean/running_var buffer updates (training
    # state mutation) are not modeled; they do not affect the forward output.
    return {
        "w_skip": w(ks[0], (3, 3, Cin, Cm), 9 * Cin),     # HWIO
        "b_skip": w(ks[1], (Cm,), 9 * Cin),
        "w1":     w(ks[2], (3, 3, Cin, Cm), 9 * Cin),
        "b1":     w(ks[3], (Cm,), 9 * Cin),
        "w2":     w(ks[4], (3, 3, Cm, Cm), 9 * Cm),
        "b2":     w(ks[5], (Cm,), 9 * Cm),
        "w_de":   w(ks[6], (Cm, Co, 3, 3), 9 * Cm),       # PyTorch deconv layout
        "b_de":   w(ks[7], (Co,), 9 * Cm),
        "g1":  1.0 + 0.1 * jax.random.normal(ks[8], (Cm,), jnp.float32),
        "be1": 0.1 * jax.random.normal(ks[9], (Cm,), jnp.float32),
        "g2":  1.0 + 0.1 * jax.random.normal(ks[10], (Cm,), jnp.float32),
        "be2": 0.1 * jax.random.normal(ks[11], (Cm,), jnp.float32),
    }


# ---------------------------------------------------------------------------
if __name__ == "__main__":
    key = jax.random.PRNGKey(0)
    k_x, k_p = jax.random.split(key)

    N, Cin, Cm, Co, H, W = 2, 4, 8, 8, 16, 16
    x = jax.random.normal(k_x, (N, Cin, H, W), jnp.float32)   # NCHW like PyTorch
    params = init_params(k_p, Cin, Cm, Co)

    fwd = jax.jit(expansive_block_forward)
    out = jax.block_until_ready(fwd(x, params))

    ref = reference_forward(x, params)
    assert out.shape == (N, Co, 2 * H, 2 * W), out.shape
    err = float(jnp.max(jnp.abs(out - ref)))
    assert jnp.allclose(out, ref, atol=5e-3, rtol=5e-3), err

    print("KERNEL_OK")
</pallas_src>

<mosaic_0001>
module attributes {stable_mosaic.version = 11 : i64} {
  func.func @stage_a_kernel(%arg0: i32, %arg1: memref<1x18x18x128xbf16, #tpu.memory_space<vmem>>, %arg2: memref<1152x256xbf16, #tpu.memory_space<vmem>>, %arg3: memref<1x256xf32, #tpu.memory_space<vmem>>, %arg4: memref<1x16x16x128xbf16, #tpu.memory_space<vmem>>, %arg5: memref<1x16x16x128xbf16, #tpu.memory_space<vmem>>, %arg6: memref<1x2x128xf32, #tpu.memory_space<vmem>>) attributes {dimension_semantics = [#tpu.dimension_semantics<parallel>], iteration_bounds = array<i64: 2>, scalar_prefetch = 0 : i64, scratch_operands = 0 : i64, tpu.core_type = #tpu.core_type<tc>, window_params = [{transform_indices = @transform_0, window_bounds = array<i64: 1, 18, 18, 128>}, {pipeline_mode = #tpu.pipeline_mode<synchronous>, transform_indices = @transform_1, window_bounds = array<i64: 1152, 256>}, {pipeline_mode = #tpu.pipeline_mode<synchronous>, transform_indices = @transform_2, window_bounds = array<i64: 1, 256>}, {transform_indices = @transform_3, window_bounds = array<i64: 1, 16, 16, 128>}, {transform_indices = @transform_4, window_bounds = array<i64: 1, 16, 16, 128>}, {transform_indices = @transform_5, window_bounds = array<i64: 1, 2, 128>}]} {
    %c0 = arith.constant 0 : index
    %c0_0 = arith.constant 0 : index
    %c0_1 = arith.constant 0 : index
    %c0_2 = arith.constant 0 : index
    %0 = vector.load %arg1[%c0, %c0_0, %c0_1, %c0_2] : memref<1x18x18x128xbf16, #tpu.memory_space<vmem>>, vector<1x18x18x128xbf16>
    %1 = vector.shape_cast %0 : vector<1x18x18x128xbf16> to vector<18x18x128xbf16>
    %2 = vector.extract_strided_slice %1 {offsets = [0, 0, 0], sizes = [16, 16, 128], strides = [1, 1, 1]} : vector<18x18x128xbf16> to vector<16x16x128xbf16>
    %3 = vector.shape_cast %2 : vector<16x16x128xbf16> to vector<256x128xbf16>
    %4 = vector.extract_strided_slice %1 {offsets = [0, 1, 0], sizes = [16, 16, 128], strides = [1, 1, 1]} : vector<18x18x128xbf16> to vector<16x16x128xbf16>
    %5 = vector.shape_cast %4 : vector<16x16x128xbf16> to vector<256x128xbf16>
    %6 = vector.extract_strided_slice %1 {offsets = [0, 2, 0], sizes = [16, 16, 128], strides = [1, 1, 1]} : vector<18x18x128xbf16> to vector<16x16x128xbf16>
    %7 = vector.shape_cast %6 : vector<16x16x128xbf16> to vector<256x128xbf16>
    %8 = vector.extract_strided_slice %1 {offsets = [1, 0, 0], sizes = [16, 16, 128], strides = [1, 1, 1]} : vector<18x18x128xbf16> to vector<16x16x128xbf16>
    %9 = vector.shape_cast %8 : vector<16x16x128xbf16> to vector<256x128xbf16>
    %10 = vector.extract_strided_slice %1 {offsets = [1, 1, 0], sizes = [16, 16, 128], strides = [1, 1, 1]} : vector<18x18x128xbf16> to vector<16x16x128xbf16>
    %11 = vector.shape_cast %10 : vector<16x16x128xbf16> to vector<256x128xbf16>
    %12 = vector.extract_strided_slice %1 {offsets = [1, 2, 0], sizes = [16, 16, 128], strides = [1, 1, 1]} : vector<18x18x128xbf16> to vector<16x16x128xbf16>
    %13 = vector.shape_cast %12 : vector<16x16x128xbf16> to vector<256x128xbf16>
    %14 = vector.extract_strided_slice %1 {offsets = [2, 0, 0], sizes = [16, 16, 128], strides = [1, 1, 1]} : vector<18x18x128xbf16> to vector<16x16x128xbf16>
    %15 = vector.shape_cast %14 : vector<16x16x128xbf16> to vector<256x128xbf16>
    %16 = vector.extract_strided_slice %1 {offsets = [2, 1, 0], sizes = [16, 16, 128], strides = [1, 1, 1]} : vector<18x18x128xbf16> to vector<16x16x128xbf16>
    %17 = vector.shape_cast %16 : vector<16x16x128xbf16> to vector<256x128xbf16>
    %18 = vector.extract_strided_slice %1 {offsets = [2, 2, 0], sizes = [16, 16, 128], strides = [1, 1, 1]} : vector<18x18x128xbf16> to vector<16x16x128xbf16>
    %19 = vector.shape_cast %18 : vector<16x16x128xbf16> to vector<256x128xbf16>
    %20 = tpu.concatenate %3, %5, %7, %9, %11, %13, %15, %17, %19 in 1 : vector<256x128xbf16>, vector<256x128xbf16>, vector<256x128xbf16>, vector<256x128xbf16>, vector<256x128xbf16>, vector<256x128xbf16>, vector<256x128xbf16>, vector<256x128xbf16>, vector<256x128xbf16> -> vector<256x1152xbf16>
    %c0_3 = arith.constant 0 : index
    %c0_4 = arith.constant 0 : index
    %21 = vector.load %arg2[%c0_3, %c0_4] : memref<1152x256xbf16, #tpu.memory_space<vmem>>, vector<1152x256xbf16>
    %cst = arith.constant dense<0.000000e+00> : vector<256x256xf32>
    %22 = tpu.matmul %20, %21, %cst {dimension_numbers = #tpu.dot_dimension_numbers<[1], [0], [0], [1], [0, 0, 1, 1], [], []>} : vector<256x1152xbf16>, vector<1152x256xbf16>, vector<256x256xf32> -> vector<256x256xf32>
    %c0_5 = arith.constant 0 : index
    %c0_6 = arith.constant 0 : index
    %23 = vector.load %arg3[%c0_5, %c0_6] : memref<1x256xf32, #tpu.memory_space<vmem>>, vector<1x256xf32>
    %24 = vector.broadcast %23 : vector<1x256xf32> to vector<256x256xf32>
    %25 = arith.addf %22, %24 : vector<256x256xf32>
    %26 = vector.extract_strided_slice %25 {offsets = [0, 0], sizes = [256, 128], strides = [1, 1]} : vector<256x256xf32> to vector<256x128xf32>
    %27 = vector.extract_strided_slice %25 {offsets = [0, 128], sizes = [256, 128], strides = [1, 1]} : vector<256x256xf32> to vector<256x128xf32>
    %cst_7 = arith.constant 0.000000e+00 : f32
    %28 = vector.broadcast %cst_7 : f32 to vector<256x128xf32>
    %29 = arith.maximumf %27, %28 : vector<256x128xf32>
    %30 = vector.shape_cast %26 : vector<256x128xf32> to vector<16x16x128xf32>
    %31 = arith.truncf %30 : vector<16x16x128xf32> to vector<16x16x128xbf16>
    %c0_8 = arith.constant 0 : index
    %c0_9 = arith.constant 0 : index
    %c0_10 = arith.constant 0 : index
    %c0_11 = arith.constant 0 : index
    %32 = vector.load %arg4[%c0_8, %c0_9, %c0_10, %c0_11] : memref<1x16x16x128xbf16, #tpu.memory_space<vmem>>, vector<1x16x16x128xbf16>
    %33 = vector.shape_cast %32 : vector<1x16x16x128xbf16> to vector<16x16x128xbf16>
    %34 = vector.shape_cast %31 : vector<16x16x128xbf16> to vector<1x16x16x128xbf16>
    tpu.vector_store %arg4[%c0_8, %c0_9, %c0_10, %c0_11], %34 {strides = array<i32>} : memref<1x16x16x128xbf16, #tpu.memory_space<vmem>>, vector<1x16x16x128xbf16>,
    %35 = vector.shape_cast %29 : vector<256x128xf32> to vector<16x16x128xf32>
    %36 = arith.truncf %35 : vector<16x16x128xf32> to vector<16x16x128xbf16>
    %c0_12 = arith.constant 0 : index
    %c0_13 = arith.constant 0 : index
    %c0_14 = arith.constant 0 : index
    %c0_15 = arith.constant 0 : index
    %37 = vector.load %arg5[%c0_12, %c0_13, %c0_14, %c0_15] : memref<1x16x16x128xbf16, #tpu.memory_space<vmem>>, vector<1x16x16x128xbf16>
    %38 = vector.shape_cast %37 : vector<1x16x16x128xbf16> to vector<16x16x128xbf16>
    %39 = vector.shape_cast %36 : vector<16x16x128xbf16> to vector<1x16x16x128xbf16>
    tpu.vector_store %arg5[%c0_12, %c0_13, %c0_14, %c0_15], %39 {strides = array<i32>} : memref<1x16x16x128xbf16, #tpu.memory_space<vmem>>, vector<1x16x16x128xbf16>,
    %cst_16 = arith.constant dense<0.000000e+00> : vector<128xf32>
    %40 = vector.multi_reduction <add>, %29, %cst_16 [0] : vector<256x128xf32> to vector<128xf32>
    %41 = vector.shape_cast %40 : vector<128xf32> to vector<1x128xf32>
    %cst_17 = arith.constant 3.906250e-03 : f32
    %42 = vector.broadcast %cst_17 : f32 to vector<1x128xf32>
    %43 = arith.mulf %41, %42 : vector<1x128xf32>
    %44 = vector.broadcast %43 : vector<1x128xf32> to vector<256x128xf32>
    %45 = arith.subf %29, %44 : vector<256x128xf32>
    %46 = arith.mulf %45, %45 : vector<256x128xf32>
    %cst_18 = arith.constant dense<0.000000e+00> : vector<128xf32>
    %47 = vector.multi_reduction <add>, %46, %cst_18 [0] : vector<256x128xf32> to vector<128xf32>
    %48 = vector.shape_cast %47 : vector<128xf32> to vector<1x128xf32>
    %49 = tpu.concatenate %41, %48 in 0 : vector<1x128xf32>, vector<1x128xf32> -> vector<2x128xf32>
    %c0_19 = arith.constant 0 : index
    %c0_20 = arith.constant 0 : index
    %c0_21 = arith.constant 0 : index
    %50 = vector.load %arg6[%c0_19, %c0_20, %c0_21] : memref<1x2x128xf32, #tpu.memory_space<vmem>>, vector<1x2x128xf32>
    %51 = vector.shape_cast %50 : vector<1x2x128xf32> to vector<2x128xf32>
    %52 = vector.shape_cast %49 : vector<2x128xf32> to vector<1x2x128xf32>
    tpu.vector_store %arg6[%c0_19, %c0_20, %c0_21], %52 {strides = array<i32>} : memref<1x2x128xf32, #tpu.memory_space<vmem>>, vector<1x2x128xf32>,
    return
  }
  func.func @transform_0(%arg0: i32) -> (i32, i32, i32, i32) {
    %c0_i32 = arith.constant 0 : i32
    %c0_i32_0 = arith.constant 0 : i32
    %c0_i32_1 = arith.constant 0 : i32
    %c0_i32_2 = arith.constant 0 : i32
    return %arg0, %c0_i32, %c0_i32_0, %c0_i32_1 : i32, i32, i32, i32
  }
  func.func @transform_1(%arg0: i32) -> (i32, i32) {
    %c0_i32 = arith.constant 0 : i32
    %c0_i32_0 = arith.constant 0 : i32
    %c0_i32_1 = arith.constant 0 : i32
    return %c0_i32, %c0_i32_0 : i32, i32
  }
  func.func @transform_2(%arg0: i32) -> (i32, i32) {
    %c0_i32 = arith.constant 0 : i32
    %c0_i32_0 = arith.constant 0 : i32
    %c0_i32_1 = arith.constant 0 : i32
    return %c0_i32, %c0_i32_0 : i32, i32
  }
  func.func @transform_3(%arg0: i32) -> (i32, i32, i32, i32) {
    %c0_i32 = arith.constant 0 : i32
    %c0_i32_0 = arith.constant 0 : i32
    %c0_i32_1 = arith.constant 0 : i32
    %c0_i32_2 = arith.constant 0 : i32
    return %arg0, %c0_i32, %c0_i32_0, %c0_i32_1 : i32, i32, i32, i32
  }
  func.func @transform_4(%arg0: i32) -> (i32, i32, i32, i32) {
    %c0_i32 = arith.constant 0 : i32
    %c0_i32_0 = arith.constant 0 : i32
    %c0_i32_1 = arith.constant 0 : i32
    %c0_i32_2 = arith.constant 0 : i32
    return %arg0, %c0_i32, %c0_i32_0, %c0_i32_1 : i32, i32, i32, i32
  }
  func.func @transform_5(%arg0: i32) -> (i32, i32, i32) {
    %c0_i32 = arith.constant 0 : i32
    %c0_i32_0 = arith.constant 0 : i32
    %c0_i32_1 = arith.constant 0 : i32
    return %arg0, %c0_i32, %c0_i32_0 : i32, i32, i32
  }
}

module attributes {stable_mosaic.version = 11 : i64} {
  func.func @stage_b_kernel(%arg0: i32, %arg1: memref<1x16x16x128xbf16, #tpu.memory_space<vmem>>, %arg2: memref<1x16x16x128xbf16, #tpu.memory_space<vmem>>, %arg3: memref<1152x128xbf16, #tpu.memory_space<vmem>>, %arg4: memref<1x128xf32, #tpu.memory_space<vmem>>, %arg5: memref<1x128xf32, #tpu.memory_space<vmem>>, %arg6: memref<1x128xf32, #tpu.memory_space<vmem>>, %arg7: memref<1x16x16x128xbf16, #tpu.memory_space<vmem>>, %arg8: memref<1x2x128xf32, #tpu.memory_space<vmem>>) attributes {dimension_semantics = [#tpu.dimension_semantics<parallel>], iteration_bounds = array<i64: 2>, scalar_prefetch = 0 : i64, scratch_operands = 0 : i64, tpu.core_type = #tpu.core_type<tc>, window_params = [{transform_indices = @transform_0, window_bounds = array<i64: 1, 16, 16, 128>}, {transform_indices = @transform_1, window_bounds = array<i64: 1, 16, 16, 128>}, {pipeline_mode = #tpu.pipeline_mode<synchronous>, transform_indices = @transform_2, window_bounds = array<i64: 1152, 128>}, {pipeline_mode = #tpu.pipeline_mode<synchronous>, transform_indices = @transform_3, window_bounds = array<i64: 1, 128>}, {pipeline_mode = #tpu.pipeline_mode<synchronous>, transform_indices = @transform_4, window_bounds = array<i64: 1, 128>}, {pipeline_mode = #tpu.pipeline_mode<synchronous>, transform_indices = @transform_5, window_bounds = array<i64: 1, 128>}, {transform_indices = @transform_6, window_bounds = array<i64: 1, 16, 16, 128>}, {transform_indices = @transform_7, window_bounds = array<i64: 1, 2, 128>}]} {
    %c0 = arith.constant 0 : index
    %c0_0 = arith.constant 0 : index
    %c0_1 = arith.constant 0 : index
    %c0_2 = arith.constant 0 : index
    %0 = vector.load %arg1[%c0, %c0_0, %c0_1, %c0_2] : memref<1x16x16x128xbf16, #tpu.memory_space<vmem>>, vector<1x16x16x128xbf16>
    %1 = vector.shape_cast %0 : vector<1x16x16x128xbf16> to vector<16x16x128xbf16>
    %2 = arith.extf %1 : vector<16x16x128xbf16> to vector<16x16x128xf32>
    %c0_3 = arith.constant 0 : index
    %c0_4 = arith.constant 0 : index
    %3 = vector.load %arg5[%c0_3, %c0_4] : memref<1x128xf32, #tpu.memory_space<vmem>>, vector<1x128xf32>
    %4 = vector.shape_cast %3 : vector<1x128xf32> to vector<1x1x128xf32>
    %5 = vector.broadcast %4 : vector<1x1x128xf32> to vector<16x16x128xf32>
    %6 = arith.mulf %2, %5 : vector<16x16x128xf32>
    %c0_5 = arith.constant 0 : index
    %c0_6 = arith.constant 0 : index
    %7 = vector.load %arg6[%c0_5, %c0_6] : memref<1x128xf32, #tpu.memory_space<vmem>>, vector<1x128xf32>
    %8 = vector.shape_cast %7 : vector<1x128xf32> to vector<1x1x128xf32>
    %9 = vector.broadcast %8 : vector<1x1x128xf32> to vector<16x16x128xf32>
    %10 = arith.addf %6, %9 : vector<16x16x128xf32>
    %11 = arith.truncf %10 : vector<16x16x128xf32> to vector<16x16x128xbf16>
    %cst = arith.constant 0.000000e+00 : bf16
    %12 = vector.broadcast %cst : bf16 to vector<16x1x128xbf16>
    %cst_7 = arith.constant 0.000000e+00 : bf16
    %13 = vector.broadcast %cst_7 : bf16 to vector<1x18x128xbf16>
    %14 = tpu.concatenate %12, %11, %12 in 1 : vector<16x1x128xbf16>, vector<16x16x128xbf16>, vector<16x1x128xbf16> -> vector<16x18x128xbf16>
    %15 = tpu.concatenate %13, %14, %13 in 0 : vector<1x18x128xbf16>, vector<16x18x128xbf16>, vector<1x18x128xbf16> -> vector<18x18x128xbf16>
    %16 = vector.extract_strided_slice %15 {offsets = [0, 0, 0], sizes = [16, 16, 128], strides = [1, 1, 1]} : vector<18x18x128xbf16> to vector<16x16x128xbf16>
    %17 = vector.shape_cast %16 : vector<16x16x128xbf16> to vector<256x128xbf16>
    %18 = vector.extract_strided_slice %15 {offsets = [0, 1, 0], sizes = [16, 16, 128], strides = [1, 1, 1]} : vector<18x18x128xbf16> to vector<16x16x128xbf16>
    %19 = vector.shape_cast %18 : vector<16x16x128xbf16> to vector<256x128xbf16>
    %20 = vector.extract_strided_slice %15 {offsets = [0, 2, 0], sizes = [16, 16, 128], strides = [1, 1, 1]} : vector<18x18x128xbf16> to vector<16x16x128xbf16>
    %21 = vector.shape_cast %20 : vector<16x16x128xbf16> to vector<256x128xbf16>
    %22 = vector.extract_strided_slice %15 {offsets = [1, 0, 0], sizes = [16, 16, 128], strides = [1, 1, 1]} : vector<18x18x128xbf16> to vector<16x16x128xbf16>
    %23 = vector.shape_cast %22 : vector<16x16x128xbf16> to vector<256x128xbf16>
    %24 = vector.extract_strided_slice %15 {offsets = [1, 1, 0], sizes = [16, 16, 128], strides = [1, 1, 1]} : vector<18x18x128xbf16> to vector<16x16x128xbf16>
    %25 = vector.shape_cast %24 : vector<16x16x128xbf16> to vector<256x128xbf16>
    %26 = vector.extract_strided_slice %15 {offsets = [1, 2, 0], sizes = [16, 16, 128], strides = [1, 1, 1]} : vector<18x18x128xbf16> to vector<16x16x128xbf16>
    %27 = vector.shape_cast %26 : vector<16x16x128xbf16> to vector<256x128xbf16>
    %28 = vector.extract_strided_slice %15 {offsets = [2, 0, 0], sizes = [16, 16, 128], strides = [1, 1, 1]} : vector<18x18x128xbf16> to vector<16x16x128xbf16>
    %29 = vector.shape_cast %28 : vector<16x16x128xbf16> to vector<256x128xbf16>
    %30 = vector.extract_strided_slice %15 {offsets = [2, 1, 0], sizes = [16, 16, 128], strides = [1, 1, 1]} : vector<18x18x128xbf16> to vector<16x16x128xbf16>
    %31 = vector.shape_cast %30 : vector<16x16x128xbf16> to vector<256x128xbf16>
    %32 = vector.extract_strided_slice %15 {offsets = [2, 2, 0], sizes = [16, 16, 128], strides = [1, 1, 1]} : vector<18x18x128xbf16> to vector<16x16x128xbf16>
    %33 = vector.shape_cast %32 : vector<16x16x128xbf16> to vector<256x128xbf16>
    %34 = tpu.concatenate %17, %19, %21, %23, %25, %27, %29, %31, %33 in 1 : vector<256x128xbf16>, vector<256x128xbf16>, vector<256x128xbf16>, vector<256x128xbf16>, vector<256x128xbf16>, vector<256x128xbf16>, vector<256x128xbf16>, vector<256x128xbf16>, vector<256x128xbf16> -> vector<256x1152xbf16>
    %c0_8 = arith.constant 0 : index
    %c0_9 = arith.constant 0 : index
    %35 = vector.load %arg3[%c0_8, %c0_9] : memref<1152x128xbf16, #tpu.memory_space<vmem>>, vector<1152x128xbf16>
    %cst_10 = arith.constant dense<0.000000e+00> : vector<256x128xf32>
    %36 = tpu.matmul %34, %35, %cst_10 {dimension_numbers = #tpu.dot_dimension_numbers<[1], [0], [0], [1], [0, 0, 1, 1], [], []>} : vector<256x1152xbf16>, vector<1152x128xbf16>, vector<256x128xf32> -> vector<256x128xf32>
    %c0_11 = arith.constant 0 : index
    %c0_12 = arith.constant 0 : index
    %37 = vector.load %arg4[%c0_11, %c0_12] : memref<1x128xf32, #tpu.memory_space<vmem>>, vector<1x128xf32>
    %38 = vector.broadcast %37 : vector<1x128xf32> to vector<256x128xf32>
    %39 = arith.addf %36, %38 : vector<256x128xf32>
    %c0_13 = arith.constant 0 : index
    %c0_14 = arith.constant 0 : index
    %c0_15 = arith.constant 0 : index
    %c0_16 = arith.constant 0 : index
    %40 = vector.load %arg2[%c0_13, %c0_14, %c0_15, %c0_16] : memref<1x16x16x128xbf16, #tpu.memory_space<vmem>>, vector<1x16x16x128xbf16>
    %41 = vector.shape_cast %40 : vector<1x16x16x128xbf16> to vector<16x16x128xbf16>
    %42 = arith.extf %41 : vector<16x16x128xbf16> to vector<16x16x128xf32>
    %43 = vector.shape_cast %42 : vector<16x16x128xf32> to vector<256x128xf32>
    %44 = arith.addf %39, %43 : vector<256x128xf32>
    %cst_17 = arith.constant 0.000000e+00 : f32
    %45 = vector.broadcast %cst_17 : f32 to vector<256x128xf32>
    %46 = arith.maximumf %44, %45 : vector<256x128xf32>
    %47 = vector.shape_cast %46 : vector<256x128xf32> to vector<16x16x128xf32>
    %48 = arith.truncf %47 : vector<16x16x128xf32> to vector<16x16x128xbf16>
    %c0_18 = arith.constant 0 : index
    %c0_19 = arith.constant 0 : index
    %c0_20 = arith.constant 0 : index
    %c0_21 = arith.constant 0 : index
    %49 = vector.load %arg7[%c0_18, %c0_19, %c0_20, %c0_21] : memref<1x16x16x128xbf16, #tpu.memory_space<vmem>>, vector<1x16x16x128xbf16>
    %50 = vector.shape_cast %49 : vector<1x16x16x128xbf16> to vector<16x16x128xbf16>
    %51 = vector.shape_cast %48 : vector<16x16x128xbf16> to vector<1x16x16x128xbf16>
    tpu.vector_store %arg7[%c0_18, %c0_19, %c0_20, %c0_21], %51 {strides = array<i32>} : memref<1x16x16x128xbf16, #tpu.memory_space<vmem>>, vector<1x16x16x128xbf16>,
    %cst_22 = arith.constant dense<0.000000e+00> : vector<128xf32>
    %52 = vector.multi_reduction <add>, %46, %cst_22 [0] : vector<256x128xf32> to vector<128xf32>
    %53 = vector.shape_cast %52 : vector<128xf32> to vector<1x128xf32>
    %cst_23 = arith.constant 3.906250e-03 : f32
    %54 = vector.broadcast %cst_23 : f32 to vector<1x128xf32>
    %55 = arith.mulf %53, %54 : vector<1x128xf32>
    %56 = vector.broadcast %55 : vector<1x128xf32> to vector<256x128xf32>
    %57 = arith.subf %46, %56 : vector<256x128xf32>
    %58 = arith.mulf %57, %57 : vector<256x128xf32>
    %cst_24 = arith.constant dense<0.000000e+00> : vector<128xf32>
    %59 = vector.multi_reduction <add>, %58, %cst_24 [0] : vector<256x128xf32> to vector<128xf32>
    %60 = vector.shape_cast %59 : vector<128xf32> to vector<1x128xf32>
    %61 = tpu.concatenate %53, %60 in 0 : vector<1x128xf32>, vector<1x128xf32> -> vector<2x128xf32>
    %c0_25 = arith.constant 0 : index
    %c0_26 = arith.constant 0 : index
    %c0_27 = arith.constant 0 : index
    %62 = vector.load %arg8[%c0_25, %c0_26, %c0_27] : memref<1x2x128xf32, #tpu.memory_space<vmem>>, vector<1x2x128xf32>
    %63 = vector.shape_cast %62 : vector<1x2x128xf32> to vector<2x128xf32>
    %64 = vector.shape_cast %61 : vector<2x128xf32> to vector<1x2x128xf32>
    tpu.vector_store %arg8[%c0_25, %c0_26, %c0_27], %64 {strides = array<i32>} : memref<1x2x128xf32, #tpu.memory_space<vmem>>, vector<1x2x128xf32>,
    return
  }
  func.func @transform_0(%arg0: i32) -> (i32, i32, i32, i32) {
    %c0_i32 = arith.constant 0 : i32
    %c0_i32_0 = arith.constant 0 : i32
    %c0_i32_1 = arith.constant 0 : i32
    %c0_i32_2 = arith.constant 0 : i32
    return %arg0, %c0_i32, %c0_i32_0, %c0_i32_1 : i32, i32, i32, i32
  }
  func.func @transform_1(%arg0: i32) -> (i32, i32, i32, i32) {
    %c0_i32 = arith.constant 0 : i32
    %c0_i32_0 = arith.constant 0 : i32
    %c0_i32_1 = arith.constant 0 : i32
    %c0_i32_2 = arith.constant 0 : i32
    return %arg0, %c0_i32, %c0_i32_0, %c0_i32_1 : i32, i32, i32, i32
  }
  func.func @transform_2(%arg0: i32) -> (i32, i32) {
    %c0_i32 = arith.constant 0 : i32
    %c0_i32_0 = arith.constant 0 : i32
    %c0_i32_1 = arith.constant 0 : i32
    return %c0_i32, %c0_i32_0 : i32, i32
  }
  func.func @transform_3(%arg0: i32) -> (i32, i32) {
    %c0_i32 = arith.constant 0 : i32
    %c0_i32_0 = arith.constant 0 : i32
    %c0_i32_1 = arith.constant 0 : i32
    return %c0_i32, %c0_i32_0 : i32, i32
  }
  func.func @transform_4(%arg0: i32) -> (i32, i32) {
    %c0_i32 = arith.constant 0 : i32
    %c0_i32_0 = arith.constant 0 : i32
    %c0_i32_1 = arith.constant 0 : i32
    return %c0_i32, %c0_i32_0 : i32, i32
  }
  func.func @transform_5(%arg0: i32) -> (i32, i32) {
    %c0_i32 = arith.constant 0 : i32
    %c0_i32_0 = arith.constant 0 : i32
    %c0_i32_1 = arith.constant 0 : i32
    return %c0_i32, %c0_i32_0 : i32, i32
  }
  func.func @transform_6(%arg0: i32) -> (i32, i32, i32, i32) {
    %c0_i32 = arith.constant 0 : i32
    %c0_i32_0 = arith.constant 0 : i32
    %c0_i32_1 = arith.constant 0 : i32
    %c0_i32_2 = arith.constant 0 : i32
    return %arg0, %c0_i32, %c0_i32_0, %c0_i32_1 : i32, i32, i32, i32
  }
  func.func @transform_7(%arg0: i32) -> (i32, i32, i32) {
    %c0_i32 = arith.constant 0 : i32
    %c0_i32_0 = arith.constant 0 : i32
    %c0_i32_1 = arith.constant 0 : i32
    return %arg0, %c0_i32, %c0_i32_0 : i32, i32, i32
  }
}

module attributes {stable_mosaic.version = 11 : i64} {
  func.func @stage_c_kernel(%arg0: i32, %arg1: memref<1x16x16x128xbf16, #tpu.memory_space<vmem>>, %arg2: memref<512x512xbf16, #tpu.memory_space<vmem>>, %arg3: memref<1x512xf32, #tpu.memory_space<vmem>>, %arg4: memref<1x128xf32, #tpu.memory_space<vmem>>, %arg5: memref<1x128xf32, #tpu.memory_space<vmem>>, %arg6: memref<1x4x16x16x128xf32, #tpu.memory_space<vmem>>) attributes {dimension_semantics = [#tpu.dimension_semantics<parallel>], iteration_bounds = array<i64: 2>, scalar_prefetch = 0 : i64, scratch_operands = 0 : i64, tpu.core_type = #tpu.core_type<tc>, window_params = [{transform_indices = @transform_0, window_bounds = array<i64: 1, 16, 16, 128>}, {pipeline_mode = #tpu.pipeline_mode<synchronous>, transform_indices = @transform_1, window_bounds = array<i64: 512, 512>}, {pipeline_mode = #tpu.pipeline_mode<synchronous>, transform_indices = @transform_2, window_bounds = array<i64: 1, 512>}, {pipeline_mode = #tpu.pipeline_mode<synchronous>, transform_indices = @transform_3, window_bounds = array<i64: 1, 128>}, {pipeline_mode = #tpu.pipeline_mode<synchronous>, transform_indices = @transform_4, window_bounds = array<i64: 1, 128>}, {transform_indices = @transform_5, window_bounds = array<i64: 1, 4, 16, 16, 128>}]} {
    %c0 = arith.constant 0 : index
    %c0_0 = arith.constant 0 : index
    %c0_1 = arith.constant 0 : index
    %c0_2 = arith.constant 0 : index
    %0 = vector.load %arg1[%c0, %c0_0, %c0_1, %c0_2] : memref<1x16x16x128xbf16, #tpu.memory_space<vmem>>, vector<1x16x16x128xbf16>
    %1 = vector.shape_cast %0 : vector<1x16x16x128xbf16> to vector<16x16x128xbf16>
    %2 = arith.extf %1 : vector<16x16x128xbf16> to vector<16x16x128xf32>
    %c0_3 = arith.constant 0 : index
    %c0_4 = arith.constant 0 : index
    %3 = vector.load %arg4[%c0_3, %c0_4] : memref<1x128xf32, #tpu.memory_space<vmem>>, vector<1x128xf32>
    %4 = vector.shape_cast %3 : vector<1x128xf32> to vector<1x1x128xf32>
    %5 = vector.broadcast %4 : vector<1x1x128xf32> to vector<16x16x128xf32>
    %6 = arith.mulf %2, %5 : vector<16x16x128xf32>
    %c0_5 = arith.constant 0 : index
    %c0_6 = arith.constant 0 : index
    %7 = vector.load %arg5[%c0_5, %c0_6] : memref<1x128xf32, #tpu.memory_space<vmem>>, vector<1x128xf32>
    %8 = vector.shape_cast %7 : vector<1x128xf32> to vector<1x1x128xf32>
    %9 = vector.broadcast %8 : vector<1x1x128xf32> to vector<16x16x128xf32>
    %10 = arith.addf %6, %9 : vector<16x16x128xf32>
    %11 = arith.truncf %10 : vector<16x16x128xf32> to vector<16x16x128xbf16>
    %cst = arith.constant 0.000000e+00 : bf16
    %12 = vector.broadcast %cst : bf16 to vector<16x1x128xbf16>
    %cst_7 = arith.constant 0.000000e+00 : bf16
    %13 = vector.broadcast %cst_7 : bf16 to vector<1x17x128xbf16>
    %14 = tpu.concatenate %11, %12 in 1 : vector<16x16x128xbf16>, vector<16x1x128xbf16> -> vector<16x17x128xbf16>
    %15 = tpu.concatenate %14, %13 in 0 : vector<16x17x128xbf16>, vector<1x17x128xbf16> -> vector<17x17x128xbf16>
    %16 = vector.extract_strided_slice %15 {offsets = [0, 0, 0], sizes = [16, 16, 128], strides = [1, 1, 1]} : vector<17x17x128xbf16> to vector<16x16x128xbf16>
    %17 = vector.shape_cast %16 : vector<16x16x128xbf16> to vector<256x128xbf16>
    %18 = vector.extract_strided_slice %15 {offsets = [0, 1, 0], sizes = [16, 16, 128], strides = [1, 1, 1]} : vector<17x17x128xbf16> to vector<16x16x128xbf16>
    %19 = vector.shape_cast %18 : vector<16x16x128xbf16> to vector<256x128xbf16>
    %20 = vector.extract_strided_slice %15 {offsets = [1, 0, 0], sizes = [16, 16, 128], strides = [1, 1, 1]} : vector<17x17x128xbf16> to vector<16x16x128xbf16>
    %21 = vector.shape_cast %20 : vector<16x16x128xbf16> to vector<256x128xbf16>
    %22 = vector.extract_strided_slice %15 {offsets = [1, 1, 0], sizes = [16, 16, 128], strides = [1, 1, 1]} : vector<17x17x128xbf16> to vector<16x16x128xbf16>
    %23 = vector.shape_cast %22 : vector<16x16x128xbf16> to vector<256x128xbf16>
    %24 = tpu.concatenate %17, %19, %21, %23 in 1 : vector<256x128xbf16>, vector<256x128xbf16>, vector<256x128xbf16>, vector<256x128xbf16> -> vector<256x512xbf16>
    %c0_8 = arith.constant 0 : index
    %c0_9 = arith.constant 0 : index
    %25 = vector.load %arg2[%c0_8, %c0_9] : memref<512x512xbf16, #tpu.memory_space<vmem>>, vector<512x128xbf16>
    %cst_10 = arith.constant dense<0.000000e+00> : vector<256x128xf32>
    %26 = tpu.matmul %24, %25, %cst_10 {dimension_numbers = #tpu.dot_dimension_numbers<[1], [0], [0], [1], [0, 0, 1, 1], [], []>} : vector<256x512xbf16>, vector<512x128xbf16>, vector<256x128xf32> -> vector<256x128xf32>
    %c0_11 = arith.constant 0 : index
    %c0_12 = arith.constant 0 : index
    %27 = vector.load %arg3[%c0_11, %c0_12] : memref<1x512xf32, #tpu.memory_space<vmem>>, vector<1x128xf32>
    %28 = vector.broadcast %27 : vector<1x128xf32> to vector<256x128xf32>
    %29 = arith.addf %26, %28 : vector<256x128xf32>
    %30 = vector.shape_cast %29 : vector<256x128xf32> to vector<16x16x128xf32>
    %c0_13 = arith.constant 0 : index
    %c0_14 = arith.constant 0 : index
    %c0_15 = arith.constant 0 : index
    %c0_16 = arith.constant 0 : index
    %c0_17 = arith.constant 0 : index
    %31 = vector.load %arg6[%c0_13, %c0_14, %c0_15, %c0_16, %c0_17] : memref<1x4x16x16x128xf32, #tpu.memory_space<vmem>>, vector<1x1x16x16x128xf32>
    %32 = vector.shape_cast %31 : vector<1x1x16x16x128xf32> to vector<16x16x128xf32>
    %33 = vector.shape_cast %30 : vector<16x16x128xf32> to vector<1x1x16x16x128xf32>
    tpu.vector_store %arg6[%c0_13, %c0_14, %c0_15, %c0_16, %c0_17], %33 {strides = array<i32>} : memref<1x4x16x16x128xf32, #tpu.memory_space<vmem>>, vector<1x1x16x16x128xf32>,
    %c0_18 = arith.constant 0 : index
    %c128 = arith.constant 128 : index
    %34 = vector.load %arg2[%c0_18, %c128] : memref<512x512xbf16, #tpu.memory_space<vmem>>, vector<512x128xbf16>
    %cst_19 = arith.constant dense<0.000000e+00> : vector<256x128xf32>
    %35 = tpu.matmul %24, %34, %cst_19 {dimension_numbers = #tpu.dot_dimension_numbers<[1], [0], [0], [1], [0, 0, 1, 1], [], []>} : vector<256x512xbf16>, vector<512x128xbf16>, vector<256x128xf32> -> vector<256x128xf32>
    %c0_20 = arith.constant 0 : index
    %c128_21 = arith.constant 128 : index
    %36 = vector.load %arg3[%c0_20, %c128_21] : memref<1x512xf32, #tpu.memory_space<vmem>>, vector<1x128xf32>
    %37 = vector.broadcast %36 : vector<1x128xf32> to vector<256x128xf32>
    %38 = arith.addf %35, %37 : vector<256x128xf32>
    %39 = vector.shape_cast %38 : vector<256x128xf32> to vector<16x16x128xf32>
    %c0_22 = arith.constant 0 : index
    %c1 = arith.constant 1 : index
    %c0_23 = arith.constant 0 : index
    %c0_24 = arith.constant 0 : index
    %c0_25 = arith.constant 0 : index
    %40 = vector.load %arg6[%c0_22, %c1, %c0_23, %c0_24, %c0_25] : memref<1x4x16x16x128xf32, #tpu.memory_space<vmem>>, vector<1x1x16x16x128xf32>
    %41 = vector.shape_cast %40 : vector<1x1x16x16x128xf32> to vector<16x16x128xf32>
    %42 = vector.shape_cast %39 : vector<16x16x128xf32> to vector<1x1x16x16x128xf32>
    tpu.vector_store %arg6[%c0_22, %c1, %c0_23, %c0_24, %c0_25], %42 {strides = array<i32>} : memref<1x4x16x16x128xf32, #tpu.memory_space<vmem>>, vector<1x1x16x16x128xf32>,
    %c0_26 = arith.constant 0 : index
    %c256 = arith.constant 256 : index
    %43 = vector.load %arg2[%c0_26, %c256] : memref<512x512xbf16, #tpu.memory_space<vmem>>, vector<512x128xbf16>
    %cst_27 = arith.constant dense<0.000000e+00> : vector<256x128xf32>
    %44 = tpu.matmul %24, %43, %cst_27 {dimension_numbers = #tpu.dot_dimension_numbers<[1], [0], [0], [1], [0, 0, 1, 1], [], []>} : vector<256x512xbf16>, vector<512x128xbf16>, vector<256x128xf32> -> vector<256x128xf32>
    %c0_28 = arith.constant 0 : index
    %c256_29 = arith.constant 256 : index
    %45 = vector.load %arg3[%c0_28, %c256_29] : memref<1x512xf32, #tpu.memory_space<vmem>>, vector<1x128xf32>
    %46 = vector.broadcast %45 : vector<1x128xf32> to vector<256x128xf32>
    %47 = arith.addf %44, %46 : vector<256x128xf32>
    %48 = vector.shape_cast %47 : vector<256x128xf32> to vector<16x16x128xf32>
    %c0_30 = arith.constant 0 : index
    %c2 = arith.constant 2 : index
    %c0_31 = arith.constant 0 : index
    %c0_32 = arith.constant 0 : index
    %c0_33 = arith.constant 0 : index
    %49 = vector.load %arg6[%c0_30, %c2, %c0_31, %c0_32, %c0_33] : memref<1x4x16x16x128xf32, #tpu.memory_space<vmem>>, vector<1x1x16x16x128xf32>
    %50 = vector.shape_cast %49 : vector<1x1x16x16x128xf32> to vector<16x16x128xf32>
    %51 = vector.shape_cast %48 : vector<16x16x128xf32> to vector<1x1x16x16x128xf32>
    tpu.vector_store %arg6[%c0_30, %c2, %c0_31, %c0_32, %c0_33], %51 {strides = array<i32>} : memref<1x4x16x16x128xf32, #tpu.memory_space<vmem>>, vector<1x1x16x16x128xf32>,
    %c0_34 = arith.constant 0 : index
    %c384 = arith.constant 384 : index
    %52 = vector.load %arg2[%c0_34, %c384] : memref<512x512xbf16, #tpu.memory_space<vmem>>, vector<512x128xbf16>
    %cst_35 = arith.constant dense<0.000000e+00> : vector<256x128xf32>
    %53 = tpu.matmul %24, %52, %cst_35 {dimension_numbers = #tpu.dot_dimension_numbers<[1], [0], [0], [1], [0, 0, 1, 1], [], []>} : vector<256x512xbf16>, vector<512x128xbf16>, vector<256x128xf32> -> vector<256x128xf32>
    %c0_36 = arith.constant 0 : index
    %c384_37 = arith.constant 384 : index
    %54 = vector.load %arg3[%c0_36, %c384_37] : memref<1x512xf32, #tpu.memory_space<vmem>>, vector<1x128xf32>
    %55 = vector.broadcast %54 : vector<1x128xf32> to vector<256x128xf32>
    %56 = arith.addf %53, %55 : vector<256x128xf32>
    %57 = vector.shape_cast %56 : vector<256x128xf32> to vector<16x16x128xf32>
    %c0_38 = arith.constant 0 : index
    %c3 = arith.constant 3 : index
    %c0_39 = arith.constant 0 : index
    %c0_40 = arith.constant 0 : index
    %c0_41 = arith.constant 0 : index
    %58 = vector.load %arg6[%c0_38, %c3, %c0_39, %c0_40, %c0_41] : memref<1x4x16x16x128xf32, #tpu.memory_space<vmem>>, vector<1x1x16x16x128xf32>
    %59 = vector.shape_cast %58 : vector<1x1x16x16x128xf32> to vector<16x16x128xf32>
    %60 = vector.shape_cast %57 : vector<16x16x128xf32> to vector<1x1x16x16x128xf32>
    tpu.vector_store %arg6[%c0_38, %c3, %c0_39, %c0_40, %c0_41], %60 {strides = array<i32>} : memref<1x4x16x16x128xf32, #tpu.memory_space<vmem>>, vector<1x1x16x16x128xf32>,
    return
  }
  func.func @transform_0(%arg0: i32) -> (i32, i32, i32, i32) {
    %c0_i32 = arith.constant 0 : i32
    %c0_i32_0 = arith.constant 0 : i32
    %c0_i32_1 = arith.constant 0 : i32
    %c0_i32_2 = arith.constant 0 : i32
    return %arg0, %c0_i32, %c0_i32_0, %c0_i32_1 : i32, i32, i32, i32
  }
  func.func @transform_1(%arg0: i32) -> (i32, i32) {
    %c0_i32 = arith.constant 0 : i32
    %c0_i32_0 = arith.constant 0 : i32
    %c0_i32_1 = arith.constant 0 : i32
    return %c0_i32, %c0_i32_0 : i32, i32
  }
  func.func @transform_2(%arg0: i32) -> (i32, i32) {
    %c0_i32 = arith.constant 0 : i32
    %c0_i32_0 = arith.constant 0 : i32
    %c0_i32_1 = arith.constant 0 : i32
    return %c0_i32, %c0_i32_0 : i32, i32
  }
  func.func @transform_3(%arg0: i32) -> (i32, i32) {
    %c0_i32 = arith.constant 0 : i32
    %c0_i32_0 = arith.constant 0 : i32
    %c0_i32_1 = arith.constant 0 : i32
    return %c0_i32, %c0_i32_0 : i32, i32
  }
  func.func @transform_4(%arg0: i32) -> (i32, i32) {
    %c0_i32 = arith.constant 0 : i32
    %c0_i32_0 = arith.constant 0 : i32
    %c0_i32_1 = arith.constant 0 : i32
    return %c0_i32, %c0_i32_0 : i32, i32
  }
  func.func @transform_5(%arg0: i32) -> (i32, i32, i32, i32, i32) {
    %c0_i32 = arith.constant 0 : i32
    %c0_i32_0 = arith.constant 0 : i32
    %c0_i32_1 = arith.constant 0 : i32
    %c0_i32_2 = arith.constant 0 : i32
    %c0_i32_3 = arith.constant 0 : i32
    return %arg0, %c0_i32, %c0_i32_0, %c0_i32_1, %c0_i32_2 : i32, i32, i32, i32, i32
  }
}

</mosaic_0001>

<bundles_post_ra>
// kernel: expansive_block_forward.4
= control target key start
LH: loop header
LB: loop body
LE: loop exit
PB: predicated region body
PF: predicated region fallthrough
CT: control target
= control target key end

     0   :  { %s3960_s24 = smov 0   ;;  %s5449_s0 = inlined_call_operand.vmem [shape: bf16[2,16,16,128], index: 0, kind: input, shape index: {}]   ;;  %s5450_s1 = inlined_call_operand.vmem [shape: bf16[2,16,16,128], index: 1, kind: input, shape index: {}]   ;;  %s5451_s2 = inlined_call_operand.vmem [shape: bf16[1152,128], index: 2, kind: input, shape index: {}]   ;;  %s5452_s3 = inlined_call_operand.vmem [shape: f32[1,128], index: 3, kind: input, shape index: {}]   ;;  %s5453_s4 = inlined_call_operand.vmem [shape: f32[1,128], index: 4, kind: input, shape index: {}]   ;;  %s5454_s5 = inlined_call_operand.vmem [shape: f32[1,128], index: 5, kind: input, shape index: {}]   ;;  %s5455_s6 = inlined_call_operand.vmem [shape: bf16[2,16,16,128], index: 6, kind: output, shape index: {0}]   ;;  %s5456_s7 = inlined_call_operand.vmem [shape: f32[2,2,128], index: 7, kind: output, shape index: {1}]  }
   0x1 LB: > { %s2883_s25 = sadd.s32 4294967295, %s3917_s24   ;;  %p2887_p0 = scmp.ge.s32.totalorder %s3917_s24, 1  ;;  %s3917_s24 = sphi %s3960_s24, %s18_s24  }
   0x2   : > { %p250_p1 = scmp.lt.s32.totalorder %s3917_s24, 3 }
   0x4   : > { %p251_p2 = pnand %p2887_p0, %p250_p1 }
   0x6   : > { %254 = sbr.rel (%p251_p2) target bundleno = 633 (0x279), region = 44 }
   0xb   : > { %v3837_v0 = vld [vmem:[%s5451_s2 + $0x78] sm:$0xff]   ;;  %v3919_v2 = vmov 0   ;;  %v3839_v4 = vld [vmem:[%s5451_s2 + $0x70] sm:$0xff]   ;;  %p291_p3 = scmp.lt.s32.totalorder %s2883_s25, 1  ;;  %v3841_v6 = vld [vmem:[%s5451_s2 + $0x68] sm:$0xff]   ;;  %vm613_vm0 = vcmask 1040384  }
   0xc   : > { %v3838_v1 = vld [vmem:[%s5451_s2 + $0x38] sm:$0xff]   ;;  %v3975_v3 = vrot.slane %v3919_v2, 1  ;;  %3292 = vmatprep.subr.bf16.mxu0 %v3837_v0  ;;  %3812 = vmatprep.subr.bf16.mxu1 %v3837_v0  ;;  %v3840_v5 = vld [vmem:[%s5451_s2 + $0x30] sm:$0xff]   ;;  %v3842_v7 = vld [vmem:[%s5451_s2 + $0x28] sm:$0xff]   ;;  %vm614_vm1 = vsmask.f32 256 }
   0xd   : > { %3293 = vmatpush3.bf16.msra.mxu0 %v3838_v1  ;;  %3820 = vmatpush3.bf16.msra.mxu1 %v3838_v1  ;;  %s5480_s25 = smov (!%p291_p3, %s2883_s25), 1  ;;  %v3843_v8 = vld [vmem:[%s5451_s2 + $0x60] sm:$0xff]   ;;  %v3845_v10 = vld [vmem:[%s5451_s2 + $0x58] sm:$0xff]   ;;  %v3847_v12 = vld [vmem:[%s5451_s2 + $0x50] sm:$0xff]   ;;  %vm648_vm3 = vsmask.f32 7424 }
   0xe   : > { %3294 = vmatprep.subr.bf16.mxu0 %v3839_v4  ;;  %3813 = vmatprep.subr.bf16.mxu1 %v3839_v4  ;;  %s3996_s17 = sshll.u32 %s5480_s25, 7  ;;  %v3844_v9 = vld [vmem:[%s5451_s2 + $0x20] sm:$0xff]   ;;  %v3846_v11 = vld [vmem:[%s5451_s2 + $0x18] sm:$0xff]   ;;  %v3848_v18 = vld [vmem:[%s5451_s2 + $0x10] sm:$0xff]   ;;  %vm884_vm4 = vcmask 1046528  }
   0xf   : > { %1582 = vmatprep.mubr.bf16.mxu0 %v3975_v3  ;;  %s4008_s26 = scalar_lea.vmem %s5449_s0, %s3996_s17  ;;  %v4020_v14 = vld [vmem:[%s5453_s4] ss:$0 sm:$0xff]  ;;  %v3849_v21 = vld [vmem:[%s5451_s2 + $0x48] sm:$0xff]   ;;  %vm4049_vm2 = vmand %vm613_vm0, %vm614_vm1  ;;  %s5096_s8 = scalar_lea.vmem %s5450_s1, %s3996_s17 }
  0x10   : > { %v3257_v13 = vld [vmem:[%s4008_s26 + $0x58] sm:$0xff]   ;;  %v4025_v17 = vld [vmem:[%s5454_s5] ss:$0 sm:$0xff]  ;;  %v3850_v22 = vld [vmem:[%s5451_s2 + $0x8] sm:$0xff]   ;;  %s5154_s11 = scalar_lea.vmem %s5455_s6, %s3996_s17  ;;  %s2894_s17 = sshll.u32 %s5480_s25, 1 }
  0x11   : > { %3295 = vmatpush3.bf16.msra.mxu0 %v3840_v5  ;;  %3821 = vmatpush3.bf16.msra.mxu1 %v3840_v5  ;;  %v3085_v15 = vunpack.c.l.bf16 %v3257_v13  ;;  %v3086_v16 = vunpack.c.h.bf16 %v3257_v13  ;;  %v3851_v25 = vld [vmem:[%s5451_s2 + $0x40] sm:$0xff]   ;;  %v3853_v38 = vld [vmem:[%s5451_s2 + $0xf8] sm:$0xff]   ;;  %v3247_v52 = vld [vmem:[%s4008_s26 + $0x8] sm:$0xff]   ;;  %s309_s14 = scalar_lea.vmem %s5456_s7, %s2894_s17 }
  0x12   : > { %3296 = vmatprep.subr.bf16.mxu0 %v3841_v6  ;;  %3814 = vmatprep.subr.bf16.mxu1 %v3841_v6  ;;  %v3040_v27 = vld [vmem:[%s4008_s26] sm:$0xff]   ;;  %v3854_v41 = vld [vmem:[%s5451_s2 + $0x178] sm:$0xff]   ;;  %v3045_v55 = vunpack.c.l.bf16 %v3247_v52  ;;  %v3046_v56 = vunpack.c.h.bf16 %v3247_v52  ;;  %v3259_v57 = vld [vmem:[%s4008_s26 + $0x68] sm:$0xff]  }
  0x13   : > { %v404_v19 = vmul.f32 %v3085_v15, %v4020_v14  ;;  %v405_v20 = vmul.f32 %v3086_v16, %v4020_v14  ;;  %v3258_v28 = vld [vmem:[%s4008_s26 + $0x60] sm:$0xff]   ;;  %v3041_v33 = vunpack.c.l.bf16 %v3040_v27  ;;  %v3042_v34 = vunpack.c.h.bf16 %v3040_v27  ;;  %v3856_v49 = vld [vmem:[%s5451_s2 + $0x138] sm:$0xff]   ;;  %v3862_v62 = vld [vmem:[%s5451_s2 + $0x170] sm:$0xff]  }
  0x14   : > { %v3852_v29 = vld [vmem:[%s5451_s2] sm:$0xff]   ;;  %v3089_v35 = vunpack.c.l.bf16 %v3258_v28  ;;  %v3090_v36 = vunpack.c.h.bf16 %v3258_v28  ;;  %v384_v1 = vmul.f32 %v3045_v55, %v4020_v14  ;;  %v385_v4 = vmul.f32 %v3046_v56, %v4020_v14  ;;  %v3248_v15 = vld [vmem:[%s4008_s26 + $0x10] sm:$0xff]  }
  0x15   : > { %3297 = vmatpush3.bf16.msra.mxu0 %v3842_v7  ;;  %3822 = vmatpush3.bf16.msra.mxu1 %v3842_v7  ;;  %v443_v23 = vadd.f32 %v4025_v17, %v404_v19  ;;  %v444_v24 = vadd.f32 %v4025_v17, %v405_v20  ;;  %v382_v39 = vmul.f32 %v3041_v33, %v4020_v14  ;;  %v3094_v13 = vunpack.c.h.bf16 %v3259_v57  ;;  %v3857_v27 = vld [vmem:[%s5451_s2 + $0xf0] sm:$0xff]  }
  0x16   : > { %3298 = vmatprep.subr.bf16.mxu0 %v3843_v8  ;;  %3815 = vmatprep.subr.bf16.mxu1 %v3843_v8  ;;  %v383_v40 = vmul.f32 %v3042_v34, %v4020_v14  ;;  %v406_v42 = vmul.f32 %v3089_v35, %v4020_v14  ;;  %v407_v43 = vmul.f32 %v3090_v36, %v4020_v14  ;;  %v3864_v8 = vld [vmem:[%s5451_s2 + $0x130] sm:$0xff]   ;;  %v3049_v20 = vunpack.c.l.bf16 %v3248_v15 }
  0x17   : > { %v464_v26 = vpack.c.bf16 %v444_v24, %v443_v23  ;;  %v421_v46 = vadd.f32 %v4025_v17, %v382_v39  ;;  %v3858_v33 = vld [vmem:[%s5451_s2 + $0xb0] sm:$0xff]   ;;  %v3050_v52 = vunpack.c.h.bf16 %v3248_v15 }
  0x18   : > { %v422_v47 = vadd.f32 %v4025_v17, %v383_v40  ;;  %v445_v50 = vadd.f32 %v4025_v17, %v406_v42  ;;  %v446_v51 = vadd.f32 %v4025_v17, %v407_v43  ;;  %v3859_v42 = vld [vmem:[%s5451_s2 + $0xe8] sm:$0xff]   ;;  %v3260_v43 = vld [vmem:[%s4008_s26 + $0x70] sm:$0xff]  }
  0x19   : > { %3299 = vmatpush3.bf16.msra.mxu0 %v3844_v9  ;;  %3823 = vmatpush3.bf16.msra.mxu1 %v3844_v9  ;;  %v547_v30 = vshrl.u32 %v464_v26, 16  ;;  %v550_v31 = vshll.u32 %v464_v26, 16  ;;  %v3093_v9 = vunpack.c.l.bf16 %v3259_v57 }
  0x1a   : > { %3300 = vmatprep.subr.bf16.mxu0 %v3845_v10  ;;  %3816 = vmatprep.subr.bf16.mxu1 %v3845_v10  ;;  %v453_v54 = vpack.c.bf16 %v422_v47, %v421_v46  ;;  %v465_v61 = vpack.c.bf16 %v446_v51, %v445_v50 }
  0x1b   : > { %v549_v37 = vrot.slane %v547_v30, 7  ;;  %v408_v19 = vmul.f32 %v3093_v9, %v4020_v14 }
  0x1c   : > { %v470_v63 = vshrl.u32 %v453_v54, 16  ;;  %v473_v0 = vshll.u32 %v453_v54, 16  ;;  %v554_v6 = vshrl.u32 %v465_v61, 16  ;;  %v557_v7 = vshll.u32 %v465_v61, 16  ;;  %v3872_v54 = vld [vmem:[%s5451_s2 + $0x128] sm:$0xff]  }
  0x1d   : > { %3301 = vmatpush3.bf16.msra.mxu0 %v3846_v11  ;;  %3824 = vmatpush3.bf16.msra.mxu1 %v3846_v11  ;;  %v552_v44 = vor.u32 %v550_v31, %v549_v37  ;;  %v4065_v45 = vsel %vm4049_vm2, %v549_v37, 0  ;;  %v423_v11 = vadd.f32 %v4025_v17, %v384_v1  ;;  %v3870_v31 = vld [vmem:[%s5451_s2 + $0x168] sm:$0xff]   ;;  %v447_v50 = vadd.f32 %v4025_v17, %v408_v19 }
  0x1e   : > { %3302 = vmatprep.subr.bf16.mxu0 %v3847_v12  ;;  %3817 = vmatprep.subr.bf16.mxu1 %v3847_v12  ;;  %v797_v48 = vshll.u32 %v4065_v45, 16  ;;  %v472_v10 = vrot.slane %v470_v63, 7  ;;  %v424_v12 = vadd.f32 %v4025_v17, %v385_v4  ;;  %v387_v63 = vmul.f32 %v3050_v52, %v4020_v14 }
  0x1f   : > { %v4078_v53 = vsel %vm4049_vm2, 0, %v552_v44 }
  0x20   : > { %v790_v58 = vshrl.u32 %v4078_v53, 16  ;;  %v792_v59 = vshll.u32 %v4078_v53, 16  ;;  %v799_v60 = vrot.slane %v797_v48, 1  ;;  %v4101_v23 = vsel %vm4049_vm2, %v472_v10, 0 }
  0x21   : > { %3303 = vmatpush3.bf16.msra.mxu0 %v3848_v18  ;;  %3825 = vmatpush3.bf16.msra.mxu1 %v3848_v18  ;;  %v556_v18 = vrot.slane %v554_v6, 7  ;;  %v454_v24 = vpack.c.bf16 %v424_v12, %v423_v11  ;;  %v665_v28 = vshll.u32 %v4101_v23, 16  ;;  %v3249_v6 = vld [vmem:[%s4008_s26 + $0x18] sm:$0xff]  }
  0x22   : > { %3304 = vmatprep.subr.bf16.mxu0 %v3849_v21  ;;  %3818 = vmatprep.subr.bf16.mxu1 %v3849_v21  ;;  %v794_v5 = vrot.slane %v792_v59, 1  ;;  %v3855_v21 = vld [vmem:[%s5451_s2 + $0xb8] sm:$0xff]  }
  0x23   : > { %v4113_v30 = vsel %vm4049_vm2, %v556_v18, 0  ;;  %v477_v36 = vshrl.u32 %v454_v24, 16  ;;  %v480_v37 = vshll.u32 %v454_v24, 16  ;;  %v667_v40 = vrot.slane %v665_v28, 1  ;;  %v3877_v24 = vld [vmem:[%s5451_s2 + $0x160] sm:$0xff]  }
  0x24   : > { %v795_v16 = vor.u32 %v794_v5, %v790_v58  ;;  %v809_v35 = vshll.u32 %v4113_v30, 16  ;;  %v386_v58 = vmul.f32 %v3049_v20, %v4020_v14  ;;  %v3097_v5 = vunpack.c.l.bf16 %v3260_v43 }
  0x25   : > { %3305 = vmatpush3.bf16.msra.mxu0 %v3850_v22  ;;  %3826 = vmatpush3.bf16.msra.mxu1 %v3850_v22  ;;  %v475_v22 = vor.u32 %v473_v0, %v472_v10  ;;  %v479_v48 = vrot.slane %v477_v36, 7  ;;  %v3098_v20 = vunpack.c.h.bf16 %v3260_v43 }
  0x26   : > { %3306 = vmatprep.subr.bf16.mxu0 %v3851_v25  ;;  %3819 = vmatprep.subr.bf16.mxu1 %v3851_v25  ;;  %v409_v25 = vmul.f32 %v3094_v13, %v4020_v14  ;;  %v4105_v26 = vsel %vm648_vm3, %v795_v16, %v799_v60  ;;  %v811_v47 = vrot.slane %v809_v35, 1  ;;  %v3860_v60 = vld [vmem:[%s5451_s2 + $0xa8] sm:$0xff]   ;;  %v425_v4 = vadd.f32 %v4025_v17, %v386_v58 }
  0x27   : > { %1678 = vmatprep.mubr.bf16.mxu1 %v4105_v26  ;;  %v4124_v34 = vsel %vm4049_vm2, 0, %v475_v22  ;;  %v482_v56 = vor.u32 %v480_v37, %v479_v48  ;;  %v4147_v57 = vsel %vm4049_vm2, %v479_v48, 0  ;;  %v426_v16 = vadd.f32 %v4025_v17, %v387_v63 }
  0x28   : > { %v660_v39 = vshll.u32 %v4124_v34, 16  ;;  %v448_v51 = vadd.f32 %v4025_v17, %v409_v25  ;;  %v677_v61 = vshll.u32 %v4147_v57, 16  ;;  %v3053_v22 = vunpack.c.l.bf16 %v3249_v6 }
  0x29   : > { %3307 = vmatpush3.bf16.msra.mxu0 %v3852_v29  ;;  %3827 = vmatpush3.bf16.msra.mxu1 %v3852_v29  ;;  %v559_v29 = vor.u32 %v557_v7, %v556_v18  ;;  %v4157_v1 = vsel %vm4049_vm2, 0, %v482_v56  ;;  %v3863_v18 = vld [vmem:[%s5451_s2 + $0xa0] sm:$0xff]   ;;  %v455_v28 = vpack.c.bf16 %v426_v16, %v425_v4  ;;  %v411_v35 = vmul.f32 %v3098_v20, %v4020_v14  ;;  %v3881_v56 = vld [vmem:[%s5451_s2 + $0x118] sm:$0xff]  }
  0x2a   : > { %3404 = vmatprep.subr.bf16.mxu1 %v3853_v38  ;;  %3516 = vmatprep.subr.bf16.mxu0 %v3854_v41  ;;  %v658_v38 = vshrl.u32 %v4124_v34, 16  ;;  %v670_v9 = vshrl.u32 %v4157_v1, 16  ;;  %v672_v10 = vshll.u32 %v4157_v1, 16  ;;  %v679_v11 = vrot.slane %v677_v61, 1  ;;  %v3867_v61 = vld [vmem:[%s5451_s2 + $0xd0] sm:$0xff]  }
  0x2b   : > { %v4132_v41 = vsel %vm4049_vm2, 0, %v559_v29  ;;  %v3054_v29 = vunpack.c.h.bf16 %v3249_v6  ;;  %v388_v37 = vmul.f32 %v3053_v22, %v4020_v14  ;;  %v487_v43 = vshll.u32 %v455_v28, 16  ;;  %v3883_v6 = vld [vmem:[%s5451_s2 + $0x150] sm:$0xff]  }
  0x2c   : > { %1583 = vmatmul.mubr.bf16.vlgmr.msra.gmra.mxu0 %v3919_v2  ;;  %1679 = vmatmul.mubr.bf16.vlgmr.msra.gmra.mxu1 %v4078_v53  ;;  %v802_v44 = vshrl.u32 %v4132_v41, 16  ;;  %v804_v46 = vshll.u32 %v4132_v41, 16  ;;  %v674_v19 = vrot.slane %v672_v10, 1  ;;  %v450_v48 = vadd.f32 %v4025_v17, %v411_v35 }
  0x2d   : > { %3517 = vmatpush3.bf16.msra.mxu0 %v3856_v49  ;;  %3405 = vmatpush3.bf16.msra.mxu1 %v3855_v21  ;;  %v662_v49 = vrot.slane %v660_v39, 1  ;;  %v410_v21 = vmul.f32 %v3097_v5, %v4020_v14 }
  0x2e   : > { %3518 = vmatprep.subr.bf16.mxu0 %v3862_v62  ;;  %3406 = vmatprep.subr.bf16.mxu1 %v3857_v27  ;;  %v806_v55 = vrot.slane %v804_v46, 1  ;;  %v466_v62 = vpack.c.bf16 %v448_v51, %v447_v50  ;;  %v3865_v27 = vld [vmem:[%s5451_s2 + $0xd8] sm:$0xff]  }
  0x2f   : > { %v663_v59 = vor.u32 %v662_v49, %v658_v38  ;;  %v449_v36 = vadd.f32 %v4025_v17, %v410_v21  ;;  %v3250_v38 = vld [vmem:[%s4008_s26 + $0x20] sm:$0xff]   ;;  %v389_v49 = vmul.f32 %v3054_v29, %v4020_v14  ;;  %v3866_v51 = vld [vmem:[%s5451_s2 + $0x98] sm:$0xff]   ;;  %v3868_v21 = vld [vmem:[%s5451_s2 + $0x90] sm:$0xff]  }
  0x30   : > { %v807_v0 = vor.u32 %v806_v55, %v802_v44  ;;  %v561_v13 = vshrl.u32 %v466_v62, 16  ;;  %v564_v15 = vshll.u32 %v466_v62, 16  ;;  %v3879_v44 = vld [vmem:[%s5451_s2 + $0x158] sm:$0xff]   ;;  %v3057_v55 = vunpack.c.l.bf16 %v3250_v38 }
  0x31   : > { %3519 = vmatpush3.bf16.msra.mxu0 %v3864_v8  ;;  %3407 = vmatpush3.bf16.msra.mxu1 %v3858_v33  ;;  %v4162_v7 = vsel %vm648_vm3, %v663_v59, %v667_v40  ;;  %v3861_v8 = vld [vmem:[%s5451_s2 + $0xe0] sm:$0xff]   ;;  %v675_v33 = vor.u32 %v674_v19, %v670_v9  ;;  %v467_v62 = vpack.c.bf16 %v450_v48, %v449_v36  ;;  %v3058_v5 = vunpack.c.h.bf16 %v3250_v38  ;;  %v3884_v19 = vld [vmem:[%s5451_s2 + $0x110] sm:$0xff]  }
  0x32   : > { %3520 = vmatprep.subr.bf16.mxu0 %v3870_v31  ;;  %3408 = vmatprep.subr.bf16.mxu1 %v3859_v42  ;;  %v4171_v12 = vsel %vm648_vm3, %v807_v0, %v811_v47  ;;  %v563_v25 = vrot.slane %v561_v13, 7  ;;  %v3878_v31 = vld [vmem:[%s5451_s2 + $0x120] sm:$0xff]   ;;  %v484_v42 = vshrl.u32 %v455_v28, 16  ;;  %v428_v4 = vadd.f32 %v4025_v17, %v389_v49 }
  0x33   : > { %1590 = vmatprep.mubr.bf16.mxu0 %v4162_v7  ;;  %1686 = vmatprep.mubr.bf16.mxu1 %v4171_v12  ;;  %v4202_v46 = vsel %vm648_vm3, %v675_v33, %v679_v11  ;;  %v568_v10 = vshrl.u32 %v467_v62, 16  ;;  %v571_v11 = vshll.u32 %v467_v62, 16  ;;  %v390_v16 = vmul.f32 %v3057_v55, %v4020_v14  ;;  %v3251_v33 = vld [vmem:[%s4008_s26 + $0x28] sm:$0xff]  }
  0x34   : > { %1591 = vmatmul.mubr.bf16.gmra.mxu0 %v4124_v34  ;;  %1687 = vmatmul.mubr.bf16.gmra.mxu1 %v4132_v41  ;;  %v566_v39 = vor.u32 %v564_v15, %v563_v25  ;;  %v4196_v40 = vsel %vm4049_vm2, %v563_v25, 0  ;;  %v486_v52 = vrot.slane %v484_v42, 7  ;;  %v3869_v25 = vld [vmem:[%s5451_s2 + $0xc8] sm:$0xff]   ;;  %v3061_v49 = vunpack.c.l.bf16 %v3251_v33 }
  0x35   : > { %3521 = vmatpush3.bf16.msra.mxu0 %v3872_v54  ;;  %3409 = vmatpush3.bf16.msra.mxu1 %v3860_v60  ;;  %v821_v47 = vshll.u32 %v4196_v40, 16  ;;  %v427_v54 = vadd.f32 %v4025_v17, %v388_v37 }
  0x36   : > { %3410 = vmatprep.subr.bf16.mxu1 %v3861_v8  ;;  %3522 = vmatprep.subr.bf16.mxu0 %v3877_v24  ;;  %v4210_v50 = vsel %vm4049_vm2, 0, %v566_v39  ;;  %v489_v63 = vor.u32 %v487_v43, %v486_v52  ;;  %v4226_v0 = vsel %vm4049_vm2, %v486_v52, 0 }
  0x37   : > { %1598 = vmatprep.mubr.bf16.mxu0 %v4202_v46  ;;  %v814_v58 = vshrl.u32 %v4210_v50, 16  ;;  %v816_v59 = vshll.u32 %v4210_v50, 16  ;;  %v823_v60 = vrot.slane %v821_v47, 1  ;;  %v689_v9 = vshll.u32 %v4226_v0, 16 }
  0x38   : > { %v4236_v13 = vsel %vm4049_vm2, 0, %v489_v63  ;;  %v456_v15 = vpack.c.bf16 %v428_v4, %v427_v54  ;;  %v3871_v54 = vld [vmem:[%s5451_s2 + $0x88] sm:$0xff]   ;;  %v3873_v4 = vld [vmem:[%s5451_s2 + $0xc0] sm:$0xff]  }
  0x39   : > { %3523 = vmatpush3.bf16.msra.mxu0 %v3878_v31  ;;  %3411 = vmatpush3.bf16.msra.mxu1 %v3863_v18  ;;  %v818_v8 = vrot.slane %v816_v59, 1  ;;  %v391_v18 = vmul.f32 %v3058_v5, %v4020_v14  ;;  %v682_v22 = vshrl.u32 %v4236_v13, 16  ;;  %v684_v24 = vshll.u32 %v4236_v13, 16  ;;  %v3888_v59 = vld [vmem:[%s5451_s2 + $0x108] sm:$0xff]   ;;  %v3874_v5 = vld [vmem:[%s5451_s2 + $0x80] sm:$0xff]  }
  0x3a   : > { %3524 = vmatprep.subr.bf16.mxu0 %v3879_v44  ;;  %3412 = vmatprep.subr.bf16.mxu1 %v3865_v27  ;;  %v570_v27 = vrot.slane %v568_v10, 7  ;;  %v491_v28 = vshrl.u32 %v456_v15, 16  ;;  %v494_v29 = vshll.u32 %v456_v15, 16  ;;  %v429_v31 = vadd.f32 %v4025_v17, %v390_v16 }
  0x3b   : > { %v819_v20 = vor.u32 %v818_v8, %v814_v58  ;;  %v686_v36 = vrot.slane %v684_v24, 1  ;;  %v691_v37 = vrot.slane %v689_v9, 1  ;;  %v430_v38 = vadd.f32 %v4025_v17, %v391_v18  ;;  %v3891_v24 = vld [vmem:[%s5451_s2 + $0x140] sm:$0xff]  }
  0x3c   : > { %1599 = vmatmul.mubr.bf16.gmra.mxu0 %v4157_v1  ;;  %v573_v39 = vor.u32 %v571_v11, %v570_v27  ;;  %v4260_v42 = vsel %vm4049_vm2, %v570_v27, 0  ;;  %v493_v43 = vrot.slane %v491_v28, 7  ;;  %v3062_v58 = vunpack.c.h.bf16 %v3251_v33 }
  0x3d   : > { %3525 = vmatpush3.bf16.msra.mxu0 %v3881_v56  ;;  %3413 = vmatpush3.bf16.msra.mxu1 %v3866_v51  ;;  %v4254_v35 = vsel %vm648_vm3, %v819_v20, %v823_v60  ;;  %v687_v44 = vor.u32 %v686_v36, %v682_v22  ;;  %v833_v47 = vshll.u32 %v4260_v42, 16  ;;  %v457_v48 = vpack.c.bf16 %v430_v38, %v429_v31  ;;  %v3887_v51 = vld [vmem:[%s5451_s2 + $0x148] sm:$0xff]   ;;  %v3875_v20 = vld [vmem:[%s5451_s2 + $0x1f8] sm:$0xff]  }
  0x3e   : > { %3526 = vmatprep.subr.bf16.mxu0 %v3883_v6  ;;  %3414 = vmatprep.subr.bf16.mxu1 %v3867_v61  ;;  %v4269_v52 = vsel %vm4049_vm2, 0, %v573_v39  ;;  %v496_v55 = vor.u32 %v494_v29, %v493_v43  ;;  %v4276_v56 = vsel %vm4049_vm2, %v493_v43, 0  ;;  %v392_v18 = vmul.f32 %v3061_v49, %v4020_v14 }
  0x3f   : > { %1694 = vmatprep.mubr.bf16.mxu1 %v4254_v35  ;;  %v4282_v60 = vsel %vm648_vm3, %v687_v44, %v691_v37  ;;  %v826_v61 = vshrl.u32 %v4269_v52, 16  ;;  %v828_v62 = vshll.u32 %v4269_v52, 16  ;;  %v835_v63 = vrot.slane %v833_v47, 1  ;;  %v3253_v44 = vld [vmem:[%s4008_s26 + $0x38] sm:$0xff]  }
  0x40   : > { %1695 = vmatmul.mubr.bf16.gmra.mxu1 %v4210_v50  ;;  %1606 = vmatprep.mubr.bf16.mxu0 %v4282_v60  ;;  %v4295_v6 = vsel %vm4049_vm2, 0, %v496_v55  ;;  %v701_v8 = vshll.u32 %v4276_v56, 16  ;;  %v498_v9 = vshrl.u32 %v457_v48, 16  ;;  %v501_v10 = vshll.u32 %v457_v48, 16 }
  0x41   : > { %3527 = vmatpush3.bf16.msra.mxu0 %v3884_v19  ;;  %3415 = vmatpush3.bf16.msra.mxu1 %v3868_v21  ;;  %v830_v11 = vrot.slane %v828_v62, 1  ;;  %v694_v15 = vshrl.u32 %v4295_v6, 16  ;;  %v696_v16 = vshll.u32 %v4295_v6, 16  ;;  %v3252_v19 = vld [vmem:[%s4008_s26 + $0x30] sm:$0xff]   ;;  %v393_v22 = vmul.f32 %v3062_v58, %v4020_v14 }
  0x42   : > { %3416 = vmatprep.subr.bf16.mxu1 %v3869_v25  ;;  %3528 = vmatprep.subr.bf16.mxu0 %v3887_v51  ;;  %v500_v21 = vrot.slane %v498_v9, 7  ;;  %v703_v28 = vrot.slane %v701_v8, 1  ;;  %v431_v29 = vadd.f32 %v4025_v17, %v392_v18  ;;  %v3065_v37 = vunpack.c.l.bf16 %v3252_v19 }
  0x43   : > { %v831_v25 = vor.u32 %v830_v11, %v826_v61  ;;  %v698_v27 = vrot.slane %v696_v16, 1  ;;  %v432_v36 = vadd.f32 %v4025_v17, %v393_v22  ;;  %v3066_v49 = vunpack.c.h.bf16 %v3252_v19  ;;  %v4339_v61 = vld [vmem:[%s5451_s2 + $0x238] sm:$0xff]  }
  0x44   : > { %1607 = vmatmul.mubr.bf16.gmra.mxu0 %v4236_v13  ;;  %v503_v31 = vor.u32 %v501_v10, %v500_v21  ;;  %v4313_v33 = vsel %vm4049_vm2, %v500_v21, 0  ;;  %v394_v51 = vmul.f32 %v3065_v37, %v4020_v14  ;;  %v3069_v10 = vunpack.c.l.bf16 %v3253_v44  ;;  %v3876_v11 = vld [vmem:[%s5451_s2 + $0x1b8] sm:$0xff]  }
  0x45   : > { %3529 = vmatpush3.bf16.msra.mxu0 %v3888_v59  ;;  %3417 = vmatpush3.bf16.msra.mxu1 %v3871_v54  ;;  %v4317_v38 = vsel %vm648_vm3, %v831_v25, %v835_v63  ;;  %v699_v39 = vor.u32 %v698_v27, %v694_v15  ;;  %v713_v43 = vshll.u32 %v4313_v33, 16  ;;  %v458_v48 = vpack.c.bf16 %v432_v36, %v431_v29  ;;  %v3892_v54 = vld [vmem:[%s5451_s2 + $0x100] sm:$0xff]  }
  0x46   : > { %3418 = vmatprep.subr.bf16.mxu1 %v3873_v4  ;;  %3530 = vmatprep.subr.bf16.mxu0 %v3891_v24  ;;  %v4324_v47 = vsel %vm4049_vm2, 0, %v503_v31  ;;  %v395_v4 = vmul.f32 %v3066_v49, %v4020_v14  ;;  %v3070_v18 = vunpack.c.h.bf16 %v3253_v44  ;;  %v888_v21 = vrot.slane %v4101_v23, 1  ;;  %v3254_v29 = vld [vmem:[%s4008_s26 + $0x40] sm:$0xff]   ;;  %v3880_v23 = vld [vmem:[%s5451_s2 + $0x1f0] sm:$0xff]  }
  0x47   : > { %1702 = vmatprep.mubr.bf16.mxu1 %v4317_v38  ;;  %v4332_v55 = vsel %vm648_vm3, %v699_v39, %v703_v28  ;;  %v706_v58 = vshrl.u32 %v4324_v47, 16  ;;  %v708_v59 = vshll.u32 %v4324_v47, 16  ;;  %v505_v62 = vshrl.u32 %v458_v48, 16 }
  0x48   : > { %1703 = vmatmul.mubr.bf16.gmra.mxu1 %v4269_v52  ;;  %1614 = vmatprep.mubr.bf16.mxu0 %v4332_v55  ;;  %v508_v63 = vshll.u32 %v458_v48, 16  ;;  %v715_v9 = vrot.slane %v713_v43, 1  ;;  %v434_v16 = vadd.f32 %v4025_v17, %v395_v4  ;;  %v396_v22 = vmul.f32 %v3069_v10, %v4020_v14  ;;  %v3255_v48 = vld [vmem:[%s4008_s26 + $0x48] sm:$0xff]  }
  0x49   : > { %3419 = vmatpush3.bf16.msra.mxu1 %v3874_v5  ;;  %1743 = vmatprep.mubr.bf16.mxu1 %v4124_v34  ;;  %v433_v5 = vadd.f32 %v4025_v17, %v394_v51  ;;  %v710_v8 = vrot.slane %v708_v59, 1  ;;  %v507_v15 = vrot.slane %v505_v62, 7  ;;  %v397_v28 = vmul.f32 %v3070_v18, %v4020_v14  ;;  %v3885_v4 = vld [vmem:[%s5451_s2 + $0x1e8] sm:$0xff]  }
  0x4a   : > { %3628 = vmatprep.subr.bf16.mxu1 %v3875_v20  ;;  %3531 = vmatpush3.bf16.msra.mxu0 %v3892_v54  ;;  %v887_v20 = vrot.slane %v4124_v34, 1  ;;  %v435_v36 = vadd.f32 %v4025_v17, %v396_v22  ;;  %v3882_v54 = vld [vmem:[%s5451_s2 + $0x1b0] sm:$0xff]  }
  0x4b   : > { %v711_v19 = vor.u32 %v710_v8, %v706_v58  ;;  %3764 = vmatprep.subr.bf16.mxu0 %v4339_v61  ;;  %v510_v24 = vor.u32 %v508_v63, %v507_v15  ;;  %v4356_v25 = vsel %vm4049_vm2, %v507_v15, 0  ;;  %v459_v27 = vpack.c.bf16 %v434_v16, %v433_v5 }
  0x4c   : > { %1615 = vmatmul.mubr.bf16.gmra.mxu0 %v4295_v6  ;;  %v725_v34 = vshll.u32 %v4356_v25, 16  ;;  %v436_v44 = vadd.f32 %v4025_v17, %v397_v28  ;;  %v3073_v58 = vunpack.c.l.bf16 %v3254_v29  ;;  %v4383_v59 = vsel %vm884_vm4, %v887_v20, %v888_v21 }
  0x4d   : > { %v4361_v31 = vsel %vm648_vm3, %v711_v19, %v715_v9  ;;  %v4371_v37 = vsel %vm4049_vm2, 0, %v510_v24  ;;  %v512_v39 = vshrl.u32 %v459_v27, 16  ;;  %v515_v43 = vshll.u32 %v459_v27, 16 }
  0x4e   : > { %1622 = vmatprep.mubr.bf16.mxu0 %v4361_v31  ;;  %v718_v49 = vshrl.u32 %v4371_v37, 16  ;;  %v720_v51 = vshll.u32 %v4371_v37, 16  ;;  %v460_v63 = vpack.c.bf16 %v436_v44, %v435_v36  ;;  %v3074_v5 = vunpack.c.h.bf16 %v3254_v29  ;;  %v3886_v29 = vld [vmem:[%s5451_s2 + $0x1a8] sm:$0xff]  }
  0x4f   : > { %v514_v62 = vrot.slane %v512_v39, 7  ;;  %v727_v9 = vrot.slane %v725_v34, 1  ;;  %v398_v10 = vmul.f32 %v3073_v58, %v4020_v14  ;;  %v890_v21 = vrot.slane %v4157_v1, 1 }
  0x50   : > { %1744 = vmatmul.mubr.bf16.vlgmr.msra.gmra.mxu1 %v3975_v3  ;;  %v722_v8 = vrot.slane %v720_v51, 1  ;;  %v519_v18 = vshrl.u32 %v460_v63, 16  ;;  %v522_v19 = vshll.u32 %v460_v63, 16  ;;  %v399_v24 = vmul.f32 %v3074_v5, %v4020_v14  ;;  %v3890_v5 = vld [vmem:[%s5451_s2 + $0x1a0] sm:$0xff]  }
  0x51   : > { %3629 = vmatpush3.bf16.msra.mxu1 %v3876_v11  ;;  %1751 = vmatprep.mubr.bf16.mxu1 %v4157_v1  ;;  %v3077_v11 = vunpack.c.l.bf16 %v3255_v48  ;;  %v517_v15 = vor.u32 %v515_v43, %v514_v62  ;;  %v4392_v16 = vsel %vm4049_vm2, %v514_v62, 0  ;;  %v437_v34 = vadd.f32 %v4025_v17, %v398_v10 }
  0x52   : > { %3630 = vmatprep.subr.bf16.mxu1 %v3880_v23  ;;  %v723_v20 = vor.u32 %v722_v8, %v718_v49  ;;  %v737_v22 = vshll.u32 %v4392_v16, 16  ;;  %v521_v28 = vrot.slane %v519_v18, 7  ;;  %v3078_v23 = vunpack.c.h.bf16 %v3255_v48  ;;  %v3889_v49 = vld [vmem:[%s5451_s2 + $0x1e0] sm:$0xff]  }
  0x53   : > { %v4399_v27 = vsel %vm4049_vm2, 0, %v517_v15  ;;  %v891_v39 = vrot.slane %v4147_v57, 1  ;;  %v400_v57 = vmul.f32 %v3077_v11, %v4020_v14  ;;  %v3256_v11 = vld [vmem:[%s4008_s26 + $0x50] sm:$0xff]  }
  0x54   : > { %1623 = vmatmul.mubr.bf16.gmra.mxu0 %v4324_v47  ;;  %v4406_v36 = vsel %vm648_vm3, %v723_v20, %v727_v9  ;;  %v730_v43 = vshrl.u32 %v4399_v27, 16  ;;  %v732_v44 = vshll.u32 %v4399_v27, 16  ;;  %v524_v51 = vor.u32 %v522_v19, %v521_v28  ;;  %v3893_v19 = vld [vmem:[%s5451_s2 + $0x1d8] sm:$0xff]  }
  0x55   : > { %3631 = vmatpush3.bf16.msra.mxu1 %v3882_v54  ;;  %1630 = vmatprep.mubr.bf16.mxu0 %v4406_v36  ;;  %v4417_v48 = vsel %vm4049_vm2, %v521_v28, 0  ;;  %v438_v54 = vadd.f32 %v4025_v17, %v399_v24  ;;  %v739_v62 = vrot.slane %v737_v22, 1  ;;  %v439_v10 = vadd.f32 %v4025_v17, %v400_v57 }
  0x56   : > { %3632 = vmatprep.subr.bf16.mxu1 %v3885_v4  ;;  %v734_v58 = vrot.slane %v732_v44, 1  ;;  %v749_v63 = vshll.u32 %v4417_v48, 16  ;;  %v401_v4 = vmul.f32 %v3078_v23, %v4020_v14  ;;  %v4430_v8 = vsel %vm4049_vm2, 0, %v524_v51 }
  0x57   : > { %v461_v9 = vpack.c.bf16 %v438_v54, %v437_v34  ;;  %v742_v14 = vshrl.u32 %v4430_v8, 16  ;;  %v744_v18 = vshll.u32 %v4430_v8, 16  ;;  %v3081_v23 = vunpack.c.l.bf16 %v3256_v11  ;;  %v3895_v54 = vld [vmem:[%s5451_s2 + $0x198] sm:$0xff]  }
  0x58   : > { %1752 = vmatmul.mubr.bf16.gmra.mxu1 %v4383_v59  ;;  %v735_v15 = vor.u32 %v734_v58, %v730_v43  ;;  %v751_v20 = vrot.slane %v749_v63, 1  ;;  %v440_v28 = vadd.f32 %v4025_v17, %v401_v4  ;;  %v3082_v43 = vunpack.c.h.bf16 %v3256_v11  ;;  %v4454_v17 = vld [vmem:[%s5453_s4] ss:$0 sm:$0xff] }
  0x59   : > { %1759 = vmatprep.mubr.bf16.mxu1 %v4236_v13  ;;  %3633 = vmatpush3.bf16.msra.mxu1 %v3886_v29  ;;  %v526_v22 = vshrl.u32 %v461_v9, 16  ;;  %v529_v24 = vshll.u32 %v461_v9, 16  ;;  %v746_v34 = vrot.slane %v744_v18, 1  ;;  %v4445_v44 = vsel %vm884_vm4, %v890_v21, %v891_v39  ;;  %v3896_v39 = vld [vmem:[%s5451_s2 + $0x1d0] sm:$0xff]   ;;  %v4473_v11 = vld [vmem:[%s5454_s5] ss:$0 sm:$0xff] }
  0x5a   : > { %3634 = vmatprep.subr.bf16.mxu1 %v3889_v49  ;;  %v4442_v29 = vsel %vm648_vm3, %v735_v15, %v739_v62  ;;  %v462_v51 = vpack.c.bf16 %v440_v28, %v439_v10  ;;  %v402_v58 = vmul.f32 %v4454_v17, %v3081_v23  ;;  %v403_v21 = vmul.f32 %v4454_v17, %v3082_v43 }
  0x5b   : > { %v528_v49 = vrot.slane %v526_v22, 7  ;;  %v747_v57 = vor.u32 %v746_v34, %v742_v14  ;;  %v893_v18 = vrot.slane %v4236_v13, 1 }
  0x5c   : > { %1631 = vmatmul.mubr.bf16.gmra.mxu0 %v4371_v37  ;;  %v533_v4 = vshrl.u32 %v462_v51, 16  ;;  %v441_v15 = vadd.f32 %v4473_v11, %v402_v58  ;;  %v442_v14 = vadd.f32 %v4473_v11, %v403_v21 }
  0x5d   : > { %1638 = vmatprep.mubr.bf16.mxu0 %v4442_v29  ;;  %3635 = vmatpush3.bf16.msra.mxu1 %v3890_v5  ;;  %v531_v62 = vor.u32 %v529_v24, %v528_v49  ;;  %v4463_v63 = vsel %vm4049_vm2, %v528_v49, 0  ;;  %v536_v5 = vshll.u32 %v462_v51, 16  ;;  %v4467_v9 = vsel %vm648_vm3, %v747_v57, %v751_v20  ;;  %v3898_v24 = vld [vmem:[%s5451_s2 + $0x190] sm:$0xff]  }
  0x5e   : > { %3636 = vmatprep.subr.bf16.mxu1 %v3893_v19  ;;  %v761_v10 = vshll.u32 %v4463_v63, 16  ;;  %v894_v19 = vrot.slane %v4226_v0, 1  ;;  %v535_v22 = vrot.slane %v533_v4, 7  ;;  %v463_v23 = vpack.c.bf16 %v442_v14, %v441_v15  ;;  %v3899_v0 = vld [vmem:[%s5451_s2 + $0x1c8] sm:$0xff]  }
  0x5f   : > { %v4482_v20 = vsel %vm4049_vm2, 0, %v531_v62  ;;  %v3901_v62 = vld [vmem:[%s5451_s2 + $0x188] sm:$0xff]  }
  0x60   : > { %1760 = vmatmul.mubr.bf16.gmra.mxu1 %v4445_v44  ;;  %v754_v28 = vshrl.u32 %v4482_v20, 16  ;;  %v756_v34 = vshll.u32 %v4482_v20, 16  ;;  %v538_v43 = vor.u32 %v536_v5, %v535_v22  ;;  %v763_v51 = vrot.slane %v761_v10, 1  ;;  %v3902_v10 = vld [vmem:[%s5451_s2 + $0x1c0] sm:$0xff]  }
  0x61   : > { %1767 = vmatprep.mubr.bf16.mxu1 %v4295_v6  ;;  %3637 = vmatpush3.bf16.msra.mxu1 %v3895_v54  ;;  %v540_v54 = vshrl.u32 %v463_v23, 16  ;;  %v4495_v57 = vsel %vm884_vm4, %v893_v18, %v894_v19  ;;  %v4503_v21 = vsel %vm4049_vm2, %v535_v22, 0 }
  0x62   : > { %3638 = vmatprep.subr.bf16.mxu1 %v3896_v39  ;;  %v758_v49 = vrot.slane %v756_v34, 1  ;;  %v4499_v58 = vsel %vm4049_vm2, 0, %v538_v43  ;;  %v543_v39 = vshll.u32 %v463_v23, 16  ;;  %v773_v22 = vshll.u32 %v4503_v21, 16  ;;  %v3904_v23 = vld [vmem:[%s5451_s2 + $0x180] sm:$0xff]  }
  0x63   : > { %v768_v5 = vshll.u32 %v4499_v58, 16  ;;  %v542_v15 = vrot.slane %v540_v54, 7  ;;  %v766_v18 = vshrl.u32 %v4499_v58, 16 }
  0x64   : > { %1639 = vmatmul.mubr.bf16.gmra.mxu0 %v4399_v27  ;;  %v759_v4 = vor.u32 %v758_v49, %v754_v28  ;;  %v897_v28 = vrot.slane %v4276_v56, 1  ;;  %v775_v49 = vrot.slane %v773_v22, 1 }
  0x65   : > { %1646 = vmatprep.mubr.bf16.mxu0 %v4467_v9  ;;  %3639 = vmatpush3.bf16.msra.mxu1 %v3898_v24  ;;  %v770_v19 = vrot.slane %v768_v5, 1  ;;  %v896_v24 = vrot.slane %v4295_v6, 1  ;;  %v545_v34 = vor.u32 %v543_v39, %v542_v15  ;;  %v4536_v54 = vsel %vm4049_vm2, %v542_v15, 0 }
  0x66   : > { %3640 = vmatprep.subr.bf16.mxu1 %v3899_v0  ;;  %v4514_v14 = vsel %vm648_vm3, %v759_v4, %v763_v51  ;;  %v785_v5 = vshll.u32 %v4536_v54, 16 }
  0x67   : > { %v4528_v0 = vsel %vm4049_vm2, 0, %v545_v34  ;;  %v771_v43 = vor.u32 %v770_v19, %v766_v18  ;;  %v4532_v56 = vsel %vm884_vm4, %v896_v24, %v897_v28  ;;  %v900_v18 = vrot.slane %v4313_v33, 1 }
  0x68   : > { %1768 = vmatmul.mubr.bf16.gmra.mxu1 %v4495_v57  ;;  %v780_v51 = vshll.u32 %v4528_v0, 16  ;;  %v787_v19 = vrot.slane %v785_v5, 1  ;;  %v902_v28 = vrot.slane %v4371_v37, 1  ;;  %v903_v33 = vrot.slane %v4356_v25, 1 }
  0x69   : > { %1775 = vmatprep.mubr.bf16.mxu1 %v4324_v47  ;;  %3641 = vmatpush3.bf16.msra.mxu1 %v3901_v62  ;;  %v4540_v39 = vsel %vm648_vm3, %v771_v43, %v775_v49  ;;  %v778_v62 = vshrl.u32 %v4528_v0, 16  ;;  %v906_v43 = vrot.slane %v4392_v16, 1  ;;  %v3897_v49 = vld [vmem:[%s5451_s2 + $0x230] sm:$0xff]  }
  0x6a   : > { %3642 = vmatprep.subr.bf16.mxu1 %v3902_v10  ;;  %v782_v4 = vrot.slane %v780_v51, 1  ;;  %v899_v10 = vrot.slane %v4324_v47, 1  ;;  %v4562_v34 = vsel %vm884_vm4, %v902_v28, %v903_v33  ;;  %v908_v51 = vrot.slane %v4430_v8, 1  ;;  %v3261_v28 = vld [vmem:[%s4008_s26 + $0x78] sm:$0xff]  }
  0x6b   : > { %v917_v33 = vrot.slane %v4528_v0, 1 }
  0x6c   : > { %1647 = vmatmul.mubr.bf16.gmra.mxu0 %v4430_v8  ;;  %v783_v15 = vor.u32 %v782_v4, %v778_v62  ;;  %v4550_v22 = vsel %vm884_vm4, %v899_v10, %v900_v18  ;;  %v909_v62 = vrot.slane %v4417_v48, 1  ;;  %v912_v48 = vrot.slane %v4463_v63, 1  ;;  %v3905_v4 = vld [vmem:[%s5451_s2 + $0x218] sm:$0xff]   ;;  %v3906_v63 = vld [vmem:[%s5451_s2 + $0x210] sm:$0xff]  }
  0x6d   : > { %1654 = vmatprep.mubr.bf16.mxu0 %v4514_v14  ;;  %3643 = vmatpush3.bf16.msra.mxu1 %v3904_v23  ;;  %v905_v23 = vrot.slane %v4399_v27, 1  ;;  %v914_v10 = vrot.slane %v4499_v58, 1  ;;  %v915_v18 = vrot.slane %v4503_v21, 1  ;;  %v3908_v21 = vld [vmem:[%s5451_s2 + $0x200] sm:$0xff]  }
  0x6e   : > { %v4554_v24 = vsel %vm648_vm3, %v783_v15, %v787_v19  ;;  %v4587_v16 = vsel %vm884_vm4, %v908_v51, %v909_v62  ;;  %v3907_v15 = vld [vmem:[%s5451_s2 + $0x208] sm:$0xff]  }
  0x6f   : > { %v4571_v25 = vsel %vm884_vm4, %v905_v23, %v906_v43  ;;  %v4617_v19 = vsel %vm884_vm4, %v914_v10, %v915_v18  ;;  %v918_v23 = vrot.slane %v4536_v54, 1  ;;  %v3101_v43 = vunpack.c.l.bf16 %v3261_v28 }
  0x70   : > { %1776 = vmatmul.mubr.bf16.gmra.mxu1 %v4532_v56  ;;  %v920_v54 = vrot.slane %v4078_v53, 1 }
  0x71   : > { %1783 = vmatprep.mubr.bf16.mxu1 %v4371_v37  ;;  %v4630_v51 = vsel %vm884_vm4, %v917_v33, %v918_v23  ;;  %v412_v62 = vmul.f32 %v4454_v17, %v3101_v43  ;;  %v929_v43 = vrot.slane %v4269_v52, 1 }
  0x74   : > { %1655 = vmatmul.mubr.bf16.gmra.mxu0 %v4482_v20 }
  0x75   : > { %1662 = vmatprep.mubr.bf16.mxu0 %v4540_v39 }
  0x78   : > { %1784 = vmatmul.mubr.bf16.gmra.mxu1 %v4550_v22 }
  0x79   : > { %1791 = vmatprep.mubr.bf16.mxu1 %v4399_v27 }
  0x7c   : > { %1663 = vmatmul.mubr.bf16.gmra.mxu0 %v4499_v58 }
  0x7d   : > { %1670 = vmatprep.mubr.bf16.mxu0 %v4554_v24 }
  0x80   : > { %1792 = vmatmul.mubr.bf16.gmra.mxu1 %v4562_v34 }
  0x81   : > { %1799 = vmatprep.mubr.bf16.mxu1 %v4430_v8 }
  0x84   : > { %1671 = vmatmul.mubr.bf16.gmra.mxu0 %v4528_v0 }
  0x85   : > { %1904 = vmatprep.mubr.bf16.mxu0 %v4383_v59  ;;  %v3900_v59 = vld [vmem:[%s5451_s2 + $0x228] sm:$0xff]  }
  0x88   : > { %1800 = vmatmul.mubr.bf16.gmra.mxu1 %v4571_v25 }
  0x89   : > { %1807 = vmatprep.mubr.bf16.mxu1 %v4482_v20 }
  0x8c   : > { %1905 = vmatmul.mubr.bf16.vlgmr.msra.gmra.mxu0 %v4162_v7  ;;  %v3903_v7 = vld [vmem:[%s5451_s2 + $0x220] sm:$0xff]  }
  0x8d   : > { %3765 = vmatpush3.bf16.msra.mxu0 %v4339_v61  ;;  %1912 = vmatprep.mubr.bf16.mxu0 %v4445_v44  ;;  %v911_v61 = vrot.slane %v4482_v20, 1 }
  0x8e   : > { %3766 = vmatprep.subr.bf16.mxu0 %v3897_v49 }
  0x8f   : > { %v4602_v5 = vsel %vm884_vm4, %v911_v61, %v912_v48  ;;  %v451_v61 = vadd.f32 %v4473_v11, %v412_v62 }
  0x90   : > { %1808 = vmatmul.mubr.bf16.gmra.mxu1 %v4587_v16 }
  0x91   : > { %3767 = vmatpush3.bf16.msra.mxu0 %v3897_v49  ;;  %1815 = vmatprep.mubr.bf16.mxu1 %v4499_v58  ;;  %v3102_v49 = vunpack.c.h.bf16 %v3261_v28  ;;  %v926_v28 = vrot.slane %v4210_v50, 1 }
  0x92   : > { %3768 = vmatprep.subr.bf16.mxu0 %v3900_v59 }
  0x94   : > { %1913 = vmatmul.mubr.bf16.gmra.mxu0 %v4202_v46 }
  0x95   : > { %1920 = vmatprep.mubr.bf16.mxu0 %v4495_v57  ;;  %3769 = vmatpush3.bf16.msra.mxu0 %v3900_v59  ;;  %v413_v59 = vmul.f32 %v4454_v17, %v3102_v49 }
  0x96   : > { %3770 = vmatprep.subr.bf16.mxu0 %v3903_v7 }
  0x97   : > { %v452_v48 = vadd.f32 %v4473_v11, %v413_v59 }
  0x98   : > { %1816 = vmatmul.mubr.bf16.gmra.mxu1 %v4602_v5 }
  0x99   : > { %3771 = vmatpush3.bf16.msra.mxu0 %v3903_v7  ;;  %1823 = vmatprep.mubr.bf16.mxu1 %v4528_v0  ;;  %v921_v7 = vrot.slane %v4065_v45, 1  ;;  %v468_v17 = vpack.c.bf16 %v452_v48, %v451_v61  ;;  %v924_v45 = vrot.slane %v4113_v30, 1 }
  0x9a   : > { %3772 = vmatprep.subr.bf16.mxu0 %v3905_v4 }
  0x9b   : > { %v575_v10 = vshrl.u32 %v468_v17, 16 }
  0x9c   : > { %1921 = vmatmul.mubr.bf16.gmra.mxu0 %v4282_v60 }
  0x9d   : > { %1928 = vmatprep.mubr.bf16.mxu0 %v4532_v56  ;;  %3773 = vmatpush3.bf16.msra.mxu0 %v3905_v4  ;;  %v4643_v4 = vsel %vm884_vm4, %v920_v54, %v921_v7  ;;  %v577_v18 = vrot.slane %v575_v10, 7 }
  0x9e   : > { %3774 = vmatprep.subr.bf16.mxu0 %v3906_v63 }
  0xa0   : > { %1824 = vmatmul.mubr.bf16.gmra.mxu1 %v4617_v19 }
  0xa1   : > { %3775 = vmatpush3.bf16.msra.mxu0 %v3906_v63  ;;  %1831 = vmatprep.mubr.bf16.mxu1 %v4078_v53  ;;  %v923_v63 = vrot.slane %v4132_v41, 1 }
  0xa2   : > { %3776 = vmatprep.subr.bf16.mxu0 %v3907_v15 }
  0xa3   : > { %v4652_v11 = vsel %vm884_vm4, %v923_v63, %v924_v45 }
  0xa4   : > { %1929 = vmatmul.mubr.bf16.gmra.mxu0 %v4332_v55 }
  0xa5   : > { %1936 = vmatprep.mubr.bf16.mxu0 %v4550_v22  ;;  %3777 = vmatpush3.bf16.msra.mxu0 %v3907_v15  ;;  %v578_v15 = vshll.u32 %v468_v17, 16 }
  0xa6   : > { %3778 = vmatprep.subr.bf16.mxu0 %v3908_v21 }
  0xa7   : > { %v580_v30 = vor.u32 %v578_v15, %v577_v18 }
  0xa8   : > { %1832 = vmatmul.mubr.bf16.gmra.mxu1 %v4630_v51 }
  0xa9   : > { %3779 = vmatpush3.bf16.msra.mxu0 %v3908_v21  ;;  %1839 = vmatprep.mubr.bf16.mxu1 %v4132_v41  ;;  %v927_v21 = vrot.slane %v4196_v40, 1  ;;  %v4665_v23 = vsel %vm4049_vm2, 0, %v580_v30  ;;  %v930_v40 = vrot.slane %v4260_v42, 1 }
  0xaa   : > { %v951_v45 = vshll.u32 %v4665_v23, 16  ;;  %v963_v15 = vrot.slane %v4665_v23, 1  ;;  %v949_v30 = vshrl.u32 %v4665_v23, 16 }
  0xab   : > { %v4661_v33 = vsel %vm884_vm4, %v926_v28, %v927_v21  ;;  %v4674_v49 = vsel %vm884_vm4, %v929_v43, %v930_v40 }
  0xac   : > { %1937 = vmatmul.mubr.bf16.gmra.mxu0 %v4361_v31  ;;  %v953_v43 = vrot.slane %v951_v45, 1 }
  0xad   : > { %1944 = vmatprep.mubr.bf16.mxu0 %v4562_v34 }
  0xb0   : > { %1840 = vmatmul.mubr.bf16.gmra.mxu1 %v4643_v4 }
  0xb1   : > { %1847 = vmatprep.mubr.bf16.mxu1 %v4210_v50 }
  0xb4   : > { %1945 = vmatmul.mubr.bf16.gmra.mxu0 %v4406_v36 }
  0xb5   : > { %1952 = vmatprep.mubr.bf16.mxu0 %v4571_v25 }
  0xb8   : > { %1848 = vmatmul.mubr.bf16.gmra.mxu1 %v4652_v11 }
  0xb9   : > { %1855 = vmatprep.mubr.bf16.mxu1 %v4269_v52 }
  0xbc   : > { %1953 = vmatmul.mubr.bf16.gmra.mxu0 %v4442_v29 }
  0xbd   : > { %1960 = vmatprep.mubr.bf16.mxu0 %v4587_v16 }
  0xc0   : > { %1856 = vmatmul.mubr.bf16.gmra.mxu1 %v4661_v33 }
  0xc1   : > { %1863 = vmatprep.mubr.bf16.mxu1 %v4665_v23 }
  0xc4   : > { %1961 = vmatmul.mubr.bf16.gmra.mxu0 %v4467_v9 }
  0xc5   : > { %1968 = vmatprep.mubr.bf16.mxu0 %v4602_v5 }
  0xc8   : > { %1864 = vmatmul.mubr.bf16.gmra.mxu1 %v4674_v49 }
  0xc9   : > { %2065 = vmatprep.mubr.bf16.mxu1 %v4202_v46 }
  0xcc   : > { %1969 = vmatmul.mubr.bf16.gmra.mxu0 %v4514_v14 }
  0xcd   : > { %1976 = vmatprep.mubr.bf16.mxu0 %v4617_v19 }
  0xd0   : > { %2066 = vmatmul.mubr.bf16.vlgmr.msra.gmra.mxu1 %v4157_v1 }
  0xd1   : > { %2073 = vmatprep.mubr.bf16.mxu1 %v4282_v60 }
  0xd4   : > { %1977 = vmatmul.mubr.bf16.gmra.mxu0 %v4540_v39 }
  0xd5   : > { %1984 = vmatprep.mubr.bf16.mxu0 %v4630_v51 }
  0xd8   : > { %2074 = vmatmul.mubr.bf16.gmra.mxu1 %v4236_v13 }
  0xd9   : > { %2081 = vmatprep.mubr.bf16.mxu1 %v4332_v55 }
  0xdc   : > { %1985 = vmatmul.mubr.bf16.gmra.mxu0 %v4554_v24 }
  0xdd   : > { %1992 = vmatprep.mubr.bf16.mxu0 %v4643_v4 }
  0xe0   : > { %2082 = vmatmul.mubr.bf16.gmra.mxu1 %v4295_v6 }
  0xe1   : > { %2089 = vmatprep.mubr.bf16.mxu1 %v4361_v31 }
  0xe4   : > { %1993 = vmatmul.mubr.bf16.gmra.mxu0 %v4105_v26 }
  0xe5   : > { %2000 = vmatprep.mubr.bf16.mxu0 %v4652_v11 }
  0xe8   : > { %2090 = vmatmul.mubr.bf16.gmra.mxu1 %v4324_v47 }
  0xe9   : > { %2097 = vmatprep.mubr.bf16.mxu1 %v4406_v36  ;;  %v647_v36 = vsel %vm4049_vm2, %v577_v18, 0 }
  0xea   : > { %v956_v40 = vshll.u32 %v647_v36, 16 }
  0xec   : > { %v3308_v1 = vpop.f32.mrf.mxu0  ;;  %v3380_v13 = vpop.f32.mrf.mxu1  ;;  %2001 = vmatmul.mubr.bf16.gmra.mxu0 %v4171_v12 }
  0xed   : > { %2008 = vmatprep.mubr.bf16.mxu0 %v4661_v33 }
  0xee   : > { %v3309_v46 = vpop.f32.mrf.mxu0  ;;  %v3381_v6 = vpop.f32.mrf.mxu1 }
  0xef   : > { %v4692_v42 = vadd.f32 %v3309_v46, %v3308_v1  ;;  %v4699_v31 = vadd.f32 %v3381_v6, %v3380_v13  ;;  %v954_v6 = vor.u32 %v953_v43, %v949_v30 }
  0xf0   : > { %v3311_v60 = vpop.f32.mrf.mxu0  ;;  %v3383_v59 = vpop.f32.mrf.mxu1  ;;  %2098 = vmatmul.mubr.bf16.gmra.mxu1 %v4371_v37 }
  0xf1   : > { %2105 = vmatprep.mubr.bf16.mxu1 %v4442_v29  ;;  %v964_v29 = vrot.slane %v647_v36, 1 }
  0xf2   : > { %v3312_v55 = vpop.f32.mrf.mxu0  ;;  %v3384_v54 = vpop.f32.mrf.mxu1 }
  0xf3   : > { %v4696_v62 = vadd.f32 %v3312_v55, %v3311_v60  ;;  %v4702_v7 = vadd.f32 %v3384_v54, %v3383_v59  ;;  %v4723_v60 = vsel %vm884_vm4, %v963_v15, %v964_v29  ;;  %v958_v59 = vrot.slane %v956_v40, 1 }
  0xf4   : > { %v3314_v47 = vpop.f32.mrf.mxu0  ;;  %v3386_v61 = vpop.f32.mrf.mxu1  ;;  %2009 = vmatmul.mubr.bf16.gmra.mxu0 %v4254_v35 }
  0xf5   : > { %2016 = vmatprep.mubr.bf16.mxu0 %v4674_v49  ;;  %v4733_v36 = vsel %vm648_vm3, %v954_v6, %v958_v59 }
  0xf6   : > { %v3315_v48 = vpop.f32.mrf.mxu0  ;;  %v3387_v63 = vpop.f32.mrf.mxu1 }
  0xf7   : > { %v4709_v17 = vadd.f32 %v3315_v48, %v3314_v47  ;;  %v4713_v10 = vadd.f32 %v3387_v63, %v3386_v61 }
  0xf8   : > { %v3317_v37 = vpop.f32.mrf.mxu0  ;;  %v3389_v28 = vpop.f32.mrf.mxu1  ;;  %2106 = vmatmul.mubr.bf16.gmra.mxu1 %v4399_v27 }
  0xf9   : > { %2113 = vmatprep.mubr.bf16.mxu1 %v4467_v9 }
  0xfa   : > { %v3318_v21 = vpop.f32.mrf.mxu0  ;;  %v3390_v18 = vpop.f32.mrf.mxu1 }
  0xfb   : > { %v4716_v32 = vadd.f32 %v3318_v21, %v3317_v37  ;;  %v4720_v1 = vadd.f32 %v3390_v18, %v3389_v28 }
  0xfc   : > { %v3320_v46 = vpop.f32.mrf.mxu0  ;;  %2017 = vmatmul.mubr.bf16.gmra.mxu0 %v4317_v38 }
  0xfd   : > { %2024 = vmatprep.mubr.bf16.mxu0 %v4723_v60 }
  0xfe   : > { %v3321_v13 = vpop.f32.mrf.mxu0 }
  0xff   : > { %v4727_v55 = vadd.f32 %v3321_v13, %v3320_v46 }
 0x100   : > { %v3323_v54 = vpop.f32.mrf.mxu0  ;;  %v3392_v47 = vpop.f32.mrf.mxu1  ;;  %2114 = vmatmul.mubr.bf16.gmra.mxu1 %v4430_v8 }
 0x101   : > { %2121 = vmatprep.mubr.bf16.mxu1 %v4514_v14 }
 0x102   : > { %v3324_v27 = vpop.f32.mrf.mxu0  ;;  %v3393_v9 = vpop.f32.mrf.mxu1 }
 0x103   : > { %v4730_v61 = vadd.f32 %v3324_v27, %v3323_v54  ;;  %v4736_v48 = vadd.f32 %v3393_v9, %v3392_v47 }
 0x104   : > { %v3395_v63 = vpop.f32.mrf.mxu1  ;;  %v3326_v45 = vpop.f32.mrf.mxu0  ;;  %2025 = vmatmul.mubr.bf16.gmra.mxu0 %v4733_v36 }
 0x105   : > { %3780 = vmatprep.mubr.bf16.mxu0 %v4445_v44 }
 0x106   : > { %v3396_v37 = vpop.f32.mrf.mxu1  ;;  %v3327_v15 = vpop.f32.mrf.mxu0 }
 0x107   : > { %v4741_v29 = vadd.f32 %v3396_v37, %v3395_v63  ;;  %v4743_v28 = vadd.f32 %v3327_v15, %v3326_v45 }
 0x108   : > { %v3329_v21 = vpop.f32.mrf.mxu0  ;;  %v3398_v18 = vpop.f32.mrf.mxu1  ;;  %2122 = vmatmul.mubr.bf16.gmra.mxu1 %v4482_v20 }
 0x109   : > { %2129 = vmatprep.mubr.bf16.mxu1 %v4540_v39  ;;  %v4760_v39 = vld [vmem:[%s5452_s3] ss:$0 sm:$0xff] }
 0x10a   : > { %v3330_v8 = vpop.f32.mrf.mxu0  ;;  %v3399_v14 = vpop.f32.mrf.mxu1  ;;  %v1585_v9 = vadd.f32 %v4692_v42, %v4760_v39 }
 0x10b   : > { %v4746_v30 = vadd.f32 %v3330_v8, %v3329_v21  ;;  %v4750_v44 = vadd.f32 %v3399_v14, %v3398_v18 }
 0x10c   : > { %v3332_v43 = vpop.f32.mrf.mxu0  ;;  %3781 = vmatmul.mubr.bf16.vlgmr.msra.gmra.mxu0 %v4495_v57  ;;  %v3401_v40 = vpop.f32.mrf.mxu1 }
 0x10d   : > { %3784 = vmatprep.mubr.bf16.mxu0 %v4532_v56 }
 0x10e   : > { %v3333_v46 = vpop.f32.mrf.mxu0  ;;  %v3402_v6 = vpop.f32.mrf.mxu1 }
 0x10f   : > { %v4753_v13 = vadd.f32 %v3333_v46, %v3332_v43  ;;  %v4755_v20 = vadd.f32 %v3402_v6, %v3401_v40  ;;  %v1593_v46 = vadd.f32 %v4709_v17, %v4760_v39 }
 0x110   : > { %v3335_v59 = vpop.f32.mrf.mxu0  ;;  %v3420_v54 = vpop.f32.mrf.mxu1  ;;  %2130 = vmatmul.mubr.bf16.gmra.mxu1 %v4499_v58 }
 0x111   : > { %2137 = vmatprep.mubr.bf16.mxu1 %v4554_v24  ;;  %v1588_v24 = vadd.f32 %v4696_v62, %v4760_v39 }
 0x112   : > { %v3336_v57 = vpop.f32.mrf.mxu0  ;;  %v3421_v56 = vpop.f32.mrf.mxu1 }
 0x113   : > { %v4763_v47 = vadd.f32 %v3336_v57, %v3335_v59  ;;  %v3422_v63 = vadd.f32 %v3421_v56, %v3420_v54 }
 0x114   : > { %v3338_v27 = vpop.f32.mrf.mxu0  ;;  %3785 = vmatmul.mubr.bf16.gmra.mxu0 %v4550_v22  ;;  %v3423_v45 = vpop.f32.mrf.mxu1 }
 0x115   : > { %3788 = vmatprep.mubr.bf16.mxu0 %v4562_v34  ;;  %v4770_v15 = vadd.f32 %v3422_v63, %v1585_v9 }
 0x116   : > { %v3339_v37 = vpop.f32.mrf.mxu0  ;;  %v3424_v21 = vpop.f32.mrf.mxu1 }
 0x117   : > { %v4772_v58 = vadd.f32 %v3339_v37, %v3338_v27  ;;  %v3425_v8 = vadd.f32 %v3424_v21, %v3423_v45  ;;  %v1601_v37 = vadd.f32 %v4727_v55, %v4760_v39 }
 0x118   : > { %v3341_v18 = vpop.f32.mrf.mxu0  ;;  %v3426_v14 = vpop.f32.mrf.mxu1  ;;  %2138 = vmatmul.mubr.bf16.gmra.mxu1 %v4528_v0 }
 0x119   : > { %v4777_v42 = vadd.f32 %v3425_v8, %v1588_v24  ;;  %2145 = vmatprep.mubr.bf16.mxu1 %v4105_v26  ;;  %v1596_v26 = vadd.f32 %v4716_v32, %v4760_v39 }
 0x11a   : > { %v3342_v22 = vpop.f32.mrf.mxu0  ;;  %v3427_v34 = vpop.f32.mrf.mxu1 }
 0x11b   : > { %v4779_v43 = vadd.f32 %v3342_v22, %v3341_v18  ;;  %v3428_v6 = vadd.f32 %v3427_v34, %v3426_v14 }
 0x11c   : > { %v3344_v40 = vpop.f32.mrf.mxu0  ;;  %3789 = vmatmul.mubr.bf16.gmra.mxu0 %v4571_v25  ;;  %v3429_v62 = vpop.f32.mrf.mxu1 }
 0x11d   : > { %3792 = vmatprep.mubr.bf16.mxu0 %v4587_v16  ;;  %v4786_v0 = vadd.f32 %v3428_v6, %v1593_v46  ;;  %v1609_v6 = vadd.f32 %v4743_v28, %v4760_v39 }
 0x11e   : > { %v3345_v59 = vpop.f32.mrf.mxu0  ;;  %v3430_v57 = vpop.f32.mrf.mxu1 }
 0x11f   : > { %v4788_v54 = vadd.f32 %v3345_v59, %v3344_v40  ;;  %v3431_v27 = vadd.f32 %v3430_v57, %v3429_v62 }
 0x120   : > { %v3347_v56 = vpop.f32.mrf.mxu0  ;;  %v3432_v9 = vpop.f32.mrf.mxu1  ;;  %2146 = vmatmul.mubr.bf16.gmra.mxu1 %v4078_v53 }
 0x121   : > { %v4793_v17 = vadd.f32 %v3431_v27, %v1596_v26  ;;  %2153 = vmatprep.mubr.bf16.mxu1 %v4171_v12  ;;  %v1604_v12 = vadd.f32 %v4730_v61, %v4760_v39 }
 0x122   : > { %v3348_v25 = vpop.f32.mrf.mxu0  ;;  %v3433_v16 = vpop.f32.mrf.mxu1 }
 0x123   : > { %v4795_v63 = vadd.f32 %v3348_v25, %v3347_v56  ;;  %v3434_v21 = vadd.f32 %v3433_v16, %v3432_v9 }
 0x124   : > { %v3350_v45 = vpop.f32.mrf.mxu0  ;;  %3793 = vmatmul.mubr.bf16.gmra.mxu0 %v4602_v5  ;;  %v3435_v32 = vpop.f32.mrf.mxu1 }
 0x125   : > { %3796 = vmatprep.mubr.bf16.mxu0 %v4617_v19  ;;  %v4802_v53 = vadd.f32 %v3434_v21, %v1601_v37 }
 0x126   : > { %v3351_v18 = vpop.f32.mrf.mxu0  ;;  %v3436_v8 = vpop.f32.mrf.mxu1 }
 0x127   : > { %v4804_v24 = vadd.f32 %v3351_v18, %v3350_v45  ;;  %v3437_v22 = vadd.f32 %v3436_v8, %v3435_v32  ;;  %v1617_v45 = vadd.f32 %v4753_v13, %v4760_v39 }
 0x128   : > { %v3353_v14 = vpop.f32.mrf.mxu0  ;;  %v3438_v34 = vpop.f32.mrf.mxu1  ;;  %2154 = vmatmul.mubr.bf16.gmra.mxu1 %v4132_v41 }
 0x129   : > { %v4809_v55 = vadd.f32 %v3437_v22, %v1604_v12  ;;  %2161 = vmatprep.mubr.bf16.mxu1 %v4254_v35  ;;  %v1612_v35 = vadd.f32 %v4746_v30, %v4760_v39 }
 0x12a   : > { %v3354_v5 = vpop.f32.mrf.mxu0  ;;  %v3439_v19 = vpop.f32.mrf.mxu1 }
 0x12b   : > { %v4811_v40 = vadd.f32 %v3354_v5, %v3353_v14  ;;  %v3440_v62 = vadd.f32 %v3439_v19, %v3438_v34  ;;  %v1625_v5 = vadd.f32 %v4772_v58, %v4760_v39 }
 0x12c   : > { %v3356_v46 = vpop.f32.mrf.mxu0  ;;  %3797 = vmatmul.mubr.bf16.gmra.mxu0 %v4630_v51  ;;  %v3441_v61 = vpop.f32.mrf.mxu1 }
 0x12d   : > { %3800 = vmatprep.mubr.bf16.mxu0 %v4643_v4  ;;  %v4818_v41 = vadd.f32 %v3440_v62, %v1609_v6 }
 0x12e   : > { %v3357_v59 = vpop.f32.mrf.mxu0  ;;  %v3442_v56 = vpop.f32.mrf.mxu1 }
 0x12f   : > { %v4820_v57 = vadd.f32 %v3357_v59, %v3356_v46  ;;  %v3443_v27 = vadd.f32 %v3442_v56, %v3441_v61 }
 0x130   : > { %v3359_v26 = vpop.f32.mrf.mxu0  ;;  %v3444_v9 = vpop.f32.mrf.mxu1  ;;  %2162 = vmatmul.mubr.bf16.gmra.mxu1 %v4210_v50 }
 0x131   : > { %v4825_v28 = vadd.f32 %v3443_v27, %v1612_v35  ;;  %2169 = vmatprep.mubr.bf16.mxu1 %v4317_v38  ;;  %v1620_v38 = vadd.f32 %v4763_v47, %v4760_v39  ;;  %v1633_v27 = vadd.f32 %v4788_v54, %v4760_v39 }
 0x132   : > { %v3360_v51 = vpop.f32.mrf.mxu0  ;;  %v3445_v4 = vpop.f32.mrf.mxu1 }
 0x133   : > { %v4827_v25 = vadd.f32 %v3360_v51, %v3359_v26  ;;  %v3446_v37 = vadd.f32 %v3445_v4, %v3444_v9 }
 0x134   : > { %v3362_v16 = vpop.f32.mrf.mxu0  ;;  %3801 = vmatmul.mubr.bf16.gmra.mxu0 %v4652_v11  ;;  %v3447_v30 = vpop.f32.mrf.mxu1 }
 0x135   : > { %3804 = vmatprep.mubr.bf16.mxu0 %v4661_v33  ;;  %v4834_v50 = vadd.f32 %v3446_v37, %v1617_v45  ;;  %v1636_v37 = vadd.f32 %v4795_v63, %v4760_v39 }
 0x136   : > { %v3363_v21 = vpop.f32.mrf.mxu0  ;;  %v3448_v18 = vpop.f32.mrf.mxu1 }
 0x137   : > { %v4836_v32 = vadd.f32 %v3363_v21, %v3362_v16  ;;  %v3449_v14 = vadd.f32 %v3448_v18, %v3447_v30 }
 0x138   : > { %v3365_v8 = vpop.f32.mrf.mxu0  ;;  %v3450_v12 = vpop.f32.mrf.mxu1  ;;  %2170 = vmatmul.mubr.bf16.gmra.mxu1 %v4269_v52 }
 0x139   : > { %v4841_v13 = vadd.f32 %v3449_v14, %v1620_v38  ;;  %2177 = vmatprep.mubr.bf16.mxu1 %v4733_v36  ;;  %v1628_v36 = vadd.f32 %v4779_v43, %v4760_v39  ;;  %v1641_v14 = vadd.f32 %v4804_v24, %v4760_v39 }
 0x13a   : > { %v3366_v11 = vpop.f32.mrf.mxu0  ;;  %v3451_v33 = vpop.f32.mrf.mxu1 }
 0x13b   : > { %v4843_v22 = vadd.f32 %v3366_v11, %v3365_v8  ;;  %v3452_v19 = vadd.f32 %v3451_v33, %v3450_v12 }
 0x13c   : > { %v3368_v34 = vpop.f32.mrf.mxu0  ;;  %3805 = vmatmul.mubr.bf16.gmra.mxu0 %v4674_v49  ;;  %v3453_v47 = vpop.f32.mrf.mxu1 }
 0x13d   : > { %3808 = vmatprep.mubr.bf16.mxu0 %v4723_v60  ;;  %v4850_v52 = vadd.f32 %v3452_v19, %v1625_v5 }
 0x13e   : > { %v3369_v46 = vpop.f32.mrf.mxu0  ;;  %v3454_v62 = vpop.f32.mrf.mxu1 }
 0x13f   : > { %v4852_v6 = vadd.f32 %v3369_v46, %v3368_v34  ;;  %v3455_v59 = vadd.f32 %v3454_v62, %v3453_v47 }
 0x140   : > { %v3371_v61 = vpop.f32.mrf.mxu0  ;;  %v3456_v56 = vpop.f32.mrf.mxu1  ;;  %2178 = vmatmul.mubr.bf16.gmra.mxu1 %v4665_v23 }
 0x141   : > { %v4857_v58 = vadd.f32 %v3455_v59, %v1628_v36  ;;  %2185 = vmatprep.mubr.bf16.mxu1 %v3975_v3 }
 0x142   : > { %v3372_v49 = vpop.f32.mrf.mxu0  ;;  %v3457_v60 = vpop.f32.mrf.mxu1 }
 0x143   : > { %v4859_v26 = vadd.f32 %v3372_v49, %v3371_v61  ;;  %v3458_v9 = vadd.f32 %v3457_v60, %v3456_v56  ;;  %v1649_v49 = vadd.f32 %v4820_v57, %v4760_v39 }
 0x144   : > { %v3374_v35 = vpop.f32.mrf.mxu0  ;;  %3809 = vmatmul.mubr.bf16.gmra.mxu0 %v3975_v3  ;;  %v3459_v43 = vpop.f32.mrf.mxu1 }
 0x145   : > { %v4865_v4 = vadd.f32 %v3458_v9, %v1633_v27 }
 0x146   : > { %v3375_v51 = vpop.f32.mrf.mxu0  ;;  %v3460_v16 = vpop.f32.mrf.mxu1 }
 0x147   : > { %v4867_v23 = vadd.f32 %v3375_v51, %v3374_v35  ;;  %v3461_v30 = vadd.f32 %v3460_v16, %v3459_v43  ;;  %v1652_v16 = vadd.f32 %v4827_v25, %v4760_v39 }
 0x148   : > { %v3377_v45 = vpop.f32.mrf.mxu0  ;;  %v3462_v21 = vpop.f32.mrf.mxu1  ;;  %2186 = vmatmul.mubr.bf16.gmra.mxu1 %v3919_v2  ;;  %v1644_v2 = vadd.f32 %v4811_v40, %v4760_v39 }
 0x149   : > { %v4872_v18 = vadd.f32 %v3461_v30, %v1636_v37 }
 0x14a   : > { %v3378_v3 = vpop.f32.mrf.mxu0  ;;  %v3463_v8 = vpop.f32.mrf.mxu1 }
 0x14b   : > { %v4874_v54 = vadd.f32 %v3378_v3, %v3377_v45  ;;  %v3464_v12 = vadd.f32 %v3463_v8, %v3462_v21 }
 0x14c   : > { %v3532_v38 = vpop.f32.mrf.mxu0  ;;  %v3465_v11 = vpop.f32.mrf.mxu1 }
 0x14d   : > { %v4878_v34 = vadd.f32 %v3464_v12, %v1641_v14 }
 0x14e   : > { %v3533_v33 = vpop.f32.mrf.mxu0  ;;  %v3466_v5 = vpop.f32.mrf.mxu1 }
 0x14f   : > { %v3534_v63 = vadd.f32 %v3533_v33, %v3532_v38  ;;  %v3467_v47 = vadd.f32 %v3466_v5, %v3465_v11  ;;  %v1657_v38 = vadd.f32 %v4836_v32, %v4760_v39 }
 0x150   : > { %v3535_v19 = vpop.f32.mrf.mxu0  ;;  %v3468_v62 = vpop.f32.mrf.mxu1 }
 0x151   : > { %v4883_v46 = vadd.f32 %v3534_v63, %v4770_v15  ;;  %v4885_v36 = vadd.f32 %v3467_v47, %v1644_v2 }
 0x152   : > { %v3536_v61 = vpop.f32.mrf.mxu0  ;;  %v3469_v59 = vpop.f32.mrf.mxu1 }
 0x153   : > { %v3537_v24 = vadd.f32 %v3536_v61, %v3535_v19  ;;  %v3470_v60 = vadd.f32 %v3469_v59, %v3468_v62  ;;  %v1660_v19 = vadd.f32 %v4843_v22, %v4760_v39 }
 0x154   : > { %v3538_v56 = vpop.f32.mrf.mxu0  ;;  %v3471_v27 = vpop.f32.mrf.mxu1 }
 0x155   : > { %v4890_v35 = vadd.f32 %v3537_v24, %v4777_v42  ;;  %v4892_v9 = vadd.f32 %v3470_v60, %v1649_v49 }
 0x156   : > { %v3539_v40 = vpop.f32.mrf.mxu0  ;;  %v3472_v43 = vpop.f32.mrf.mxu1 }
 0x157   : > { %v3540_v15 = vadd.f32 %v3539_v40, %v3538_v56  ;;  %v3473_v45 = vadd.f32 %v3472_v43, %v3471_v27  ;;  %v1665_v56 = vadd.f32 %v4852_v6, %v4760_v39 }
 0x158   : > { %v3541_v51 = vpop.f32.mrf.mxu0  ;;  %v3474_v30 = vpop.f32.mrf.mxu1 }
 0x159   : > { %v4897_v37 = vadd.f32 %v3540_v15, %v4786_v0  ;;  %v4899_v21 = vadd.f32 %v3473_v45, %v1652_v16 }
 0x15a   : > { %v3542_v57 = vpop.f32.mrf.mxu0  ;;  %v3475_v3 = vpop.f32.mrf.mxu1 }
 0x15b   : > { %v3543_v42 = vadd.f32 %v3542_v57, %v3541_v51  ;;  %v3476_v14 = vadd.f32 %v3475_v3, %v3474_v30  ;;  %v1668_v51 = vadd.f32 %v4859_v26, %v4760_v39 }
 0x15c   : > { %v3544_v8 = vpop.f32.mrf.mxu0  ;;  %v3477_v11 = vpop.f32.mrf.mxu1 }
 0x15d   : > { %v4904_v12 = vadd.f32 %v3543_v42, %v4793_v17  ;;  %v4906_v33 = vadd.f32 %v3476_v14, %v1657_v38 }
 0x15e   : > { %v3545_v25 = vpop.f32.mrf.mxu0  ;;  %v3478_v63 = vpop.f32.mrf.mxu1 }
 0x15f   : > { %v3546_v0 = vadd.f32 %v3545_v25, %v3544_v8  ;;  %v3479_v2 = vadd.f32 %v3478_v63, %v3477_v11  ;;  %v1673_v8 = vadd.f32 %v4867_v23, %v4760_v39 }
 0x160   : > { %v3547_v5 = vpop.f32.mrf.mxu0  ;;  %v3480_v62 = vpop.f32.mrf.mxu1 }
 0x161   : > { %v4911_v47 = vadd.f32 %v3546_v0, %v4802_v53  ;;  %v4913_v61 = vadd.f32 %v3479_v2, %v1660_v19 }
 0x162   : > { %v3548_v32 = vpop.f32.mrf.mxu0  ;;  %v3481_v24 = vpop.f32.mrf.mxu1 }
 0x163   : > { %v3549_v17 = vadd.f32 %v3548_v32, %v3547_v5  ;;  %v3482_v49 = vadd.f32 %v3481_v24, %v3480_v62  ;;  %v1676_v5 = vadd.f32 %v4874_v54, %v4760_v39 }
 0x164   : > { %v3550_v59 = vpop.f32.mrf.mxu0  ;;  %v3483_v27 = vpop.f32.mrf.mxu1 }
 0x165   : > { %v4918_v60 = vadd.f32 %v3549_v17, %v4809_v55  ;;  %v4920_v40 = vadd.f32 %v3482_v49, %v1665_v56 }
 0x166   : > { %v3551_v22 = vpop.f32.mrf.mxu0  ;;  %v3484_v15 = vpop.f32.mrf.mxu1 }
 0x167   : > { %v3552_v53 = vadd.f32 %v3551_v22, %v3550_v59  ;;  %v3485_v16 = vadd.f32 %v3484_v15, %v3483_v27  ;;  %v1681_v59 = vadd.f32 %v4699_v31, %v4760_v39 }
 0x168   : > { %v3553_v43 = vpop.f32.mrf.mxu0  ;;  %v3486_v30 = vpop.f32.mrf.mxu1 }
 0x169   : > { %v4925_v45 = vadd.f32 %v3552_v53, %v4818_v41  ;;  %v4927_v57 = vadd.f32 %v3485_v16, %v1668_v51 }
 0x16a   : > { %v3554_v6 = vpop.f32.mrf.mxu0  ;;  %v3487_v42 = vpop.f32.mrf.mxu1 }
 0x16b   : > { %v3555_v55 = vadd.f32 %v3554_v6, %v3553_v43  ;;  %v3488_v38 = vadd.f32 %v3487_v42, %v3486_v30  ;;  %v1684_v43 = vadd.f32 %v4702_v7, %v4760_v39 }
 0x16c   : > { %v3556_v3 = vpop.f32.mrf.mxu0  ;;  %v3489_v11 = vpop.f32.mrf.mxu1 }
 0x16d   : > { %v4932_v14 = vadd.f32 %v3555_v55, %v4825_v28  ;;  %v4934_v25 = vadd.f32 %v3488_v38, %v1673_v8 }
 0x16e   : > { %v3557_v26 = vpop.f32.mrf.mxu0  ;;  %v3490_v0 = vpop.f32.mrf.mxu1 }
 0x16f   : > { %v3558_v41 = vadd.f32 %v3557_v26, %v3556_v3  ;;  %v3491_v19 = vadd.f32 %v3490_v0, %v3489_v11  ;;  %v1689_v3 = vadd.f32 %v4713_v10, %v4760_v39 }
 0x170   : > { %v3559_v63 = vpop.f32.mrf.mxu0  ;;  %v3492_v62 = vpop.f32.mrf.mxu1 }
 0x171   : > { %v4939_v2 = vadd.f32 %v3558_v41, %v4834_v50  ;;  %v4941_v32 = vadd.f32 %v3491_v19, %v1676_v5 }
 0x172   : > { %v3560_v23 = vpop.f32.mrf.mxu0  ;;  %v3493_v17 = vpop.f32.mrf.mxu1 }
 0x173   : > { %v3561_v28 = vadd.f32 %v3560_v23, %v3559_v63  ;;  %v3494_v56 = vadd.f32 %v3493_v17, %v3492_v62  ;;  %v1692_v63 = vadd.f32 %v4720_v1, %v4760_v39 }
 0x174   : > { %v3562_v24 = vpop.f32.mrf.mxu0  ;;  %v3495_v27 = vpop.f32.mrf.mxu1 }
 0x175   : > { %v4946_v49 = vadd.f32 %v3561_v28, %v4841_v13  ;;  %v4948_v22 = vadd.f32 %v3494_v56, %v1681_v59 }
 0x176   : > { %v3563_v54 = vpop.f32.mrf.mxu0  ;;  %v3496_v53 = vpop.f32.mrf.mxu1 }
 0x177   : > { %v3564_v50 = vadd.f32 %v3563_v54, %v3562_v24  ;;  %v3497_v51 = vadd.f32 %v3496_v53, %v3495_v27  ;;  %v1697_v24 = vadd.f32 %v4736_v48, %v4760_v39 }
 0x178   : > { %v3565_v15 = vpop.f32.mrf.mxu0  ;;  %v3498_v30 = vpop.f32.mrf.mxu1 }
 0x179   : > { %v4953_v16 = vadd.f32 %v3564_v50, %v4850_v52  ;;  %v4955_v6 = vadd.f32 %v3497_v51, %v1684_v43 }
 0x17a   : > { %v3566_v31 = vpop.f32.mrf.mxu0  ;;  %v3499_v55 = vpop.f32.mrf.mxu1 }
 0x17b   : > { %v3567_v13 = vadd.f32 %v3566_v31, %v3565_v15  ;;  %v3500_v8 = vadd.f32 %v3499_v55, %v3498_v30  ;;  %v1700_v15 = vadd.f32 %v4741_v29, %v4760_v39 }
 0x17c   : > { %v3568_v42 = vpop.f32.mrf.mxu0  ;;  %v3501_v11 = vpop.f32.mrf.mxu1 }
 0x17d   : > { %v4960_v38 = vadd.f32 %v3567_v13, %v4857_v58  ;;  %v4962_v26 = vadd.f32 %v3500_v8, %v1689_v3 }
 0x17e   : > { %v3569_v7 = vpop.f32.mrf.mxu0  ;;  %v3502_v41 = vpop.f32.mrf.mxu1 }
 0x17f   : > { %v3570_v52 = vadd.f32 %v3569_v7, %v3568_v42  ;;  %v3503_v5 = vadd.f32 %v3502_v41, %v3501_v11  ;;  %v1705_v42 = vadd.f32 %v4750_v44, %v4760_v39 }
 0x180   : > { %v3571_v0 = vpop.f32.mrf.mxu0  ;;  %v3504_v62 = vpop.f32.mrf.mxu1 }
 0x181   : > { %v4967_v19 = vadd.f32 %v3570_v52, %v4865_v4  ;;  %v4969_v23 = vadd.f32 %v3503_v5, %v1692_v63 }
 0x182   : > { %v3572_v10 = vpop.f32.mrf.mxu0  ;;  %v3505_v28 = vpop.f32.mrf.mxu1 }
 0x183   : > { %v3573_v58 = vadd.f32 %v3572_v10, %v3571_v0  ;;  %v3506_v59 = vadd.f32 %v3505_v28, %v3504_v62  ;;  %v1708_v0 = vadd.f32 %v4755_v20, %v4760_v39 }
 0x184   : > { %v3574_v17 = vpop.f32.mrf.mxu0  ;;  %v3507_v27 = vpop.f32.mrf.mxu1 }
 0x185   : > { %v4974_v56 = vadd.f32 %v3573_v58, %v4872_v18  ;;  %v4976_v54 = vadd.f32 %v3506_v59, %v1697_v24 }
 0x186   : > { %v3575_v1 = vpop.f32.mrf.mxu0  ;;  %v3508_v50 = vpop.f32.mrf.mxu1 }
 0x187   : > { %v3576_v4 = vadd.f32 %v3575_v1, %v3574_v17  ;;  %v3509_v43 = vadd.f32 %v3508_v50, %v3507_v27 }
 0x188   : > { %v3577_v53 = vpop.f32.mrf.mxu0  ;;  %v3510_v30 = vpop.f32.mrf.mxu1 }
 0x189   : > { %v4981_v51 = vadd.f32 %v3576_v4, %v4878_v34  ;;  %v4983_v31 = vadd.f32 %v3509_v43, %v1700_v15 }
 0x18a   : > { %v3578_v48 = vpop.f32.mrf.mxu0  ;;  %v3511_v13 = vpop.f32.mrf.mxu1 }
 0x18b   : > { %v3579_v18 = vadd.f32 %v3578_v48, %v3577_v53  ;;  %v3512_v3 = vadd.f32 %v3511_v13, %v3510_v30 }
 0x18c   : > { %v3580_v55 = vpop.f32.mrf.mxu0  ;;  %v3513_v11 = vpop.f32.mrf.mxu1 }
 0x18d   : > { %v4988_v8 = vadd.f32 %v3579_v18, %v4885_v36  ;;  %v4990_v7 = vadd.f32 %v3512_v3, %v1705_v42 }
 0x18e   : > { %v3581_v29 = vpop.f32.mrf.mxu0  ;;  %v3514_v52 = vpop.f32.mrf.mxu1 }
 0x18f   : > { %v3582_v34 = vadd.f32 %v3581_v29, %v3580_v55  ;;  %v3515_v63 = vadd.f32 %v3514_v52, %v3513_v11 }
 0x190   : > { %v3583_v41 = vpop.f32.mrf.mxu0  ;;  %v4997_v62 = vpop.f32.mrf.mxu1 }
 0x191   : > { %v4995_v5 = vadd.f32 %v3582_v34, %v4892_v9  ;;  %v4999_v10 = vadd.f32 %v3515_v63, %v1708_v0 }
 0x192   : > { %v3584_v44 = vpop.f32.mrf.mxu0  ;;  %v5001_v58 = vpop.f32.mrf.mxu1 }
 0x193   : > { %v3585_v36 = vadd.f32 %v3584_v44, %v3583_v41 }
 0x194   : > { %v3586_v28 = vpop.f32.mrf.mxu0  ;;  %v5006_v24 = vpop.f32.mrf.mxu1 }
 0x195   : > { %v5004_v17 = vadd.f32 %v3585_v36, %v4899_v21 }
 0x196   : > { %v3587_v59 = vpop.f32.mrf.mxu0  ;;  %v5008_v39 = vpop.f32.mrf.mxu1 }
 0x197   : > { %v3588_v20 = vadd.f32 %v3587_v59, %v3586_v28 }
 0x198   : > { %v3589_v9 = vpop.f32.mrf.mxu0  ;;  %v5013_v1 = vpop.f32.mrf.mxu1 }
 0x199   : > { %v5011_v27 = vadd.f32 %v3588_v20, %v4906_v33 }
 0x19a   : > { %v3590_v4 = vpop.f32.mrf.mxu0  ;;  %v5015_v53 = vpop.f32.mrf.mxu1 }
 0x19b   : > { %v3591_v50 = vadd.f32 %v3590_v4, %v3589_v9 }
 0x19c   : > { %v3592_v15 = vpop.f32.mrf.mxu0  ;;  %v5020_v43 = vpop.f32.mrf.mxu1 }
 0x19d   : > { %v5018_v21 = vadd.f32 %v3591_v50, %v4913_v61 }
 0x19e   : > { %v3593_v30 = vpop.f32.mrf.mxu0  ;;  %v5022_v18 = vpop.f32.mrf.mxu1 }
 0x19f   : > { %v3594_v48 = vadd.f32 %v3593_v30, %v3592_v15 }
 0x1a0   : > { %v3595_v13 = vpop.f32.mrf.mxu0  ;;  %v5027_v55 = vpop.f32.mrf.mxu1 }
 0x1a1   : > { %v5025_v33 = vadd.f32 %v3594_v48, %v4920_v40 }
 0x1a2   : > { %v3596_v42 = vpop.f32.mrf.mxu0  ;;  %v5029_v11 = vpop.f32.mrf.mxu1 }
 0x1a3   : > { %5459 = vst [vmem:[#allocation2_spill] sm:$0xff] %v5025_v33  ;;  %v3597_v3 = vadd.f32 %v3596_v42, %v3595_v13  ;;  %v3104_v33 = vld [vmem:[%s5096_s8] sm:$0xff]  }
 0x1a4   : > { %v3598_v29 = vpop.f32.mrf.mxu0  ;;  %v5034_v34 = vpop.f32.mrf.mxu1 }
 0x1a5   : > { %v5032_v61 = vadd.f32 %v3597_v3, %v4927_v57 }
 0x1a6   : > { %v3599_v52 = vpop.f32.mrf.mxu0  ;;  %v5036_v0 = vpop.f32.mrf.mxu1 }
 0x1a7   : > { %5460 = vst [vmem:[#allocation3_spill] sm:$0xff] %v5032_v61  ;;  %v3600_v41 = vadd.f32 %v3599_v52, %v3598_v29 }
 0x1a8   : > { %v3601_v63 = vpop.f32.mrf.mxu0  ;;  %v5041_v44 = vpop.f32.mrf.mxu1 }
 0x1a9   : > { %v5039_v40 = vadd.f32 %v3600_v41, %v4934_v25 }
 0x1aa   : > { %v3602_v36 = vpop.f32.mrf.mxu0  ;;  %v5043_v59 = vpop.f32.mrf.mxu1 }
 0x1ab   : > { %v3603_v28 = vadd.f32 %v3602_v36, %v3601_v63 }
 0x1ac   : > { %v3604_v20 = vpop.f32.mrf.mxu0  ;;  %v5048_v9 = vpop.f32.mrf.mxu1 }
 0x1ad   : > { %v5046_v57 = vadd.f32 %v3603_v28, %v4941_v32 }
 0x1ae   : > { %v3605_v4 = vpop.f32.mrf.mxu0  ;;  %v5050_v15 = vpop.f32.mrf.mxu1 }
 0x1af   : > { %5461 = vst [vmem:[#allocation4_spill] sm:$0xff] %v5046_v57  ;;  %v3606_v50 = vadd.f32 %v3605_v4, %v3604_v20 }
 0x1b0   : > { %v3607_v30 = vpop.f32.mrf.mxu0  ;;  %v5055_v48 = vpop.f32.mrf.mxu1 }
 0x1b1   : > { %v5053_v25 = vadd.f32 %v3606_v50, %v4948_v22 }
 0x1b2   : > { %v3608_v13 = vpop.f32.mrf.mxu0  ;;  %v5057_v3 = vpop.f32.mrf.mxu1 }
 0x1b3   : > { %5462 = vst [vmem:[#allocation5_spill] sm:$0xff] %v5053_v25  ;;  %v3609_v42 = vadd.f32 %v3608_v13, %v3607_v30 }
 0x1b4   : > { %v3610_v29 = vpop.f32.mrf.mxu0  ;;  %v5062_v52 = vpop.f32.mrf.mxu1 }
 0x1b5   : > { %v5060_v32 = vadd.f32 %v3609_v42, %v4955_v6 }
 0x1b6   : > { %v3611_v41 = vpop.f32.mrf.mxu0  ;;  %v5064_v36 = vpop.f32.mrf.mxu1 }
 0x1b7   : > { %5463 = vst [vmem:[#allocation6_spill] sm:$0xff] %v5060_v32  ;;  %v3612_v63 = vadd.f32 %v3611_v41, %v3610_v29 }
 0x1b8   : > { %v3613_v28 = vpop.f32.mrf.mxu0  ;;  %v5069_v20 = vpop.f32.mrf.mxu1 }
 0x1b9   : > { %v5067_v22 = vadd.f32 %v3612_v63, %v4962_v26 }
 0x1ba   : > { %v3614_v4 = vpop.f32.mrf.mxu0  ;;  %v5071_v30 = vpop.f32.mrf.mxu1 }
 0x1bb   : > { %5464 = vst [vmem:[#allocation7_spill] sm:$0xff] %v5067_v22  ;;  %v3615_v50 = vadd.f32 %v3614_v4, %v3613_v28 }
 0x1bc   : > { %v3616_v13 = vpop.f32.mrf.mxu0  ;;  %v5076_v42 = vpop.f32.mrf.mxu1 }
 0x1bd   : > { %v5074_v6 = vadd.f32 %v3615_v50, %v4969_v23 }
 0x1be   : > { %v3617_v29 = vpop.f32.mrf.mxu0  ;;  %v5078_v32 = vpop.f32.mrf.mxu1 }
 0x1bf   : > { %5465 = vst [vmem:[#allocation8_spill] sm:$0xff] %v5074_v6  ;;  %v3618_v41 = vadd.f32 %v3617_v29, %v3616_v13 }
 0x1c0   : > { %v3619_v25 = vpop.f32.mrf.mxu0  ;;  %v5083_v63 = vpop.f32.mrf.mxu1 }
 0x1c1   : > { %v5081_v26 = vadd.f32 %v3618_v41, %v4976_v54  ;;  %v3652_v54 = vadd.f32 %v5015_v53, %v5013_v1 }
 0x1c2   : > { %v3620_v28 = vpop.f32.mrf.mxu0  ;;  %v5085_v22 = vpop.f32.mrf.mxu1 }
 0x1c3   : > { %5466 = vst [vmem:[#allocation9_spill] sm:$0xff] %v5081_v26  ;;  %v3621_v4 = vadd.f32 %v3620_v28, %v3619_v25  ;;  %v3262_v28 = vld [vmem:[%s5096_s8 + $0x8] sm:$0xff]   ;;  %v3655_v26 = vadd.f32 %v5022_v18, %v5020_v43  ;;  %v2076_v1 = vadd.f32 %v3652_v54, %v4897_v37 }
 0x1c4   : > { %v3622_v61 = vpop.f32.mrf.mxu0  ;;  %v5090_v50 = vpop.f32.mrf.mxu1  ;;  %v3110_v54 = vunpack.c.h.bf16 %v3262_v28 }
 0x1c5   : > { %v5088_v23 = vadd.f32 %v3621_v4, %v4983_v31  ;;  %v3646_v31 = vadd.f32 %v5001_v58, %v4997_v62  ;;  %v3649_v62 = vadd.f32 %v5008_v39, %v5006_v24  ;;  %v2079_v37 = vadd.f32 %v3655_v26, %v4904_v12 }
 0x1c6   : > { %v3623_v6 = vpop.f32.mrf.mxu0  ;;  %v5100_v13 = vpop.f32.mrf.mxu1 }
 0x1c7   : > { %5467 = vst [vmem:[#allocation10_spill] sm:$0xff] %v5088_v23  ;;  %v3624_v25 = vadd.f32 %v3623_v6, %v3622_v61  ;;  %v3109_v6 = vunpack.c.l.bf16 %v3262_v28 }
 0x1c8   : > { %v3625_v29 = vpop.f32.mrf.mxu0  ;;  %v5108_v4 = vpop.f32.mrf.mxu1 }
 0x1c9   : > { %v5105_v41 = vadd.f32 %v3624_v25, %v4990_v7  ;;  %v2068_v25 = vadd.f32 %v3646_v31, %v4883_v46  ;;  %v2071_v31 = vadd.f32 %v3649_v62, %v4890_v35 }
 0x1ca   : > { %v3626_v23 = vpop.f32.mrf.mxu0  ;;  %v5113_v53 = vpop.f32.mrf.mxu1 }
 0x1cb   : > { %5468 = vst [vmem:[#allocation11_spill] sm:$0xff] %v5105_v41  ;;  %v3627_v57 = vadd.f32 %v3626_v23, %v3625_v29  ;;  %v3105_v23 = vunpack.c.l.bf16 %v3104_v33  ;;  %v3658_v29 = vadd.f32 %v5029_v11, %v5027_v55  ;;  %v3263_v55 = vld [vmem:[%s5096_s8 + $0x10] sm:$0xff]   ;;  %v3667_v11 = vadd.f32 %v5050_v15, %v5048_v9 }
 0x1cc   : > { %v3782_v61 = vpop.f32.mrf.mxu0  ;;  %v5122_v41 = vpop.f32.mrf.mxu1  ;;  %v3113_v15 = vunpack.c.l.bf16 %v3263_v55 }
 0x1cd   : > { %v5119_v7 = vadd.f32 %v3627_v57, %v4999_v10  ;;  %v2237_v58 = vadd.f32 %v3782_v61, %v2076_v1  ;;  %v3664_v10 = vadd.f32 %v5043_v59, %v5041_v44  ;;  %v3106_v1 = vunpack.c.h.bf16 %v3104_v33 }
 0x1ce   : > { %v2228_v43 = vpop.f32.mrf.mxu0  ;;  %v5129_v24 = vpop.f32.mrf.mxu1  ;;  %v2084_v35 = vadd.f32 %v3658_v29, %v4911_v47  ;;  %v3661_v33 = vadd.f32 %v5036_v0, %v5034_v34  ;;  %v3670_v29 = vadd.f32 %v5057_v3, %v5055_v48  ;;  %v3114_v3 = vunpack.c.h.bf16 %v3263_v55 }
 0x1cf   : > { %v2229_v18 = vadd.f32 %v2228_v43, %v2068_v25  ;;  %v2421_v46 = vadd.f32 %v3109_v6, %v2237_v58  ;;  %v3264_v43 = vld [vmem:[%s5096_s8 + $0x18] sm:$0xff]   ;;  %v2092_v59 = vadd.f32 %v3664_v10, %v4925_v45  ;;  %v3676_v10 = vadd.f32 %v5071_v30, %v5069_v20 }
 0x1d0   : > { %v3783_v39 = vpop.f32.mrf.mxu0  ;;  %v5132_v61 = vpop.f32.mrf.mxu1  ;;  %v3117_v9 = vunpack.c.l.bf16 %v3264_v43  ;;  %v2087_v48 = vadd.f32 %v3661_v33, %v4918_v60  ;;  %v2100_v33 = vadd.f32 %v3670_v29, %v4939_v2 }
 0x1d1   : > { %v2240_v57 = vadd.f32 %v3783_v39, %v2079_v37  ;;  %v2419_v12 = vadd.f32 %v3105_v23, %v2229_v18  ;;  %v5144_v62 = vmax.f32 %v2421_v46, 0.0  ;;  %v2095_v46 = vadd.f32 %v3667_v11, %v4932_v14 }
 0x1d2   : > { %v2231_v25 = vpop.f32.mrf.mxu0  ;;  %v5138_v44 = vpop.f32.mrf.mxu1  ;;  %v2108_v60 = vadd.f32 %v3676_v10, %v4953_v16 }
 0x1d3   : > { %v2422_v26 = vadd.f32 %v3110_v54, %v2240_v57  ;;  %v2232_v28 = vadd.f32 %v2231_v25, %v2071_v31  ;;  %v5156_v37 = vmax.f32 %v2419_v12, 0.0  ;;  %v3118_v31 = vunpack.c.h.bf16 %v3264_v43 }
 0x1d4   : > { %v3786_v6 = vpop.f32.mrf.mxu0  ;;  %v5148_v23 = vpop.f32.mrf.mxu1 }
 0x1d5   : > { %v5146_v58 = vmax.f32 %v2422_v26, 0.0  ;;  %v2420_v18 = vadd.f32 %v3106_v1, %v2232_v28  ;;  %v2253_v45 = vadd.f32 %v3786_v6, %v2092_v59  ;;  %v3266_v1 = vld [vmem:[%s5096_s8 + $0x28] sm:$0xff]   ;;  %v3265_v6 = vld [vmem:[%s5096_s8 + $0x20] sm:$0xff]  }
 0x1d6   : > { %v2244_v47 = vpop.f32.mrf.mxu0  ;;  %v5166_v39 = vpop.f32.mrf.mxu1  ;;  %v3125_v59 = vunpack.c.l.bf16 %v3266_v1  ;;  %v3121_v10 = vunpack.c.l.bf16 %v3265_v6 }
 0x1d7   : > { %v3175_v34 = vpack.c.bf16 %v5146_v58, %v5144_v62  ;;  %v5160_v0 = vmax.f32 %v2420_v18, 0.0  ;;  %v2245_v54 = vadd.f32 %v2244_v47, %v2084_v35  ;;  %v2425_v30 = vadd.f32 %v3117_v9, %v2253_v45 }
 0x1d8   : > { %v3787_v57 = vpop.f32.mrf.mxu0  ;;  %v5176_v20 = vpop.f32.mrf.mxu1  ;;  %v3679_v35 = vadd.f32 %v5078_v32, %v5076_v42  ;;  %v3673_v45 = vadd.f32 %v5064_v36, %v5062_v52  ;;  %v3126_v36 = vunpack.c.h.bf16 %v3266_v1 }
 0x1d9   : > { %3277 = vst [vmem:[%s5154_s11 + $0x8] sm:$0xff] %v3175_v34   ;;  %v3170_v25 = vpack.c.bf16 %v5160_v0, %v5156_v37  ;;  %v2643_v12 = vadd.f32 %v5160_v0, %v5156_v37  ;;  %v2423_v26 = vadd.f32 %v3113_v15, %v2245_v54  ;;  %v2256_v28 = vadd.f32 %v3787_v57, %v2095_v46 }
 0x1da   : > { %v2247_v14 = vpop.f32.mrf.mxu0  ;;  %v3699_v18 = vpop.f32.mrf.mxu1  ;;  %v5190_v54 = vmax.f32 %v2425_v30, 0.0  ;;  %v3682_v57 = vadd.f32 %v5085_v22, %v5083_v63  ;;  %v3268_v30 = vld [vmem:[%s5096_s8 + $0x38] sm:$0xff]   ;;  %v2103_v22 = vadd.f32 %v3673_v45, %v4946_v49  ;;  %v3122_v63 = vunpack.c.h.bf16 %v3265_v6 }
 0x1db   : > { %3171 = vst [vmem:[%s5154_s11] sm:$0xff] %v3170_v25   ;;  %v2644_v43 = vadd.f32 %v2643_v12, %v5144_v62  ;;  %v2248_v11 = vadd.f32 %v2247_v14, %v2087_v48  ;;  %v2426_v47 = vadd.f32 %v3118_v31, %v2256_v28  ;;  %v5187_v9 = vmax.f32 %v2423_v26, 0.0 }
 0x1dc   : > { %v3790_v55 = vpop.f32.mrf.mxu0  ;;  %v5192_v46 = vpop.f32.mrf.mxu1  ;;  %v3688_v31 = vadd.f32 %v5113_v53, %v5108_v4  ;;  %v2111_v48 = vadd.f32 %v3679_v35, %v4960_v38  ;;  %v3133_v35 = vunpack.c.l.bf16 %v3268_v30  ;;  %v2116_v45 = vadd.f32 %v3682_v57, %v4967_v19 }
 0x1dd   : > { %v2645_v15 = vadd.f32 %v2644_v43, %v5146_v58  ;;  %v2424_v34 = vadd.f32 %v3114_v3, %v2248_v11  ;;  %v5194_v32 = vmax.f32 %v2426_v47, 0.0  ;;  %v2269_v42 = vadd.f32 %v3790_v55, %v2108_v60  ;;  %v3267_v47 = vld [vmem:[%s5096_s8 + $0x30] sm:$0xff]  }
 0x1de   : > { %v2260_v16 = vpop.f32.mrf.mxu0  ;;  %v3702_v12 = vpop.f32.mrf.mxu1  ;;  %v3691_v60 = vadd.f32 %v5129_v24, %v5122_v41  ;;  %v2124_v49 = vadd.f32 %v3688_v31, %v4981_v51  ;;  %v3700_v57 = vadd.f32 %v3699_v18, %v5176_v20 }
 0x1df   : > { %v2646_v2 = vadd.f32 %v2645_v15, %v5187_v9  ;;  %v5197_v29 = vmax.f32 %v2424_v34, 0.0  ;;  %v2261_v52 = vadd.f32 %v2260_v16, %v2100_v33  ;;  %v3185_v25 = vpack.c.bf16 %v5194_v32, %v5190_v54 }
 0x1e0   : > { %v3791_v3 = vpop.f32.mrf.mxu0  ;;  %v5212_v4 = vpop.f32.mrf.mxu1  ;;  %v2429_v53 = vadd.f32 %v3125_v59, %v2269_v42  ;;  %v3685_v59 = vadd.f32 %v5100_v13, %v5090_v50  ;;  %v3134_v13 = vunpack.c.h.bf16 %v3268_v30 }
 0x1e1   : > { %v3180_v26 = vpack.c.bf16 %v5197_v29, %v5187_v9  ;;  %v2647_v1 = vadd.f32 %v2646_v2, %v5197_v29  ;;  %3279 = vst [vmem:[%s5154_s11 + $0x18] sm:$0xff] %v3185_v25   ;;  %v2427_v28 = vadd.f32 %v3121_v10, %v2261_v52  ;;  %v2272_v14 = vadd.f32 %v3791_v3, %v2111_v48 }
 0x1e2   : > { %v2263_v43 = vpop.f32.mrf.mxu0  ;;  %v3705_v55 = vpop.f32.mrf.mxu1  ;;  %v5226_v16 = vmax.f32 %v2429_v53, 0.0  ;;  %v3129_v2 = vunpack.c.l.bf16 %v3267_v47  ;;  %v2127_v48 = vadd.f32 %v3691_v60, %v4988_v8 }
 0x1e3   : > { %3278 = vst [vmem:[%s5154_s11 + $0x10] sm:$0xff] %v3180_v26   ;;  %v2648_v38 = vadd.f32 %v2647_v1, %v5190_v54  ;;  %v2264_v11 = vadd.f32 %v2263_v43, %v2103_v22  ;;  %v2430_v33 = vadd.f32 %v3126_v36, %v2272_v14  ;;  %v5223_v15 = vmax.f32 %v2427_v28, 0.0  ;;  %v3270_v26 = vld [vmem:[%s5096_s8 + $0x48] sm:$0xff]   ;;  %v3269_v43 = vld [vmem:[%s5096_s8 + $0x40] sm:$0xff]  }
 0x1e4   : > { %v3794_v6 = vpop.f32.mrf.mxu0  ;;  %v5228_v10 = vpop.f32.mrf.mxu1  ;;  %v3694_v36 = vadd.f32 %v5138_v44, %v5132_v61  ;;  %v2119_v61 = vadd.f32 %v3685_v59, %v4974_v56  ;;  %v3130_v44 = vunpack.c.h.bf16 %v3267_v47  ;;  %v3141_v14 = vunpack.c.l.bf16 %v3270_v26 }
 0x1e5   : > { %v2649_v34 = vadd.f32 %v2648_v38, %v5194_v32  ;;  %v2428_v42 = vadd.f32 %v3122_v63, %v2264_v11  ;;  %v5230_v41 = vmax.f32 %v2430_v33, 0.0  ;;  %v2285_v24 = vadd.f32 %v3794_v6, %v2124_v49 }
 0x1e6   : > { %v2276_v51 = vpop.f32.mrf.mxu0  ;;  %v5240_v25 = vpop.f32.mrf.mxu1  ;;  %v3703_v38 = vadd.f32 %v3702_v12, %v5192_v46  ;;  %v2140_v33 = vadd.f32 %v3700_v57, %v5011_v27  ;;  %v2132_v47 = vadd.f32 %v3694_v36, %v4995_v5  ;;  %v3137_v27 = vunpack.c.l.bf16 %v3269_v43  ;;  %v3272_v57 = vld [vmem:[%s5096_s8 + $0x58] sm:$0xff]  }
 0x1e7   : > { %v2650_v19 = vadd.f32 %v2649_v34, %v5223_v15  ;;  %v5233_v52 = vmax.f32 %v2428_v42, 0.0  ;;  %v2277_v50 = vadd.f32 %v2276_v51, %v2116_v45  ;;  %v3195_v31 = vpack.c.bf16 %v5230_v41, %v5226_v16 }
 0x1e8   : > { %v3795_v3 = vpop.f32.mrf.mxu0  ;;  %v3710_v20 = vpop.f32.mrf.mxu1  ;;  %v2433_v18 = vadd.f32 %v3133_v35, %v2285_v24  ;;  %v3697_v35 = vadd.f32 %v5166_v39, %v5148_v23  ;;  %v3142_v39 = vunpack.c.h.bf16 %v3270_v26  ;;  %v3706_v51 = vadd.f32 %v3705_v55, %v5212_v4 }
 0x1e9   : > { %v3190_v1 = vpack.c.bf16 %v5233_v52, %v5223_v15  ;;  %v2651_v30 = vadd.f32 %v2650_v19, %v5233_v52  ;;  %3281 = vst [vmem:[%s5154_s11 + $0x28] sm:$0xff] %v3195_v31   ;;  %v2431_v22 = vadd.f32 %v3129_v2, %v2277_v50  ;;  %v2288_v63 = vadd.f32 %v3795_v3, %v2127_v48 }
 0x1ea   : > { %v2279_v53 = vpop.f32.mrf.mxu0  ;;  %v3711_v11 = vpop.f32.mrf.mxu1  ;;  %v5260_v59 = vmax.f32 %v2433_v18, 0.0  ;;  %v2135_v3 = vadd.f32 %v3697_v35, %v5004_v17  ;;  %v3138_v26 = vunpack.c.h.bf16 %v3269_v43  ;;  %v3271_v18 = vld [vmem:[%s5096_s8 + $0x50] sm:$0xff]   ;;  %v5469_v17 = vld [vmem:[#allocation2_spill] sm:$0xff] }
 0x1eb   : > { %3280 = vst [vmem:[%s5154_s11 + $0x20] sm:$0xff] %v3190_v1   ;;  %v2652_v8 = vadd.f32 %v2651_v30, %v5226_v16  ;;  %v2280_v28 = vadd.f32 %v2279_v53, %v2119_v61  ;;  %v2434_v60 = vadd.f32 %v3134_v13, %v2288_v63  ;;  %v5257_v49 = vmax.f32 %v2431_v22, 0.0 }
 0x1ec   : > { %v3798_v56 = vpop.f32.mrf.mxu0  ;;  %v3713_v34 = vpop.f32.mrf.mxu1  ;;  %v3712_v2 = vadd.f32 %v3711_v11, %v3710_v20  ;;  %v2143_v13 = vadd.f32 %v3703_v38, %v5018_v21  ;;  %v3149_v20 = vunpack.c.l.bf16 %v3272_v57  ;;  %v2148_v43 = vadd.f32 %v3706_v51, %v5469_v17 }
 0x1ed   : > { %v2653_v6 = vadd.f32 %v2652_v8, %v5230_v41  ;;  %v2432_v45 = vadd.f32 %v3130_v44, %v2280_v28  ;;  %v5262_v46 = vmax.f32 %v2434_v60, 0.0  ;;  %v2301_v12 = vadd.f32 %v3798_v56, %v2140_v33 }
 0x1ee   : > { %v2292_v42 = vpop.f32.mrf.mxu0  ;;  %v3714_v50 = vpop.f32.mrf.mxu1  ;;  %v2156_v8 = vadd.f32 %v3712_v2, %v5039_v40  ;;  %v3145_v40 = vunpack.c.l.bf16 %v3271_v18 }
 0x1ef   : > { %v2654_v5 = vadd.f32 %v2653_v6, %v5257_v49  ;;  %v5265_v24 = vmax.f32 %v2432_v45, 0.0  ;;  %v2293_v23 = vadd.f32 %v2292_v42, %v2132_v47  ;;  %v3205_v19 = vpack.c.bf16 %v5262_v46, %v5260_v59 }
 0x1f0   : > { %v3799_v36 = vpop.f32.mrf.mxu0  ;;  %v3716_v4 = vpop.f32.mrf.mxu1  ;;  %v2437_v55 = vadd.f32 %v3141_v14, %v2301_v12  ;;  %v3715_v22 = vadd.f32 %v3714_v50, %v3713_v34  ;;  %v3709_v14 = vadd.f32 %v5240_v25, %v5228_v10 }
 0x1f1   : > { %v3200_v31 = vpack.c.bf16 %v5265_v24, %v5257_v49  ;;  %v2655_v48 = vadd.f32 %v2654_v5, %v5265_v24  ;;  %3283 = vst [vmem:[%s5154_s11 + $0x38] sm:$0xff] %v3205_v19   ;;  %v2435_v1 = vadd.f32 %v3137_v27, %v2293_v23  ;;  %v2304_v30 = vadd.f32 %v3799_v36, %v2143_v13  ;;  %v5470_v27 = vld [vmem:[#allocation4_spill] sm:$0xff]  ;;  %v5471_v19 = vld [vmem:[#allocation3_spill] sm:$0xff] }
 0x1f2   : > { %v2295_v61 = vpop.f32.mrf.mxu0  ;;  %v3717_v63 = vpop.f32.mrf.mxu1  ;;  %v5287_v33 = vmax.f32 %v2437_v55, 0.0  ;;  %v2159_v5 = vadd.f32 %v3715_v22, %v5470_v27  ;;  %v2151_v50 = vadd.f32 %v3709_v14, %v5471_v19  ;;  %v3146_v13 = vunpack.c.h.bf16 %v3271_v18 }
 0x1f3   : > { %3282 = vst [vmem:[%s5154_s11 + $0x30] sm:$0xff] %v3200_v31   ;;  %v2656_v21 = vadd.f32 %v2655_v48, %v5260_v59  ;;  %v2296_v44 = vadd.f32 %v2295_v61, %v2135_v3  ;;  %v2438_v53 = vadd.f32 %v3142_v39, %v2304_v30  ;;  %v5284_v38 = vmax.f32 %v2435_v1, 0.0 }
 0x1f4   : > { %v3802_v28 = vpop.f32.mrf.mxu0  ;;  %v3719_v56 = vpop.f32.mrf.mxu1  ;;  %v3718_v10 = vadd.f32 %v3717_v63, %v3716_v4  ;;  %v3150_v39 = vunpack.c.h.bf16 %v3272_v57  ;;  %v3273_v57 = vld [vmem:[%s5096_s8 + $0x60] sm:$0xff]  }
 0x1f5   : > { %v2657_v11 = vadd.f32 %v2656_v21, %v5262_v46  ;;  %v2436_v60 = vadd.f32 %v3138_v26, %v2296_v44  ;;  %v5289_v47 = vmax.f32 %v2438_v53, 0.0  ;;  %v2317_v35 = vadd.f32 %v3802_v28, %v2156_v8  ;;  %v5472_v44 = vld [vmem:[#allocation5_spill] sm:$0xff]  ;;  %v3274_v8 = vld [vmem:[%s5096_s8 + $0x68] sm:$0xff]  }
 0x1f6   : > { %v2308_v6 = vpop.f32.mrf.mxu0  ;;  %v3720_v42 = vpop.f32.mrf.mxu1  ;;  %v2164_v22 = vadd.f32 %v3718_v10, %v5472_v44  ;;  %v3157_v10 = vunpack.c.l.bf16 %v3274_v8 }
 0x1f7   : > { %v2658_v45 = vadd.f32 %v2657_v11, %v5284_v38  ;;  %v5292_v34 = vmax.f32 %v2436_v60, 0.0  ;;  %v2309_v12 = vadd.f32 %v2308_v6, %v2148_v43  ;;  %v3215_v25 = vpack.c.bf16 %v5289_v47, %v5287_v33 }
 0x1f8   : > { %v3803_v23 = vpop.f32.mrf.mxu0  ;;  %v3722_v36 = vpop.f32.mrf.mxu1  ;;  %v2441_v31 = vadd.f32 %v3149_v20, %v2317_v35  ;;  %v3721_v1 = vadd.f32 %v3720_v42, %v3719_v56  ;;  %v3153_v11 = vunpack.c.l.bf16 %v3273_v57  ;;  %v5473_v35 = vld [vmem:[#allocation7_spill] sm:$0xff]  ;;  %v5474_v42 = vld [vmem:[#allocation6_spill] sm:$0xff] }
 0x1f9   : > { %v3210_v51 = vpack.c.bf16 %v5292_v34, %v5284_v38  ;;  %v2659_v2 = vadd.f32 %v2658_v45, %v5292_v34  ;;  %3285 = vst [vmem:[%s5154_s11 + $0x48] sm:$0xff] %v3215_v25   ;;  %v2439_v48 = vadd.f32 %v3145_v40, %v2309_v12  ;;  %v2320_v3 = vadd.f32 %v3803_v23, %v2159_v5 }
 0x1fa   : > { %v2311_v26 = vpop.f32.mrf.mxu0  ;;  %v3723_v30 = vpop.f32.mrf.mxu1  ;;  %v5310_v28 = vmax.f32 %v2441_v31, 0.0  ;;  %v2167_v27 = vadd.f32 %v3721_v1, %v5474_v42  ;;  %v5475_v31 = vld [vmem:[#allocation8_spill] sm:$0xff] }
 0x1fb   : > { %3284 = vst [vmem:[%s5154_s11 + $0x40] sm:$0xff] %v3210_v51   ;;  %v2660_v4 = vadd.f32 %v2659_v2, %v5287_v33  ;;  %v2312_v55 = vadd.f32 %v2311_v26, %v2151_v50  ;;  %v2442_v61 = vadd.f32 %v3150_v39, %v2320_v3  ;;  %v3724_v63 = vadd.f32 %v3723_v30, %v3722_v36  ;;  %v3275_v30 = vld [vmem:[%s5096_s8 + $0x70] sm:$0xff]  }
 0x1fc   : > { %v3806_v21 = vpop.f32.mrf.mxu0  ;;  %v5306_v18 = vmax.f32 %v2439_v48, 0.0  ;;  %v3725_v17 = vpop.f32.mrf.mxu1  ;;  %v3158_v3 = vunpack.c.h.bf16 %v3274_v8  ;;  %v3161_v8 = vunpack.c.l.bf16 %v3275_v30 }
 0x1fd   : > { %v2661_v20 = vadd.f32 %v2660_v4, %v5289_v47  ;;  %v2440_v53 = vadd.f32 %v3146_v13, %v2312_v55  ;;  %v5312_v43 = vmax.f32 %v2442_v61, 0.0  ;;  %v2172_v6 = vadd.f32 %v3724_v63, %v5473_v35 }
 0x1fe   : > { %v2324_v14 = vpop.f32.mrf.mxu0  ;;  %v3726_v12 = vpop.f32.mrf.mxu1  ;;  %v3154_v13 = vunpack.c.h.bf16 %v3273_v57 }
 0x1ff   : > { %v2662_v60 = vadd.f32 %v2661_v20, %v5306_v18  ;;  %v5315_v56 = vmax.f32 %v2440_v53, 0.0  ;;  %v2325_v40 = vadd.f32 %v2324_v14, %v2164_v22  ;;  %v3225_v45 = vpack.c.bf16 %v5312_v43, %v5310_v28  ;;  %v5476_v14 = vld [vmem:[#allocation9_spill] sm:$0xff] }
 0x200   : > { %v3807_v25 = vpop.f32.mrf.mxu0  ;;  %v3727_v5 = vadd.f32 %v3726_v12, %v3725_v17  ;;  %v2333_v51 = vadd.f32 %v3806_v21, %v2172_v6  ;;  %v3728_v2 = vpop.f32.mrf.mxu1 }
 0x201   : > { %v3220_v23 = vpack.c.bf16 %v5315_v56, %v5306_v18  ;;  %v2663_v39 = vadd.f32 %v2662_v60, %v5315_v56  ;;  %3287 = vst [vmem:[%s5154_s11 + $0x58] sm:$0xff] %v3225_v45   ;;  %v2443_v19 = vadd.f32 %v3153_v11, %v2325_v40 }
 0x202   : > { %v2327_v50 = vpop.f32.mrf.mxu0  ;;  %v2175_v48 = vadd.f32 %v3727_v5, %v5475_v31  ;;  %v2445_v4 = vadd.f32 %v3157_v10, %v2333_v51  ;;  %v3729_v55 = vpop.f32.mrf.mxu1  ;;  %v5477_v51 = vld [vmem:[#allocation10_spill] sm:$0xff] }
 0x203   : > { %3286 = vst [vmem:[%s5154_s11 + $0x50] sm:$0xff] %v3220_v23   ;;  %v2664_v36 = vadd.f32 %v2663_v39, %v5310_v28  ;;  %v2328_v26 = vadd.f32 %v2327_v50, %v2167_v27  ;;  %v3730_v61 = vadd.f32 %v3729_v55, %v3728_v2  ;;  %v5329_v44 = vmax.f32 %v2443_v19, 0.0  ;;  %v5478_v55 = vld [vmem:[#allocation11_spill] sm:$0xff] }
 0x204   : > { %v3810_v1 = vpop.f32.mrf.mxu0  ;;  %v2336_v22 = vadd.f32 %v3807_v25, %v2175_v48  ;;  %v3731_v63 = vpop.f32.mrf.mxu1  ;;  %v5336_v40 = vmax.f32 %v2445_v4, 0.0  ;;  %v3162_v19 = vunpack.c.h.bf16 %v3275_v30 }
 0x205   : > { %v2665_v21 = vadd.f32 %v2664_v36, %v5312_v43  ;;  %v2444_v20 = vadd.f32 %v3154_v13, %v2328_v26  ;;  %v2180_v11 = vadd.f32 %v3730_v61, %v5476_v14  ;;  %v3276_v36 = vld [vmem:[%s5096_s8 + $0x78] sm:$0xff]  }
 0x206   : > { %v2340_v57 = vpop.f32.mrf.mxu0  ;;  %v2446_v17 = vadd.f32 %v3158_v3, %v2336_v22  ;;  %v3732_v60 = vpop.f32.mrf.mxu1 }
 0x207   : > { %v2666_v53 = vadd.f32 %v2665_v21, %v5329_v44  ;;  %v5334_v35 = vmax.f32 %v2444_v20, 0.0  ;;  %v3733_v12 = vadd.f32 %v3732_v60, %v3731_v63  ;;  %v2341_v10 = vadd.f32 %v2340_v57, %v2180_v11 }
 0x208   : > { %v3811_v6 = vpop.f32.mrf.mxu0  ;;  %v5338_v45 = vmax.f32 %v2446_v17, 0.0  ;;  %v3734_v27 = vpop.f32.mrf.mxu1  ;;  %v3165_v21 = vunpack.c.l.bf16 %v3276_v36  ;;  %v3166_v17 = vunpack.c.h.bf16 %v3276_v36 }
 0x209   : > { %v3230_v25 = vpack.c.bf16 %v5334_v35, %v5329_v44  ;;  %v2667_v42 = vadd.f32 %v2666_v53, %v5334_v35  ;;  %v2447_v39 = vadd.f32 %v3161_v8, %v2341_v10  ;;  %v2183_v2 = vadd.f32 %v3733_v12, %v5477_v51 }
 0x20a   : > { %v2343_v5 = vpop.f32.mrf.mxu0  ;;  %v3235_v23 = vpack.c.bf16 %v5338_v45, %v5336_v40  ;;  %v3735_v13 = vpop.f32.mrf.mxu1 }
 0x20b   : > { %3288 = vst [vmem:[%s5154_s11 + $0x60] sm:$0xff] %v3230_v25   ;;  %v2668_v50 = vadd.f32 %v2667_v42, %v5336_v40  ;;  %v3736_v31 = vadd.f32 %v3735_v13, %v3734_v27  ;;  %v2344_v48 = vadd.f32 %v2343_v5, %v2183_v2  ;;  %v5350_v3 = vmax.f32 %v2447_v39, 0.0 }
 0x20c   : > { %3289 = vst [vmem:[%s5154_s11 + $0x68] sm:$0xff] %v3235_v23   ;;  %v3737_v4 = vpop.f32.mrf.mxu1 }
 0x20d   : > { %v2669_v26 = vadd.f32 %v2668_v50, %v5338_v45  ;;  %v2188_v61 = vadd.f32 %v3736_v31, %v5478_v55  ;;  %v2448_v22 = vadd.f32 %v3162_v19, %v2344_v48 }
 0x20e   : > { %v3738_v63 = vpop.f32.mrf.mxu1 }
 0x20f   : > { %v2670_v30 = vadd.f32 %v2669_v26, %v5350_v3  ;;  %v2349_v20 = vadd.f32 %v3810_v1, %v2188_v61  ;;  %v3739_v57 = vadd.f32 %v3738_v63, %v3737_v4  ;;  %v5355_v53 = vmax.f32 %v2448_v22, 0.0 }
 0x211   : > { %v2449_v14 = vadd.f32 %v3165_v21, %v2349_v20  ;;  %v2191_v11 = vadd.f32 %v3739_v57, %v5119_v7  ;;  %v3240_v8 = vpack.c.bf16 %v5355_v53, %v5350_v3  ;;  %v2671_v60 = vadd.f32 %v2670_v30, %v5355_v53 }
 0x213   : > { %v5361_v12 = vmax.f32 %v2449_v14, 0.0  ;;  %v2352_v10 = vadd.f32 %v3811_v6, %v2191_v11  ;;  %3290 = vst [vmem:[%s5154_s11 + $0x70] sm:$0xff] %v3240_v8  }
 0x215   : > { %v2450_v25 = vadd.f32 %v3166_v17, %v2352_v10  ;;  %v2672_v1 = vadd.f32 %v2671_v60, %v5361_v12 }
 0x217   : > { %v5365_v42 = vmax.f32 %v2450_v25, 0.0 }
 0x219   : > { %v3245_v27 = vpack.c.bf16 %v5365_v42, %v5361_v12  ;;  %v2673_v5 = vadd.f32 %v2672_v1, %v5365_v42 }
 0x21b   : > { %3291 = vst [vmem:[%s5154_s11 + $0x78] sm:$0xff] %v3245_v27   ;;  %v2674_v7 = vrot.slane %v2673_v5, 4 }
 0x21d   : > { %v2675_v23 = vadd.f32 %v2674_v7, %v2673_v5 }
 0x21f   : > { %v2676_v39 = vrot.slane %v2675_v23, 2 }
 0x221   : > { %v2677_v51 = vadd.f32 %v2676_v39, %v2675_v23 }
 0x223   : > { %v2678_v2 = vrot.slane %v2677_v51, 1 }
 0x225   : > { %v5371_v19 = vadd.f32 %v2678_v2, %v2677_v51 }
 0x227   : > { %v5374_v6 = vmul.f32 0.00390625, %v5371_v19 }
 0x229   : > { %v2681_v50 = vsub.f32 %v5156_v37, %v5374_v6  ;;  %v2682_v13 = vsub.f32 %v5160_v0, %v5374_v6  ;;  %v2683_v36 = vsub.f32 %v5144_v62, %v5374_v6  ;;  %v2684_v26 = vsub.f32 %v5146_v58, %v5374_v6 }
 0x22a   : > { %v2685_v4 = vsub.f32 %v5187_v9, %v5374_v6  ;;  %v2686_v21 = vsub.f32 %v5197_v29, %v5374_v6  ;;  %v2687_v0 = vsub.f32 %v5190_v54, %v5374_v6  ;;  %v2688_v63 = vsub.f32 %v5194_v32, %v5374_v6 }
 0x22b   : > { %v2713_v31 = vmul.f32 %v2681_v50, %v2681_v50  ;;  %v2714_v48 = vmul.f32 %v2682_v13, %v2682_v13  ;;  %v2715_v55 = vmul.f32 %v2683_v36, %v2683_v36  ;;  %v2716_v37 = vmul.f32 %v2684_v26, %v2684_v26 }
 0x22c   : > { %v2717_v30 = vmul.f32 %v2685_v4, %v2685_v4  ;;  %v2718_v20 = vmul.f32 %v2686_v21, %v2686_v21  ;;  %v2689_v9 = vsub.f32 %v5223_v15, %v5374_v6  ;;  %v2719_v57 = vmul.f32 %v2687_v0, %v2687_v0 }
 0x22d   : > { %v2745_v61 = vadd.f32 %v2714_v48, %v2713_v31  ;;  %v2690_v29 = vsub.f32 %v5233_v52, %v5374_v6  ;;  %v2720_v14 = vmul.f32 %v2688_v63, %v2688_v63  ;;  %v2691_v54 = vsub.f32 %v5226_v16, %v5374_v6 }
 0x22e   : > { %v2721_v8 = vmul.f32 %v2689_v9, %v2689_v9  ;;  %v2692_v32 = vsub.f32 %v5230_v41, %v5374_v6  ;;  %v2693_v15 = vsub.f32 %v5257_v49, %v5374_v6  ;;  %v2694_v52 = vsub.f32 %v5265_v24, %v5374_v6 }
 0x22f   : > { %v2746_v22 = vadd.f32 %v2745_v61, %v2715_v55  ;;  %v2722_v10 = vmul.f32 %v2690_v29, %v2690_v29  ;;  %v2723_v1 = vmul.f32 %v2691_v54, %v2691_v54  ;;  %v2695_v16 = vsub.f32 %v5260_v59, %v5374_v6 }
 0x230   : > { %v2724_v5 = vmul.f32 %v2692_v32, %v2692_v32  ;;  %v2725_v23 = vmul.f32 %v2693_v15, %v2693_v15  ;;  %v2696_v41 = vsub.f32 %v5262_v46, %v5374_v6  ;;  %v2726_v51 = vmul.f32 %v2694_v52, %v2694_v52 }
 0x231   : > { %v2747_v62 = vadd.f32 %v2746_v22, %v2716_v37  ;;  %v2697_v49 = vsub.f32 %v5284_v38, %v5374_v6  ;;  %v2727_v50 = vmul.f32 %v2695_v16, %v2695_v16  ;;  %v2698_v24 = vsub.f32 %v5292_v34, %v5374_v6 }
 0x232   : > { %v2728_v36 = vmul.f32 %v2696_v41, %v2696_v41  ;;  %v2699_v59 = vsub.f32 %v5287_v33, %v5374_v6  ;;  %v2700_v46 = vsub.f32 %v5289_v47, %v5374_v6  ;;  %v2701_v38 = vsub.f32 %v5306_v18, %v5374_v6 }
 0x233   : > { %v2748_v58 = vadd.f32 %v2747_v62, %v2717_v30  ;;  %v2729_v48 = vmul.f32 %v2697_v49, %v2697_v49  ;;  %v2730_v4 = vmul.f32 %v2698_v24, %v2698_v24  ;;  %v2702_v34 = vsub.f32 %v5315_v56, %v5374_v6 }
 0x234   : > { %v2731_v61 = vmul.f32 %v2699_v59, %v2699_v59  ;;  %v2732_v37 = vmul.f32 %v2700_v46, %v2700_v46  ;;  %v2703_v33 = vsub.f32 %v5310_v28, %v5374_v6  ;;  %v2733_v0 = vmul.f32 %v2701_v38, %v2701_v38 }
 0x235   : > { %v2749_v17 = vadd.f32 %v2748_v58, %v2718_v20  ;;  %v2704_v47 = vsub.f32 %v5312_v43, %v5374_v6  ;;  %v2734_v62 = vmul.f32 %v2702_v34, %v2702_v34  ;;  %v2705_v18 = vsub.f32 %v5329_v44, %v5374_v6 }
 0x236   : > { %v2735_v20 = vmul.f32 %v2703_v33, %v2703_v33  ;;  %v2706_v56 = vsub.f32 %v5334_v35, %v5374_v6  ;;  %v2707_v28 = vsub.f32 %v5336_v40, %v5374_v6  ;;  %v2708_v43 = vsub.f32 %v5338_v45, %v5374_v6 }
 0x237   : > { %v2750_v11 = vadd.f32 %v2749_v17, %v2719_v57  ;;  %v2736_v9 = vmul.f32 %v2704_v47, %v2704_v47  ;;  %v2737_v17 = vmul.f32 %v2705_v18, %v2705_v18  ;;  %v2709_v44 = vsub.f32 %v5350_v3, %v5374_v6 }
 0x238   : > { %v2739_v54 = vmul.f32 %v2707_v28, %v2707_v28  ;;  %v2710_v35 = vsub.f32 %v5355_v53, %v5374_v6  ;;  %v2711_v40 = vsub.f32 %v5361_v12, %v5374_v6  ;;  %v2712_v45 = vsub.f32 %v5365_v42, %v5374_v6 }
 0x239   : > { %v2751_v60 = vadd.f32 %v2750_v11, %v2720_v14  ;;  %v2738_v14 = vmul.f32 %v2706_v56, %v2706_v56 }
 0x23a   : > { %v2742_v15 = vmul.f32 %v2710_v35, %v2710_v35  ;;  %v2744_v52 = vmul.f32 %v2712_v45, %v2712_v45 }
 0x23b   : > { %v2752_v25 = vadd.f32 %v2751_v60, %v2721_v8  ;;  %v2740_v60 = vmul.f32 %v2708_v43, %v2708_v43 }
 0x23d   : > { %v2753_v27 = vadd.f32 %v2752_v25, %v2722_v10  ;;  %v2741_v10 = vmul.f32 %v2709_v44, %v2709_v44 }
 0x23f   : > { %v2754_v7 = vadd.f32 %v2753_v27, %v2723_v1  ;;  %v2743_v27 = vmul.f32 %v2711_v40, %v2711_v40 }
 0x241   : > { %v2755_v39 = vadd.f32 %v2754_v7, %v2724_v5 }
 0x243   : > { %v2756_v2 = vadd.f32 %v2755_v39, %v2725_v23 }
 0x245   : > { %v2757_v13 = vadd.f32 %v2756_v2, %v2726_v51 }
 0x247   : > { %v2758_v31 = vadd.f32 %v2757_v13, %v2727_v50 }
 0x249   : > { %v2759_v26 = vadd.f32 %v2758_v31, %v2728_v36 }
 0x24b   : > { %v2760_v55 = vadd.f32 %v2759_v26, %v2729_v48 }
 0x24d   : > { %v2761_v21 = vadd.f32 %v2760_v55, %v2730_v4 }
 0x24f   : > { %v2762_v22 = vadd.f32 %v2761_v21, %v2731_v61 }
 0x251   : > { %v2763_v30 = vadd.f32 %v2762_v22, %v2732_v37 }
 0x253   : > { %v2764_v63 = vadd.f32 %v2763_v30, %v2733_v0 }
 0x255   : > { %v2765_v58 = vadd.f32 %v2764_v63, %v2734_v62 }
 0x257   : > { %v2766_v57 = vadd.f32 %v2765_v58, %v2735_v20 }
 0x259   : > { %v2767_v29 = vadd.f32 %v2766_v57, %v2736_v9 }
 0x25b   : > { %v2768_v11 = vadd.f32 %v2767_v29, %v2737_v17 }
 0x25d   : > { %v2769_v8 = vadd.f32 %v2768_v11, %v2738_v14 }
 0x25f   : > { %v2770_v32 = vadd.f32 %v2769_v8, %v2739_v54 }
 0x261   : > { %v2771_v25 = vadd.f32 %v2770_v32, %v2740_v60 }
 0x263   : > { %v2772_v1 = vadd.f32 %v2771_v25, %v2741_v10 }
 0x265   : > { %v2773_v3 = vadd.f32 %v2772_v1, %v2742_v15 }
 0x267   : > { %v2774_v5 = vadd.f32 %v2773_v3, %v2743_v27 }
 0x269   : > { %v2775_v7 = vadd.f32 %v2774_v5, %v2744_v52 }
 0x26b   : > { %v2776_v16 = vrot.slane %v2775_v7, 4 }
 0x26d   : > { %v2777_v53 = vadd.f32 %v2776_v16, %v2775_v7 }
 0x26f   : > { %v2778_v23 = vrot.slane %v2777_v53, 2 }
 0x271   : > { %v2779_v39 = vadd.f32 %v2778_v23, %v2777_v53 }
 0x273   : > { %v2780_v41 = vrot.slane %v2779_v39, 1 }
 0x275   : > { %v2781_v12 = vadd.f32 %v2780_v41, %v2779_v39 }
 0x277   : > { %v2783_v42 = vsel %vm613_vm0, %v5371_v19, %v2781_v12 }
 0x278   : > { %2784 = vst [vmem:[%s309_s14] sm:$0x3] %v2783_v42 }
 0x279 PF: > { %s18_s24 = sadd.s32 1, %s3917_s24  }
 0x27a   : > { %p15_p4 = scmp.ge.s32.totalorder %s18_s24, 4  }
 0x27c   :  { %17 = sbr.rel (!%p15_p4) target bundleno = 1 (0x1), region = 89 }

// kernel: expansive_block_forward.3
= control target key start
LH: loop header
LB: loop body
LE: loop exit
PB: predicated region body
PF: predicated region fallthrough
CT: control target
= control target key end

     0   :  { %s4471_s18 = smov 0   ;;  %s6456_s0 = inlined_call_operand.vmem [shape: bf16[2,18,18,128], index: 0, kind: input, shape index: {}]   ;;  %s6457_s1 = inlined_call_operand.vmem [shape: bf16[1152,256], index: 1, kind: input, shape index: {}]   ;;  %s6458_s2 = inlined_call_operand.vmem [shape: f32[1,256], index: 2, kind: input, shape index: {}]   ;;  %s6459_s3 = inlined_call_operand.vmem [shape: bf16[2,16,16,128], index: 3, kind: output, shape index: {0}]   ;;  %s6460_s4 = inlined_call_operand.vmem [shape: bf16[2,16,16,128], index: 4, kind: output, shape index: {1}]   ;;  %s6461_s5 = inlined_call_operand.vmem [shape: f32[2,2,128], index: 5, kind: output, shape index: {2}]  }
   0x1 LB: > { %s3591_s19 = sadd.s32 4294967295, %s4438_s18   ;;  %p3595_p0 = scmp.ge.s32.totalorder %s4438_s18, 1  ;;  %s4438_s18 = sphi %s4471_s18, %s16_s18  }
   0x2   : > { %p192_p1 = scmp.lt.s32.totalorder %s4438_s18, 3 }
   0x4   : > { %p193_p2 = pnand %p3595_p0, %p192_p1 }
   0x6   : > { %196 = sbr.rel (%p193_p2) target bundleno = 689 (0x2b1), region = 32 }
   0xb   : > { %v4182_v0 = vld [vmem:[%s6457_s1 + $0x74] ss:$8 sps:$4 sm:$0xff]   ;;  %v4184_v1 = vld [vmem:[%s6457_s1 + $0x70] ss:$8 sps:$4 sm:$0xff]   ;;  %v4185_v2 = vld [vmem:[%s6457_s1 + $0x64] ss:$8 sps:$4 sm:$0xff]  }
   0xc   : > { %2013 = vmatprep.subr.bf16.mxu0 %v4182_v0  ;;  %4140 = vmatprep.subr.bf16.mxu1 %v4182_v0  ;;  %v4187_v3 = vld [vmem:[%s6457_s1 + $0x60] ss:$8 sps:$4 sm:$0xff]   ;;  %v4188_v4 = vld [vmem:[%s6457_s1 + $0x54] ss:$8 sps:$4 sm:$0xff]   ;;  %p229_p3 = scmp.lt.s32.totalorder %s3591_s19, 1  ;;  %vm738_vm0 = vcmask 1042432  }
   0xd   : > { %2014 = vmatpush1.bf16.msra.mxu0 %v4184_v1  ;;  %4156 = vmatpush1.bf16.msra.mxu1 %v4184_v1  ;;  %v4190_v5 = vld [vmem:[%s6457_s1 + $0x50] ss:$8 sps:$4 sm:$0xff]   ;;  %v4191_v6 = vld [vmem:[%s6457_s1 + $0x44] ss:$8 sps:$4 sm:$0xff]   ;;  %v4193_v7 = vld [vmem:[%s6457_s1 + $0x40] ss:$8 sps:$4 sm:$0xff]  }
   0xe   : > { %2015 = vmatprep.subr.bf16.mxu0 %v4185_v2  ;;  %4141 = vmatprep.subr.bf16.mxu1 %v4185_v2  ;;  %s6656_s19 = smov (!%p229_p3, %s3591_s19), 1  ;;  %v4194_v8 = vld [vmem:[%s6457_s1 + $0x34] ss:$8 sps:$4 sm:$0xff]   ;;  %v4196_v9 = vld [vmem:[%s6457_s1 + $0x30] ss:$8 sps:$4 sm:$0xff]   ;;  %vm739_vm2 = vcmask 1046532  }
   0xf   : > { %s4172_s13 = smul.u32 216, %s6656_s19  ;;  %v4197_v10 = vld [vmem:[%s6457_s1 + $0x24] ss:$8 sps:$4 sm:$0xff]   ;;  %v4199_v11 = vld [vmem:[%s6457_s1 + $0x20] ss:$8 sps:$4 sm:$0xff]   ;;  %vm4550_vm4 = vmor %vm738_vm0, %vm739_vm2  ;;  %s3601_s8 = sshll.u32 %s6656_s19, 1 }
  0x10   : > { %vm303_vm1 = vsmask.f32 3328  ;;  %v4200_v12 = vld [vmem:[%s6457_s1 + $0x14] ss:$8 sps:$4 sm:$0xff]   ;;  %vm304_vm3 = vsmask.f32 7440  ;;  %s247_s11 = scalar_lea.vmem %s6461_s5, %s3601_s8 }
  0x11   : > { %2016 = vmatpush1.bf16.msra.mxu0 %v4187_v3  ;;  %4157 = vmatpush1.bf16.msra.mxu1 %v4187_v3  ;;  %s4518_s22 = scalar_lea.vmem %s6456_s0, %s4172_s13  ;;  %v4202_v13 = vld [vmem:[%s6457_s1 + $0x10] ss:$8 sps:$4 sm:$0xff]   ;;  %v4203_v16 = vld [vmem:[%s6457_s1 + $0x4] ss:$8 sps:$4 sm:$0xff]   ;;  %v4205_v38 = vld [vmem:[%s6457_s1] ss:$8 sps:$4 sm:$0xff]  }
  0x12   : > { %2017 = vmatprep.subr.bf16.mxu0 %v4188_v4  ;;  %4142 = vmatprep.subr.bf16.mxu1 %v4188_v4  ;;  %v4530_v14 = vld [vmem:[%s4518_s22] sm:$0xf]  ;;  %v4533_v15 = vld [vmem:[%s4518_s22 + $0x4] sm:$0xf]  ;;  %v251_v17 = vld [vmem:[%s4518_s22 + $0x8] sm:$0x1] }
  0x13   : > { %v307_v18 = vshrl.u32 %v4530_v14, 16  ;;  %v310_v19 = vshll.u32 %v4530_v14, 16  ;;  %v316_v20 = vshll.u32 %v4533_v15, 16  ;;  %v320_v21 = vshrl.u32 %v4533_v15, 16  ;;  %v4546_v26 = vld [vmem:[%s4518_s22 + $0x60] sm:$0xf]  ;;  %vm4570_vm5 = vmor %vm303_vm1, %vm304_vm3 }
  0x14   : > { %v326_v22 = vshll.u32 %v251_v17, 16  ;;  %v3602_v23 = vrot.slane %v4530_v14, 9  ;;  %v743_v24 = vrot.slane %v4533_v15, 5  ;;  %v746_v25 = vrot.slane %v251_v17, 5  ;;  %v4555_v32 = vld [vmem:[%s4518_s22 + $0x64] sm:$0xf] }
  0x15   : > { %2018 = vmatpush1.bf16.msra.mxu0 %v4190_v5  ;;  %4158 = vmatpush1.bf16.msra.mxu1 %v4190_v5  ;;  %v309_v27 = vrot.slane %v307_v18, 4  ;;  %v312_v28 = vrot.slane %v310_v19, 5  ;;  %v318_v29 = vrot.slane %v316_v20, 5  ;;  %v322_v30 = vrot.slane %v320_v21, 4  ;;  %v275_v35 = vld [vmem:[%s4518_s22 + $0x68] sm:$0x1] }
  0x16   : > { %2019 = vmatprep.subr.bf16.mxu0 %v4191_v6  ;;  %4143 = vmatprep.subr.bf16.mxu1 %v4191_v6  ;;  %v328_v33 = vrot.slane %v326_v22, 5  ;;  %v745_v34 = vrot.slane %v743_v24, 4  ;;  %v499_v36 = vshrl.u32 %v4546_v26, 16  ;;  %v502_v37 = vshll.u32 %v4546_v26, 16  ;;  %v4206_v43 = vld [vmem:[%s6457_s1 + $0xf4] ss:$8 sps:$4 sm:$0xff]  }
  0x17   : > { %v313_v39 = vor.u32 %v312_v28, %v309_v27  ;;  %v323_v40 = vor.u32 %v322_v30, %v318_v29  ;;  %v508_v41 = vshll.u32 %v4555_v32, 16  ;;  %v512_v42 = vshrl.u32 %v4555_v32, 16  ;;  %v4208_v59 = vld [vmem:[%s6457_s1 + $0xf0] ss:$8 sps:$4 sm:$0xff]   ;;  %v4209_v60 = vld [vmem:[%s6457_s1 + $0xe4] ss:$8 sps:$4 sm:$0xff]  }
  0x18   : > { %v4576_v45 = vsel %vm4550_vm4, %v745_v34, %v746_v25  ;;  %v501_v46 = vrot.slane %v499_v36, 4  ;;  %v504_v47 = vrot.slane %v502_v37, 5  ;;  %v518_v48 = vshll.u32 %v275_v35, 16  ;;  %v4595_v1 = vld [vmem:[%s4518_s22 + $0xc] sm:$0xf] }
  0x19   : > { %2020 = vmatpush1.bf16.msra.mxu0 %v4193_v7  ;;  %4159 = vmatpush1.bf16.msra.mxu1 %v4193_v7  ;;  %v314_v49 = vrot.slane %v313_v39, 4  ;;  %v324_v50 = vrot.slane %v323_v40, 4  ;;  %v510_v51 = vrot.slane %v508_v41, 5  ;;  %v514_v52 = vrot.slane %v512_v42, 4  ;;  %v4598_v2 = vld [vmem:[%s4518_s22 + $0x10] sm:$0xf] }
  0x1a   : > { %2021 = vmatprep.subr.bf16.mxu0 %v4194_v8  ;;  %4144 = vmatprep.subr.bf16.mxu1 %v4194_v8  ;;  %v505_v53 = vor.u32 %v504_v47, %v501_v46  ;;  %v520_v54 = vrot.slane %v518_v48, 5  ;;  %v4584_v58 = vsel %vm4550_vm4, %v3602_v23, %v743_v24  ;;  %v331_v4 = vshrl.u32 %v4595_v1, 16  ;;  %v4626_v20 = vld [vmem:[%s4518_s22 + $0x70] sm:$0xf]  ;;  %v254_v21 = vld [vmem:[%s4518_s22 + $0x14] sm:$0x1] }
  0x1b   : > { %v319_v55 = vsel %vm4570_vm5, %v314_v49, %v318_v29  ;;  %v329_v56 = vsel %vm4570_vm5, %v324_v50, %v328_v33  ;;  %v515_v57 = vor.u32 %v514_v52, %v510_v51  ;;  %v334_v6 = vshll.u32 %v4595_v1, 16  ;;  %v4215_v22 = vld [vmem:[%s6457_s1 + $0xc4] ss:$8 sps:$4 sm:$0xff]   ;;  %v4217_v33 = vld [vmem:[%s6457_s1 + $0xc0] ss:$8 sps:$4 sm:$0xff]  }
  0x1c   : > { %v3636_v61 = vcombine.low %v319_v55, %v329_v56  ;;  %v506_v62 = vrot.slane %v505_v53, 4  ;;  %v340_v7 = vshll.u32 %v4598_v2, 16  ;;  %v344_v8 = vshrl.u32 %v4598_v2, 16  ;;  %v4218_v34 = vld [vmem:[%s6457_s1 + $0xb4] ss:$8 sps:$4 sm:$0xff]  }
  0x1d   : > { %2022 = vmatpush1.bf16.msra.mxu0 %v4196_v9  ;;  %4160 = vmatpush1.bf16.msra.mxu1 %v4196_v9  ;;  %v516_v0 = vrot.slane %v515_v57, 4  ;;  %v4211_v9 = vld [vmem:[%s6457_s1 + $0xe0] ss:$8 sps:$4 sm:$0xff]   ;;  %v336_v17 = vrot.slane %v334_v6, 5  ;;  %v532_v25 = vshll.u32 %v4626_v20, 16  ;;  %v536_v27 = vshrl.u32 %v4626_v20, 16 }
  0x1e   : > { %2023 = vmatprep.subr.bf16.mxu0 %v4197_v10  ;;  %4145 = vmatprep.subr.bf16.mxu1 %v4197_v10  ;;  %v511_v3 = vsel %vm4570_vm5, %v506_v62, %v510_v51  ;;  %v4623_v18 = vrot.slane %v340_v7, 5  ;;  %v346_v19 = vrot.slane %v344_v8, 4  ;;  %v350_v30 = vshll.u32 %v254_v21, 16  ;;  %v4644_v35 = vld [vmem:[%s4518_s22 + $0x18] sm:$0xf] }
  0x1f   : > { %2045 = vmatprep.mubr.bf16.mxu0 %v3636_v61  ;;  %v521_v5 = vsel %vm4570_vm5, %v516_v0, %v520_v54  ;;  %v4220_v36 = vld [vmem:[%s6457_s1 + $0xb0] ss:$8 sps:$4 sm:$0xff]   ;;  %v4649_v39 = vrot.slane %v532_v25, 5  ;;  %v538_v40 = vrot.slane %v536_v27, 4  ;;  %v278_v46 = vld [vmem:[%s4518_s22 + $0x74] sm:$0x1]  ;;  %v3620_v7 = vcombine.low %v4530_v14, %v4533_v15 }
  0x20   : > { %v4611_v10 = vcombine.low %v511_v3, %v521_v5  ;;  %v347_v29 = vor.u32 %v346_v19, %v4623_v18  ;;  %v4653_v47 = vld [vmem:[%s4518_s22 + $0x1c] sm:$0xf]  ;;  %v355_v48 = vshrl.u32 %v4644_v35, 16  ;;  %v358_v49 = vshll.u32 %v4644_v35, 16  ;;  %v4221_v50 = vld [vmem:[%s6457_s1 + $0xa4] ss:$8 sps:$4 sm:$0xff]  }
  0x21   : > { %2024 = vmatpush1.bf16.msra.mxu0 %v4199_v11  ;;  %4161 = vmatpush1.bf16.msra.mxu1 %v4199_v11  ;;  %v4212_v11 = vld [vmem:[%s6457_s1 + $0xd4] ss:$8 sps:$4 sm:$0xff]   ;;  %v4661_v51 = vld [vmem:[%s4518_s22 + $0x78] sm:$0xf]  ;;  %v539_v53 = vor.u32 %v538_v40, %v4649_v39  ;;  %v542_v54 = vshll.u32 %v278_v46, 16  ;;  %v368_v61 = vshrl.u32 %v4653_v47, 16  ;;  %v4689_v8 = vcombine.low %v4546_v26, %v4555_v32 }
  0x22   : > { %2025 = vmatprep.subr.bf16.mxu0 %v4200_v12  ;;  %4146 = vmatprep.subr.bf16.mxu1 %v4200_v12  ;;  %6503 = vst [vmem:[#allocation2_spill] sm:$0xff] %v4611_v10  ;;  %v4214_v12 = vld [vmem:[%s6457_s1 + $0xd0] ss:$8 sps:$4 sm:$0xff]   ;;  %v348_v42 = vrot.slane %v347_v29, 4  ;;  %v4665_v55 = vld [vmem:[%s4518_s22 + $0x7c] sm:$0xf]  ;;  %v4698_v19 = vcombine.low %v4595_v1, %v4598_v2 }
  0x23   : > { %2125 = vmatprep.mubr.bf16.mxu1 %v4611_v10  ;;  %v4223_v56 = vld [vmem:[%s6457_s1 + $0xa0] ss:$8 sps:$4 sm:$0xff]   ;;  %v357_v0 = vrot.slane %v355_v48, 4  ;;  %v360_v3 = vrot.slane %v358_v49, 5  ;;  %v550_v5 = vshll.u32 %v4661_v51, 16  ;;  %6504 = vst [vmem:[#allocation3_spill] sm:$0xff] %v4689_v8 }
  0x24   : > { %v4678_v62 = vld [vmem:[%s4518_s22 + $0x20] sm:$0x1]  ;;  %v4224_v6 = vld [vmem:[%s6457_s1 + $0x94] ss:$8 sps:$4 sm:$0xff]   ;;  %v4701_v21 = vld [vmem:[%s4518_s22 + $0x24] sm:$0xf] }
  0x25   : > { %2026 = vmatpush1.bf16.msra.mxu0 %v4202_v13  ;;  %4162 = vmatpush1.bf16.msra.mxu1 %v4202_v13  ;;  %v4621_v13 = vld [vmem:[%s4518_s22 + $0x6c] sm:$0xf]  ;;  %v4716_v25 = vld [vmem:[%s4518_s22 + $0x80] sm:$0x1]  ;;  %v4719_v1 = vld [vmem:[%s4518_s22 + $0x28] sm:$0xf]  ;;  %v361_v27 = vor.u32 %v360_v3, %v357_v0 }
  0x26   : > { %2027 = vmatprep.subr.bf16.mxu0 %v4203_v16  ;;  %4147 = vmatprep.subr.bf16.mxu1 %v4203_v16  ;;  %v333_v16 = vrot.slane %v331_v4, 4  ;;  %v523_v23 = vshrl.u32 %v4621_v13, 16  ;;  %v526_v24 = vshll.u32 %v4621_v13, 16  ;;  %v547_v4 = vshrl.u32 %v4661_v51, 16  ;;  %v4227_v26 = vld [vmem:[%s6457_s1 + $0x84] ss:$8 sps:$4 sm:$0xff]  }
  0x27   : > { %v4722_v2 = vld [vmem:[%s4518_s22 + $0x84] sm:$0xf]  ;;  %v4232_v3 = vld [vmem:[%s6457_s1 + $0x170] ss:$8 sps:$4 sm:$0xff]   ;;  %vm3469_vm6 = vcmask 1040384  }
  0x28   : > { %v337_v28 = vor.u32 %v336_v17, %v333_v16  ;;  %v525_v37 = vrot.slane %v523_v23, 4  ;;  %v540_v17 = vrot.slane %v539_v53, 4  ;;  %v4724_v29 = vrot.slane %v547_v4, 4  ;;  %v4235_v4 = vld [vmem:[%s6457_s1 + $0x270] ss:$8 sps:$4 sm:$0xff]  }
  0x29   : > { %2028 = vmatpush1.bf16.msra.mxu0 %v4205_v38  ;;  %4163 = vmatpush1.bf16.msra.mxu1 %v4205_v38  ;;  %v528_v38 = vrot.slane %v526_v24, 5  ;;  %v374_v24 = vshll.u32 %v4678_v62, 16  ;;  %v571_v40 = vshrl.u32 %v4722_v2, 16 }
  0x2a   : > { %2029 = vmatprep.subr.bf16.mxu0 %v4206_v43  ;;  %4148 = vmatprep.subr.bf16.mxu1 %v4206_v43  ;;  %v338_v41 = vrot.slane %v337_v28, 4  ;;  %v352_v43 = vrot.slane %v350_v30, 5  ;;  %v370_v28 = vrot.slane %v368_v61, 4  ;;  %v552_v30 = vrot.slane %v550_v5, 5 }
  0x2b   : > { %v529_v52 = vor.u32 %v528_v38, %v525_v37  ;;  %v388_v37 = vshll.u32 %v4719_v1, 16  ;;  %v392_v38 = vshrl.u32 %v4719_v1, 16 }
  0x2c   : > { %v343_v57 = vsel %vm4570_vm5, %v338_v41, %v4623_v18  ;;  %v544_v18 = vrot.slane %v542_v54, 5  ;;  %v574_v41 = vshll.u32 %v4722_v2, 16  ;;  %v4753_v54 = vrot.slane %v374_v24, 5 }
  0x2d   : > { %2030 = vmatpush2.bf16.msra.mxu0 %v4208_v59  ;;  %4164 = vmatpush2.bf16.msra.mxu1 %v4208_v59  ;;  %v353_v59 = vsel %vm4570_vm5, %v348_v42, %v352_v43  ;;  %v530_v16 = vrot.slane %v529_v52, 4  ;;  %v4229_v42 = vld [vmem:[%s6457_s1 + $0x80] ss:$8 sps:$4 sm:$0xff]   ;;  %v4750_v52 = vrot.slane %v361_v27, 4  ;;  %v4774_v5 = vrot.slane %v388_v37, 5 }
  0x2e   : > { %2031 = vmatprep.subr.bf16.mxu0 %v4209_v60  ;;  %4149 = vmatprep.subr.bf16.mxu1 %v4209_v60  ;;  %v364_v60 = vshll.u32 %v4653_v47, 16  ;;  %v4706_v32 = vcombine.low %v343_v57, %v353_v59  ;;  %v545_v46 = vsel %vm4570_vm5, %v540_v17, %v544_v18  ;;  %v553_v57 = vor.u32 %v552_v30, %v4724_v29  ;;  %v4796_v27 = vld [vmem:[%s4518_s22 + $0x34] sm:$0xf]  ;;  %v284_v30 = vld [vmem:[%s4518_s22 + $0x8c] sm:$0x1] }
  0x2f   : > { %v535_v43 = vsel %vm4570_vm5, %v530_v16, %v4649_v39  ;;  %v566_v39 = vshll.u32 %v4716_v25, 16  ;;  %v4243_v16 = vld [vmem:[%s6457_s1 + $0x264] ss:$8 sps:$4 sm:$0xff]   ;;  %v4788_v18 = vcombine.low %v4644_v35, %v4653_v47  ;;  %v4793_v25 = vld [vmem:[%s4518_s22 + $0x30] sm:$0xf]  ;;  %v4802_v29 = vcombine.low %v4661_v51, %v4665_v55 }
  0x30   : > { %v4712_v23 = vrot.slane %v364_v60, 5  ;;  %v4762_v60 = vld [vmem:[%s4518_s22 + $0x2c] sm:$0x1]  ;;  %v4784_v17 = vcombine.low %v535_v43, %v545_v46  ;;  %6507 = vst [vmem:[#allocation6_spill] sm:$0xff] %v4793_v25  ;;  %v403_v35 = vshrl.u32 %v4793_v25, 16  ;;  %v412_v37 = vshll.u32 %v4796_v27, 16 }
  0x31   : > { %2032 = vmatpush2.bf16.msra.mxu0 %v4211_v9  ;;  %4165 = vmatpush2.bf16.msra.mxu1 %v4211_v9  ;;  %v556_v9 = vshll.u32 %v4665_v55, 16  ;;  %6508 = vst [vmem:[#allocation7_spill] sm:$0xff] %v4802_v29  ;;  %v416_v51 = vshrl.u32 %v4796_v27, 16  ;;  %v398_v43 = vshll.u32 %v4762_v60, 16  ;;  %v4828_v46 = vld [vmem:[%s4518_s22 + $0x94] sm:$0xf] }
  0x32   : > { %2033 = vmatprep.subr.bf16.mxu0 %v4212_v11  ;;  %4150 = vmatprep.subr.bf16.mxu1 %v4212_v11  ;;  %v560_v11 = vshrl.u32 %v4665_v55, 16  ;;  %v371_v53 = vor.u32 %v370_v28, %v4712_v23  ;;  %6506 = vst [vmem:[#allocation5_spill] sm:$0xff] %v4784_v17  ;;  %v4816_v55 = vld [vmem:[%s4518_s22 + $0x90] sm:$0xf]  ;;  %v4846_v14 = vrot.slane %v403_v35, 4 }
  0x33   : > { %v4879_v35 = vrot.slane %v398_v43, 5  ;;  %v4252_v43 = vld [vmem:[%s6457_s1 + $0x140] ss:$8 sps:$4 sm:$0xff]  }
  0x34   : > { %v4798_v28 = vrot.slane %v371_v53, 4 }
  0x35   : > { %2034 = vmatpush2.bf16.msra.mxu0 %v4214_v12  ;;  %4166 = vmatpush2.bf16.msra.mxu1 %v4214_v12  ;;  %v4226_v12 = vld [vmem:[%s6457_s1 + $0x90] ss:$8 sps:$4 sm:$0xff]  }
  0x36   : > { %2035 = vmatprep.subr.bf16.mxu0 %v4215_v22  ;;  %4151 = vmatprep.subr.bf16.mxu1 %v4215_v22  ;;  %v4710_v22 = vcombine.low %v4621_v13, %v4626_v20  ;;  %v4729_v13 = vrot.slane %v556_v9, 5  ;;  %v562_v20 = vrot.slane %v560_v11, 4  ;;  %v4776_v9 = vrot.slane %v571_v40, 4  ;;  %v4241_v40 = vld [vmem:[%s6457_s1 + $0x260] ss:$8 sps:$4 sm:$0xff]  }
  0x37   : > { %v576_v11 = vrot.slane %v574_v41, 5  ;;  %v554_v41 = vrot.slane %v553_v57, 4  ;;  %v598_v57 = vshll.u32 %v4816_v55, 16 }
  0x38   : > { %6505 = vst [vmem:[#allocation4_spill] sm:$0xff] %v4710_v22  ;;  %v563_v59 = vor.u32 %v562_v20, %v4729_v13  ;;  %v406_v20 = vshll.u32 %v4793_v25, 16 }
  0x39   : > { %2036 = vmatpush2.bf16.msra.mxu0 %v4217_v33  ;;  %4167 = vmatpush2.bf16.msra.mxu1 %v4217_v33  ;;  %v4727_v33 = vld [vmem:[%s4518_s22 + $0x88] sm:$0xf] }
  0x3a   : > { %2037 = vmatprep.subr.bf16.mxu0 %v4218_v34  ;;  %4152 = vmatprep.subr.bf16.mxu1 %v4218_v34  ;;  %v379_v34 = vshrl.u32 %v4701_v21, 16  ;;  %v580_v48 = vshll.u32 %v4727_v33, 16  ;;  %v584_v49 = vshrl.u32 %v4727_v33, 16  ;;  %v408_v15 = vrot.slane %v406_v20, 5 }
  0x3c   : > { %v4764_v61 = vrot.slane %v379_v34, 4  ;;  %v586_v24 = vrot.slane %v584_v49, 4  ;;  %v367_v34 = vsel %vm4570_vm5, %v4750_v52, %v4712_v23  ;;  %v4251_v49 = vld [vmem:[%s6457_s1 + $0x254] ss:$8 sps:$4 sm:$0xff]   ;;  %v577_v52 = vor.u32 %v576_v11, %v4776_v9 }
  0x3d   : > { %2038 = vmatpush2.bf16.msra.mxu0 %v4220_v36  ;;  %4168 = vmatpush2.bf16.msra.mxu1 %v4220_v36  ;;  %v382_v36 = vshll.u32 %v4701_v21, 16  ;;  %v377_v9 = vsel %vm4570_vm5, %v4798_v28, %v4753_v54  ;;  %v559_v11 = vsel %vm4570_vm5, %v554_v41, %v4729_v13  ;;  %v409_v41 = vor.u32 %v408_v15, %v4846_v14 }
  0x3e   : > { %2039 = vmatprep.subr.bf16.mxu0 %v4221_v50  ;;  %4153 = vmatprep.subr.bf16.mxu1 %v4221_v50  ;;  %v4234_v50 = vld [vmem:[%s6457_s1 + $0x174] ss:$8 sps:$4 sm:$0xff]   ;;  %v4881_v54 = vrot.slane %v577_v52, 4 }
  0x3f   : > { %v4766_v0 = vrot.slane %v382_v36, 5  ;;  %v4811_v36 = vrot.slane %v566_v39, 5  ;;  %v590_v39 = vshll.u32 %v284_v30, 16 }
  0x41   : > { %2040 = vmatpush2.bf16.msra.mxu0 %v4223_v56  ;;  %4169 = vmatpush2.bf16.msra.mxu1 %v4223_v56  ;;  %v4237_v56 = vld [vmem:[%s6457_s1 + $0x274] ss:$8 sps:$4 sm:$0xff]   ;;  %v385_v23 = vor.u32 %v4766_v0, %v4764_v61  ;;  %v418_v61 = vrot.slane %v416_v51, 4  ;;  %v604_v0 = vshll.u32 %v4828_v46, 16  ;;  %v4883_v28 = vrot.slane %v590_v39, 5 }
  0x42   : > { %2041 = vmatprep.subr.bf16.mxu0 %v4224_v6  ;;  %4154 = vmatprep.subr.bf16.mxu1 %v4224_v6  ;;  %v394_v6 = vrot.slane %v392_v38, 4  ;;  %v4238_v38 = vld [vmem:[%s6457_s1 + $0x160] ss:$8 sps:$4 sm:$0xff]   ;;  %v4257_v51 = vld [vmem:[%s6457_s1 + $0x244] ss:$8 sps:$4 sm:$0xff]  }
  0x43   : > { %v4916_v39 = vld [vmem:[%s4518_s22 + $0x40] sm:$0xf] }
  0x45   : > { %2042 = vmatpush2.bf16.msra.mxu0 %v4226_v12  ;;  %4170 = vmatpush2.bf16.msra.mxu1 %v4226_v12  ;;  %v4240_v12 = vld [vmem:[%s6457_s1 + $0x164] ss:$8 sps:$4 sm:$0xff]  }
  0x46   : > { %2043 = vmatprep.subr.bf16.mxu0 %v4227_v26  ;;  %4155 = vmatprep.subr.bf16.mxu1 %v4227_v26  ;;  %v4790_v26 = vrot.slane %v580_v48, 5  ;;  %v4248_v48 = vld [vmem:[%s6457_s1 + $0x154] ss:$8 sps:$4 sm:$0xff]  }
  0x48   : > { %v587_v53 = vor.u32 %v586_v24, %v4790_v26  ;;  %v4254_v24 = vld [vmem:[%s6457_s1 + $0x144] ss:$8 sps:$4 sm:$0xff]  }
  0x49   : > { %2044 = vmatpush2.bf16.msra.mxu0 %v4229_v42  ;;  %4171 = vmatpush2.bf16.msra.mxu1 %v4229_v42  ;;  %v564_v42 = vrot.slane %v563_v59, 4  ;;  %v4850_v59 = vrot.slane %v412_v37, 5  ;;  %v600_v37 = vrot.slane %v598_v57, 5  ;;  %v440_v57 = vshrl.u32 %v4916_v39, 16 }
  0x4a   : > { %2206 = vmatprep.subr.bf16.mxu1 %v4234_v50  ;;  %2399 = vmatprep.subr.bf16.mxu0 %v4237_v56  ;;  %v395_v50 = vor.u32 %v394_v6, %v4774_v5  ;;  %v4844_v56 = vld [vmem:[%s4518_s22 + $0x38] sm:$0x1]  ;;  %v608_v6 = vshrl.u32 %v4828_v46, 16  ;;  %v588_v13 = vrot.slane %v587_v53, 4 }
  0x4b   : > { %6509 = vst [vmem:[#allocation8_spill] sm:$0xff] %v4844_v56  ;;  %v422_v20 = vshll.u32 %v4844_v56, 16  ;;  %v4913_v53 = vld [vmem:[%s4518_s22 + $0x98] sm:$0x1] }
  0x4c   : > { %2046 = vmatmul.mubr.bf16.vlgmr.msra.gmra.mxu0 %v3620_v7  ;;  %2126 = vmatmul.mubr.bf16.vlgmr.msra.gmra.mxu1 %v4689_v8  ;;  %v595_v7 = vshrl.u32 %v4816_v55, 16  ;;  %v4877_v30 = vrot.slane %v395_v50, 4 }
  0x4d   : > { %2207 = vmatpush1.bf16.msra.mxu1 %v4232_v3  ;;  %2400 = vmatpush1.bf16.msra.mxu0 %v4235_v4  ;;  %v4246_v3 = vld [vmem:[%s6457_s1 + $0x150] ss:$8 sps:$4 sm:$0xff]  }
  0x4e   : > { %2208 = vmatprep.subr.bf16.mxu1 %v4240_v12  ;;  %2401 = vmatprep.subr.bf16.mxu0 %v4243_v16  ;;  %v4249_v4 = vld [vmem:[%s6457_s1 + $0x250] ss:$8 sps:$4 sm:$0xff]   ;;  %v569_v12 = vsel %vm4570_vm5, %v564_v42, %v4811_v36  ;;  %v4872_v16 = vrot.slane %v385_v23, 4  ;;  %v597_v36 = vrot.slane %v595_v7, 4  ;;  %v419_v42 = vor.u32 %v418_v61, %v4850_v59  ;;  %v4932_v61 = vld [vmem:[%s4518_s22 + $0x9c] sm:$0xf] }
  0x4f   : > { %2055 = vmatprep.mubr.bf16.mxu0 %v4706_v32  ;;  %2135 = vmatprep.mubr.bf16.mxu1 %v4784_v17  ;;  %v4891_v23 = vrot.slane %v604_v0, 5  ;;  %v4906_v50 = vcombine.low %v559_v11, %v569_v12  ;;  %v436_v7 = vshll.u32 %v4916_v39, 16  ;;  %v4265_v0 = vld [vmem:[%s6457_s1 + $0x234] ss:$8 sps:$4 sm:$0xff]   ;;  %v424_v11 = vrot.slane %v422_v20, 5 }
  0x50   : > { %v391_v52 = vsel %vm4570_vm5, %v4872_v16, %v4774_v5  ;;  %v401_v5 = vsel %vm4570_vm5, %v4877_v30, %v4879_v35  ;;  %v601_v12 = vor.u32 %v600_v37, %v597_v36  ;;  %v4945_v16 = vld [vmem:[%s4518_s22 + $0xa0] sm:$0xf]  ;;  %v614_v35 = vshll.u32 %v4913_v53, 16  ;;  %v4961_v36 = vld [vmem:[%s4518_s22 + $0x44] sm:$0x1] }
  0x51   : > { %2209 = vmatpush1.bf16.msra.mxu1 %v4238_v38  ;;  %2402 = vmatpush1.bf16.msra.mxu0 %v4241_v40  ;;  %v4893_v38 = vrot.slane %v608_v6, 4  ;;  %v4896_v40 = vld [vmem:[%s4518_s22 + $0x3c] sm:$0xf]  ;;  %6511 = vst [vmem:[#allocation10_spill] sm:$0xff] %v4906_v50  ;;  %v583_v6 = vsel %vm4570_vm5, %v4881_v54, %v4790_v26  ;;  %v4260_v26 = vld [vmem:[%s6457_s1 + $0x130] ss:$8 sps:$4 sm:$0xff]  }
  0x52   : > { %2210 = vmatprep.subr.bf16.mxu1 %v4248_v48  ;;  %2403 = vmatprep.subr.bf16.mxu0 %v4251_v49  ;;  %v4255_v48 = vld [vmem:[%s6457_s1 + $0x240] ss:$8 sps:$4 sm:$0xff]   ;;  %v4904_v49 = vcombine.low %v367_v34, %v377_v9  ;;  %v427_v14 = vshrl.u32 %v4896_v40, 16  ;;  %v4262_v34 = vld [vmem:[%s6457_s1 + $0x134] ss:$8 sps:$4 sm:$0xff]   ;;  %v430_v15 = vshll.u32 %v4896_v40, 16  ;;  %v593_v9 = vsel %vm4570_vm5, %v588_v13, %v4883_v28 }
  0x53   : > { %v611_v30 = vor.u32 %v4893_v38, %v4891_v23  ;;  %v619_v13 = vshrl.u32 %v4932_v61, 16  ;;  %v622_v20 = vshll.u32 %v4932_v61, 16  ;;  %6512 = vst [vmem:[#allocation11_spill] sm:$0xff] %v4961_v36  ;;  %v4963_v37 = vrot.slane %v436_v7, 5  ;;  %v4268_v38 = vld [vmem:[%s6457_s1 + $0x124] ss:$8 sps:$4 sm:$0xff]  }
  0x54   : > { %6510 = vst [vmem:[#allocation9_spill] sm:$0xff] %v4904_v49  ;;  %2056 = vmatmul.mubr.bf16.gmra.mxu0 %v4698_v19  ;;  %2136 = vmatmul.mubr.bf16.gmra.mxu1 %v4710_v22  ;;  %v429_v54 = vrot.slane %v427_v14, 4  ;;  %v432_v28 = vrot.slane %v430_v15, 5  ;;  %v4271_v14 = vld [vmem:[%s6457_s1 + $0x224] ss:$8 sps:$4 sm:$0xff]   ;;  %v4973_v15 = vcombine.low %v391_v52, %v401_v5  ;;  %v4975_v63 = vcombine.low %v583_v6, %v593_v9 }
  0x55   : > { %2211 = vmatpush1.bf16.msra.mxu1 %v4246_v3  ;;  %2404 = vmatpush1.bf16.msra.mxu0 %v4249_v4  ;;  %v410_v3 = vrot.slane %v409_v41, 4  ;;  %v420_v4 = vrot.slane %v419_v42, 4  ;;  %v628_v41 = vshll.u32 %v4945_v16, 16  ;;  %v632_v42 = vshrl.u32 %v4945_v16, 16  ;;  %v4266_v52 = vld [vmem:[%s6457_s1 + $0x120] ss:$8 sps:$4 sm:$0xff]  }
  0x56   : > { %2212 = vmatprep.subr.bf16.mxu1 %v4254_v24  ;;  %2405 = vmatprep.subr.bf16.mxu0 %v4257_v51  ;;  %v4263_v24 = vld [vmem:[%s6457_s1 + $0x230] ss:$8 sps:$4 sm:$0xff]   ;;  %v442_v51 = vrot.slane %v440_v57, 4  ;;  %6513 = vst [vmem:[#allocation12_spill] sm:$0xff] %v4973_v15  ;;  %6514 = vst [vmem:[#allocation13_spill] sm:$0xff] %v4975_v63  ;;  %v4977_v7 = vrot.slane %v601_v12, 4  ;;  %v433_v5 = vor.u32 %v432_v28, %v429_v54 }
  0x57   : > { %2065 = vmatprep.mubr.bf16.mxu0 %v4904_v49  ;;  %2145 = vmatprep.mubr.bf16.mxu1 %v4906_v50  ;;  %v4985_v57 = vld [vmem:[%s4518_s22 + $0xa4] sm:$0x1]  ;;  %v621_v50 = vrot.slane %v619_v13, 4  ;;  %v624_v17 = vrot.slane %v622_v20, 5  ;;  %v634_v6 = vrot.slane %v632_v42, 4  ;;  %v5000_v9 = vcombine.low %v4701_v21, %v4719_v1 }
  0x58   : > { %v612_v12 = vrot.slane %v611_v30, 4  ;;  %v5007_v54 = vld [vmem:[%s4518_s22 + $0x48] sm:$0xf]  ;;  %v5011_v28 = vcombine.low %v4722_v2, %v4727_v33  ;;  %v4279_v13 = vld [vmem:[%s6457_s1 + $0x214] ss:$8 sps:$4 sm:$0xff]   ;;  %v638_v30 = vshll.u32 %v4985_v57, 16 }
  0x59   : > { %2213 = vmatpush1.bf16.msra.mxu1 %v4252_v43  ;;  %2406 = vmatpush1.bf16.msra.mxu0 %v4255_v48  ;;  %v415_v43 = vsel %vm4570_vm5, %v410_v3, %v4850_v59  ;;  %v425_v48 = vsel %vm4570_vm5, %v420_v4, %v424_v11  ;;  %v4994_v59 = vrot.slane %v628_v41, 5  ;;  %6515 = vst [vmem:[#allocation14_spill] sm:$0xff] %v5000_v9  ;;  %v4276_v11 = vld [vmem:[%s6457_s1 + $0x114] ss:$8 sps:$4 sm:$0xff]   ;;  %v616_v3 = vrot.slane %v614_v35, 5 }
  0x5a   : > { %2214 = vmatprep.subr.bf16.mxu1 %v4262_v34  ;;  %2407 = vmatprep.subr.bf16.mxu0 %v4265_v0  ;;  %v4269_v34 = vld [vmem:[%s6457_s1 + $0x220] ss:$8 sps:$4 sm:$0xff]   ;;  %v446_v0 = vshll.u32 %v4961_v36, 16  ;;  %v443_v4 = vor.u32 %v442_v51, %v4963_v37  ;;  %6516 = vst [vmem:[#allocation15_spill] sm:$0xff] %v5011_v28  ;;  %v5016_v20 = vcombine.low %v415_v43, %v425_v48  ;;  %v5020_v35 = vld [vmem:[%s4518_s22 + $0x4c] sm:$0xf] }
  0x5b   : > { %v451_v51 = vshrl.u32 %v5007_v54, 16  ;;  %v460_v2 = vshll.u32 %v5020_v35, 16  ;;  %v464_v33 = vshrl.u32 %v5020_v35, 16  ;;  %v5027_v41 = vld [vmem:[%s4518_s22 + $0xa8] sm:$0xf]  ;;  %v635_v43 = vor.u32 %v634_v6, %v4994_v59 }
  0x5c   : > { %2066 = vmatmul.mubr.bf16.gmra.mxu0 %v4788_v18  ;;  %2146 = vmatmul.mubr.bf16.gmra.mxu1 %v4802_v29  ;;  %6517 = vst [vmem:[#allocation16_spill] sm:$0xff] %v5016_v20  ;;  %v4274_v42 = vld [vmem:[%s6457_s1 + $0x110] ss:$8 sps:$4 sm:$0xff]   ;;  %v5047_v48 = vld [vmem:[%s4518_s22 + $0xac] sm:$0xf]  ;;  %v643_v10 = vshrl.u32 %v5027_v41, 16 }
  0x5d   : > { %2215 = vmatpush1.bf16.msra.mxu1 %v4260_v26  ;;  %2408 = vmatpush1.bf16.msra.mxu0 %v4263_v24  ;;  %v625_v26 = vor.u32 %v624_v17, %v621_v50  ;;  %v454_v24 = vshll.u32 %v5007_v54, 16  ;;  %v4277_v17 = vld [vmem:[%s6457_s1 + $0x210] ss:$8 sps:$4 sm:$0xff]   ;;  %v607_v50 = vsel %vm4570_vm5, %v4977_v7, %v4891_v23  ;;  %v4285_v29 = vld [vmem:[%s6457_s1 + $0x204] ss:$8 sps:$4 sm:$0xff]   ;;  %v617_v23 = vsel %vm4570_vm5, %v612_v12, %v616_v3 }
  0x5e   : > { %2216 = vmatprep.subr.bf16.mxu1 %v4268_v38  ;;  %2409 = vmatprep.subr.bf16.mxu0 %v4271_v14  ;;  %v5041_v38 = vrot.slane %v433_v5, 4  ;;  %v5043_v14 = vrot.slane %v446_v0, 5  ;;  %v444_v7 = vrot.slane %v443_v4, 4  ;;  %v453_v5 = vrot.slane %v451_v51, 4  ;;  %v5062_v49 = vld [vmem:[%s4518_s22 + $0x50] sm:$0x1] }
  0x5f   : > { %2075 = vmatprep.mubr.bf16.mxu0 %v4973_v15  ;;  %2155 = vmatprep.mubr.bf16.mxu1 %v4975_v63  ;;  %v4282_v63 = vld [vmem:[%s6457_s1 + $0x104] ss:$8 sps:$4 sm:$0xff]   ;;  %v456_v0 = vrot.slane %v454_v24, 5  ;;  %v5057_v6 = vrot.slane %v460_v2, 5  ;;  %v466_v22 = vrot.slane %v464_v33, 4  ;;  %v646_v8 = vshll.u32 %v5027_v41, 16 }
  0x60   : > { %v626_v15 = vrot.slane %v625_v26, 4  ;;  %v640_v36 = vrot.slane %v638_v30, 5  ;;  %6518 = vst [vmem:[#allocation17_spill] sm:$0xff] %v5062_v49  ;;  %v652_v12 = vshll.u32 %v5047_v48, 16  ;;  %v656_v3 = vshrl.u32 %v5047_v48, 16 }
  0x61   : > { %2217 = vmatpush1.bf16.msra.mxu1 %v4266_v52  ;;  %2410 = vmatpush1.bf16.msra.mxu0 %v4269_v34  ;;  %v5066_v4 = vcombine.low %v607_v50, %v617_v23  ;;  %v636_v52 = vrot.slane %v635_v43, 4  ;;  %v5069_v34 = vld [vmem:[%s4518_s22 + $0xb0] sm:$0x1]  ;;  %v645_v51 = vrot.slane %v643_v10, 4  ;;  %v648_v24 = vrot.slane %v646_v8, 5 }
  0x62   : > { %2218 = vmatprep.subr.bf16.mxu1 %v4276_v11  ;;  %2411 = vmatprep.subr.bf16.mxu0 %v4279_v13  ;;  %v4280_v11 = vld [vmem:[%s6457_s1 + $0x100] ss:$8 sps:$4 sm:$0xff]   ;;  %v5076_v13 = vrot.slane %v652_v12, 5  ;;  %v658_v30 = vrot.slane %v656_v3, 4  ;;  %v4290_v10 = vld [vmem:[%s6457_s1 + $0x1f4] ss:$8 sps:$4 sm:$0xff]   ;;  %v439_v8 = vsel %vm4570_vm5, %v5041_v38, %v4963_v37  ;;  %v457_v2 = vor.u32 %v456_v0, %v453_v5 }
  0x63   : > { %6519 = vst [vmem:[#allocation18_spill] sm:$0xff] %v5066_v4  ;;  %v4283_v26 = vld [vmem:[%s6457_s1 + $0x200] ss:$8 sps:$4 sm:$0xff]   ;;  %v467_v33 = vor.u32 %v466_v22, %v5057_v6  ;;  %v470_v50 = vshll.u32 %v5062_v49, 16  ;;  %v649_v43 = vor.u32 %v648_v24, %v645_v51  ;;  %v662_v37 = vshll.u32 %v5069_v34, 16 }
  0x64   : > { %2076 = vmatmul.mubr.bf16.gmra.mxu0 %v5000_v9  ;;  %2156 = vmatmul.mubr.bf16.gmra.mxu1 %v5011_v28  ;;  %v659_v23 = vor.u32 %v658_v30, %v5076_v13  ;;  %v5099_v38 = vld [vmem:[%s4518_s22 + $0x54] sm:$0xf]  ;;  %v4288_v22 = vld [vmem:[%s6457_s1 + $0x1f0] ss:$8 sps:$4 sm:$0xff]   ;;  %v5124_v12 = vcombine.low %v4816_v55, %v4828_v46  ;;  %v4296_v3 = vld [vmem:[%s6457_s1 + $0x1e4] ss:$8 sps:$4 sm:$0xff]  }
  0x65   : > { %2219 = vmatpush1.bf16.msra.mxu1 %v4274_v42  ;;  %2412 = vmatpush1.bf16.msra.mxu0 %v4277_v17  ;;  %v4293_v42 = vld [vmem:[%s6457_s1 + $0x2f4] ss:$8 sps:$4 sm:$0xff]   ;;  %v449_v17 = vsel %vm4570_vm5, %v444_v7, %v5043_v14  ;;  %v631_v14 = vsel %vm4570_vm5, %v626_v15, %v4994_v59  ;;  %v641_v7 = vsel %vm4570_vm5, %v636_v52, %v640_v36  ;;  %v5119_v5 = vld [vmem:[%s4518_s22 + $0x58] sm:$0xf]  ;;  %v475_v0 = vshrl.u32 %v5099_v38, 16 }
  0x66   : > { %2220 = vmatprep.subr.bf16.mxu1 %v4282_v63  ;;  %2413 = vmatprep.subr.bf16.mxu0 %v4285_v29  ;;  %v5105_v63 = vcombine.low %v4793_v25, %v4796_v27  ;;  %v4291_v29 = vld [vmem:[%s6457_s1 + $0x2f0] ss:$8 sps:$4 sm:$0xff]   ;;  %6521 = vst [vmem:[#allocation20_spill] sm:$0xff] %v5124_v12  ;;  %v4299_v15 = vld [vmem:[%s6457_s1 + $0x2e4] ss:$8 sps:$4 sm:$0xff]   ;;  %v478_v59 = vshll.u32 %v5099_v38, 16  ;;  %v5138_v24 = vcombine.low %v439_v8, %v449_v17 }
  0x67   : > { %2085 = vmatprep.mubr.bf16.mxu0 %v5016_v20  ;;  %2165 = vmatprep.mubr.bf16.mxu1 %v5066_v4  ;;  %v484_v36 = vshll.u32 %v5119_v5, 16  ;;  %v488_v52 = vshrl.u32 %v5119_v5, 16  ;;  %v5136_v51 = vld [vmem:[%s4518_s22 + $0xb4] sm:$0xf]  ;;  %v458_v30 = vrot.slane %v457_v2, 4  ;;  %v468_v4 = vrot.slane %v467_v33, 4 }
  0x68   : > { %6520 = vst [vmem:[#allocation19_spill] sm:$0xff] %v5105_v63  ;;  %v472_v28 = vrot.slane %v470_v50, 5  ;;  %v5141_v20 = vld [vmem:[%s4518_s22 + $0xb8] sm:$0xf]  ;;  %v5143_v49 = vcombine.low %v631_v14, %v641_v7  ;;  %v650_v9 = vrot.slane %v649_v43, 4  ;;  %v660_v56 = vrot.slane %v659_v23, 4 }
  0x69   : > { %2221 = vmatpush1.bf16.msra.mxu1 %v4280_v11  ;;  %2414 = vmatpush1.bf16.msra.mxu0 %v4283_v26  ;;  %v664_v25 = vrot.slane %v662_v37, 5  ;;  %v4294_v11 = vld [vmem:[%s6457_s1 + $0x1e0] ss:$8 sps:$4 sm:$0xff]   ;;  %v477_v8 = vrot.slane %v475_v0, 4  ;;  %v480_v2 = vrot.slane %v478_v59, 5  ;;  %v667_v33 = vshrl.u32 %v5136_v51, 16 }
  0x6a   : > { %2222 = vmatprep.subr.bf16.mxu1 %v4290_v10  ;;  %2415 = vmatprep.subr.bf16.mxu0 %v4293_v42  ;;  %v4297_v26 = vld [vmem:[%s6457_s1 + $0x2e0] ss:$8 sps:$4 sm:$0xff]   ;;  %v670_v10 = vshll.u32 %v5136_v51, 16  ;;  %v4304_v50 = vld [vmem:[%s6457_s1 + $0x1d4] ss:$8 sps:$4 sm:$0xff]   ;;  %v5161_v17 = vrot.slane %v484_v36, 5  ;;  %v5167_v14 = vcombine.low %v4896_v40, %v4916_v39  ;;  %v5171_v7 = vcombine.low %v4932_v61, %v4945_v16 }
  0x6b   : > { %v5159_v42 = vld [vmem:[%s4518_s22 + $0x5c] sm:$0x1]  ;;  %v490_v43 = vrot.slane %v488_v52, 4  ;;  %v676_v23 = vshll.u32 %v5141_v20, 16  ;;  %v680_v37 = vshrl.u32 %v5141_v20, 16  ;;  %v669_v59 = vrot.slane %v667_v33, 4 }
  0x6c   : > { %2086 = vmatmul.mubr.bf16.gmra.mxu0 %v5105_v63  ;;  %2166 = vmatmul.mubr.bf16.gmra.mxu1 %v5124_v12  ;;  %v5174_v0 = vld [vmem:[%s4518_s22 + $0xbc] sm:$0x1]  ;;  %v672_v36 = vrot.slane %v670_v10, 5  ;;  %v481_v33 = vor.u32 %v480_v2, %v477_v8  ;;  %v494_v10 = vshll.u32 %v5159_v42, 16  ;;  %v4311_v2 = vld [vmem:[%s6457_s1 + $0x2c0] ss:$8 sps:$4 sm:$0xff]  }
  0x6d   : > { %2223 = vmatpush2.bf16.msra.mxu1 %v4288_v22  ;;  %2416 = vmatpush2.bf16.msra.mxu0 %v4291_v29  ;;  %v4307_v52 = vld [vmem:[%s6457_s1 + $0x2d4] ss:$8 sps:$4 sm:$0xff]   ;;  %v463_v22 = vsel %vm4570_vm5, %v458_v30, %v5057_v6  ;;  %v473_v29 = vsel %vm4570_vm5, %v468_v4, %v472_v28  ;;  %v678_v12 = vrot.slane %v676_v23, 5  ;;  %v682_v63 = vrot.slane %v680_v37, 4  ;;  %v4302_v28 = vld [vmem:[%s6457_s1 + $0x1d0] ss:$8 sps:$4 sm:$0xff]  }
  0x6e   : > { %2224 = vmatprep.subr.bf16.mxu1 %v4296_v3  ;;  %2417 = vmatprep.subr.bf16.mxu0 %v4299_v15  ;;  %v655_v3 = vsel %vm4570_vm5, %v650_v9, %v5076_v13  ;;  %v665_v15 = vsel %vm4570_vm5, %v660_v56, %v664_v25  ;;  %v491_v6 = vor.u32 %v490_v43, %v5161_v17  ;;  %v686_v23 = vshll.u32 %v5174_v0, 16  ;;  %v4305_v9 = vld [vmem:[%s6457_s1 + $0x2d0] ss:$8 sps:$4 sm:$0xff]   ;;  %v4310_v25 = vld [vmem:[%s6457_s1 + $0x1c4] ss:$8 sps:$4 sm:$0xff]  }
  0x6f   : > { %2095 = vmatprep.mubr.bf16.mxu0 %v5138_v24  ;;  %2175 = vmatprep.mubr.bf16.mxu1 %v5143_v49  ;;  %v673_v4 = vor.u32 %v672_v36, %v669_v59  ;;  %v683_v30 = vor.u32 %v682_v63, %v678_v12  ;;  %v4313_v56 = vld [vmem:[%s6457_s1 + $0x2c4] ss:$8 sps:$4 sm:$0xff]   ;;  %v4308_v13 = vld [vmem:[%s6457_s1 + $0x1c0] ss:$8 sps:$4 sm:$0xff]   ;;  %v5209_v63 = vcombine.low %v463_v22, %v473_v29  ;;  %v496_v8 = vrot.slane %v494_v10, 5 }
  0x70   : > { %v688_v59 = vrot.slane %v686_v23, 5  ;;  %v4318_v36 = vld [vmem:[%s6457_s1 + $0x1b4] ss:$8 sps:$4 sm:$0xff]   ;;  %v5228_v22 = vcombine.low %v5007_v54, %v5020_v35  ;;  %v5232_v29 = vcombine.low %v5027_v41, %v5047_v48  ;;  %v4319_v10 = vld [vmem:[%s6457_s1 + $0x2b0] ss:$8 sps:$4 sm:$0xff]  }
  0x71   : > { %2225 = vmatpush2.bf16.msra.mxu1 %v4294_v11  ;;  %2418 = vmatpush2.bf16.msra.mxu0 %v4297_v26  ;;  %v5211_v11 = vcombine.low %v655_v3, %v665_v15  ;;  %v482_v26 = vrot.slane %v481_v33, 4  ;;  %v674_v43 = vrot.slane %v673_v4, 4  ;;  %v684_v37 = vrot.slane %v683_v30, 4  ;;  %v4416_v3 = vld [vmem:[%s4518_s22 + $0x10] sm:$0xf] }
  0x72   : > { %2226 = vmatprep.subr.bf16.mxu1 %v4304_v50  ;;  %2419 = vmatprep.subr.bf16.mxu0 %v4307_v52  ;;  %v492_v50 = vrot.slane %v491_v6, 4  ;;  %v4321_v52 = vld [vmem:[%s6457_s1 + $0x2b4] ss:$8 sps:$4 sm:$0xff]   ;;  %6522 = vst [vmem:[#allocation21_spill] sm:$0xff] %v5232_v29  ;;  %v750_v15 = vrot.slane %v4416_v3, 5 }
  0x73   : > { %v4316_v33 = vld [vmem:[%s6457_s1 + $0x1b0] ss:$8 sps:$4 sm:$0xff]   ;;  %v679_v4 = vsel %vm4570_vm5, %v674_v43, %v678_v12  ;;  %v689_v30 = vsel %vm4570_vm5, %v684_v37, %v688_v59  ;;  %v4324_v23 = vld [vmem:[%s6457_s1 + $0x1a4] ss:$8 sps:$4 sm:$0xff]   ;;  %v4332_v43 = vld [vmem:[%s6457_s1 + $0x194] ss:$8 sps:$4 sm:$0xff]  }
  0x74   : > { %2096 = vmatmul.mubr.bf16.gmra.mxu0 %v5167_v14  ;;  %2176 = vmatmul.mubr.bf16.gmra.mxu1 %v5171_v7  ;;  %v497_v6 = vsel %vm4570_vm5, %v492_v50, %v496_v8  ;;  %v4417_v12 = vld [vmem:[%s4518_s22 + $0xc] sm:$0xf]  ;;  %v4418_v8 = vld [vmem:[%s4518_s22 + $0x14] sm:$0x1]  ;;  %v4325_v50 = vld [vmem:[%s6457_s1 + $0x2a0] ss:$8 sps:$4 sm:$0xff]  }
  0x75   : > { %2227 = vmatpush2.bf16.msra.mxu1 %v4302_v28  ;;  %2420 = vmatpush2.bf16.msra.mxu0 %v4305_v9  ;;  %v487_v28 = vsel %vm4570_vm5, %v482_v26, %v5161_v17  ;;  %v4327_v17 = vld [vmem:[%s6457_s1 + $0x2a4] ss:$8 sps:$4 sm:$0xff]   ;;  %v752_v26 = vrot.slane %v750_v15, 4  ;;  %v4335_v37 = vld [vmem:[%s6457_s1 + $0x294] ss:$8 sps:$4 sm:$0xff]   ;;  %v757_v59 = vrot.slane %v4653_v47, 5 }
  0x76   : > { %2228 = vmatprep.subr.bf16.mxu1 %v4310_v25  ;;  %2421 = vmatprep.subr.bf16.mxu0 %v4313_v56  ;;  %v5256_v9 = vcombine.low %v487_v28, %v497_v6  ;;  %v5258_v25 = vcombine.low %v679_v4, %v689_v30  ;;  %v3603_v56 = vrot.slane %v4417_v12, 9  ;;  %v4330_v47 = vld [vmem:[%s6457_s1 + $0x190] ss:$8 sps:$4 sm:$0xff]   ;;  %v4338_v28 = vld [vmem:[%s6457_s1 + $0x184] ss:$8 sps:$4 sm:$0xff]  }
  0x77   : > { %2105 = vmatprep.mubr.bf16.mxu0 %v5209_v63  ;;  %2185 = vmatprep.mubr.bf16.mxu1 %v5211_v11  ;;  %v4419_v4 = vld [vmem:[%s4518_s22 + $0x18] sm:$0xf]  ;;  %v4336_v12 = vld [vmem:[%s6457_s1 + $0x180] ss:$8 sps:$4 sm:$0xff]  }
  0x78   : > { %v751_v3 = vsel %vm4550_vm4, %v3603_v56, %v750_v15  ;;  %v4341_v15 = vld [vmem:[%s6457_s1 + $0x284] ss:$8 sps:$4 sm:$0xff]   ;;  %v3604_v30 = vrot.slane %v4419_v4, 9  ;;  %v4339_v56 = vld [vmem:[%s6457_s1 + $0x280] ss:$8 sps:$4 sm:$0xff]  }
  0x79   : > { %2229 = vmatpush2.bf16.msra.mxu1 %v4308_v13  ;;  %2422 = vmatpush2.bf16.msra.mxu0 %v4311_v2  ;;  %v4322_v13 = vld [vmem:[%s6457_s1 + $0x1a0] ss:$8 sps:$4 sm:$0xff]   ;;  %v753_v2 = vrot.slane %v4418_v8, 5 }
  0x7a   : > { %2230 = vmatprep.subr.bf16.mxu1 %v4318_v36  ;;  %2423 = vmatprep.subr.bf16.mxu0 %v4321_v52  ;;  %v5281_v36 = vcombine.low %v5099_v38, %v5119_v5  ;;  %v5285_v52 = vcombine.low %v5136_v51, %v5141_v20  ;;  %v758_v8 = vsel %vm4550_vm4, %v3604_v30, %v757_v59  ;;  %v4354_v4 = vld [vmem:[%s6457_s1 + $0x460] ss:$8 sps:$4 sm:$0xff]   ;;  %v771_v30 = vrot.slane %v4796_v27, 5 }
  0x7c   : > { %2106 = vmatmul.mubr.bf16.gmra.mxu0 %v5228_v22  ;;  %2186 = vmatmul.mubr.bf16.gmra.mxu1 %v5232_v29 }
  0x7d   : > { %2231 = vmatpush2.bf16.msra.mxu1 %v4316_v33  ;;  %2424 = vmatpush2.bf16.msra.mxu0 %v4319_v10  ;;  %v754_v33 = vsel %vm4550_vm4, %v752_v26, %v753_v2  ;;  %v4333_v10 = vld [vmem:[%s6457_s1 + $0x290] ss:$8 sps:$4 sm:$0xff]   ;;  %v4347_v26 = vld [vmem:[%s6457_s1 + $0x474] ss:$8 sps:$4 sm:$0xff]  }
  0x7e   : > { %2232 = vmatprep.subr.bf16.mxu1 %v4324_v23  ;;  %2425 = vmatprep.subr.bf16.mxu0 %v4327_v17  ;;  %v5303_v6 = vcombine.low %v751_v3, %v754_v33  ;;  %v759_v23 = vrot.slane %v757_v59, 4  ;;  %v760_v17 = vrot.slane %v4678_v62, 5  ;;  %v764_v62 = vrot.slane %v4719_v1, 5 }
  0x7f   : > { %2115 = vmatprep.mubr.bf16.mxu0 %v5256_v9  ;;  %2195 = vmatprep.mubr.bf16.mxu1 %v5258_v25  ;;  %v3614_v1 = vrot.slane %v4816_v55, 9  ;;  %v767_v3 = vrot.slane %v4762_v60, 5  ;;  %v830_v33 = vrot.slane %v4913_v53, 5  ;;  %v4350_v60 = vld [vmem:[%s6457_s1 + $0x364] ss:$8 sps:$4 sm:$0xff]  }
  0x80   : > { %v761_v2 = vsel %vm4550_vm4, %v759_v23, %v760_v17  ;;  %v766_v59 = vrot.slane %v764_v62, 4 }
  0x81   : > { %2233 = vmatpush2.bf16.msra.mxu1 %v4322_v13  ;;  %2426 = vmatpush2.bf16.msra.mxu0 %v4325_v50  ;;  %v4344_v13 = vld [vmem:[%s6457_s1 + $0x374] ss:$8 sps:$4 sm:$0xff]   ;;  %v3605_v50 = vrot.slane %v4701_v21, 9  ;;  %v3615_v21 = vrot.slane %v4932_v61, 9  ;;  %v5340_v55 = vcombine.low %v758_v8, %v761_v2  ;;  %v4356_v61 = vld [vmem:[%s6457_s1 + $0x464] ss:$8 sps:$4 sm:$0xff]  }
  0x82   : > { %2234 = vmatprep.subr.bf16.mxu1 %v4332_v43  ;;  %2427 = vmatprep.subr.bf16.mxu0 %v4335_v37  ;;  %v4342_v43 = vld [vmem:[%s6457_s1 + $0x370] ss:$8 sps:$4 sm:$0xff]   ;;  %v827_v37 = vrot.slane %v4828_v46, 5  ;;  %v4348_v46 = vld [vmem:[%s6457_s1 + $0x360] ss:$8 sps:$4 sm:$0xff]   ;;  %v768_v27 = vsel %vm4550_vm4, %v766_v59, %v767_v3  ;;  %v851_v2 = vrot.slane %v5174_v0, 5 }
  0x83   : > { %v765_v53 = vsel %vm4550_vm4, %v3605_v50, %v764_v62  ;;  %v773_v59 = vrot.slane %v771_v30, 4  ;;  %v6525_v0 = vld [vmem:[#allocation8_spill] sm:$0xff] }
  0x84   : > { %2116 = vmatmul.mubr.bf16.gmra.mxu0 %v5281_v36  ;;  %2196 = vmatmul.mubr.bf16.gmra.mxu1 %v5285_v52  ;;  %v774_v3 = vrot.slane %v6525_v0, 5  ;;  %v4399_v0 = vld [vmem:[%s6457_s1 + $0x410] ss:$8 sps:$4 sm:$0xff]  }
  0x85   : > { %2235 = vmatpush2.bf16.msra.mxu1 %v4330_v47  ;;  %2428 = vmatpush2.bf16.msra.mxu0 %v4333_v10  ;;  %v828_v47 = vsel %vm4550_vm4, %v3614_v1, %v827_v37  ;;  %v829_v10 = vrot.slane %v827_v37, 4 }
  0x86   : > { %2236 = vmatprep.subr.bf16.mxu1 %v4338_v28  ;;  %2429 = vmatprep.subr.bf16.mxu0 %v4341_v15  ;;  %v834_v28 = vrot.slane %v4945_v16, 5  ;;  %v837_v15 = vrot.slane %v4985_v57, 5  ;;  %v6523_v16 = vcombine.low %v4584_v58, %v4576_v45  ;;  %v3616_v45 = vrot.slane %v5027_v41, 9 }
  0x87   : > { %2238 = vmatprep.mubr.bf16.mxu1 %v4698_v19  ;;  %2431 = vmatprep.mubr.bf16.mxu0 %v5303_v6  ;;  %v4345_v19 = vld [vmem:[%s6457_s1 + $0x470] ss:$8 sps:$4 sm:$0xff]   ;;  %v831_v23 = vsel %vm4550_vm4, %v829_v10, %v830_v33  ;;  %v841_v58 = vrot.slane %v5047_v48, 5  ;;  %v3617_v48 = vrot.slane %v5136_v51, 9  ;;  %v6524_v51 = vld [vmem:[#allocation6_spill] sm:$0xff] }
  0x88   : > { %v835_v17 = vsel %vm4550_vm4, %v3615_v21, %v834_v28  ;;  %v5369_v57 = vcombine.low %v828_v47, %v831_v23  ;;  %v4363_v33 = vld [vmem:[%s6457_s1 + $0x450] ss:$8 sps:$4 sm:$0xff]   ;;  %v4359_v10 = vld [vmem:[%s6457_s1 + $0x344] ss:$8 sps:$4 sm:$0xff]   ;;  %v4362_v23 = vld [vmem:[%s6457_s1 + $0x334] ss:$8 sps:$4 sm:$0xff]  }
  0x89   : > { %2237 = vmatpush2.bf16.msra.mxu1 %v4336_v12  ;;  %2430 = vmatpush2.bf16.msra.mxu0 %v4339_v56  ;;  %v836_v12 = vrot.slane %v834_v28, 4  ;;  %v4353_v56 = vld [vmem:[%s6457_s1 + $0x354] ss:$8 sps:$4 sm:$0xff]   ;;  %v843_v8 = vrot.slane %v841_v58, 4  ;;  %v4374_v28 = vld [vmem:[%s6457_s1 + $0x444] ss:$8 sps:$4 sm:$0xff]  }
  0x8a   : > { %2592 = vmatprep.subr.bf16.mxu1 %v4344_v13  ;;  %2785 = vmatprep.subr.bf16.mxu0 %v4347_v26  ;;  %v4365_v13 = vld [vmem:[%s6457_s1 + $0x454] ss:$8 sps:$4 sm:$0xff]   ;;  %v842_v26 = vsel %vm4550_vm4, %v3616_v45, %v841_v58  ;;  %v6528_v45 = vld [vmem:[#allocation11_spill] sm:$0xff] }
  0x8b   : > { %v838_v41 = vsel %vm4550_vm4, %v836_v12, %v837_v15  ;;  %v775_v15 = vsel %vm4550_vm4, %v773_v59, %v774_v3  ;;  %v3607_v12 = vrot.slane %v4896_v40, 9  ;;  %v781_v58 = vrot.slane %v6528_v45, 5  ;;  %v4392_v40 = vld [vmem:[%s6457_s1 + $0x424] ss:$8 sps:$4 sm:$0xff]   ;;  %v4369_v59 = vld [vmem:[%s6457_s1 + $0x310] ss:$8 sps:$4 sm:$0xff]  }
  0x8c   : > { %2239 = vmatmul.mubr.bf16.vlgmr.msra.gmra.mxu1 %v6523_v16  ;;  %2432 = vmatmul.mubr.bf16.vlgmr.msra.gmra.mxu0 %v4706_v32  ;;  %v844_v32 = vrot.slane %v5069_v34, 5  ;;  %v848_v34 = vrot.slane %v5141_v20, 5  ;;  %v5388_v62 = vcombine.low %v835_v17, %v838_v41  ;;  %v4351_v20 = vld [vmem:[%s6457_s1 + $0x350] ss:$8 sps:$4 sm:$0xff]   ;;  %v4357_v16 = vld [vmem:[%s6457_s1 + $0x340] ss:$8 sps:$4 sm:$0xff]  }
  0x8d   : > { %2593 = vmatpush1.bf16.msra.mxu1 %v4342_v43  ;;  %2786 = vmatpush1.bf16.msra.mxu0 %v4345_v19  ;;  %v5395_v43 = vcombine.low %v765_v53, %v768_v27  ;;  %v3606_v19 = vrot.slane %v6524_v51, 9  ;;  %v6527_v53 = vld [vmem:[#allocation14_spill] sm:$0xff]  ;;  %v4381_v27 = vld [vmem:[%s6457_s1 + $0x430] ss:$8 sps:$4 sm:$0xff]   ;;  %v6530_v41 = vld [vmem:[#allocation19_spill] sm:$0xff] }
  0x8e   : > { %2248 = vmatprep.mubr.bf16.mxu1 %v4788_v18  ;;  %2441 = vmatprep.mubr.bf16.mxu0 %v5340_v55  ;;  %v849_v50 = vsel %vm4550_vm4, %v3617_v48, %v848_v34  ;;  %v850_v1 = vrot.slane %v848_v34, 4  ;;  %v845_v37 = vsel %vm4550_vm4, %v843_v8, %v844_v32  ;;  %v4360_v32 = vld [vmem:[%s6457_s1 + $0x330] ss:$8 sps:$4 sm:$0xff]   ;;  %v4366_v8 = vld [vmem:[%s6457_s1 + $0x320] ss:$8 sps:$4 sm:$0xff]  }
  0x8f   : > { %2594 = vmatprep.subr.bf16.mxu1 %v4350_v60  ;;  %2787 = vmatprep.subr.bf16.mxu0 %v4356_v61  ;;  %v5407_v21 = vcombine.low %v842_v26, %v845_v37  ;;  %v6526_v60 = vld [vmem:[#allocation9_spill] sm:$0xff]  ;;  %v772_v61 = vsel %vm4550_vm4, %v3606_v19, %v771_v30  ;;  %v785_v26 = vrot.slane %v5020_v35, 5  ;;  %v4377_v3 = vld [vmem:[%s6457_s1 + $0x304] ss:$8 sps:$4 sm:$0xff]  }
  0x90   : > { %v852_v47 = vsel %vm4550_vm4, %v850_v1, %v851_v2  ;;  %v4383_v30 = vld [vmem:[%s6457_s1 + $0x434] ss:$8 sps:$4 sm:$0xff]   ;;  %v5440_v17 = vcombine.low %v772_v61, %v775_v15  ;;  %v4390_v2 = vld [vmem:[%s6457_s1 + $0x420] ss:$8 sps:$4 sm:$0xff]  }
  0x91   : > { %2595 = vmatpush1.bf16.msra.mxu1 %v4348_v46  ;;  %2788 = vmatpush1.bf16.msra.mxu0 %v4354_v4  ;;  %v5417_v46 = vcombine.low %v849_v50, %v852_v47  ;;  %v778_v4 = vrot.slane %v4916_v39, 5  ;;  %v4371_v50 = vld [vmem:[%s6457_s1 + $0x314] ss:$8 sps:$4 sm:$0xff]   ;;  %v787_v51 = vrot.slane %v785_v26, 4  ;;  %v4375_v61 = vld [vmem:[%s6457_s1 + $0x300] ss:$8 sps:$4 sm:$0xff]  }
  0x92   : > { %2596 = vmatprep.subr.bf16.mxu1 %v4353_v56  ;;  %2789 = vmatprep.subr.bf16.mxu0 %v4365_v13  ;;  %v4368_v56 = vld [vmem:[%s6457_s1 + $0x324] ss:$8 sps:$4 sm:$0xff]   ;;  %v6529_v13 = vld [vmem:[#allocation12_spill] sm:$0xff]  ;;  %v6531_v19 = vld [vmem:[#allocation17_spill] sm:$0xff] }
  0x93   : > { %v780_v39 = vrot.slane %v778_v4, 4  ;;  %v779_v48 = vsel %vm4550_vm4, %v3607_v12, %v778_v4  ;;  %v4401_v1 = vld [vmem:[%s6457_s1 + $0x414] ss:$8 sps:$4 sm:$0xff]   ;;  %v788_v37 = vrot.slane %v6531_v19, 5  ;;  %v4408_v15 = vld [vmem:[%s6457_s1 + $0x400] ss:$8 sps:$4 sm:$0xff]  }
  0x94   : > { %2249 = vmatmul.mubr.bf16.gmra.mxu1 %v5303_v6  ;;  %2442 = vmatmul.mubr.bf16.gmra.mxu0 %v6526_v60  ;;  %v4372_v6 = vld [vmem:[%s6457_s1 + $0x440] ss:$8 sps:$4 sm:$0xff]   ;;  %v4386_v12 = vld [vmem:[%s6457_s1 + $0x3e4] ss:$8 sps:$4 sm:$0xff]  }
  0x95   : > { %2258 = vmatprep.mubr.bf16.mxu1 %v6527_v53  ;;  %2451 = vmatprep.mubr.bf16.mxu0 %v5395_v43  ;;  %v782_v34 = vsel %vm4550_vm4, %v780_v39, %v781_v58  ;;  %v4420_v39 = vld [vmem:[%s4518_s22 + $0x64] sm:$0xf]  ;;  %v4384_v58 = vld [vmem:[%s6457_s1 + $0x3e0] ss:$8 sps:$4 sm:$0xff]  }
  0x96   : > { %2597 = vmatpush1.bf16.msra.mxu1 %v4351_v20  ;;  %2790 = vmatpush1.bf16.msra.mxu0 %v4363_v33  ;;  %v5477_v35 = vcombine.low %v779_v48, %v782_v34  ;;  %v3608_v20 = vrot.slane %v5007_v54, 9  ;;  %v4410_v54 = vld [vmem:[%s6457_s1 + $0x404] ss:$8 sps:$4 sm:$0xff]   ;;  %v6532_v33 = vld [vmem:[#allocation16_spill] sm:$0xff]  ;;  %v799_v45 = vrot.slane %v4420_v39, 5 }
  0x97   : > { %2598 = vmatprep.subr.bf16.mxu1 %v4359_v10  ;;  %2791 = vmatprep.subr.bf16.mxu0 %v4374_v28  ;;  %v789_v10 = vsel %vm4550_vm4, %v787_v51, %v788_v37  ;;  %v792_v28 = vrot.slane %v5119_v5, 5  ;;  %v3609_v5 = vrot.slane %v5099_v38, 9  ;;  %v4422_v34 = vld [vmem:[%s4518_s22 + $0x68] sm:$0x1]  ;;  %v4398_v37 = vld [vmem:[%s6457_s1 + $0x3b4] ss:$8 sps:$4 sm:$0xff]  }
  0x98   : > { %v786_v47 = vsel %vm4550_vm4, %v3608_v20, %v785_v26  ;;  %v801_v48 = vrot.slane %v799_v45, 4  ;;  %v802_v26 = vrot.slane %v4422_v34, 5  ;;  %v4423_v20 = vld [vmem:[%s4518_s22 + $0x70] sm:$0xf]  ;;  %v4393_v19 = vld [vmem:[%s6457_s1 + $0x3c0] ss:$8 sps:$4 sm:$0xff]  }
  0x99   : > { %v5511_v4 = vcombine.low %v786_v47, %v789_v10  ;;  %v793_v38 = vsel %vm4550_vm4, %v3609_v5, %v792_v28  ;;  %v806_v51 = vrot.slane %v4423_v20, 5  ;;  %v4425_v47 = vld [vmem:[%s4518_s22 + $0x74] sm:$0x1] }
  0x9a   : > { %2599 = vmatpush1.bf16.msra.mxu1 %v4357_v16  ;;  %2792 = vmatpush1.bf16.msra.mxu0 %v4372_v6  ;;  %v4380_v16 = vld [vmem:[%s6457_s1 + $0x3f4] ss:$8 sps:$4 sm:$0xff]   ;;  %v794_v6 = vrot.slane %v792_v28, 4  ;;  %v809_v10 = vrot.slane %v4425_v47, 5  ;;  %v4396_v28 = vld [vmem:[%s6457_s1 + $0x3b0] ss:$8 sps:$4 sm:$0xff]  }
  0x9b   : > { %2600 = vmatprep.subr.bf16.mxu1 %v4362_v23  ;;  %2793 = vmatprep.subr.bf16.mxu0 %v4383_v30  ;;  %v795_v23 = vrot.slane %v5159_v42, 5  ;;  %v4378_v30 = vld [vmem:[%s6457_s1 + $0x3f0] ss:$8 sps:$4 sm:$0xff]   ;;  %v6537_v47 = vld [vmem:[#allocation7_spill] sm:$0xff] }
  0x9c   : > { %2259 = vmatmul.mubr.bf16.gmra.mxu1 %v5340_v55  ;;  %2452 = vmatmul.mubr.bf16.gmra.mxu0 %v6529_v13  ;;  %v6535_v34 = vld [vmem:[#allocation4_spill] sm:$0xff] }
  0x9d   : > { %2268 = vmatprep.mubr.bf16.mxu1 %v6530_v41  ;;  %2461 = vmatprep.mubr.bf16.mxu0 %v5440_v17  ;;  %v796_v42 = vsel %vm4550_vm4, %v794_v6, %v795_v23  ;;  %v4426_v6 = vld [vmem:[%s4518_s22 + $0x7c] sm:$0xf] }
  0x9e   : > { %2601 = vmatpush1.bf16.msra.mxu1 %v4360_v32  ;;  %2794 = vmatpush1.bf16.msra.mxu0 %v4381_v27  ;;  %v4389_v32 = vld [vmem:[%s6457_s1 + $0x3d4] ss:$8 sps:$4 sm:$0xff]   ;;  %v5536_v27 = vcombine.low %v793_v38, %v796_v42  ;;  %v813_v23 = vrot.slane %v4426_v6, 5  ;;  %v4427_v42 = vld [vmem:[%s4518_s22 + $0x78] sm:$0xf] }
  0x9f   : > { %2602 = vmatprep.subr.bf16.mxu1 %v4368_v56  ;;  %2795 = vmatprep.subr.bf16.mxu0 %v4392_v40  ;;  %v4421_v56 = vld [vmem:[%s4518_s22 + $0x60] sm:$0xf]  ;;  %v3612_v39 = vrot.slane %v4427_v42, 9  ;;  %v6540_v6 = vld [vmem:[#allocation13_spill] sm:$0xff]  ;;  %v298_v42 = vld [vmem:[%s4518_s22 + $0xc4] sm:$0xf] }
  0xa0   : > { %v3610_v40 = vrot.slane %v4421_v56, 9  ;;  %v4405_v56 = vld [vmem:[%s6457_s1 + $0x390] ss:$8 sps:$4 sm:$0xff]  }
  0xa2   : > { %2603 = vmatpush1.bf16.msra.mxu1 %v4366_v8  ;;  %2796 = vmatpush1.bf16.msra.mxu0 %v4390_v2  ;;  %v4387_v8 = vld [vmem:[%s6457_s1 + $0x3d0] ss:$8 sps:$4 sm:$0xff]   ;;  %v4395_v2 = vld [vmem:[%s6457_s1 + $0x3c4] ss:$8 sps:$4 sm:$0xff]  }
  0xa3   : > { %2604 = vmatprep.subr.bf16.mxu1 %v4371_v50  ;;  %2797 = vmatprep.subr.bf16.mxu0 %v4401_v1  ;;  %v800_v50 = vsel %vm4550_vm4, %v3610_v40, %v799_v45  ;;  %v803_v1 = vsel %vm4550_vm4, %v801_v48, %v802_v26  ;;  %v815_v45 = vrot.slane %v813_v23, 4  ;;  %v4414_v40 = vld [vmem:[%s6457_s1 + $0x384] ss:$8 sps:$4 sm:$0xff]   ;;  %v814_v26 = vsel %vm4550_vm4, %v3612_v39, %v813_v23  ;;  %v6541_v23 = vld [vmem:[#allocation20_spill] sm:$0xff] }
  0xa4   : > { %2269 = vmatmul.mubr.bf16.gmra.mxu1 %v5395_v43  ;;  %2462 = vmatmul.mubr.bf16.gmra.mxu0 %v6532_v33  ;;  %v6534_v48 = vld [vmem:[#allocation2_spill] sm:$0xff] }
  0xa5   : > { %2278 = vmatprep.mubr.bf16.mxu1 %v5167_v14  ;;  %2471 = vmatprep.mubr.bf16.mxu0 %v5477_v35 }
  0xa6   : > { %2605 = vmatpush1.bf16.msra.mxu1 %v4369_v59  ;;  %2798 = vmatpush1.bf16.msra.mxu0 %v4399_v0  ;;  %v5561_v59 = vcombine.low %v800_v50, %v803_v1  ;;  %v4424_v0 = vld [vmem:[%s4518_s22 + $0x6c] sm:$0xf]  ;;  %v4412_v1 = vld [vmem:[%s6457_s1 + $0x380] ss:$8 sps:$4 sm:$0xff]  }
  0xa7   : > { %2606 = vmatprep.subr.bf16.mxu1 %v4377_v3  ;;  %2799 = vmatprep.subr.bf16.mxu0 %v4410_v54  ;;  %v3611_v3 = vrot.slane %v4424_v0, 9  ;;  %v808_v54 = vrot.slane %v806_v51, 4  ;;  %v4431_v0 = vld [vmem:[%s4518_s22 + $0x8c] sm:$0x1] }
  0xa9   : > { %v810_v5 = vsel %vm4550_vm4, %v808_v54, %v809_v10  ;;  %v6536_v54 = vld [vmem:[#allocation5_spill] sm:$0xff] }
  0xaa   : > { %2607 = vmatpush1.bf16.msra.mxu1 %v4375_v61  ;;  %2800 = vmatpush1.bf16.msra.mxu0 %v4408_v15  ;;  %v4404_v61 = vld [vmem:[%s6457_s1 + $0x3a4] ss:$8 sps:$4 sm:$0xff]  }
  0xab   : > { %2608 = vmatprep.subr.bf16.mxu1 %v4380_v16  ;;  %v6533_v15 = vld [vmem:[#allocation3_spill] sm:$0xff]  ;;  %v807_v16 = vsel %vm4550_vm4, %v3611_v3, %v806_v51  ;;  %v4430_v51 = vld [vmem:[%s4518_s22 + $0x84] sm:$0xf]  ;;  %v823_v3 = vrot.slane %v4431_v0, 5 }
  0xac   : > { %2279 = vmatmul.mubr.bf16.gmra.mxu1 %v5440_v17  ;;  %2472 = vmatmul.mubr.bf16.gmra.mxu0 %v5138_v24  ;;  %v5586_v38 = vcombine.low %v807_v16, %v810_v5  ;;  %v6538_v16 = vld [vmem:[#allocation10_spill] sm:$0xff]  ;;  %v6539_v5 = vld [vmem:[#allocation15_spill] sm:$0xff] }
  0xad   : > { %2288 = vmatprep.mubr.bf16.mxu1 %v5228_v22  ;;  %2481 = vmatprep.mubr.bf16.mxu0 %v5511_v4 }
  0xae   : > { %2609 = vmatpush2.bf16.msra.mxu1 %v4378_v30  ;;  %v4402_v30 = vld [vmem:[%s6457_s1 + $0x3a0] ss:$8 sps:$4 sm:$0xff]  }
  0xaf   : > { %2610 = vmatprep.subr.bf16.mxu1 %v4386_v12  ;;  %v4407_v12 = vld [vmem:[%s6457_s1 + $0x394] ss:$8 sps:$4 sm:$0xff]  }
  0xb2   : > { %2611 = vmatpush2.bf16.msra.mxu1 %v4384_v58  ;;  %v4428_v58 = vld [vmem:[%s4518_s22 + $0x80] sm:$0x1] }
  0xb3   : > { %2612 = vmatprep.subr.bf16.mxu1 %v4389_v32  ;;  %v816_v32 = vrot.slane %v4428_v58, 5  ;;  %v867_v58 = vshrl.u32 %v298_v42, 16 }
  0xb4   : > { %2289 = vmatmul.mubr.bf16.gmra.mxu1 %v5477_v35  ;;  %2482 = vmatmul.mubr.bf16.gmra.mxu0 %v5209_v63 }
  0xb5   : > { %2298 = vmatprep.mubr.bf16.mxu1 %v5281_v36  ;;  %2491 = vmatprep.mubr.bf16.mxu0 %v5536_v27 }
  0xb6   : > { %2613 = vmatpush2.bf16.msra.mxu1 %v4387_v8  ;;  %v817_v8 = vsel %vm4550_vm4, %v815_v45, %v816_v32  ;;  %v863_v32 = vshll.u32 %v298_v42, 16 }
  0xb7   : > { %2614 = vmatprep.subr.bf16.mxu1 %v4395_v2  ;;  %v4429_v2 = vld [vmem:[%s4518_s22 + $0x88] sm:$0xf]  ;;  %v5608_v20 = vcombine.low %v814_v26, %v817_v8 }
  0xb8   : > { %v820_v50 = vrot.slane %v4429_v2, 5  ;;  %v865_v2 = vrot.slane %v863_v32, 5 }
  0xba   : > { %2615 = vmatpush2.bf16.msra.mxu1 %v4393_v19  ;;  %v3613_v19 = vrot.slane %v4430_v51, 9 }
  0xbb   : > { %2616 = vmatprep.subr.bf16.mxu1 %v4398_v37  ;;  %v822_v37 = vrot.slane %v820_v50, 4 }
  0xbc   : > { %2299 = vmatmul.mubr.bf16.gmra.mxu1 %v5511_v4  ;;  %2492 = vmatmul.mubr.bf16.gmra.mxu0 %v5256_v9  ;;  %v821_v10 = vsel %vm4550_vm4, %v3613_v19, %v820_v50  ;;  %v869_v50 = vrot.slane %v867_v58, 4 }
  0xbd   : > { %2308 = vmatprep.mubr.bf16.mxu1 %v6533_v15  ;;  %2501 = vmatprep.mubr.bf16.mxu0 %v5561_v59 }
  0xbe   : > { %2617 = vmatpush2.bf16.msra.mxu1 %v4396_v28  ;;  %v824_v28 = vsel %vm4550_vm4, %v822_v37, %v823_v3  ;;  %v870_v0 = vor.u32 %v869_v50, %v865_v2 }
  0xbf   : > { %2618 = vmatprep.subr.bf16.mxu1 %v4404_v61  ;;  %v5620_v61 = vcombine.low %v821_v10, %v824_v28 }
  0xc0   : > { %v871_v32 = vrot.slane %v870_v0, 4 }
  0xc2   : > { %2619 = vmatpush2.bf16.msra.mxu1 %v4402_v30  ;;  %v6542_v30 = vld [vmem:[#allocation18_spill] sm:$0xff] }
  0xc3   : > { %2620 = vmatprep.subr.bf16.mxu1 %v4407_v12  ;;  %v297_v12 = vld [vmem:[%s4518_s22 + $0xc0] sm:$0xf] }
  0xc4   : > { %2309 = vmatmul.mubr.bf16.gmra.mxu1 %v5536_v27  ;;  %2502 = vmatmul.mubr.bf16.gmra.mxu0 %v6534_v48  ;;  %v854_v39 = vshrl.u32 %v297_v12, 16  ;;  %v857_v45 = vshll.u32 %v297_v12, 16 }
  0xc5   : > { %2318 = vmatprep.mubr.bf16.mxu1 %v6535_v34  ;;  %2511 = vmatprep.mubr.bf16.mxu0 %v5586_v38 }
  0xc6   : > { %2621 = vmatpush2.bf16.msra.mxu1 %v4405_v56  ;;  %v882_v56 = vrot.slane %v298_v42, 5  ;;  %v856_v26 = vrot.slane %v854_v39, 4  ;;  %v859_v8 = vrot.slane %v857_v45, 5  ;;  %v5649_v39 = vcombine.low %v297_v12, %v298_v42 }
  0xc7   : > { %2622 = vmatprep.subr.bf16.mxu1 %v4414_v40  ;;  %v299_v40 = vld [vmem:[%s4518_s22 + $0xc8] sm:$0x1]  ;;  %v1283_v42 = vlaneseq }
  0xc8   : > { %v884_v51 = vrot.slane %v882_v56, 4  ;;  %v885_v19 = vrot.slane %v299_v40, 5  ;;  %v860_v37 = vor.u32 %v859_v8, %v856_v26  ;;  %v873_v3 = vshll.u32 %v299_v40, 16 }
  0xc9   : > { %v1284_v26 = vshrl.u32 %v1283_v42, 7  ;;  %v6497_v8 = vmov 0  }
  0xca   : > { %2623 = vmatpush2.bf16.msra.mxu1 %v4412_v1  ;;  %v3618_v1 = vrot.slane %v297_v12, 9  ;;  %v886_v28 = vsel %vm4550_vm4, %v884_v51, %v885_v19  ;;  %v861_v58 = vrot.slane %v860_v37, 4 }
  0xcb   : > { %v1285_v50 = vsub.s32 0, %v1284_v26 }
  0xcc   : > { %2319 = vmatmul.mubr.bf16.gmra.mxu1 %v5561_v59  ;;  %2512 = vmatmul.mubr.bf16.gmra.mxu0 %v6536_v54  ;;  %v883_v10 = vsel %vm4550_vm4, %v3618_v1, %v882_v56  ;;  %v866_v56 = vsel %vm4570_vm5, %v861_v58, %v865_v2  ;;  %v1281_v2 = vld [vmem:[%s6458_s2] sm:$0x3]  ;;  %v1289_v1 = vsub.s32 1, %v1284_v26 }
  0xcd   : > { %2328 = vmatprep.mubr.bf16.mxu1 %v6537_v47  ;;  %2521 = vmatprep.mubr.bf16.mxu0 %v5608_v20  ;;  %v5651_v45 = vcombine.low %v883_v10, %v886_v28 }
  0xce   : > { %v5672_v51 = vrot.slane %v1281_v2, %v1289_v1 }
  0xd4   : > { %2329 = vmatmul.mubr.bf16.gmra.mxu1 %v5586_v38  ;;  %2522 = vmatmul.mubr.bf16.gmra.mxu0 %v6538_v16 }
  0xd5   : > { %2338 = vmatprep.mubr.bf16.mxu1 %v6539_v5  ;;  %2531 = vmatprep.mubr.bf16.mxu0 %v5620_v61 }
  0xdc   : > { %2339 = vmatmul.mubr.bf16.gmra.mxu1 %v5608_v20  ;;  %2532 = vmatmul.mubr.bf16.gmra.mxu0 %v6540_v6 }
  0xdd   : > { %2348 = vmatprep.mubr.bf16.mxu1 %v6541_v23  ;;  %2541 = vmatprep.mubr.bf16.mxu0 %v5369_v57 }
  0xe4   : > { %2349 = vmatmul.mubr.bf16.gmra.mxu1 %v5620_v61  ;;  %2542 = vmatmul.mubr.bf16.gmra.mxu0 %v6542_v30 }
  0xe5   : > { %2358 = vmatprep.mubr.bf16.mxu1 %v5171_v7  ;;  %2551 = vmatprep.mubr.bf16.mxu0 %v5388_v62 }
  0xec   : > { %2359 = vmatmul.mubr.bf16.gmra.mxu1 %v5369_v57  ;;  %2552 = vmatmul.mubr.bf16.gmra.mxu0 %v5143_v49 }
  0xed   : > { %2368 = vmatprep.mubr.bf16.mxu1 %v5232_v29  ;;  %2561 = vmatprep.mubr.bf16.mxu0 %v5407_v21  ;;  %v875_v29 = vrot.slane %v873_v3, 5 }
  0xef   : > { %v876_v12 = vsel %vm4570_vm5, %v871_v32, %v875_v29  ;;  %v5670_v29 = vrot.slane %v1281_v2, %v1285_v50 }
  0xf0   : > { %v5661_v40 = vcombine.low %v866_v56, %v876_v12 }
  0xf4   : > { %2369 = vmatmul.mubr.bf16.gmra.mxu1 %v5388_v62  ;;  %2562 = vmatmul.mubr.bf16.gmra.mxu0 %v5211_v11 }
  0xf5   : > { %2378 = vmatprep.mubr.bf16.mxu1 %v5285_v52  ;;  %2571 = vmatprep.mubr.bf16.mxu0 %v5417_v46 }
  0xfc   : > { %2379 = vmatmul.mubr.bf16.gmra.mxu1 %v5407_v21  ;;  %2572 = vmatmul.mubr.bf16.gmra.mxu0 %v5258_v25 }
  0xfd   : > { %2388 = vmatprep.mubr.bf16.mxu1 %v5649_v39  ;;  %2581 = vmatprep.mubr.bf16.mxu0 %v5651_v45 }
 0x104   : > { %2389 = vmatmul.mubr.bf16.gmra.mxu1 %v5417_v46  ;;  %2582 = vmatmul.mubr.bf16.gmra.mxu0 %v5661_v40 }
 0x105   : > { %2624 = vmatprep.mubr.bf16.mxu1 %v6526_v60  ;;  %2817 = vmatprep.mubr.bf16.mxu0 %v6497_v8 }
 0x10c   : > { %v5674_v19 = vpop.f32.mrf.mxu0  ;;  %v2127_v37 = vpop.f32.mrf.mxu1  ;;  %2625 = vmatmul.mubr.bf16.vlgmr.msra.gmra.mxu1 %v4788_v18  ;;  %2818 = vmatmul.mubr.bf16.vlgmr.msra.gmra.mxu0 %v5340_v55 }
 0x10d   : > { %v5679_v60 = vadd.f32 %v2127_v37, %v5670_v29  ;;  %2634 = vmatprep.mubr.bf16.mxu1 %v6529_v13  ;;  %2827 = vmatprep.mubr.bf16.mxu0 %v6497_v8 }
 0x10e   : > { %v5683_v0 = vpop.f32.mrf.mxu0  ;;  %v2129_v3 = vpop.f32.mrf.mxu1 }
 0x10f   : > { %6543 = vst [vmem:[#allocation6_spill] sm:$0xff] %v5679_v60  ;;  %v5686_v10 = vadd.f32 %v2129_v3, %v5672_v51 }
 0x110   : > { %v5688_v28 = vpop.f32.mrf.mxu0  ;;  %v2131_v58 = vpop.f32.mrf.mxu1 }
 0x111   : > { %6544 = vst [vmem:[#allocation8_spill] sm:$0xff] %v5686_v10  ;;  %v5691_v18 = vadd.f32 %v2131_v58, %v5670_v29 }
 0x112   : > { %v5693_v55 = vpop.f32.mrf.mxu0  ;;  %v2133_v32 = vpop.f32.mrf.mxu1 }
 0x113   : > { %6545 = vst [vmem:[#allocation9_spill] sm:$0xff] %v5691_v18  ;;  %v5696_v56 = vadd.f32 %v2133_v32, %v5672_v51 }
 0x114   : > { %v5698_v13 = vpop.f32.mrf.mxu0  ;;  %v2137_v12 = vpop.f32.mrf.mxu1  ;;  %2635 = vmatmul.mubr.bf16.gmra.mxu1 %v6527_v53  ;;  %2828 = vmatmul.mubr.bf16.gmra.mxu0 %v5395_v43 }
 0x115   : > { %6546 = vst [vmem:[#allocation14_spill] sm:$0xff] %v5696_v56  ;;  %v5703_v42 = vadd.f32 %v2137_v12, %v5670_v29  ;;  %2644 = vmatprep.mubr.bf16.mxu1 %v6532_v33  ;;  %2837 = vmatprep.mubr.bf16.mxu0 %v6497_v8 }
 0x116   : > { %v5707_v26 = vpop.f32.mrf.mxu0  ;;  %v2139_v50 = vpop.f32.mrf.mxu1 }
 0x117   : > { %6547 = vst [vmem:[#allocation11_spill] sm:$0xff] %v5703_v42  ;;  %v5710_v2 = vadd.f32 %v2139_v50, %v5672_v51 }
 0x118   : > { %v5712_v1 = vpop.f32.mrf.mxu0  ;;  %v2141_v37 = vpop.f32.mrf.mxu1 }
 0x119   : > { %6548 = vst [vmem:[#allocation12_spill] sm:$0xff] %v5710_v2  ;;  %v5715_v53 = vadd.f32 %v2141_v37, %v5670_v29 }
 0x11a   : > { %v5717_v43 = vpop.f32.mrf.mxu0  ;;  %v2143_v3 = vpop.f32.mrf.mxu1 }
 0x11b   : > { %6549 = vst [vmem:[#allocation19_spill] sm:$0xff] %v5715_v53  ;;  %v5720_v58 = vadd.f32 %v2143_v3, %v5672_v51 }
 0x11c   : > { %v5722_v33 = vpop.f32.mrf.mxu0  ;;  %v2147_v32 = vpop.f32.mrf.mxu1  ;;  %2645 = vmatmul.mubr.bf16.gmra.mxu1 %v6530_v41  ;;  %2838 = vmatmul.mubr.bf16.gmra.mxu0 %v5440_v17 }
 0x11d   : > { %6550 = vst [vmem:[#allocation17_spill] sm:$0xff] %v5720_v58  ;;  %v5727_v12 = vadd.f32 %v2147_v32, %v5670_v29  ;;  %2654 = vmatprep.mubr.bf16.mxu1 %v5138_v24  ;;  %2847 = vmatprep.mubr.bf16.mxu0 %v6497_v8 }
 0x11e   : > { %v5731_v50 = vpop.f32.mrf.mxu0  ;;  %v2149_v37 = vpop.f32.mrf.mxu1 }
 0x11f   : > { %6551 = vst [vmem:[#allocation16_spill] sm:$0xff] %v5727_v12  ;;  %v5734_v3 = vadd.f32 %v2149_v37, %v5672_v51 }
 0x120   : > { %v5736_v58 = vpop.f32.mrf.mxu0  ;;  %v2151_v53 = vpop.f32.mrf.mxu1 }
 0x121   : > { %6552 = vst [vmem:[#allocation3_spill] sm:$0xff] %v5734_v3  ;;  %v5739_v41 = vadd.f32 %v2151_v53, %v5670_v29  ;;  %v6556_v53 = vmov 0  }
 0x122   : > { %v5741_v17 = vpop.f32.mrf.mxu0  ;;  %v2153_v32 = vpop.f32.mrf.mxu1 }
 0x123   : > { %6553 = vst [vmem:[#allocation2_spill] sm:$0xff] %v5739_v41  ;;  %v5744_v12 = vadd.f32 %v2153_v32, %v5672_v51 }
 0x124   : > { %v5746_v24 = vpop.f32.mrf.mxu0  ;;  %v2157_v8 = vpop.f32.mrf.mxu1  ;;  %2655 = vmatmul.mubr.bf16.gmra.mxu1 %v5167_v14  ;;  %2848 = vmatmul.mubr.bf16.gmra.mxu0 %v5477_v35 }
 0x125   : > { %6554 = vst [vmem:[#allocation4_spill] sm:$0xff] %v5744_v12  ;;  %v5751_v37 = vadd.f32 %v2157_v8, %v5670_v29  ;;  %2664 = vmatprep.mubr.bf16.mxu1 %v5209_v63  ;;  %2857 = vmatprep.mubr.bf16.mxu0 %v6556_v53 }
 0x126   : > { %v5755_v41 = vpop.f32.mrf.mxu0  ;;  %v2159_v3 = vpop.f32.mrf.mxu1 }
 0x127   : > { %6555 = vst [vmem:[#allocation5_spill] sm:$0xff] %v5751_v37  ;;  %v5758_v32 = vadd.f32 %v2159_v3, %v5672_v51 }
 0x128   : > { %v5760_v12 = vpop.f32.mrf.mxu0  ;;  %v2161_v2 = vpop.f32.mrf.mxu1 }
 0x129   : > { %6557 = vst [vmem:[#allocation7_spill] sm:$0xff] %v5758_v32  ;;  %v5763_v14 = vadd.f32 %v2161_v2, %v5670_v29 }
 0x12a   : > { %v5765_v35 = vpop.f32.mrf.mxu0  ;;  %v2163_v8 = vpop.f32.mrf.mxu1 }
 0x12b   : > { %6558 = vst [vmem:[#allocation10_spill] sm:$0xff] %v5763_v14  ;;  %v5768_v37 = vadd.f32 %v2163_v8, %v5672_v51 }
 0x12c   : > { %v5770_v63 = vpop.f32.mrf.mxu0  ;;  %v2167_v42 = vpop.f32.mrf.mxu1  ;;  %2665 = vmatmul.mubr.bf16.gmra.mxu1 %v5228_v22  ;;  %2858 = vmatmul.mubr.bf16.gmra.mxu0 %v5511_v4 }
 0x12d   : > { %6559 = vst [vmem:[#allocation15_spill] sm:$0xff] %v5768_v37  ;;  %v5775_v3 = vadd.f32 %v2167_v42, %v5670_v29  ;;  %2674 = vmatprep.mubr.bf16.mxu1 %v5256_v9  ;;  %2867 = vmatprep.mubr.bf16.mxu0 %v6556_v53 }
 0x12e   : > { %v5779_v2 = vpop.f32.mrf.mxu0  ;;  %v2169_v14 = vpop.f32.mrf.mxu1 }
 0x12f   : > { %6560 = vst [vmem:[#allocation13_spill] sm:$0xff] %v5775_v3  ;;  %v5782_v8 = vadd.f32 %v2169_v14, %v5672_v51 }
 0x130   : > { %v5784_v37 = vpop.f32.mrf.mxu0  ;;  %v2171_v32 = vpop.f32.mrf.mxu1 }
 0x131   : > { %6561 = vst [vmem:[#allocation20_spill] sm:$0xff] %v5782_v8  ;;  %v5787_v22 = vadd.f32 %v2171_v32, %v5670_v29 }
 0x132   : > { %v5789_v4 = vpop.f32.mrf.mxu0  ;;  %v2173_v42 = vpop.f32.mrf.mxu1 }
 0x133   : > { %6562 = vst [vmem:[#allocation18_spill] sm:$0xff] %v5787_v22  ;;  %v5792_v3 = vadd.f32 %v2173_v42, %v5672_v51 }
 0x134   : > { %v5794_v9 = vpop.f32.mrf.mxu0  ;;  %v2177_v56 = vpop.f32.mrf.mxu1  ;;  %2675 = vmatmul.mubr.bf16.gmra.mxu1 %v5281_v36  ;;  %2868 = vmatmul.mubr.bf16.gmra.mxu0 %v5536_v27 }
 0x135   : > { %6563 = vst [vmem:[#allocation22_spill] sm:$0xff] %v5792_v3  ;;  %v5799_v14 = vadd.f32 %v2177_v56, %v5670_v29  ;;  %2684 = vmatprep.mubr.bf16.mxu1 %v6534_v48  ;;  %2877 = vmatprep.mubr.bf16.mxu0 %v6556_v53 }
 0x136   : > { %v5803_v32 = vpop.f32.mrf.mxu0  ;;  %v2179_v22 = vpop.f32.mrf.mxu1 }
 0x137   : > { %6564 = vst [vmem:[#allocation23_spill] sm:$0xff] %v5799_v14  ;;  %v5806_v42 = vadd.f32 %v2179_v22, %v5672_v51 }
 0x138   : > { %v5808_v3 = vpop.f32.mrf.mxu0  ;;  %v2181_v8 = vpop.f32.mrf.mxu1 }
 0x139   : > { %6565 = vst [vmem:[#allocation24_spill] sm:$0xff] %v5806_v42  ;;  %v5811_v36 = vadd.f32 %v2181_v8, %v5670_v29 }
 0x13a   : > { %v5813_v27 = vpop.f32.mrf.mxu0  ;;  %v2183_v56 = vpop.f32.mrf.mxu1 }
 0x13b   : > { %6566 = vst [vmem:[#allocation25_spill] sm:$0xff] %v5811_v36  ;;  %v5816_v14 = vadd.f32 %v2183_v56, %v5672_v51 }
 0x13c   : > { %v5818_v48 = vpop.f32.mrf.mxu0  ;;  %v2187_v18 = vpop.f32.mrf.mxu1  ;;  %2685 = vmatmul.mubr.bf16.gmra.mxu1 %v6533_v15  ;;  %2878 = vmatmul.mubr.bf16.gmra.mxu0 %v5561_v59 }
 0x13d   : > { %6567 = vst [vmem:[#allocation26_spill] sm:$0xff] %v5816_v14  ;;  %v5823_v22 = vadd.f32 %v2187_v18, %v5670_v29  ;;  %2694 = vmatprep.mubr.bf16.mxu1 %v6536_v54  ;;  %2887 = vmatprep.mubr.bf16.mxu0 %v6556_v53 }
 0x13e   : > { %v5827_v8 = vpop.f32.mrf.mxu0  ;;  %v2189_v36 = vpop.f32.mrf.mxu1 }
 0x13f   : > { %6568 = vst [vmem:[#allocation27_spill] sm:$0xff] %v5823_v22  ;;  %v5830_v56 = vadd.f32 %v2189_v36, %v5672_v51 }
 0x140   : > { %v5832_v14 = vpop.f32.mrf.mxu0  ;;  %v2191_v42 = vpop.f32.mrf.mxu1 }
 0x141   : > { %6569 = vst [vmem:[#allocation28_spill] sm:$0xff] %v5830_v56  ;;  %v5835_v15 = vadd.f32 %v2191_v42, %v5670_v29 }
 0x142   : > { %v5837_v59 = vpop.f32.mrf.mxu0  ;;  %v2193_v18 = vpop.f32.mrf.mxu1 }
 0x143   : > { %6570 = vst [vmem:[#allocation29_spill] sm:$0xff] %v5835_v15  ;;  %6571 = vst [vmem:[#allocation30_spill] sm:$0xff] %v5837_v59  ;;  %v5840_v22 = vadd.f32 %v2193_v18, %v5672_v51 }
 0x144   : > { %v5842_v54 = vpop.f32.mrf.mxu0  ;;  %v2197_v10 = vpop.f32.mrf.mxu1  ;;  %2695 = vmatmul.mubr.bf16.gmra.mxu1 %v6535_v34  ;;  %2888 = vmatmul.mubr.bf16.gmra.mxu0 %v5586_v38 }
 0x145   : > { %6572 = vst [vmem:[#allocation31_spill] sm:$0xff] %v5840_v22  ;;  %6573 = vst [vmem:[#allocation32_spill] sm:$0xff] %v5842_v54  ;;  %v5847_v36 = vadd.f32 %v2197_v10, %v5670_v29  ;;  %2704 = vmatprep.mubr.bf16.mxu1 %v6538_v16  ;;  %2897 = vmatprep.mubr.bf16.mxu0 %v6556_v53  ;;  %v2048_v16 = vadd.f32 %v5674_v19, %v5670_v29 }
 0x146   : > { %v5851_v42 = vpop.f32.mrf.mxu0  ;;  %v2199_v15 = vpop.f32.mrf.mxu1  ;;  %v2052_v19 = vadd.f32 %v5688_v28, %v5670_v29 }
 0x147   : > { %6574 = vst [vmem:[#allocation33_spill] sm:$0xff] %v5847_v36  ;;  %6575 = vst [vmem:[#allocation34_spill] sm:$0xff] %v5851_v42  ;;  %v5854_v18 = vadd.f32 %v2199_v15, %v5672_v51  ;;  %v2050_v15 = vadd.f32 %v5683_v0, %v5672_v51 }
 0x148   : > { %v5856_v22 = vpop.f32.mrf.mxu0  ;;  %v2201_v56 = vpop.f32.mrf.mxu1 }
 0x149   : > { %6576 = vst [vmem:[#allocation35_spill] sm:$0xff] %v5854_v18  ;;  %6577 = vst [vmem:[#allocation36_spill] sm:$0xff] %v5856_v22  ;;  %v5859_v34 = vadd.f32 %v2201_v56, %v5670_v29 }
 0x14a   : > { %v5861_v38 = vpop.f32.mrf.mxu0  ;;  %v2203_v10 = vpop.f32.mrf.mxu1 }
 0x14b   : > { %6578 = vst [vmem:[#allocation37_spill] sm:$0xff] %v5859_v34  ;;  %6579 = vst [vmem:[#allocation38_spill] sm:$0xff] %v5861_v38  ;;  %v5866_v36 = vadd.f32 %v2203_v10, %v5672_v51 }
 0x14c   : > { %v2240_v60 = vpop.f32.mrf.mxu1  ;;  %v2433_v42 = vpop.f32.mrf.mxu0  ;;  %2705 = vmatmul.mubr.bf16.gmra.mxu1 %v6537_v47  ;;  %2898 = vmatmul.mubr.bf16.gmra.mxu0 %v5608_v20  ;;  %v2054_v20 = vadd.f32 %v5693_v55, %v5672_v51  ;;  %v2060_v55 = vadd.f32 %v5707_v26, %v5672_v51  ;;  %v2064_v26 = vadd.f32 %v5717_v43, %v5672_v51 }
 0x14d   : > { %6580 = vst [vmem:[#allocation39_spill] sm:$0xff] %v5866_v36  ;;  %v2241_v56 = vadd.f32 %v2240_v60, %v2048_v16  ;;  %2714 = vmatprep.mubr.bf16.mxu1 %v6540_v6  ;;  %2907 = vmatprep.mubr.bf16.mxu0 %v6556_v53  ;;  %v2058_v16 = vadd.f32 %v5698_v13, %v5670_v29 }
 0x14e   : > { %v2242_v34 = vpop.f32.mrf.mxu1  ;;  %v2435_v18 = vpop.f32.mrf.mxu0  ;;  %v2070_v43 = vadd.f32 %v5731_v50, %v5672_v51  ;;  %v2074_v50 = vadd.f32 %v5741_v17, %v5672_v51  ;;  %v2080_v17 = vadd.f32 %v5755_v41, %v5672_v51  ;;  %v2082_v41 = vadd.f32 %v5760_v12, %v5670_v29 }
 0x14f   : > { %v5876_v10 = vadd.f32 %v2433_v42, %v2241_v56  ;;  %v2243_v36 = vadd.f32 %v2242_v34, %v2050_v15  ;;  %v2088_v12 = vadd.f32 %v5770_v63, %v5670_v29 }
 0x150   : > { %v2244_v38 = vpop.f32.mrf.mxu1  ;;  %v2437_v47 = vpop.f32.mrf.mxu0 }
 0x151   : > { %v5880_v22 = vadd.f32 %v2435_v18, %v2243_v36  ;;  %v2245_v60 = vadd.f32 %v2244_v38, %v2052_v19  ;;  %v2062_v38 = vadd.f32 %v5712_v1, %v5670_v29 }
 0x152   : > { %v2246_v0 = vpop.f32.mrf.mxu1  ;;  %v2439_v6 = vpop.f32.mrf.mxu0 }
 0x153   : > { %v5884_v54 = vadd.f32 %v2437_v47, %v2245_v60  ;;  %v2247_v59 = vadd.f32 %v2246_v0, %v2054_v20  ;;  %v2068_v20 = vadd.f32 %v5722_v33, %v5670_v29 }
 0x154   : > { %v2250_v28 = vpop.f32.mrf.mxu1  ;;  %v2443_v42 = vpop.f32.mrf.mxu0  ;;  %2715 = vmatmul.mubr.bf16.gmra.mxu1 %v6539_v5  ;;  %2908 = vmatmul.mubr.bf16.gmra.mxu0 %v5620_v61 }
 0x155   : > { %v5890_v36 = vadd.f32 %v2439_v6, %v2247_v59  ;;  %v2251_v18 = vadd.f32 %v2250_v28, %v2058_v16  ;;  %2724 = vmatprep.mubr.bf16.mxu1 %v6542_v30  ;;  %2917 = vmatprep.mubr.bf16.mxu0 %v6556_v53 }
 0x156   : > { %v2252_v13 = vpop.f32.mrf.mxu1  ;;  %v2445_v34 = vpop.f32.mrf.mxu0 }
 0x157   : > { %v5896_v15 = vadd.f32 %v2443_v42, %v2251_v18  ;;  %v2253_v5 = vadd.f32 %v2252_v13, %v2060_v55  ;;  %v2072_v55 = vadd.f32 %v5736_v58, %v5670_v29  ;;  %v5927_v58 = vld [vmem:[%s4518_s22 + $0xcc] sm:$0xf] }
 0x158   : > { %v2254_v56 = vpop.f32.mrf.mxu1  ;;  %v2447_v61 = vpop.f32.mrf.mxu0 }
 0x159   : > { %v5900_v59 = vadd.f32 %v2445_v34, %v2253_v5  ;;  %v2255_v19 = vadd.f32 %v2254_v56, %v2062_v38  ;;  %v2078_v56 = vadd.f32 %v5746_v24, %v5670_v29 }
 0x15a   : > { %v2256_v47 = vpop.f32.mrf.mxu1  ;;  %v2449_v30 = vpop.f32.mrf.mxu0 }
 0x15b   : > { %v5904_v60 = vadd.f32 %v2447_v61, %v2255_v19  ;;  %v2257_v0 = vadd.f32 %v2256_v47, %v2064_v26  ;;  %v5930_v19 = vld [vmem:[%s4518_s22 + $0xd0] sm:$0xf] }
 0x15c   : > { %v2260_v1 = vpop.f32.mrf.mxu1  ;;  %v2453_v6 = vpop.f32.mrf.mxu0  ;;  %2725 = vmatmul.mubr.bf16.gmra.mxu1 %v6541_v23  ;;  %2918 = vmatmul.mubr.bf16.gmra.mxu0 %v5369_v57 }
 0x15d   : > { %v5910_v16 = vadd.f32 %v2449_v30, %v2257_v0  ;;  %v2261_v28 = vadd.f32 %v2260_v1, %v2068_v20  ;;  %2734 = vmatprep.mubr.bf16.mxu1 %v5143_v49  ;;  %2927 = vmatprep.mubr.bf16.mxu0 %v6556_v53 }
 0x15e   : > { %v2262_v33 = vpop.f32.mrf.mxu1  ;;  %v2455_v42 = vpop.f32.mrf.mxu0 }
 0x15f   : > { %v5916_v23 = vadd.f32 %v2453_v6, %v2261_v28  ;;  %v2263_v57 = vadd.f32 %v2262_v33, %v2070_v43  ;;  %v888_v6 = vshrl.u32 %v5927_v58, 16  ;;  %v891_v43 = vshll.u32 %v5927_v58, 16 }
 0x160   : > { %v2264_v18 = vpop.f32.mrf.mxu1  ;;  %v2457_v13 = vpop.f32.mrf.mxu0 }
 0x161   : > { %v5920_v34 = vadd.f32 %v2455_v42, %v2263_v57  ;;  %v2265_v49 = vadd.f32 %v2264_v18, %v2072_v55  ;;  %v2084_v55 = vadd.f32 %v5765_v35, %v5672_v51  ;;  %v6581_v35 = vld [vmem:[#allocation21_spill] sm:$0xff] }
 0x162   : > { %v2266_v38 = vpop.f32.mrf.mxu1  ;;  %v2459_v5 = vpop.f32.mrf.mxu0 }
 0x163   : > { %v5924_v61 = vadd.f32 %v2457_v13, %v2265_v49  ;;  %v2267_v26 = vadd.f32 %v2266_v38, %v2074_v50  ;;  %v890_v49 = vrot.slane %v888_v6, 4  ;;  %v893_v38 = vrot.slane %v891_v43, 5 }
 0x164   : > { %v2270_v47 = vpop.f32.mrf.mxu1  ;;  %v2463_v30 = vpop.f32.mrf.mxu0  ;;  %2735 = vmatmul.mubr.bf16.gmra.mxu1 %v5171_v7  ;;  %2928 = vmatmul.mubr.bf16.gmra.mxu0 %v5388_v62  ;;  %v897_v7 = vshll.u32 %v5930_v19, 16  ;;  %v901_v62 = vshrl.u32 %v5930_v19, 16 }
 0x165   : > { %v5936_v20 = vadd.f32 %v2459_v5, %v2267_v26  ;;  %v2271_v0 = vadd.f32 %v2270_v47, %v2078_v56  ;;  %2744 = vmatprep.mubr.bf16.mxu1 %v5211_v11  ;;  %2937 = vmatprep.mubr.bf16.mxu0 %v6556_v53 }
 0x166   : > { %v2272_v24 = vpop.f32.mrf.mxu1  ;;  %v2465_v1 = vpop.f32.mrf.mxu0  ;;  %v899_v5 = vrot.slane %v897_v7, 5  ;;  %v903_v56 = vrot.slane %v901_v62, 4  ;;  %v894_v7 = vor.u32 %v893_v38, %v890_v49 }
 0x167   : > { %v5946_v28 = vadd.f32 %v2463_v30, %v2271_v0  ;;  %v2273_v33 = vadd.f32 %v2272_v24, %v2080_v17  ;;  %v5957_v30 = vld [vmem:[%s4518_s22 + $0xd4] sm:$0x1]  ;;  %v2090_v24 = vadd.f32 %v5779_v2, %v5672_v51  ;;  %s3884_s22 = sshll.u32 %s6656_s19, 7 }
 0x168   : > { %v2274_v11 = vpop.f32.mrf.mxu1  ;;  %v2467_v42 = vpop.f32.mrf.mxu0  ;;  %v904_v62 = vor.u32 %v903_v56, %v899_v5  ;;  %v895_v49 = vrot.slane %v894_v7, 4  ;;  %s6152_s29 = scalar_lea.vmem %s6459_s3, %s3884_s22  ;;  %s6164_s7 = scalar_lea.vmem %s6460_s4, %s3884_s22 }
 0x169   : > { %v5950_v57 = vadd.f32 %v2465_v1, %v2273_v33  ;;  %v2275_v18 = vadd.f32 %v2274_v11, %v2082_v41  ;;  %v907_v41 = vshll.u32 %v5957_v30, 16  ;;  %v2092_v33 = vadd.f32 %v5784_v37, %v5670_v29 }
 0x16a   : > { %v2276_v13 = vpop.f32.mrf.mxu1  ;;  %v2469_v50 = vpop.f32.mrf.mxu0  ;;  %v905_v38 = vrot.slane %v904_v62, 4 }
 0x16b   : > { %v5954_v26 = vadd.f32 %v2467_v42, %v2275_v18  ;;  %v2277_v47 = vadd.f32 %v2276_v13, %v2084_v55  ;;  %v2094_v55 = vadd.f32 %v5789_v4, %v5672_v51  ;;  %v909_v56 = vrot.slane %v907_v41, 5 }
 0x16c   : > { %v2280_v17 = vpop.f32.mrf.mxu1  ;;  %v2473_v0 = vpop.f32.mrf.mxu0  ;;  %2745 = vmatmul.mubr.bf16.gmra.mxu1 %v6581_v35  ;;  %2938 = vmatmul.mubr.bf16.gmra.mxu0 %v5407_v21  ;;  %v916_v4 = vrot.slane %v5930_v19, 5  ;;  %v2100_v35 = vadd.f32 %v5803_v32, %v5672_v51 }
 0x16d   : > { %v5963_v1 = vadd.f32 %v2469_v50, %v2277_v47  ;;  %v2281_v6 = vadd.f32 %v2280_v17, %v2088_v12  ;;  %2754 = vmatprep.mubr.bf16.mxu1 %v5258_v25  ;;  %2947 = vmatprep.mubr.bf16.mxu0 %v6556_v53  ;;  %v2098_v12 = vadd.f32 %v5794_v9, %v5670_v29 }
 0x16e   : > { %v2282_v63 = vpop.f32.mrf.mxu1  ;;  %v2475_v43 = vpop.f32.mrf.mxu0 }
 0x16f   : > { %v5970_v21 = vadd.f32 %v2473_v0, %v2281_v6  ;;  %v2283_v11 = vadd.f32 %v2282_v63, %v2090_v24 }
 0x170   : > { %v2284_v2 = vpop.f32.mrf.mxu1  ;;  %v2477_v42 = vpop.f32.mrf.mxu0 }
 0x171   : > { %v5974_v25 = vadd.f32 %v2475_v43, %v2283_v11  ;;  %v2285_v18 = vadd.f32 %v2284_v2, %v2092_v33  ;;  %v900_v43 = vsel %vm4570_vm5, %v895_v49, %v899_v5  ;;  %v3619_v33 = vrot.slane %v5927_v58, 9 }
 0x172   : > { %v2286_v13 = vpop.f32.mrf.mxu1  ;;  %v2479_v50 = vpop.f32.mrf.mxu0  ;;  %v918_v11 = vrot.slane %v916_v4, 4  ;;  %v2104_v2 = vadd.f32 %v5813_v27, %v5672_v51 }
 0x173   : > { %v5978_v37 = vadd.f32 %v2477_v42, %v2285_v18  ;;  %v2287_v47 = vadd.f32 %v2286_v13, %v2094_v55  ;;  %v917_v27 = vsel %vm4550_vm4, %v3619_v33, %v916_v4 }
 0x174   : > { %v2290_v17 = vpop.f32.mrf.mxu1  ;;  %v2483_v0 = vpop.f32.mrf.mxu0  ;;  %2755 = vmatmul.mubr.bf16.gmra.mxu1 %v5285_v52  ;;  %2948 = vmatmul.mubr.bf16.gmra.mxu0 %v5417_v46  ;;  %v910_v52 = vsel %vm4570_vm5, %v905_v38, %v909_v56  ;;  %v2102_v46 = vadd.f32 %v5808_v3, %v5670_v29  ;;  %v2108_v3 = vadd.f32 %v5818_v48, %v5670_v29 }
 0x175   : > { %v5985_v24 = vadd.f32 %v2479_v50, %v2287_v47  ;;  %v2291_v6 = vadd.f32 %v2290_v17, %v2098_v12  ;;  %2764 = vmatprep.mubr.bf16.mxu1 %v5661_v40  ;;  %2957 = vmatprep.mubr.bf16.mxu0 %v6556_v53  ;;  %v919_v40 = vrot.slane %v5957_v30, 5  ;;  %v3672_v42 = vcombine.low %v900_v43, %v910_v52 }
 0x176   : > { %v2292_v9 = vpop.f32.mrf.mxu1  ;;  %v2485_v63 = vpop.f32.mrf.mxu0  ;;  %v2110_v56 = vadd.f32 %v5827_v8, %v5672_v51 }
 0x177   : > { %v5995_v7 = vadd.f32 %v2483_v0, %v2291_v6  ;;  %v2293_v32 = vadd.f32 %v2292_v9, %v2100_v35  ;;  %v920_v38 = vsel %vm4550_vm4, %v918_v11, %v919_v40  ;;  %v3671_v35 = vcombine.low %v5927_v58, %v5930_v19  ;;  %v6582_v6 = vld [vmem:[#allocation30_spill] sm:$0xff] }
 0x178   : > { %v2294_v62 = vpop.f32.mrf.mxu1  ;;  %v2487_v41 = vpop.f32.mrf.mxu0  ;;  %v3673_v8 = vcombine.low %v917_v27, %v920_v38  ;;  %v2114_v9 = vadd.f32 %v6582_v6, %v5672_v51  ;;  %v6584_v58 = vld [vmem:[#allocation34_spill] sm:$0xff] }
 0x179   : > { %v6001_v5 = vadd.f32 %v2485_v63, %v2293_v32  ;;  %v2295_v44 = vadd.f32 %v2294_v62, %v2102_v46  ;;  %v6583_v46 = vld [vmem:[#allocation32_spill] sm:$0xff]  ;;  %v2120_v19 = vadd.f32 %v6584_v58, %v5672_v51 }
 0x17a   : > { %v2296_v55 = vpop.f32.mrf.mxu1  ;;  %v2489_v18 = vpop.f32.mrf.mxu0 }
 0x17b   : > { %v6005_v13 = vadd.f32 %v2487_v41, %v2295_v44  ;;  %v2297_v50 = vadd.f32 %v2296_v55, %v2104_v2 }
 0x17c   : > { %v2300_v49 = vpop.f32.mrf.mxu1  ;;  %v2493_v30 = vpop.f32.mrf.mxu0  ;;  %2765 = vmatmul.mubr.bf16.gmra.mxu1 %v5649_v39  ;;  %2958 = vmatmul.mubr.bf16.gmra.mxu0 %v5651_v45  ;;  %v2112_v39 = vadd.f32 %v5832_v14, %v5670_v29  ;;  %v2118_v14 = vadd.f32 %v6583_v46, %v5670_v29 }
 0x17d   : > { %v6015_v12 = vadd.f32 %v2489_v18, %v2297_v50  ;;  %v2301_v48 = vadd.f32 %v2300_v49, %v2108_v3  ;;  %2774 = vmatprep.mubr.bf16.mxu1 %v3672_v42  ;;  %2967 = vmatprep.mubr.bf16.mxu0 %v6556_v53  ;;  %v6585_v42 = vld [vmem:[#allocation36_spill] sm:$0xff] }
 0x17e   : > { %v2302_v47 = vpop.f32.mrf.mxu1  ;;  %v2495_v17 = vpop.f32.mrf.mxu0  ;;  %v2122_v55 = vadd.f32 %v6585_v42, %v5670_v29  ;;  %v6587_v29 = vld [vmem:[#allocation6_spill] sm:$0xff] }
 0x17f   : > { %v6020_v45 = vadd.f32 %v2493_v30, %v2301_v48  ;;  %v2303_v0 = vadd.f32 %v2302_v47, %v2110_v56  ;;  %v6586_v30 = vld [vmem:[#allocation38_spill] sm:$0xff] }
 0x180   : > { %v2304_v4 = vpop.f32.mrf.mxu1  ;;  %v2497_v31 = vpop.f32.mrf.mxu0  ;;  %v2124_v27 = vadd.f32 %v6586_v30, %v5672_v51 }
 0x181   : > { %v6026_v63 = vadd.f32 %v2495_v17, %v2303_v0  ;;  %v2305_v53 = vadd.f32 %v2304_v4, %v2112_v39 }
 0x182   : > { %v2306_v43 = vpop.f32.mrf.mxu1  ;;  %v2499_v52 = vpop.f32.mrf.mxu0 }
 0x183   : > { %v6030_v32 = vadd.f32 %v2497_v31, %v2305_v53  ;;  %v2307_v62 = vadd.f32 %v2306_v43, %v2114_v9  ;;  %v6588_v53 = vld [vmem:[#allocation8_spill] sm:$0xff] }
 0x184   : > { %v2310_v41 = vpop.f32.mrf.mxu1  ;;  %v2503_v40 = vpop.f32.mrf.mxu0  ;;  %2775 = vmatmul.mubr.bf16.gmra.mxu1 %v3671_v35  ;;  %2968 = vmatmul.mubr.bf16.gmra.mxu0 %v3673_v8 }
 0x185   : > { %v6034_v33 = vadd.f32 %v2499_v52, %v2307_v62  ;;  %v2311_v11 = vadd.f32 %v2310_v41, %v2118_v14  ;;  %v6589_v14 = vld [vmem:[#allocation9_spill] sm:$0xff] }
 0x186   : > { %v2312_v2 = vpop.f32.mrf.mxu1  ;;  %v2505_v44 = vpop.f32.mrf.mxu0 }
 0x187   : > { %v6038_v18 = vadd.f32 %v2503_v40, %v2311_v11  ;;  %v2313_v3 = vadd.f32 %v2312_v2, %v2120_v19  ;;  %v6590_v19 = vld [vmem:[#allocation14_spill] sm:$0xff] }
 0x188   : > { %v2314_v50 = vpop.f32.mrf.mxu1  ;;  %v2507_v49 = vpop.f32.mrf.mxu0 }
 0x189   : > { %v6042_v38 = vadd.f32 %v2505_v44, %v2313_v3  ;;  %v2315_v56 = vadd.f32 %v2314_v50, %v2122_v55  ;;  %v6591_v55 = vld [vmem:[#allocation11_spill] sm:$0xff] }
 0x18a   : > { %v2316_v48 = vpop.f32.mrf.mxu1  ;;  %v2509_v47 = vpop.f32.mrf.mxu0 }
 0x18b   : > { %v6044_v17 = vadd.f32 %v2507_v49, %v2315_v56  ;;  %v2317_v39 = vadd.f32 %v2316_v48, %v2124_v27  ;;  %v6592_v27 = vld [vmem:[#allocation12_spill] sm:$0xff] }
 0x18c   : > { %v2320_v0 = vpop.f32.mrf.mxu1  ;;  %v2513_v4 = vpop.f32.mrf.mxu0 }
 0x18d   : > { %v6046_v31 = vadd.f32 %v2509_v47, %v2317_v39  ;;  %v2321_v35 = vadd.f32 %v2320_v0, %v6587_v29  ;;  %v6593_v0 = vld [vmem:[#allocation19_spill] sm:$0xff] }
 0x18e   : > { %v2322_v8 = vpop.f32.mrf.mxu1  ;;  %v2515_v6 = vpop.f32.mrf.mxu0 }
 0x18f   : > { %v6049_v9 = vadd.f32 %v2513_v4, %v2321_v35  ;;  %v2323_v51 = vadd.f32 %v2322_v8, %v6588_v53 }
 0x190   : > { %v2324_v43 = vpop.f32.mrf.mxu1  ;;  %v2517_v52 = vpop.f32.mrf.mxu0 }
 0x191   : > { %v6052_v46 = vadd.f32 %v2515_v6, %v2323_v51  ;;  %v2325_v62 = vadd.f32 %v2324_v43, %v6589_v14  ;;  %v6594_v6 = vld [vmem:[#allocation17_spill] sm:$0xff]  ;;  %v6595_v14 = vld [vmem:[#allocation16_spill] sm:$0xff] }
 0x192   : > { %v2326_v41 = vpop.f32.mrf.mxu1  ;;  %v2519_v40 = vpop.f32.mrf.mxu0 }
 0x193   : > { %v6055_v58 = vadd.f32 %v2517_v52, %v2325_v62  ;;  %v2327_v11 = vadd.f32 %v2326_v41, %v6590_v19 }
 0x194   : > { %v2330_v2 = vpop.f32.mrf.mxu1  ;;  %v2523_v44 = vpop.f32.mrf.mxu0 }
 0x195   : > { %v6058_v42 = vadd.f32 %v2519_v40, %v2327_v11  ;;  %v2331_v3 = vadd.f32 %v2330_v2, %v6591_v55  ;;  %v6596_v11 = vld [vmem:[#allocation3_spill] sm:$0xff] }
 0x196   : > { %v2332_v50 = vpop.f32.mrf.mxu1  ;;  %v2525_v49 = vpop.f32.mrf.mxu0 }
 0x197   : > { %v6061_v30 = vadd.f32 %v2523_v44, %v2331_v3  ;;  %v2333_v56 = vadd.f32 %v2332_v50, %v6592_v27  ;;  %v6597_v50 = vld [vmem:[#allocation2_spill] sm:$0xff] }
 0x198   : > { %v2334_v48 = vpop.f32.mrf.mxu1  ;;  %v2527_v47 = vpop.f32.mrf.mxu0 }
 0x199   : > { %v6064_v39 = vadd.f32 %v2525_v49, %v2333_v56  ;;  %v2335_v4 = vadd.f32 %v2334_v48, %v6593_v0 }
 0x19a   : > { %v2336_v29 = vpop.f32.mrf.mxu1  ;;  %v2529_v35 = vpop.f32.mrf.mxu0 }
 0x19b   : > { %v6067_v8 = vadd.f32 %v2527_v47, %v2335_v4  ;;  %v2337_v53 = vadd.f32 %v2336_v29, %v6594_v6  ;;  %v6598_v47 = vld [vmem:[#allocation4_spill] sm:$0xff]  ;;  %v6599_v6 = vld [vmem:[#allocation5_spill] sm:$0xff] }
 0x19c   : > { %v2340_v51 = vpop.f32.mrf.mxu1  ;;  %v2533_v43 = vpop.f32.mrf.mxu0 }
 0x19d   : > { %v6070_v52 = vadd.f32 %v2529_v35, %v2337_v53  ;;  %v2341_v62 = vadd.f32 %v2340_v51, %v6595_v14 }
 0x19e   : > { %v2342_v41 = vpop.f32.mrf.mxu1  ;;  %v2535_v40 = vpop.f32.mrf.mxu0 }
 0x19f   : > { %v6073_v19 = vadd.f32 %v2533_v43, %v2341_v62  ;;  %v2343_v2 = vadd.f32 %v2342_v41, %v6596_v11  ;;  %v6601_v62 = vld [vmem:[#allocation7_spill] sm:$0xff] }
 0x1a0   : > { %v2344_v44 = vpop.f32.mrf.mxu1  ;;  %v2537_v55 = vpop.f32.mrf.mxu0 }
 0x1a1   : > { %v6076_v3 = vadd.f32 %v2535_v40, %v2343_v2  ;;  %v2345_v49 = vadd.f32 %v2344_v44, %v6597_v50  ;;  %v6603_v44 = vld [vmem:[#allocation10_spill] sm:$0xff] }
 0x1a2   : > { %v2346_v27 = vpop.f32.mrf.mxu1  ;;  %v2539_v56 = vpop.f32.mrf.mxu0 }
 0x1a3   : > { %v6079_v48 = vadd.f32 %v2537_v55, %v2345_v49  ;;  %v2347_v0 = vadd.f32 %v2346_v27, %v6598_v47 }
 0x1a4   : > { %v2350_v4 = vpop.f32.mrf.mxu1  ;;  %v2543_v29 = vpop.f32.mrf.mxu0 }
 0x1a5   : > { %v6082_v35 = vadd.f32 %v2539_v56, %v2347_v0  ;;  %v2351_v53 = vadd.f32 %v2350_v4, %v6599_v6  ;;  %v6605_v56 = vld [vmem:[#allocation15_spill] sm:$0xff] }
 0x1a6   : > { %v2352_v51 = vpop.f32.mrf.mxu1  ;;  %v2545_v43 = vpop.f32.mrf.mxu0 }
 0x1a7   : > { %v6085_v14 = vadd.f32 %v2543_v29, %v2351_v53  ;;  %v2353_v41 = vadd.f32 %v2352_v51, %v6601_v62  ;;  %v6607_v29 = vld [vmem:[#allocation13_spill] sm:$0xff] }
 0x1a8   : > { %v2354_v40 = vpop.f32.mrf.mxu1  ;;  %v2547_v11 = vpop.f32.mrf.mxu0 }
 0x1a9   : > { %6600 = vst [vmem:[#allocation21_spill] sm:$0xff] %v6085_v14  ;;  %v6088_v2 = vadd.f32 %v2545_v43, %v2353_v41  ;;  %v2355_v55 = vadd.f32 %v2354_v40, %v6603_v44  ;;  %v6609_v43 = vld [vmem:[#allocation20_spill] sm:$0xff] }
 0x1aa   : > { %v2356_v50 = vpop.f32.mrf.mxu1  ;;  %v2549_v49 = vpop.f32.mrf.mxu0 }
 0x1ab   : > { %6602 = vst [vmem:[#allocation30_spill] sm:$0xff] %v6088_v2  ;;  %v6091_v27 = vadd.f32 %v2547_v11, %v2355_v55  ;;  %v2357_v47 = vadd.f32 %v2356_v50, %v6605_v56  ;;  %v6611_v11 = vld [vmem:[#allocation18_spill] sm:$0xff] }
 0x1ac   : > { %v2360_v0 = vpop.f32.mrf.mxu1  ;;  %v2553_v4 = vpop.f32.mrf.mxu0 }
 0x1ad   : > { %6604 = vst [vmem:[#allocation32_spill] sm:$0xff] %v6091_v27  ;;  %v6094_v6 = vadd.f32 %v2549_v49, %v2357_v47  ;;  %v2361_v53 = vadd.f32 %v2360_v0, %v6607_v29  ;;  %v6613_v49 = vld [vmem:[#allocation22_spill] sm:$0xff] }
 0x1ae   : > { %v2362_v14 = vpop.f32.mrf.mxu1  ;;  %v2555_v51 = vpop.f32.mrf.mxu0 }
 0x1af   : > { %6606 = vst [vmem:[#allocation34_spill] sm:$0xff] %v6094_v6  ;;  %v6097_v62 = vadd.f32 %v2553_v4, %v2361_v53  ;;  %v2363_v41 = vadd.f32 %v2362_v14, %v6609_v43  ;;  %v6615_v4 = vld [vmem:[#allocation23_spill] sm:$0xff] }
 0x1b0   : > { %v2364_v2 = vpop.f32.mrf.mxu1  ;;  %v2557_v40 = vpop.f32.mrf.mxu0 }
 0x1b1   : > { %6608 = vst [vmem:[#allocation36_spill] sm:$0xff] %v6097_v62  ;;  %v6100_v44 = vadd.f32 %v2555_v51, %v2363_v41  ;;  %v2365_v55 = vadd.f32 %v2364_v2, %v6611_v11  ;;  %v6617_v51 = vld [vmem:[#allocation24_spill] sm:$0xff] }
 0x1b2   : > { %v2366_v27 = vpop.f32.mrf.mxu1  ;;  %v2559_v50 = vpop.f32.mrf.mxu0 }
 0x1b3   : > { %6610 = vst [vmem:[#allocation38_spill] sm:$0xff] %v6100_v44  ;;  %v6103_v56 = vadd.f32 %v2557_v40, %v2365_v55  ;;  %v2367_v47 = vadd.f32 %v2366_v27, %v6613_v49  ;;  %v6619_v40 = vld [vmem:[#allocation25_spill] sm:$0xff] }
 0x1b4   : > { %v2370_v6 = vpop.f32.mrf.mxu1  ;;  %v2563_v0 = vpop.f32.mrf.mxu0 }
 0x1b5   : > { %6612 = vst [vmem:[#allocation6_spill] sm:$0xff] %v6103_v56  ;;  %v6106_v29 = vadd.f32 %v2559_v50, %v2367_v47  ;;  %v2371_v53 = vadd.f32 %v2370_v6, %v6615_v4  ;;  %v6621_v50 = vld [vmem:[#allocation26_spill] sm:$0xff] }
 0x1b6   : > { %v2372_v62 = vpop.f32.mrf.mxu1  ;;  %v2565_v14 = vpop.f32.mrf.mxu0 }
 0x1b7   : > { %6614 = vst [vmem:[#allocation8_spill] sm:$0xff] %v6106_v29  ;;  %v6109_v43 = vadd.f32 %v2563_v0, %v2371_v53  ;;  %v2373_v41 = vadd.f32 %v2372_v62, %v6617_v51  ;;  %v6623_v0 = vld [vmem:[#allocation27_spill] sm:$0xff] }
 0x1b8   : > { %v2374_v44 = vpop.f32.mrf.mxu1  ;;  %v2567_v2 = vpop.f32.mrf.mxu0 }
 0x1b9   : > { %6616 = vst [vmem:[#allocation9_spill] sm:$0xff] %v6109_v43  ;;  %v6112_v11 = vadd.f32 %v2565_v14, %v2373_v41  ;;  %v2375_v55 = vadd.f32 %v2374_v44, %v6619_v40  ;;  %v6625_v14 = vld [vmem:[#allocation28_spill] sm:$0xff] }
 0x1ba   : > { %v2376_v56 = vpop.f32.mrf.mxu1  ;;  %v2569_v27 = vpop.f32.mrf.mxu0 }
 0x1bb   : > { %6618 = vst [vmem:[#allocation14_spill] sm:$0xff] %v6112_v11  ;;  %v6115_v49 = vadd.f32 %v2567_v2, %v2375_v55  ;;  %v2377_v47 = vadd.f32 %v2376_v56, %v6621_v50  ;;  %v6627_v2 = vld [vmem:[#allocation29_spill] sm:$0xff] }
 0x1bc   : > { %v2380_v29 = vpop.f32.mrf.mxu1  ;;  %v2573_v6 = vpop.f32.mrf.mxu0 }
 0x1bd   : > { %6620 = vst [vmem:[#allocation11_spill] sm:$0xff] %v6115_v49  ;;  %v6118_v4 = vadd.f32 %v2569_v27, %v2377_v47  ;;  %v2381_v53 = vadd.f32 %v2380_v29, %v6623_v0  ;;  %v6629_v27 = vld [vmem:[#allocation31_spill] sm:$0xff] }
 0x1be   : > { %v2382_v43 = vpop.f32.mrf.mxu1  ;;  %v2575_v62 = vpop.f32.mrf.mxu0 }
 0x1bf   : > { %6622 = vst [vmem:[#allocation12_spill] sm:$0xff] %v6118_v4  ;;  %v6121_v51 = vadd.f32 %v2573_v6, %v2381_v53  ;;  %v2383_v41 = vadd.f32 %v2382_v43, %v6625_v14  ;;  %v6631_v6 = vld [vmem:[#allocation33_spill] sm:$0xff] }
 0x1c0   : > { %v2384_v11 = vpop.f32.mrf.mxu1  ;;  %v2577_v44 = vpop.f32.mrf.mxu0 }
 0x1c1   : > { %6624 = vst [vmem:[#allocation19_spill] sm:$0xff] %v6121_v51  ;;  %v6124_v40 = vadd.f32 %v2575_v62, %v2383_v41  ;;  %v2385_v55 = vadd.f32 %v2384_v11, %v6627_v2  ;;  %v6632_v62 = vld [vmem:[#allocation35_spill] sm:$0xff] }
 0x1c2   : > { %v2386_v49 = vpop.f32.mrf.mxu1  ;;  %v2579_v56 = vpop.f32.mrf.mxu0 }
 0x1c3   : > { %6626 = vst [vmem:[#allocation17_spill] sm:$0xff] %v6124_v40  ;;  %v6127_v50 = vadd.f32 %v2577_v44, %v2385_v55  ;;  %v2387_v47 = vadd.f32 %v2386_v49, %v6629_v27  ;;  %v6633_v44 = vld [vmem:[#allocation37_spill] sm:$0xff] }
 0x1c4   : > { %v2390_v4 = vpop.f32.mrf.mxu1  ;;  %v2583_v29 = vpop.f32.mrf.mxu0 }
 0x1c5   : > { %6628 = vst [vmem:[#allocation16_spill] sm:$0xff] %v6127_v50  ;;  %v6130_v0 = vadd.f32 %v2579_v56, %v2387_v47  ;;  %v2391_v53 = vadd.f32 %v2390_v4, %v6631_v6  ;;  %v6635_v56 = vld [vmem:[#allocation39_spill] sm:$0xff] }
 0x1c6   : > { %v2392_v51 = vpop.f32.mrf.mxu1  ;;  %v2585_v43 = vpop.f32.mrf.mxu0 }
 0x1c7   : > { %6630 = vst [vmem:[#allocation3_spill] sm:$0xff] %v6130_v0  ;;  %v6133_v14 = vadd.f32 %v2583_v29, %v2391_v53  ;;  %v2393_v41 = vadd.f32 %v2392_v51, %v6632_v62 }
 0x1c8   : > { %v2394_v40 = vpop.f32.mrf.mxu1  ;;  %v2587_v11 = vpop.f32.mrf.mxu0 }
 0x1c9   : > { %v6136_v2 = vadd.f32 %v2585_v43, %v2393_v41  ;;  %v2395_v55 = vadd.f32 %v2394_v40, %v6633_v44 }
 0x1ca   : > { %v2396_v49 = vpop.f32.mrf.mxu1  ;;  %v2589_v27 = vpop.f32.mrf.mxu0 }
 0x1cb   : > { %v6139_v50 = vadd.f32 %v2587_v11, %v2395_v55  ;;  %v2397_v47 = vadd.f32 %v2396_v49, %v6635_v56 }
 0x1cc   : > { %v2626_v4 = vpop.f32.mrf.mxu1  ;;  %v2819_v6 = vpop.f32.mrf.mxu0 }
 0x1cd   : > { %6634 = vst [vmem:[#allocation2_spill] sm:$0xff] %v6139_v50  ;;  %v6142_v0 = vadd.f32 %v2589_v27, %v2397_v47  ;;  %v2627_v51 = vadd.f32 %v2626_v4, %v5876_v10 }
 0x1ce   : > { %v2628_v29 = vpop.f32.mrf.mxu1  ;;  %v2821_v53 = vpop.f32.mrf.mxu0 }
 0x1cf   : > { %6636 = vst [vmem:[#allocation4_spill] sm:$0xff] %v6142_v0  ;;  %v2629_v43 = vadd.f32 %v2628_v29, %v5880_v22  ;;  %v2820_v55 = vadd.f32 %v2819_v6, %v2627_v51 }
 0x1d0   : > { %v2630_v62 = vpop.f32.mrf.mxu1  ;;  %v2823_v41 = vpop.f32.mrf.mxu0 }
 0x1d1   : > { %v2631_v40 = vadd.f32 %v2630_v62, %v5884_v54  ;;  %v2822_v50 = vadd.f32 %v2821_v53, %v2629_v43 }
 0x1d2   : > { %v2632_v44 = vpop.f32.mrf.mxu1  ;;  %v2825_v11 = vpop.f32.mrf.mxu0 }
 0x1d3   : > { %v2824_v49 = vadd.f32 %v2823_v41, %v2631_v40  ;;  %v2633_v56 = vadd.f32 %v2632_v44, %v5890_v36  ;;  %v6154_v29 = vmax.f32 %v2822_v50, 0.0 }
 0x1d4   : > { %v2636_v10 = vpop.f32.mrf.mxu1  ;;  %v2829_v22 = vpop.f32.mrf.mxu0 }
 0x1d5   : > { %v3953_v27 = vpack.c.bf16 %v2824_v49, %v2820_v55  ;;  %v2826_v47 = vadd.f32 %v2825_v11, %v2633_v56  ;;  %v2637_v53 = vadd.f32 %v2636_v10, %v5896_v15 }
 0x1d6   : > { %v2638_v4 = vpop.f32.mrf.mxu1  ;;  %v2831_v54 = vpop.f32.mrf.mxu0 }
 0x1d7   : > { %3954 = vst [vmem:[%s6152_s29] sm:$0xff] %v3953_v27   ;;  %v6157_v6 = vmax.f32 %v2826_v47, 0.0  ;;  %v2639_v36 = vadd.f32 %v2638_v4, %v5900_v59  ;;  %v2830_v15 = vadd.f32 %v2829_v22, %v2637_v53 }
 0x1d8   : > { %v2640_v51 = vpop.f32.mrf.mxu1  ;;  %v2833_v43 = vpop.f32.mrf.mxu0 }
 0x1d9   : > { %v4033_v62 = vpack.c.bf16 %v6157_v6, %v6154_v29  ;;  %v2641_v50 = vadd.f32 %v2640_v51, %v5904_v60  ;;  %v2832_v44 = vadd.f32 %v2831_v54, %v2639_v36 }
 0x1da   : > { %v2642_v41 = vpop.f32.mrf.mxu1  ;;  %v2835_v40 = vpop.f32.mrf.mxu0 }
 0x1db   : > { %4034 = vst [vmem:[%s6164_s7] sm:$0xff] %v4033_v62   ;;  %v2834_v59 = vadd.f32 %v2833_v43, %v2641_v50  ;;  %v2643_v11 = vadd.f32 %v2642_v41, %v5910_v16  ;;  %v6171_v4 = vmax.f32 %v2832_v44, 0.0 }
 0x1dc   : > { %v2646_v55 = vpop.f32.mrf.mxu1  ;;  %v2839_v49 = vpop.f32.mrf.mxu0 }
 0x1dd   : > { %v3958_v56 = vpack.c.bf16 %v2834_v59, %v2830_v15  ;;  %v2836_v10 = vadd.f32 %v2835_v40, %v2643_v11  ;;  %v2647_v60 = vadd.f32 %v2646_v55, %v5916_v23 }
 0x1de   : > { %v2648_v27 = vpop.f32.mrf.mxu1  ;;  %v2841_v47 = vpop.f32.mrf.mxu0 }
 0x1df   : > { %4110 = vst [vmem:[%s6152_s29 + $0x8] sm:$0xff] %v3958_v56   ;;  %v6174_v0 = vmax.f32 %v2836_v10, 0.0  ;;  %v2649_v22 = vadd.f32 %v2648_v27, %v5920_v34  ;;  %v2840_v62 = vadd.f32 %v2839_v49, %v2647_v60 }
 0x1e0   : > { %v2650_v54 = vpop.f32.mrf.mxu1  ;;  %v2843_v53 = vpop.f32.mrf.mxu0 }
 0x1e1   : > { %v4038_v16 = vpack.c.bf16 %v6174_v0, %v6171_v4  ;;  %v2651_v36 = vadd.f32 %v2650_v54, %v5924_v61  ;;  %v2842_v50 = vadd.f32 %v2841_v47, %v2649_v22 }
 0x1e2   : > { %v2652_v51 = vpop.f32.mrf.mxu1  ;;  %v2845_v43 = vpop.f32.mrf.mxu0 }
 0x1e3   : > { %4125 = vst [vmem:[%s6164_s7 + $0x8] sm:$0xff] %v4038_v16   ;;  %v2844_v41 = vadd.f32 %v2843_v53, %v2651_v36  ;;  %v2653_v40 = vadd.f32 %v2652_v51, %v5936_v20  ;;  %v6183_v55 = vmax.f32 %v2842_v50, 0.0 }
 0x1e4   : > { %v2656_v15 = vpop.f32.mrf.mxu1  ;;  %v2849_v23 = vpop.f32.mrf.mxu0 }
 0x1e5   : > { %v3963_v34 = vpack.c.bf16 %v2844_v41, %v2840_v62  ;;  %v2846_v44 = vadd.f32 %v2845_v43, %v2653_v40  ;;  %v2657_v61 = vadd.f32 %v2656_v15, %v5946_v28 }
 0x1e6   : > { %v2658_v59 = vpop.f32.mrf.mxu1  ;;  %v2851_v11 = vpop.f32.mrf.mxu0 }
 0x1e7   : > { %4111 = vst [vmem:[%s6152_s29 + $0x10] sm:$0xff] %v3963_v34   ;;  %v6186_v56 = vmax.f32 %v2846_v44, 0.0  ;;  %v2659_v49 = vadd.f32 %v2658_v59, %v5950_v57  ;;  %v2850_v54 = vadd.f32 %v2849_v23, %v2657_v61 }
 0x1e8   : > { %v2660_v10 = vpop.f32.mrf.mxu1  ;;  %v2853_v27 = vpop.f32.mrf.mxu0 }
 0x1e9   : > { %v4043_v20 = vpack.c.bf16 %v6186_v56, %v6183_v55  ;;  %v2661_v47 = vadd.f32 %v2660_v10, %v5954_v26  ;;  %v2852_v53 = vadd.f32 %v2851_v11, %v2659_v49 }
 0x1ea   : > { %v2662_v60 = vpop.f32.mrf.mxu1  ;;  %v2855_v22 = vpop.f32.mrf.mxu0 }
 0x1eb   : > { %4126 = vst [vmem:[%s6164_s7 + $0x10] sm:$0xff] %v4043_v20   ;;  %v2854_v16 = vadd.f32 %v2853_v27, %v2661_v47  ;;  %v2663_v36 = vadd.f32 %v2662_v60, %v5963_v1  ;;  %v6195_v41 = vmax.f32 %v2852_v53, 0.0 }
 0x1ec   : > { %v2666_v51 = vpop.f32.mrf.mxu1  ;;  %v2859_v28 = vpop.f32.mrf.mxu0 }
 0x1ed   : > { %v3968_v57 = vpack.c.bf16 %v2854_v16, %v2850_v54  ;;  %v2856_v43 = vadd.f32 %v2855_v22, %v2663_v36  ;;  %v2667_v26 = vadd.f32 %v2666_v51, %v5970_v21 }
 0x1ee   : > { %v2668_v62 = vpop.f32.mrf.mxu1  ;;  %v2861_v50 = vpop.f32.mrf.mxu0 }
 0x1ef   : > { %4112 = vst [vmem:[%s6152_s29 + $0x18] sm:$0xff] %v3968_v57   ;;  %v6198_v40 = vmax.f32 %v2856_v43, 0.0  ;;  %v2669_v15 = vadd.f32 %v2668_v62, %v5974_v25  ;;  %v2860_v61 = vadd.f32 %v2859_v28, %v2667_v26 }
 0x1f0   : > { %v2670_v23 = vpop.f32.mrf.mxu1  ;;  %v2863_v34 = vpop.f32.mrf.mxu0 }
 0x1f1   : > { %v4048_v1 = vpack.c.bf16 %v6198_v40, %v6195_v41  ;;  %v2671_v44 = vadd.f32 %v2670_v23, %v5978_v37  ;;  %v2862_v49 = vadd.f32 %v2861_v50, %v2669_v15 }
 0x1f2   : > { %v2672_v59 = vpop.f32.mrf.mxu1  ;;  %v2865_v11 = vpop.f32.mrf.mxu0 }
 0x1f3   : > { %4127 = vst [vmem:[%s6164_s7 + $0x18] sm:$0xff] %v4048_v1   ;;  %v2864_v10 = vadd.f32 %v2863_v34, %v2671_v44  ;;  %v2673_v27 = vadd.f32 %v2672_v59, %v5985_v24  ;;  %v6207_v54 = vmax.f32 %v2862_v49, 0.0 }
 0x1f4   : > { %v2676_v20 = vpop.f32.mrf.mxu1  ;;  %v2869_v21 = vpop.f32.mrf.mxu0 }
 0x1f5   : > { %v3973_v25 = vpack.c.bf16 %v2864_v10, %v2860_v61  ;;  %v2866_v47 = vadd.f32 %v2865_v11, %v2673_v27  ;;  %v2677_v37 = vadd.f32 %v2676_v20, %v5995_v7  ;;  %v3330_v20 = vadd.f32 %v6157_v6, %v6154_v29 }
 0x1f6   : > { %v2678_v60 = vpop.f32.mrf.mxu1  ;;  %v2871_v22 = vpop.f32.mrf.mxu0 }
 0x1f7   : > { %4113 = vst [vmem:[%s6152_s29 + $0x20] sm:$0xff] %v3973_v25   ;;  %v6210_v53 = vmax.f32 %v2866_v47, 0.0  ;;  %v2679_v16 = vadd.f32 %v2678_v60, %v6001_v5  ;;  %v2870_v62 = vadd.f32 %v2869_v21, %v2677_v37 }
 0x1f8   : > { %v2680_v36 = vpop.f32.mrf.mxu1  ;;  %v2873_v51 = vpop.f32.mrf.mxu0 }
 0x1f9   : > { %v4053_v24 = vpack.c.bf16 %v6210_v53, %v6207_v54  ;;  %v2681_v28 = vadd.f32 %v2680_v36, %v6005_v13  ;;  %v2872_v50 = vadd.f32 %v2871_v22, %v2679_v16 }
 0x1fa   : > { %v2682_v57 = vpop.f32.mrf.mxu1  ;;  %v2875_v43 = vpop.f32.mrf.mxu0 }
 0x1fb   : > { %4128 = vst [vmem:[%s6164_s7 + $0x20] sm:$0xff] %v4053_v24   ;;  %v2874_v26 = vadd.f32 %v2873_v51, %v2681_v28  ;;  %v2683_v15 = vadd.f32 %v2682_v57, %v6015_v12  ;;  %v6219_v59 = vmax.f32 %v2872_v50, 0.0 }
 0x1fc   : > { %v2686_v23 = vpop.f32.mrf.mxu1  ;;  %v2879_v7 = vpop.f32.mrf.mxu0 }
 0x1fd   : > { %v3978_v34 = vpack.c.bf16 %v2874_v26, %v2870_v62  ;;  %v2876_v5 = vadd.f32 %v2875_v43, %v2683_v15  ;;  %v2687_v13 = vadd.f32 %v2686_v23, %v6020_v45 }
 0x1fe   : > { %v2688_v1 = vpop.f32.mrf.mxu1  ;;  %v2881_v44 = vpop.f32.mrf.mxu0 }
 0x1ff   : > { %4114 = vst [vmem:[%s6152_s29 + $0x28] sm:$0xff] %v3978_v34   ;;  %v6222_v11 = vmax.f32 %v2876_v5, 0.0  ;;  %v2689_v61 = vadd.f32 %v2688_v1, %v6026_v63  ;;  %v2880_v47 = vadd.f32 %v2879_v7, %v2687_v13  ;;  %v3331_v63 = vadd.f32 %v3330_v20, %v6171_v4 }
 0x200   : > { %v2690_v49 = vpop.f32.mrf.mxu1  ;;  %v2883_v10 = vpop.f32.mrf.mxu0 }
 0x201   : > { %v4058_v12 = vpack.c.bf16 %v6222_v11, %v6219_v59  ;;  %v2691_v27 = vadd.f32 %v2690_v49, %v6030_v32  ;;  %v2882_v60 = vadd.f32 %v2881_v44, %v2689_v61  ;;  %v3332_v32 = vadd.f32 %v3331_v63, %v6174_v0 }
 0x202   : > { %v2692_v21 = vpop.f32.mrf.mxu1  ;;  %v2885_v25 = vpop.f32.mrf.mxu0 }
 0x203   : > { %4129 = vst [vmem:[%s6164_s7 + $0x28] sm:$0xff] %v4058_v12   ;;  %v2884_v22 = vadd.f32 %v2883_v10, %v2691_v27  ;;  %v2693_v45 = vadd.f32 %v2692_v21, %v6034_v33  ;;  %v6235_v57 = vmax.f32 %v2882_v60, 0.0  ;;  %v3333_v50 = vadd.f32 %v3332_v32, %v6183_v55 }
 0x204   : > { %v2696_v37 = vpop.f32.mrf.mxu1  ;;  %v2889_v16 = vpop.f32.mrf.mxu0 }
 0x205   : > { %v3983_v36 = vpack.c.bf16 %v2884_v22, %v2880_v47  ;;  %v2886_v51 = vadd.f32 %v2885_v25, %v2693_v45  ;;  %v2697_v62 = vadd.f32 %v2696_v37, %v6038_v18  ;;  %v3334_v34 = vadd.f32 %v3333_v50, %v6186_v56 }
 0x206   : > { %v2698_v24 = vpop.f32.mrf.mxu1  ;;  %v2891_v28 = vpop.f32.mrf.mxu0 }
 0x207   : > { %4115 = vst [vmem:[%s6152_s29 + $0x30] sm:$0xff] %v3983_v36   ;;  %v6238_v43 = vmax.f32 %v2886_v51, 0.0  ;;  %v2699_v33 = vadd.f32 %v2698_v24, %v6042_v38  ;;  %v2890_v44 = vadd.f32 %v2889_v16, %v2697_v62  ;;  %v3335_v61 = vadd.f32 %v3334_v34, %v6195_v41 }
 0x208   : > { %v2700_v26 = vpop.f32.mrf.mxu1  ;;  %v2893_v15 = vpop.f32.mrf.mxu0 }
 0x209   : > { %v4063_v23 = vpack.c.bf16 %v6238_v43, %v6235_v57  ;;  %v2701_v7 = vadd.f32 %v2700_v26, %v6044_v17  ;;  %v2892_v13 = vadd.f32 %v2891_v28, %v2699_v33  ;;  %v3336_v20 = vadd.f32 %v3335_v61, %v6198_v40 }
 0x20a   : > { %v2702_v5 = vpop.f32.mrf.mxu1  ;;  %v2895_v1 = vpop.f32.mrf.mxu0 }
 0x20b   : > { %4130 = vst [vmem:[%s6164_s7 + $0x30] sm:$0xff] %v4063_v23   ;;  %v2894_v18 = vadd.f32 %v2893_v15, %v2701_v7  ;;  %v2703_v38 = vadd.f32 %v2702_v5, %v6046_v31  ;;  %v6251_v25 = vmax.f32 %v2892_v13, 0.0  ;;  %v3337_v22 = vadd.f32 %v3336_v20, %v6207_v54 }
 0x20c   : > { %v2706_v49 = vpop.f32.mrf.mxu1  ;;  %v2899_v10 = vpop.f32.mrf.mxu0 }
 0x20d   : > { %v3988_v12 = vpack.c.bf16 %v2894_v18, %v2890_v44  ;;  %v2896_v27 = vadd.f32 %v2895_v1, %v2703_v38  ;;  %v2707_v60 = vadd.f32 %v2706_v49, %v6049_v9  ;;  %v3338_v36 = vadd.f32 %v3337_v22, %v6210_v53 }
 0x20e   : > { %v2708_v17 = vpop.f32.mrf.mxu1  ;;  %v2901_v21 = vpop.f32.mrf.mxu0 }
 0x20f   : > { %4116 = vst [vmem:[%s6152_s29 + $0x38] sm:$0xff] %v3988_v12   ;;  %v6254_v47 = vmax.f32 %v2896_v27, 0.0  ;;  %v2709_v31 = vadd.f32 %v2708_v17, %v6052_v46  ;;  %v2900_v24 = vadd.f32 %v2899_v10, %v2707_v60  ;;  %v3339_v62 = vadd.f32 %v3338_v36, %v6219_v59 }
 0x210   : > { %v2710_v45 = vpop.f32.mrf.mxu1  ;;  %v2903_v63 = vpop.f32.mrf.mxu0 }
 0x211   : > { %v4068_v37 = vpack.c.bf16 %v6254_v47, %v6251_v25  ;;  %v2711_v16 = vadd.f32 %v2710_v45, %v6055_v58  ;;  %v2902_v28 = vadd.f32 %v2901_v21, %v2709_v31  ;;  %v3340_v23 = vadd.f32 %v3339_v62, %v6222_v11 }
 0x212   : > { %v2712_v51 = vpop.f32.mrf.mxu1  ;;  %v2905_v32 = vpop.f32.mrf.mxu0 }
 0x213   : > { %4131 = vst [vmem:[%s6164_s7 + $0x38] sm:$0xff] %v4068_v37   ;;  %v2904_v9 = vadd.f32 %v2903_v63, %v2711_v16  ;;  %v2713_v46 = vadd.f32 %v2712_v51, %v6058_v42  ;;  %v6267_v34 = vmax.f32 %v2902_v28, 0.0  ;;  %v3341_v44 = vadd.f32 %v3340_v23, %v6235_v57 }
 0x214   : > { %v2716_v33 = vpop.f32.mrf.mxu1  ;;  %v2909_v50 = vpop.f32.mrf.mxu0 }
 0x215   : > { %v3993_v26 = vpack.c.bf16 %v2904_v9, %v2900_v24  ;;  %v2906_v15 = vadd.f32 %v2905_v32, %v2713_v46  ;;  %v2717_v1 = vadd.f32 %v2716_v33, %v6061_v30  ;;  %v3342_v49 = vadd.f32 %v3341_v44, %v6238_v43  ;;  %v6637_v44 = vld [vmem:[#allocation21_spill] sm:$0xff] }
 0x216   : > { %v2718_v58 = vpop.f32.mrf.mxu1  ;;  %v2911_v7 = vpop.f32.mrf.mxu0 }
 0x217   : > { %4117 = vst [vmem:[%s6152_s29 + $0x40] sm:$0xff] %v3993_v26   ;;  %v6270_v5 = vmax.f32 %v2906_v15, 0.0  ;;  %v2719_v42 = vadd.f32 %v2718_v58, %v6064_v39  ;;  %v2910_v27 = vadd.f32 %v2909_v50, %v2717_v1  ;;  %v3343_v17 = vadd.f32 %v3342_v49, %v6251_v25  ;;  %v6638_v49 = vld [vmem:[#allocation30_spill] sm:$0xff] }
 0x218   : > { %v2720_v13 = vpop.f32.mrf.mxu1  ;;  %v2913_v18 = vpop.f32.mrf.mxu0 }
 0x219   : > { %v4073_v38 = vpack.c.bf16 %v6270_v5, %v6267_v34  ;;  %v2721_v61 = vadd.f32 %v2720_v13, %v6067_v8  ;;  %v2912_v20 = vadd.f32 %v2911_v7, %v2719_v42  ;;  %v3344_v45 = vadd.f32 %v3343_v17, %v6254_v47 }
 0x21a   : > { %v2722_v10 = vpop.f32.mrf.mxu1  ;;  %v2915_v12 = vpop.f32.mrf.mxu0 }
 0x21b   : > { %4132 = vst [vmem:[%s6164_s7 + $0x40] sm:$0xff] %v4073_v38   ;;  %v2914_v30 = vadd.f32 %v2913_v18, %v2721_v61  ;;  %v2723_v39 = vadd.f32 %v2722_v10, %v6070_v52  ;;  %v6283_v37 = vmax.f32 %v2912_v20, 0.0  ;;  %v3345_v24 = vadd.f32 %v3344_v45, %v6267_v34 }
 0x21c   : > { %v2726_v21 = vpop.f32.mrf.mxu1  ;;  %v2919_v60 = vpop.f32.mrf.mxu0 }
 0x21d   : > { %v3998_v31 = vpack.c.bf16 %v2914_v30, %v2910_v27  ;;  %v2916_v22 = vadd.f32 %v2915_v12, %v2723_v39  ;;  %v2727_v36 = vadd.f32 %v2726_v21, %v6073_v19  ;;  %v3346_v50 = vadd.f32 %v3345_v24, %v6270_v5  ;;  %v6639_v39 = vld [vmem:[#allocation32_spill] sm:$0xff] }
 0x21e   : > { %v2728_v8 = vpop.f32.mrf.mxu1  ;;  %v2921_v63 = vpop.f32.mrf.mxu0 }
 0x21f   : > { %4118 = vst [vmem:[%s6152_s29 + $0x48] sm:$0xff] %v3998_v31   ;;  %v6286_v16 = vmax.f32 %v2916_v22, 0.0  ;;  %v2729_v52 = vadd.f32 %v2728_v8, %v6076_v3  ;;  %v2920_v26 = vadd.f32 %v2919_v60, %v2727_v36  ;;  %v3347_v58 = vadd.f32 %v3346_v50, %v6283_v37 }
 0x220   : > { %v2730_v51 = vpop.f32.mrf.mxu1  ;;  %v2923_v32 = vpop.f32.mrf.mxu0 }
 0x221   : > { %v4078_v28 = vpack.c.bf16 %v6286_v16, %v6283_v37  ;;  %v2922_v9 = vadd.f32 %v2921_v63, %v2729_v52  ;;  %v2731_v46 = vadd.f32 %v2730_v51, %v6079_v48  ;;  %v3348_v38 = vadd.f32 %v3347_v58, %v6286_v16  ;;  %v6640_v63 = vld [vmem:[#allocation34_spill] sm:$0xff] }
 0x222   : > { %v2732_v62 = vpop.f32.mrf.mxu1  ;;  %v2925_v33 = vpop.f32.mrf.mxu0 }
 0x223   : > { %4133 = vst [vmem:[%s6164_s7 + $0x48] sm:$0xff] %v4078_v28   ;;  %v2924_v19 = vadd.f32 %v2923_v32, %v2731_v46  ;;  %v2733_v3 = vadd.f32 %v2732_v62, %v6082_v35  ;;  %v6298_v7 = vmax.f32 %v2922_v9, 0.0 }
 0x224   : > { %v2736_v15 = vpop.f32.mrf.mxu1  ;;  %v2929_v23 = vpop.f32.mrf.mxu0 }
 0x225   : > { %v4003_v1 = vpack.c.bf16 %v2924_v19, %v2920_v26  ;;  %v2926_v42 = vadd.f32 %v2925_v33, %v2733_v3  ;;  %v2737_v48 = vadd.f32 %v2736_v15, %v6637_v44  ;;  %v3349_v27 = vadd.f32 %v3348_v38, %v6298_v7  ;;  %v6641_v33 = vld [vmem:[#allocation36_spill] sm:$0xff]  ;;  %v6642_v26 = vld [vmem:[#allocation38_spill] sm:$0xff] }
 0x226   : > { %v2738_v13 = vpop.f32.mrf.mxu1  ;;  %v2931_v18 = vpop.f32.mrf.mxu0 }
 0x227   : > { %4119 = vst [vmem:[%s6152_s29 + $0x50] sm:$0xff] %v4003_v1   ;;  %v6303_v61 = vmax.f32 %v2926_v42, 0.0  ;;  %v2739_v35 = vadd.f32 %v2738_v13, %v6638_v49  ;;  %v2930_v21 = vadd.f32 %v2929_v23, %v2737_v48  ;;  %v6643_v42 = vld [vmem:[#allocation6_spill] sm:$0xff] }
 0x228   : > { %v2740_v10 = vpop.f32.mrf.mxu1  ;;  %v2933_v12 = vpop.f32.mrf.mxu0 }
 0x229   : > { %v4083_v20 = vpack.c.bf16 %v6303_v61, %v6298_v7  ;;  %v2932_v30 = vadd.f32 %v2931_v18, %v2739_v35  ;;  %v2741_v17 = vadd.f32 %v2740_v10, %v6639_v39  ;;  %v3350_v22 = vadd.f32 %v3349_v27, %v6303_v61  ;;  %v6644_v35 = vld [vmem:[#allocation8_spill] sm:$0xff] }
 0x22a   : > { %v2742_v60 = vpop.f32.mrf.mxu1  ;;  %v2935_v31 = vpop.f32.mrf.mxu0 }
 0x22b   : > { %4134 = vst [vmem:[%s6164_s7 + $0x50] sm:$0xff] %v4083_v20   ;;  %v6312_v45 = vmax.f32 %v2932_v30, 0.0  ;;  %v2934_v8 = vadd.f32 %v2933_v12, %v2741_v17  ;;  %v2743_v36 = vadd.f32 %v2742_v60, %v6640_v63 }
 0x22c   : > { %v2746_v52 = vpop.f32.mrf.mxu1  ;;  %v2939_v51 = vpop.f32.mrf.mxu0 }
 0x22d   : > { %v3351_v32 = vadd.f32 %v3350_v22, %v6312_v45  ;;  %v4008_v24 = vpack.c.bf16 %v2934_v8, %v2930_v21  ;;  %v2936_v28 = vadd.f32 %v2935_v31, %v2743_v36  ;;  %v2747_v50 = vadd.f32 %v2746_v52, %v6641_v33  ;;  %v6645_v31 = vld [vmem:[#allocation9_spill] sm:$0xff]  ;;  %v6646_v8 = vld [vmem:[#allocation14_spill] sm:$0xff] }
 0x22e   : > { %v2748_v9 = vpop.f32.mrf.mxu1  ;;  %v2941_v46 = vpop.f32.mrf.mxu0 }
 0x22f   : > { %4120 = vst [vmem:[%s6152_s29 + $0x58] sm:$0xff] %v4008_v24   ;;  %v6317_v62 = vmax.f32 %v2936_v28, 0.0  ;;  %v2749_v19 = vadd.f32 %v2748_v9, %v6642_v26  ;;  %v2940_v18 = vadd.f32 %v2939_v51, %v2747_v50  ;;  %v6647_v28 = vld [vmem:[#allocation11_spill] sm:$0xff] }
 0x230   : > { %v2750_v3 = vpop.f32.mrf.mxu1  ;;  %v2943_v15 = vpop.f32.mrf.mxu0 }
 0x231   : > { %v4088_v23 = vpack.c.bf16 %v6317_v62, %v6312_v45  ;;  %v3352_v58 = vadd.f32 %v3351_v32, %v6317_v62  ;;  %v2942_v1 = vadd.f32 %v2941_v46, %v2749_v19  ;;  %v2751_v44 = vadd.f32 %v2750_v3, %v6643_v42  ;;  %v6648_v3 = vld [vmem:[#allocation12_spill] sm:$0xff] }
 0x232   : > { %v2752_v48 = vpop.f32.mrf.mxu1  ;;  %v2945_v13 = vpop.f32.mrf.mxu0 }
 0x233   : > { %4135 = vst [vmem:[%s6164_s7 + $0x58] sm:$0xff] %v4088_v23   ;;  %v6326_v38 = vmax.f32 %v2942_v1, 0.0  ;;  %v2944_v49 = vadd.f32 %v2943_v15, %v2751_v44  ;;  %v2753_v10 = vadd.f32 %v2752_v48, %v6644_v35 }
 0x234   : > { %v2756_v12 = vpop.f32.mrf.mxu1  ;;  %v2949_v27 = vpop.f32.mrf.mxu0 }
 0x235   : > { %v3353_v20 = vadd.f32 %v3352_v58, %v6326_v38  ;;  %v4013_v30 = vpack.c.bf16 %v2944_v49, %v2940_v18  ;;  %v2946_v39 = vadd.f32 %v2945_v13, %v2753_v10  ;;  %v2757_v22 = vadd.f32 %v2756_v12, %v6645_v31  ;;  %v6649_v49 = vld [vmem:[#allocation19_spill] sm:$0xff]  ;;  %v6650_v10 = vld [vmem:[#allocation17_spill] sm:$0xff] }
 0x236   : > { %v2758_v17 = vpop.f32.mrf.mxu1  ;;  %v2951_v21 = vpop.f32.mrf.mxu0 }
 0x237   : > { %4121 = vst [vmem:[%s6152_s29 + $0x60] sm:$0xff] %v4013_v30   ;;  %v6331_v60 = vmax.f32 %v2946_v39, 0.0  ;;  %v2759_v63 = vadd.f32 %v2758_v17, %v6646_v8  ;;  %v2950_v50 = vadd.f32 %v2949_v27, %v2757_v22 }
 0x238   : > { %v2760_v36 = vpop.f32.mrf.mxu1  ;;  %v2953_v52 = vpop.f32.mrf.mxu0 }
 0x239   : > { %v4093_v51 = vpack.c.bf16 %v6331_v60, %v6326_v38  ;;  %v3354_v32 = vadd.f32 %v3353_v20, %v6331_v60  ;;  %v2952_v24 = vadd.f32 %v2951_v21, %v2759_v63  ;;  %v2761_v9 = vadd.f32 %v2760_v36, %v6647_v28  ;;  %v6651_v21 = vld [vmem:[#allocation16_spill] sm:$0xff] }
 0x23a   : > { %v2762_v46 = vpop.f32.mrf.mxu1  ;;  %v2955_v33 = vpop.f32.mrf.mxu0 }
 0x23b   : > { %4136 = vst [vmem:[%s6164_s7 + $0x60] sm:$0xff] %v4093_v51   ;;  %v6340_v26 = vmax.f32 %v2952_v24, 0.0  ;;  %v2954_v19 = vadd.f32 %v2953_v52, %v2761_v9  ;;  %v2763_v15 = vadd.f32 %v2762_v46, %v6648_v3  ;;  %v6652_v51 = vld [vmem:[#allocation3_spill] sm:$0xff] }
 0x23c   : > { %v2766_v23 = vpop.f32.mrf.mxu1  ;;  %v2959_v58 = vpop.f32.mrf.mxu0 }
 0x23d   : > { %v3355_v1 = vadd.f32 %v3354_v32, %v6340_v26  ;;  %v4018_v42 = vpack.c.bf16 %v2954_v19, %v2950_v50  ;;  %v2956_v44 = vadd.f32 %v2955_v33, %v2763_v15  ;;  %v2767_v35 = vadd.f32 %v2766_v23, %v6649_v49 }
 0x23e   : > { %v2768_v48 = vpop.f32.mrf.mxu1  ;;  %v2961_v13 = vpop.f32.mrf.mxu0 }
 0x23f   : > { %4122 = vst [vmem:[%s6152_s29 + $0x68] sm:$0xff] %v4018_v42   ;;  %v6345_v18 = vmax.f32 %v2956_v44, 0.0  ;;  %v2769_v12 = vadd.f32 %v2768_v48, %v6650_v10  ;;  %v2960_v63 = vadd.f32 %v2959_v58, %v2767_v35 }
 0x240   : > { %v2770_v27 = vpop.f32.mrf.mxu1  ;;  %v2963_v20 = vpop.f32.mrf.mxu0 }
 0x241   : > { %v4098_v30 = vpack.c.bf16 %v6345_v18, %v6340_v26  ;;  %v3356_v39 = vadd.f32 %v3355_v1, %v6345_v18  ;;  %v2962_v17 = vadd.f32 %v2961_v13, %v2769_v12  ;;  %v2771_v31 = vadd.f32 %v2770_v27, %v6651_v21  ;;  %v6653_v13 = vld [vmem:[#allocation2_spill] sm:$0xff]  ;;  %v6654_v27 = vld [vmem:[#allocation4_spill] sm:$0xff] }
 0x242   : > { %v2772_v22 = vpop.f32.mrf.mxu1  ;;  %v2965_v8 = vpop.f32.mrf.mxu0 }
 0x243   : > { %4137 = vst [vmem:[%s6164_s7 + $0x68] sm:$0xff] %v4098_v30   ;;  %v6354_v36 = vmax.f32 %v2962_v17, 0.0  ;;  %v2964_v52 = vadd.f32 %v2963_v20, %v2771_v31  ;;  %v2773_v32 = vadd.f32 %v2772_v22, %v6652_v51 }
 0x244   : > { %v2776_v24 = vpop.f32.mrf.mxu1  ;;  %v2969_v28 = vpop.f32.mrf.mxu0 }
 0x245   : > { %v3357_v9 = vadd.f32 %v3356_v39, %v6354_v36  ;;  %v4023_v46 = vpack.c.bf16 %v2964_v52, %v2960_v63  ;;  %v2966_v33 = vadd.f32 %v2965_v8, %v2773_v32  ;;  %v2777_v15 = vadd.f32 %v2776_v24, %v6133_v14 }
 0x246   : > { %v2778_v50 = vpop.f32.mrf.mxu1  ;;  %v2971_v19 = vpop.f32.mrf.mxu0 }
 0x247   : > { %4123 = vst [vmem:[%s6152_s29 + $0x70] sm:$0xff] %v4023_v46   ;;  %v6359_v3 = vmax.f32 %v2966_v33, 0.0  ;;  %v2779_v23 = vadd.f32 %v2778_v50, %v6136_v2  ;;  %v2970_v10 = vadd.f32 %v2969_v28, %v2777_v15 }
 0x248   : > { %v2780_v58 = vpop.f32.mrf.mxu1  ;;  %v2973_v1 = vpop.f32.mrf.mxu0 }
 0x249   : > { %v4103_v42 = vpack.c.bf16 %v6359_v3, %v6354_v36  ;;  %v3358_v44 = vadd.f32 %v3357_v9, %v6359_v3  ;;  %v2972_v48 = vadd.f32 %v2971_v19, %v2779_v23  ;;  %v2781_v49 = vadd.f32 %v2780_v58, %v6653_v13 }
 0x24a   : > { %v2782_v35 = vpop.f32.mrf.mxu1  ;;  %v2975_v20 = vpop.f32.mrf.mxu0 }
 0x24b   : > { %4138 = vst [vmem:[%s6164_s7 + $0x70] sm:$0xff] %v4103_v42   ;;  %v6368_v12 = vmax.f32 %v2972_v48, 0.0  ;;  %v2974_v14 = vadd.f32 %v2973_v1, %v2781_v49  ;;  %v2783_v2 = vadd.f32 %v2782_v35, %v6654_v27 }
 0x24d   : > { %v3359_v30 = vadd.f32 %v3358_v44, %v6368_v12  ;;  %v4028_v39 = vpack.c.bf16 %v2974_v14, %v2970_v10  ;;  %v2976_v17 = vadd.f32 %v2975_v20, %v2783_v2 }
 0x24f   : > { %4124 = vst [vmem:[%s6152_s29 + $0x78] sm:$0xff] %v4028_v39   ;;  %v6373_v21 = vmax.f32 %v2976_v17, 0.0 }
 0x251   : > { %v4108_v31 = vpack.c.bf16 %v6373_v21, %v6368_v12  ;;  %v3360_v22 = vadd.f32 %v3359_v30, %v6373_v21 }
 0x253   : > { %4139 = vst [vmem:[%s6164_s7 + $0x78] sm:$0xff] %v4108_v31   ;;  %v3361_v8 = vrot.slane %v3360_v22, 4 }
 0x255   : > { %v3362_v63 = vadd.f32 %v3361_v8, %v3360_v22 }
 0x257   : > { %v3363_v52 = vrot.slane %v3362_v63, 2 }
 0x259   : > { %v3364_v51 = vadd.f32 %v3363_v52, %v3362_v63 }
 0x25b   : > { %v3365_v32 = vrot.slane %v3364_v51, 1 }
 0x25d   : > { %v6379_v24 = vadd.f32 %v3365_v32, %v3364_v51 }
 0x25f   : > { %v6382_v28 = vmul.f32 0.00390625, %v6379_v24 }
 0x261   : > { %v3368_v9 = vsub.f32 %v6154_v29, %v6382_v28  ;;  %v3369_v46 = vsub.f32 %v6157_v6, %v6382_v28  ;;  %v3370_v33 = vsub.f32 %v6171_v4, %v6382_v28  ;;  %v3371_v15 = vsub.f32 %v6174_v0, %v6382_v28 }
 0x262   : > { %v3372_v23 = vsub.f32 %v6183_v55, %v6382_v28  ;;  %v3373_v42 = vsub.f32 %v6186_v56, %v6382_v28  ;;  %v3374_v6 = vsub.f32 %v6195_v41, %v6382_v28  ;;  %v3375_v13 = vsub.f32 %v6198_v40, %v6382_v28 }
 0x263   : > { %v3400_v50 = vmul.f32 %v3368_v9, %v3368_v9  ;;  %v3401_v19 = vmul.f32 %v3369_v46, %v3369_v46  ;;  %v3402_v58 = vmul.f32 %v3370_v33, %v3370_v33  ;;  %v3403_v29 = vmul.f32 %v3371_v15, %v3371_v15 }
 0x264   : > { %v3404_v48 = vmul.f32 %v3372_v23, %v3372_v23  ;;  %v3405_v49 = vmul.f32 %v3373_v42, %v3373_v42  ;;  %v3376_v55 = vsub.f32 %v6207_v54, %v6382_v28  ;;  %v3406_v35 = vmul.f32 %v3374_v6, %v3374_v6 }
 0x265   : > { %v3432_v1 = vadd.f32 %v3401_v19, %v3400_v50  ;;  %v3377_v56 = vsub.f32 %v6210_v53, %v6382_v28  ;;  %v3407_v14 = vmul.f32 %v3375_v13, %v3375_v13  ;;  %v3378_v41 = vsub.f32 %v6219_v59, %v6382_v28 }
 0x266   : > { %v3408_v2 = vmul.f32 %v3376_v55, %v3376_v55  ;;  %v3379_v40 = vsub.f32 %v6222_v11, %v6382_v28  ;;  %v3380_v54 = vsub.f32 %v6235_v57, %v6382_v28  ;;  %v3381_v53 = vsub.f32 %v6238_v43, %v6382_v28 }
 0x267   : > { %v3433_v44 = vadd.f32 %v3432_v1, %v3402_v58  ;;  %v3409_v30 = vmul.f32 %v3377_v56, %v3377_v56  ;;  %v3410_v17 = vmul.f32 %v3378_v41, %v3378_v41  ;;  %v3382_v59 = vsub.f32 %v6251_v25, %v6382_v28 }
 0x268   : > { %v3411_v22 = vmul.f32 %v3379_v40, %v3379_v40  ;;  %v3412_v63 = vmul.f32 %v3380_v54, %v3380_v54  ;;  %v3383_v11 = vsub.f32 %v6254_v47, %v6382_v28  ;;  %v3413_v51 = vmul.f32 %v3381_v53, %v3381_v53 }
 0x269   : > { %v3434_v4 = vadd.f32 %v3433_v44, %v3403_v29  ;;  %v3384_v57 = vsub.f32 %v6267_v34, %v6382_v28  ;;  %v3414_v9 = vmul.f32 %v3382_v59, %v3382_v59  ;;  %v3385_v43 = vsub.f32 %v6270_v5, %v6382_v28 }
 0x26a   : > { %v3415_v33 = vmul.f32 %v3383_v11, %v3383_v11  ;;  %v3386_v25 = vsub.f32 %v6283_v37, %v6382_v28  ;;  %v3387_v47 = vsub.f32 %v6286_v16, %v6382_v28  ;;  %v3388_v34 = vsub.f32 %v6298_v7, %v6382_v28 }
 0x26b   : > { %v3435_v0 = vadd.f32 %v3434_v4, %v3404_v48  ;;  %v3416_v19 = vmul.f32 %v3384_v57, %v3384_v57  ;;  %v3417_v23 = vmul.f32 %v3385_v43, %v3385_v43  ;;  %v3389_v5 = vsub.f32 %v6303_v61, %v6382_v28 }
 0x26c   : > { %v3418_v1 = vmul.f32 %v3386_v25, %v3386_v25  ;;  %v3419_v29 = vmul.f32 %v3387_v47, %v3387_v47  ;;  %v3390_v37 = vsub.f32 %v6312_v45, %v6382_v28  ;;  %v3420_v6 = vmul.f32 %v3388_v34, %v3388_v34 }
 0x26d   : > { %v3436_v10 = vadd.f32 %v3435_v0, %v3405_v49  ;;  %v3391_v16 = vsub.f32 %v6317_v62, %v6382_v28  ;;  %v3421_v4 = vmul.f32 %v3389_v5, %v3389_v5  ;;  %v3392_v7 = vsub.f32 %v6326_v38, %v6382_v28 }
 0x26e   : > { %v3422_v49 = vmul.f32 %v3390_v37, %v3390_v37  ;;  %v3393_v61 = vsub.f32 %v6331_v60, %v6382_v28  ;;  %v3394_v45 = vsub.f32 %v6340_v26, %v6382_v28  ;;  %v3395_v62 = vsub.f32 %v6345_v18, %v6382_v28 }
 0x26f   : > { %v3437_v27 = vadd.f32 %v3436_v10, %v3406_v35  ;;  %v3423_v55 = vmul.f32 %v3391_v16, %v3391_v16  ;;  %v3424_v10 = vmul.f32 %v3392_v7, %v3392_v7  ;;  %v3396_v38 = vsub.f32 %v6354_v36, %v6382_v28 }
 0x270   : > { %v3426_v41 = vmul.f32 %v3394_v45, %v3394_v45  ;;  %v3397_v60 = vsub.f32 %v6359_v3, %v6382_v28  ;;  %v3398_v26 = vsub.f32 %v6368_v12, %v6382_v28  ;;  %v3399_v18 = vsub.f32 %v6373_v21, %v6382_v28 }
 0x271   : > { %v3438_v20 = vadd.f32 %v3437_v27, %v3407_v14  ;;  %v3425_v14 = vmul.f32 %v3393_v61, %v3393_v61 }
 0x272   : > { %v3429_v54 = vmul.f32 %v3397_v60, %v3397_v60  ;;  %v3431_v53 = vmul.f32 %v3399_v18, %v3399_v18 }
 0x273   : > { %v3439_v39 = vadd.f32 %v3438_v20, %v3408_v2  ;;  %v3427_v20 = vmul.f32 %v3395_v62, %v3395_v62 }
 0x275   : > { %v3440_v31 = vadd.f32 %v3439_v39, %v3409_v30  ;;  %v3428_v30 = vmul.f32 %v3396_v38, %v3396_v38 }
 0x277   : > { %v3441_v8 = vadd.f32 %v3440_v31, %v3410_v17  ;;  %v3430_v31 = vmul.f32 %v3398_v26, %v3398_v26 }
 0x279   : > { %v3442_v52 = vadd.f32 %v3441_v8, %v3411_v22 }
 0x27b   : > { %v3443_v32 = vadd.f32 %v3442_v52, %v3412_v63 }
 0x27d   : > { %v3444_v46 = vadd.f32 %v3443_v32, %v3413_v51 }
 0x27f   : > { %v3445_v50 = vadd.f32 %v3444_v46, %v3414_v9 }
 0x281   : > { %v3446_v15 = vadd.f32 %v3445_v50, %v3415_v33 }
 0x283   : > { %v3447_v58 = vadd.f32 %v3446_v15, %v3416_v19 }
 0x285   : > { %v3448_v42 = vadd.f32 %v3447_v58, %v3417_v23 }
 0x287   : > { %v3449_v44 = vadd.f32 %v3448_v42, %v3418_v1 }
 0x289   : > { %v3450_v48 = vadd.f32 %v3449_v44, %v3419_v29 }
 0x28b   : > { %v3451_v13 = vadd.f32 %v3450_v48, %v3420_v6 }
 0x28d   : > { %v3452_v0 = vadd.f32 %v3451_v13, %v3421_v4 }
 0x28f   : > { %v3453_v35 = vadd.f32 %v3452_v0, %v3422_v49 }
 0x291   : > { %v3454_v56 = vadd.f32 %v3453_v35, %v3423_v55 }
 0x293   : > { %v3455_v27 = vadd.f32 %v3454_v56, %v3424_v10 }
 0x295   : > { %v3456_v2 = vadd.f32 %v3455_v27, %v3425_v14 }
 0x297   : > { %v3457_v40 = vadd.f32 %v3456_v2, %v3426_v41 }
 0x299   : > { %v3458_v39 = vadd.f32 %v3457_v40, %v3427_v20 }
 0x29b   : > { %v3459_v17 = vadd.f32 %v3458_v39, %v3428_v30 }
 0x29d   : > { %v3460_v36 = vadd.f32 %v3459_v17, %v3429_v54 }
 0x29f   : > { %v3461_v22 = vadd.f32 %v3460_v36, %v3430_v31 }
 0x2a1   : > { %v3462_v8 = vadd.f32 %v3461_v22, %v3431_v53 }
 0x2a3   : > { %v3463_v59 = vrot.slane %v3462_v8, 4 }
 0x2a5   : > { %v3464_v3 = vadd.f32 %v3463_v59, %v3462_v8 }
 0x2a7   : > { %v3465_v63 = vrot.slane %v3464_v3, 2 }
 0x2a9   : > { %v3466_v52 = vadd.f32 %v3465_v63, %v3464_v3 }
 0x2ab   : > { %v3467_v11 = vrot.slane %v3466_v52, 1 }
 0x2ad   : > { %v3468_v12 = vadd.f32 %v3467_v11, %v3466_v52 }
 0x2af   : > { %v3470_v21 = vsel %vm3469_vm6, %v6379_v24, %v3468_v12 }
 0x2b0   : > { %3471 = vst [vmem:[%s247_s11] sm:$0x3] %v3470_v21 }
 0x2b1 PF: > { %s16_s18 = sadd.s32 1, %s4438_s18  }
 0x2b2   : > { %p13_p4 = scmp.ge.s32.totalorder %s16_s18, 4  }
 0x2b4   :  { %15 = sbr.rel (!%p13_p4) target bundleno = 1 (0x1), region = 86 }

// kernel: expansive_block_forward.5
= control target key start
LH: loop header
LB: loop body
LE: loop exit
PB: predicated region body
PF: predicated region fallthrough
CT: control target
= control target key end

     0   :  { %s4458_s18 = smov 0   ;;  %s5628_s0 = inlined_call_operand.vmem [shape: bf16[2,16,16,128], index: 0, kind: input, shape index: {}]   ;;  %s5629_s1 = inlined_call_operand.vmem [shape: bf16[512,512], index: 1, kind: input, shape index: {}]   ;;  %s5630_s2 = inlined_call_operand.vmem [shape: f32[1,512], index: 2, kind: input, shape index: {}]   ;;  %s5631_s3 = inlined_call_operand.vmem [shape: f32[1,128], index: 3, kind: input, shape index: {}]   ;;  %s5632_s4 = inlined_call_operand.vmem [shape: f32[1,128], index: 4, kind: input, shape index: {}]   ;;  %s5633_s5 = inlined_call_operand.vmem [shape: f32[2,4,16,16,128], index: 5, kind: output, shape index: {}]  }
   0x1 LB: > { %s3064_s19 = sadd.s32 4294967295, %s4425_s18   ;;  %p3068_p0 = scmp.ge.s32.totalorder %s4425_s18, 1  ;;  %s4425_s18 = sphi %s4458_s18, %s15_s18  }
   0x2   : > { %p187_p1 = scmp.lt.s32.totalorder %s4425_s18, 3 }
   0x4   : > { %p188_p2 = pnand %p3068_p0, %p187_p1 }
   0x5   : > { %p215_p3 = scmp.lt.s32.totalorder (!%p188_p2), %s3064_s19, 1 }
   0x6   : > { %191 = sbr.rel (%p188_p2) target bundleno = 770 (0x302), region = 40 }
   0xb   : > { %v4291_v0 = vld [vmem:[%s5629_s1 + $0x1e0] ss:$16 sps:$4 sm:$0xff]   ;;  %s5635_s19 = smov (!%p215_p3, %s3064_s19), 1  ;;  %v4323_v32 = vld [vmem:[%s5629_s1 + $0x1e4] ss:$16 sps:$4 sm:$0xff]  }
   0xc   : > { %v4292_v1 = vld [vmem:[%s5629_s1 + $0x3e0] ss:$16 sps:$4 sm:$0xff]   ;;  %3386 = vmatprep.subr.bf16.mxu0 %v4291_v0  ;;  %s3305_s15 = sshll.u32 %s5635_s19, 7  ;;  %v4325_v33 = vld [vmem:[%s5629_s1 + $0x3e4] ss:$16 sps:$4 sm:$0xff]   ;;  %s3306_s21 = sshll.u32 %s5635_s19, 10 }
   0xd   : > { %v4293_v2 = vld [vmem:[%s5629_s1 + $0xe0] ss:$16 sps:$4 sm:$0xff]   ;;  %3498 = vmatprep.subr.bf16.mxu1 %v4292_v1  ;;  %s4575_s20 = scalar_lea.vmem %s5628_s0, %s3305_s15  ;;  %vm384_vm0 = vsmask.f32 7424  ;;  %s5109_s24 = scalar_lea.vmem %s5633_s5, %s3306_s21 }
   0xe   : > { %v4294_v3 = vld [vmem:[%s5629_s1 + $0x2e0] ss:$16 sps:$4 sm:$0xff]   ;;  %3387 = vmatpush3.bf16.msra.mxu0 %v4293_v2  ;;  %v3371_v36 = vld [vmem:[%s4575_s20 + $0x8] sm:$0xff]   ;;  %v3373_v42 = vld [vmem:[%s4575_s20 + $0x18] sm:$0xff]  }
   0xf   : > { %v4295_v4 = vld [vmem:[%s5629_s1 + $0x1c0] ss:$16 sps:$4 sm:$0xff]   ;;  %3499 = vmatpush3.bf16.msra.mxu1 %v4294_v3  ;;  %v3313_v39 = vunpack.c.l.bf16 %v3371_v36  ;;  %v3314_v40 = vunpack.c.h.bf16 %v3371_v36  ;;  %v3321_v46 = vunpack.c.l.bf16 %v3373_v42  ;;  %v3322_v47 = vunpack.c.h.bf16 %v3373_v42  ;;  %v3375_v1 = vld [vmem:[%s4575_s20 + $0x28] sm:$0xff]  }
  0x10   : > { %v4296_v5 = vld [vmem:[%s5629_s1 + $0x3c0] ss:$16 sps:$4 sm:$0xff]   ;;  %3388 = vmatprep.subr.bf16.mxu0 %v4295_v4 }
  0x11   : > { %v4297_v6 = vld [vmem:[%s5629_s1 + $0xc0] ss:$16 sps:$4 sm:$0xff]   ;;  %3500 = vmatprep.subr.bf16.mxu1 %v4296_v5 }
  0x12   : > { %v4298_v7 = vld [vmem:[%s5629_s1 + $0x2c0] ss:$16 sps:$4 sm:$0xff]   ;;  %3389 = vmatpush3.bf16.msra.mxu0 %v4297_v6 }
  0x13   : > { %v4299_v8 = vld [vmem:[%s5629_s1 + $0x1a0] ss:$16 sps:$4 sm:$0xff]   ;;  %3501 = vmatpush3.bf16.msra.mxu1 %v4298_v7 }
  0x14   : > { %v4300_v9 = vld [vmem:[%s5629_s1 + $0x3a0] ss:$16 sps:$4 sm:$0xff]   ;;  %3390 = vmatprep.subr.bf16.mxu0 %v4299_v8  ;;  %v3329_v8 = vunpack.c.l.bf16 %v3375_v1 }
  0x15   : > { %v4301_v10 = vld [vmem:[%s5629_s1 + $0xa0] ss:$16 sps:$4 sm:$0xff]   ;;  %3502 = vmatprep.subr.bf16.mxu1 %v4300_v9  ;;  %v3330_v9 = vunpack.c.h.bf16 %v3375_v1  ;;  %v4335_v1 = vld [vmem:[%s5629_s1 + $0x184] ss:$16 sps:$4 sm:$0xff]  }
  0x16   : > { %v4302_v11 = vld [vmem:[%s5629_s1 + $0x2a0] ss:$16 sps:$4 sm:$0xff]   ;;  %3391 = vmatpush3.bf16.msra.mxu0 %v4301_v10 }
  0x17   : > { %v4303_v12 = vld [vmem:[%s5629_s1 + $0x180] ss:$16 sps:$4 sm:$0xff]   ;;  %3503 = vmatpush3.bf16.msra.mxu1 %v4302_v11 }
  0x18   : > { %v4304_v13 = vld [vmem:[%s5629_s1 + $0x380] ss:$16 sps:$4 sm:$0xff]   ;;  %3392 = vmatprep.subr.bf16.mxu0 %v4303_v12 }
  0x19   : > { %v4305_v14 = vld [vmem:[%s5629_s1 + $0x80] ss:$16 sps:$4 sm:$0xff]   ;;  %3504 = vmatprep.subr.bf16.mxu1 %v4304_v13 }
  0x1a   : > { %v4306_v15 = vld [vmem:[%s5629_s1 + $0x280] ss:$16 sps:$4 sm:$0xff]   ;;  %3393 = vmatpush3.bf16.msra.mxu0 %v4305_v14  ;;  %v4427_v14 = vmov 0  }
  0x1b   : > { %v4307_v16 = vld [vmem:[%s5629_s1 + $0x160] ss:$16 sps:$4 sm:$0xff]   ;;  %3505 = vmatpush3.bf16.msra.mxu1 %v4306_v15  ;;  %v4625_v15 = vrot.slane %v4427_v14, 1 }
  0x1c   : > { %v4308_v17 = vld [vmem:[%s5629_s1 + $0x360] ss:$16 sps:$4 sm:$0xff]   ;;  %3394 = vmatprep.subr.bf16.mxu0 %v4307_v16 }
  0x1d   : > { %v4309_v18 = vld [vmem:[%s5629_s1 + $0x60] ss:$16 sps:$4 sm:$0xff]   ;;  %3506 = vmatprep.subr.bf16.mxu1 %v4308_v17 }
  0x1e   : > { %v4310_v19 = vld [vmem:[%s5629_s1 + $0x260] ss:$16 sps:$4 sm:$0xff]   ;;  %3395 = vmatpush3.bf16.msra.mxu0 %v4309_v18 }
  0x1f   : > { %v4311_v20 = vld [vmem:[%s5629_s1 + $0x140] ss:$16 sps:$4 sm:$0xff]   ;;  %3507 = vmatpush3.bf16.msra.mxu1 %v4310_v19 }
  0x20   : > { %v4312_v21 = vld [vmem:[%s5629_s1 + $0x340] ss:$16 sps:$4 sm:$0xff]   ;;  %3396 = vmatprep.subr.bf16.mxu0 %v4311_v20 }
  0x21   : > { %v4313_v22 = vld [vmem:[%s5629_s1 + $0x40] ss:$16 sps:$4 sm:$0xff]   ;;  %3508 = vmatprep.subr.bf16.mxu1 %v4312_v21 }
  0x22   : > { %v4314_v23 = vld [vmem:[%s5629_s1 + $0x240] ss:$16 sps:$4 sm:$0xff]   ;;  %3397 = vmatpush3.bf16.msra.mxu0 %v4313_v22 }
  0x23   : > { %v4315_v24 = vld [vmem:[%s5629_s1 + $0x120] ss:$16 sps:$4 sm:$0xff]   ;;  %3509 = vmatpush3.bf16.msra.mxu1 %v4314_v23  ;;  %v4324_v23 = vld [vmem:[%s5629_s1 + $0xe4] ss:$16 sps:$4 sm:$0xff]  }
  0x24   : > { %v4316_v25 = vld [vmem:[%s5629_s1 + $0x320] ss:$16 sps:$4 sm:$0xff]   ;;  %3398 = vmatprep.subr.bf16.mxu0 %v4315_v24 }
  0x25   : > { %v4317_v26 = vld [vmem:[%s5629_s1 + $0x20] ss:$16 sps:$4 sm:$0xff]   ;;  %3510 = vmatprep.subr.bf16.mxu1 %v4316_v25 }
  0x26   : > { %v4318_v27 = vld [vmem:[%s5629_s1 + $0x220] ss:$16 sps:$4 sm:$0xff]   ;;  %3399 = vmatpush3.bf16.msra.mxu0 %v4317_v26 }
  0x27   : > { %v4319_v28 = vld [vmem:[%s5629_s1 + $0x100] ss:$16 sps:$4 sm:$0xff]   ;;  %3511 = vmatpush3.bf16.msra.mxu1 %v4318_v27 }
  0x28   : > { %v4320_v29 = vld [vmem:[%s5629_s1 + $0x300] ss:$16 sps:$4 sm:$0xff]   ;;  %3400 = vmatprep.subr.bf16.mxu0 %v4319_v28 }
  0x29   : > { %v4321_v30 = vld [vmem:[%s5629_s1] ss:$16 sps:$4 sm:$0xff]   ;;  %3512 = vmatprep.subr.bf16.mxu1 %v4320_v29 }
  0x2a   : > { %v4322_v31 = vld [vmem:[%s5629_s1 + $0x200] ss:$16 sps:$4 sm:$0xff]   ;;  %3401 = vmatpush3.bf16.msra.mxu0 %v4321_v30 }
  0x2b   : > { %3513 = vmatpush3.bf16.msra.mxu1 %v4322_v31  ;;  %3610 = vmatprep.subr.bf16.mxu0 %v4323_v32  ;;  %v3308_v34 = vld [vmem:[%s4575_s20] sm:$0xff]   ;;  %v3372_v41 = vld [vmem:[%s4575_s20 + $0x10] sm:$0xff]  }
  0x2c   : > { %v4584_v35 = vld [vmem:[%s5631_s3] ss:$0 sm:$0xff]  ;;  %v3309_v37 = vunpack.c.l.bf16 %v3308_v34  ;;  %v3310_v38 = vunpack.c.h.bf16 %v3308_v34  ;;  %3722 = vmatprep.subr.bf16.mxu1 %v4325_v33  ;;  %v3317_v44 = vunpack.c.l.bf16 %v3372_v41  ;;  %v3318_v45 = vunpack.c.h.bf16 %v3372_v41  ;;  %v3376_v28 = vld [vmem:[%s4575_s20 + $0x30] sm:$0xff]  }
  0x2d   : > { %v4592_v43 = vld [vmem:[%s5632_s4] ss:$0 sm:$0xff]  ;;  %v299_v50 = vmul.f32 %v3313_v39, %v4584_v35  ;;  %v300_v51 = vmul.f32 %v3314_v40, %v4584_v35  ;;  %v303_v54 = vmul.f32 %v3321_v46, %v4584_v35  ;;  %v304_v55 = vmul.f32 %v3322_v47, %v4584_v35  ;;  %v4326_v31 = vld [vmem:[%s5629_s1 + $0x2e4] ss:$16 sps:$4 sm:$0xff]  }
  0x2e   : > { %v297_v48 = vmul.f32 %v3309_v37, %v4584_v35  ;;  %v298_v49 = vmul.f32 %v3310_v38, %v4584_v35  ;;  %v301_v52 = vmul.f32 %v3317_v44, %v4584_v35  ;;  %v302_v53 = vmul.f32 %v3318_v45, %v4584_v35  ;;  %v3374_v60 = vld [vmem:[%s4575_s20 + $0x20] sm:$0xff]  }
  0x2f   : > { %v338_v58 = vadd.f32 %v4592_v43, %v299_v50  ;;  %v339_v59 = vadd.f32 %v4592_v43, %v300_v51  ;;  %v342_v63 = vadd.f32 %v4592_v43, %v303_v54  ;;  %v343_v0 = vadd.f32 %v4592_v43, %v304_v55  ;;  %v4327_v45 = vld [vmem:[%s5629_s1 + $0x1c4] ss:$16 sps:$4 sm:$0xff]  }
  0x30   : > { %v336_v56 = vadd.f32 %v4592_v43, %v297_v48  ;;  %v337_v57 = vadd.f32 %v4592_v43, %v298_v49  ;;  %v340_v61 = vadd.f32 %v4592_v43, %v301_v52  ;;  %v341_v62 = vadd.f32 %v4592_v43, %v302_v53  ;;  %v4329_v46 = vld [vmem:[%s5629_s1 + $0x3c4] ss:$16 sps:$4 sm:$0xff]  }
  0x31   : > { %v4614_v3 = vpack.c.bf16 %v339_v59, %v338_v58  ;;  %v3325_v4 = vunpack.c.l.bf16 %v3374_v60  ;;  %v3326_v5 = vunpack.c.h.bf16 %v3374_v60  ;;  %v4618_v7 = vpack.c.bf16 %v343_v0, %v342_v63  ;;  %v4328_v48 = vld [vmem:[%s5629_s1 + $0xc4] ss:$16 sps:$4 sm:$0xff]  }
  0x32   : > { %v4612_v2 = vpack.c.bf16 %v337_v57, %v336_v56  ;;  %v4616_v6 = vpack.c.bf16 %v341_v62, %v340_v61  ;;  %v307_v26 = vmul.f32 %v3329_v8, %v4584_v35  ;;  %v308_v27 = vmul.f32 %v3330_v9, %v4584_v35  ;;  %v4330_v49 = vld [vmem:[%s5629_s1 + $0x2c4] ss:$16 sps:$4 sm:$0xff]   ;;  %v3377_v57 = vld [vmem:[%s4575_s20 + $0x38] sm:$0xff]  }
  0x33   : > { %v398_v12 = vshrl.u32 %v4614_v3, 16  ;;  %v400_v13 = vshll.u32 %v4614_v3, 16  ;;  %v416_v18 = vshll.u32 %v4618_v7, 16  ;;  %v305_v21 = vmul.f32 %v3325_v4, %v4584_v35  ;;  %v4331_v52 = vld [vmem:[%s5629_s1 + $0x1a4] ss:$16 sps:$4 sm:$0xff]  }
  0x34   : > { %v386_v10 = vshrl.u32 %v4612_v2, 16  ;;  %v388_v11 = vshll.u32 %v4612_v2, 16  ;;  %v406_v16 = vshrl.u32 %v4616_v6, 16  ;;  %v408_v17 = vshll.u32 %v4616_v6, 16  ;;  %v4333_v53 = vld [vmem:[%s5629_s1 + $0x3a4] ss:$16 sps:$4 sm:$0xff]  }
  0x35   : > { %v402_v20 = vrot.slane %v400_v13, 1  ;;  %v306_v22 = vmul.f32 %v3326_v5, %v4584_v35  ;;  %v414_v25 = vshrl.u32 %v4618_v7, 16  ;;  %v344_v32 = vadd.f32 %v4592_v43, %v305_v21  ;;  %v3380_v58 = vld [vmem:[%s4575_s20 + $0x50] sm:$0xff]   ;;  %v4698_v61 = vld [vmem:[%s4575_s20 + $0x40] sm:$0xff]  }
  0x36   : > { %v390_v19 = vrot.slane %v388_v11, 1  ;;  %v410_v24 = vrot.slane %v408_v17, 1  ;;  %v418_v36 = vrot.slane %v416_v18, 1  ;;  %v346_v37 = vadd.f32 %v4592_v43, %v307_v26  ;;  %v4332_v59 = vld [vmem:[%s5629_s1 + $0xa4] ss:$16 sps:$4 sm:$0xff]  }
  0x37   : > { %v403_v30 = vor.u32 %v402_v20, %v398_v12  ;;  %v345_v33 = vadd.f32 %v4592_v43, %v306_v22  ;;  %v347_v38 = vadd.f32 %v4592_v43, %v308_v27  ;;  %v3333_v42 = vunpack.c.l.bf16 %v3376_v28  ;;  %v4334_v60 = vld [vmem:[%s5629_s1 + $0x2a4] ss:$16 sps:$4 sm:$0xff]   ;;  %v3381_v12 = vld [vmem:[%s4575_s20 + $0x58] sm:$0xff]  }
  0x38   : > { %v391_v29 = vor.u32 %v390_v19, %v386_v10  ;;  %v411_v34 = vor.u32 %v410_v24, %v406_v16  ;;  %v3334_v47 = vunpack.c.h.bf16 %v3376_v28  ;;  %v419_v50 = vor.u32 %v418_v36, %v414_v25  ;;  %v4337_v11 = vld [vmem:[%s5629_s1 + $0x384] ss:$16 sps:$4 sm:$0xff]   ;;  %v3379_v25 = vld [vmem:[%s4575_s20 + $0x48] sm:$0xff]  }
  0x39   : > { %v4652_v40 = vsel %vm384_vm0, %v403_v30, %v4625_v15  ;;  %v4654_v41 = vpack.c.bf16 %v345_v33, %v344_v32  ;;  %v4676_v51 = vpack.c.bf16 %v347_v38, %v346_v37  ;;  %v309_v55 = vmul.f32 %v3333_v42, %v4584_v35  ;;  %v4336_v16 = vld [vmem:[%s5629_s1 + $0x84] ss:$16 sps:$4 sm:$0xff]  }
  0x3a   : > { %v4648_v39 = vsel %vm384_vm0, %v391_v29, %v4625_v15  ;;  %994 = vmatprep.mubr.bf16.mxu1 %v4652_v40  ;;  %v4660_v44 = vsel %vm384_vm0, %v411_v34, %v4625_v15  ;;  %v310_v56 = vmul.f32 %v3334_v47, %v4584_v35  ;;  %v4702_v62 = vsel %vm384_vm0, %v419_v50, %v4625_v15  ;;  %v4338_v21 = vld [vmem:[%s5629_s1 + $0x284] ss:$16 sps:$4 sm:$0xff]  }
  0x3b   : > { %833 = vmatprep.mubr.bf16.mxu0 %v4648_v39  ;;  %995 = vmatmul.mubr.bf16.vlgmr.msra.gmra.mxu1 %v4614_v3  ;;  %v424_v54 = vshll.u32 %v4654_v41, 16  ;;  %v422_v63 = vshrl.u32 %v4654_v41, 16  ;;  %v432_v0 = vshll.u32 %v4676_v51, 16  ;;  %v348_v5 = vadd.f32 %v4592_v43, %v309_v55  ;;  %v4339_v28 = vld [vmem:[%s5629_s1 + $0x164] ss:$16 sps:$4 sm:$0xff]   ;;  %v3383_v55 = vld [vmem:[%s4575_s20 + $0x68] sm:$0xff]  }
  0x3c   : > { %834 = vmatmul.mubr.bf16.vlgmr.msra.gmra.mxu0 %v4612_v2  ;;  %3723 = vmatpush3.bf16.msra.mxu1 %v4326_v31  ;;  %v349_v8 = vadd.f32 %v4592_v43, %v310_v56  ;;  %v3349_v9 = vunpack.c.l.bf16 %v3380_v58  ;;  %v3337_v10 = vunpack.c.l.bf16 %v3377_v57  ;;  %v3338_v13 = vunpack.c.h.bf16 %v3377_v57  ;;  %v4341_v29 = vld [vmem:[%s5629_s1 + $0x364] ss:$16 sps:$4 sm:$0xff]  }
  0x3d   : > { %3611 = vmatpush3.bf16.msra.mxu0 %v4324_v23  ;;  %841 = vmatprep.mubr.bf16.mxu0 %v4652_v40  ;;  %v426_v4 = vrot.slane %v424_v54, 1  ;;  %v3341_v17 = vunpack.c.l.bf16 %v4698_v61  ;;  %v3350_v18 = vunpack.c.h.bf16 %v3380_v58  ;;  %v430_v19 = vshrl.u32 %v4676_v51, 16  ;;  %v3382_v37 = vld [vmem:[%s4575_s20 + $0x60] sm:$0xff]  }
  0x3e   : > { %1002 = vmatprep.mubr.bf16.mxu1 %v4660_v44  ;;  %3612 = vmatprep.subr.bf16.mxu0 %v4327_v45  ;;  %v434_v20 = vrot.slane %v432_v0, 1  ;;  %v317_v22 = vmul.f32 %v3349_v9, %v4584_v35  ;;  %v4728_v24 = vpack.c.bf16 %v349_v8, %v348_v5  ;;  %v3353_v26 = vunpack.c.l.bf16 %v3381_v12  ;;  %v4340_v45 = vld [vmem:[%s5629_s1 + $0x64] ss:$16 sps:$4 sm:$0xff]  }
  0x3f   : > { %3724 = vmatprep.subr.bf16.mxu1 %v4329_v46  ;;  %v427_v23 = vor.u32 %v426_v4, %v422_v63  ;;  %v311_v27 = vmul.f32 %v3337_v10, %v4584_v35  ;;  %v318_v30 = vmul.f32 %v3350_v18, %v4584_v35  ;;  %v312_v32 = vmul.f32 %v3338_v13, %v4584_v35  ;;  %v4343_v54 = vld [vmem:[%s5629_s1 + $0x144] ss:$16 sps:$4 sm:$0xff]  }
  0x40   : > { %3725 = vmatpush3.bf16.msra.mxu1 %v4330_v49  ;;  %v356_v31 = vadd.f32 %v4592_v43, %v317_v22  ;;  %v3342_v33 = vunpack.c.h.bf16 %v4698_v61  ;;  %v313_v34 = vmul.f32 %v3341_v17, %v4584_v35  ;;  %v3354_v36 = vunpack.c.h.bf16 %v3381_v12  ;;  %v4346_v9 = vld [vmem:[%s5629_s1 + $0x244] ss:$16 sps:$4 sm:$0xff]  }
  0x41   : > { %3613 = vmatpush3.bf16.msra.mxu0 %v4328_v48  ;;  %3726 = vmatprep.subr.bf16.mxu1 %v4333_v53  ;;  %v435_v38 = vor.u32 %v434_v20, %v430_v19  ;;  %v3345_v42 = vunpack.c.l.bf16 %v3379_v25  ;;  %v357_v46 = vadd.f32 %v4592_v43, %v318_v30  ;;  %v319_v47 = vmul.f32 %v3353_v26, %v4584_v35  ;;  %v4347_v12 = vld [vmem:[%s5629_s1 + $0x124] ss:$16 sps:$4 sm:$0xff]  }
  0x42   : > { %3614 = vmatprep.subr.bf16.mxu0 %v4331_v52  ;;  %v4751_v48 = vsel %vm384_vm0, %v427_v23, %v4625_v15  ;;  %v440_v49 = vshll.u32 %v4728_v24, 16  ;;  %v3346_v50 = vunpack.c.h.bf16 %v3379_v25  ;;  %v4342_v52 = vld [vmem:[%s5629_s1 + $0x264] ss:$16 sps:$4 sm:$0xff]   ;;  %v320_v53 = vmul.f32 %v3354_v36, %v4584_v35  ;;  %v3385_v25 = vld [vmem:[%s4575_s20 + $0x78] sm:$0xff]  }
  0x43   : > { %1003 = vmatmul.mubr.bf16.gmra.mxu1 %v4616_v6  ;;  %v350_v56 = vadd.f32 %v4592_v43, %v311_v27  ;;  %v4763_v57 = vpack.c.bf16 %v357_v46, %v356_v31  ;;  %v358_v58 = vadd.f32 %v4592_v43, %v319_v47  ;;  %v351_v61 = vadd.f32 %v4592_v43, %v312_v32  ;;  %v3384_v19 = vld [vmem:[%s4575_s20 + $0x70] sm:$0xff]  }
  0x44   : > { %842 = vmatmul.mubr.bf16.gmra.mxu0 %v4614_v3  ;;  %1010 = vmatprep.mubr.bf16.mxu1 %v4702_v62  ;;  %v314_v63 = vmul.f32 %v3342_v33, %v4584_v35  ;;  %v359_v0 = vadd.f32 %v4592_v43, %v320_v53  ;;  %v3358_v4 = vunpack.c.h.bf16 %v3382_v37  ;;  %v4781_v5 = vsel %vm384_vm0, %v435_v38, %v4625_v15  ;;  %v4349_v23 = vld [vmem:[%s5629_s1 + $0x324] ss:$16 sps:$4 sm:$0xff]  }
  0x45   : > { %849 = vmatprep.mubr.bf16.mxu0 %v4660_v44  ;;  %3615 = vmatpush3.bf16.msra.mxu0 %v4332_v59  ;;  %v4345_v59 = vld [vmem:[%s5629_s1 + $0x344] ss:$16 sps:$4 sm:$0xff]   ;;  %v352_v8 = vadd.f32 %v4592_v43, %v313_v34  ;;  %v315_v13 = vmul.f32 %v3345_v42, %v4584_v35  ;;  %v3362_v18 = vunpack.c.h.bf16 %v3383_v55  ;;  %v438_v26 = vshrl.u32 %v4728_v24, 16 }
  0x46   : > { %3727 = vmatpush3.bf16.msra.mxu1 %v4334_v60  ;;  %3616 = vmatprep.subr.bf16.mxu0 %v4335_v1  ;;  %v3357_v60 = vunpack.c.l.bf16 %v3382_v37  ;;  %v4344_v1 = vld [vmem:[%s5629_s1 + $0x44] ss:$16 sps:$4 sm:$0xff]   ;;  %v4793_v17 = vpack.c.bf16 %v359_v0, %v358_v58  ;;  %v322_v20 = vmul.f32 %v3358_v4, %v4584_v35  ;;  %v442_v27 = vrot.slane %v440_v49, 1 }
  0x47   : > { %3728 = vmatprep.subr.bf16.mxu1 %v4337_v11  ;;  %v3361_v11 = vunpack.c.l.bf16 %v3383_v55  ;;  %v353_v30 = vadd.f32 %v4592_v43, %v314_v63  ;;  %v4348_v33 = vld [vmem:[%s5629_s1 + $0x24] ss:$16 sps:$4 sm:$0xff]   ;;  %v3365_v34 = vunpack.c.l.bf16 %v3384_v19  ;;  %v354_v36 = vadd.f32 %v4592_v43, %v315_v13 }
  0x48   : > { %v321_v10 = vmul.f32 %v3357_v60, %v4584_v35  ;;  %v361_v31 = vadd.f32 %v4592_v43, %v322_v20  ;;  %v4350_v38 = vld [vmem:[%s5629_s1 + $0x224] ss:$16 sps:$4 sm:$0xff]   ;;  %v3366_v42 = vunpack.c.h.bf16 %v3384_v19 }
  0x49   : > { %3617 = vmatpush3.bf16.msra.mxu0 %v4336_v16  ;;  %v316_v16 = vmul.f32 %v3346_v50, %v4584_v35  ;;  %v323_v22 = vmul.f32 %v3361_v11, %v4584_v35  ;;  %v4351_v46 = vld [vmem:[%s5629_s1 + $0x104] ss:$16 sps:$4 sm:$0xff]   ;;  %v325_v50 = vmul.f32 %v3365_v34, %v4584_v35  ;;  %v4841_v63 = vpack.c.bf16 %v353_v30, %v352_v8  ;;  %v4355_v8 = vld [vmem:[%s5629_s1 + $0x1e8] ss:$16 sps:$4 sm:$0xff]  }
  0x4a   : > { %3729 = vmatpush3.bf16.msra.mxu1 %v4338_v21  ;;  %3618 = vmatprep.subr.bf16.mxu0 %v4339_v28  ;;  %v360_v21 = vadd.f32 %v4592_v43, %v321_v10  ;;  %v4804_v28 = vpack.c.bf16 %v351_v61, %v350_v56  ;;  %v4353_v53 = vld [vmem:[%s5629_s1 + $0x304] ss:$16 sps:$4 sm:$0xff]   ;;  %v326_v55 = vmul.f32 %v3366_v42, %v4584_v35  ;;  %v4357_v11 = vld [vmem:[%s5629_s1 + $0x3e8] ss:$16 sps:$4 sm:$0xff]  }
  0x4b   : > { %3730 = vmatprep.subr.bf16.mxu1 %v4341_v29  ;;  %1011 = vmatmul.mubr.bf16.gmra.mxu1 %v4618_v7  ;;  %v324_v29 = vmul.f32 %v3362_v18, %v4584_v35  ;;  %v362_v32 = vadd.f32 %v4592_v43, %v323_v22  ;;  %v355_v47 = vadd.f32 %v4592_v43, %v316_v16  ;;  %v4352_v60 = vld [vmem:[%s5629_s1 + $0x4] ss:$16 sps:$4 sm:$0xff]   ;;  %v456_v19 = vshll.u32 %v4841_v63, 16 }
  0x4c   : > { %850 = vmatmul.mubr.bf16.gmra.mxu0 %v4616_v6  ;;  %1018 = vmatprep.mubr.bf16.mxu1 %v4751_v48  ;;  %v4822_v49 = vpack.c.bf16 %v361_v31, %v360_v21  ;;  %v448_v56 = vshll.u32 %v4804_v28, 16  ;;  %v364_v58 = vadd.f32 %v4592_v43, %v325_v50  ;;  %v443_v61 = vor.u32 %v442_v27, %v438_v26 }
  0x4d   : > { %857 = vmatprep.mubr.bf16.mxu0 %v4702_v62  ;;  %3619 = vmatpush3.bf16.msra.mxu0 %v4340_v45  ;;  %v363_v37 = vadd.f32 %v4592_v43, %v324_v29  ;;  %v3369_v45 = vunpack.c.l.bf16 %v3385_v25  ;;  %v365_v0 = vadd.f32 %v4592_v43, %v326_v55  ;;  %v4847_v4 = vpack.c.bf16 %v355_v47, %v354_v36 }
  0x4e   : > { %3731 = vmatpush3.bf16.msra.mxu1 %v4342_v52  ;;  %3620 = vmatprep.subr.bf16.mxu0 %v4343_v54  ;;  %v3370_v52 = vunpack.c.h.bf16 %v3385_v25  ;;  %v446_v13 = vshrl.u32 %v4804_v28, 16  ;;  %v450_v18 = vrot.slane %v448_v56, 1  ;;  %v454_v22 = vshrl.u32 %v4841_v63, 16 }
  0x4f   : > { %3732 = vmatprep.subr.bf16.mxu1 %v4345_v59  ;;  %v4830_v54 = vpack.c.bf16 %v363_v37, %v362_v32  ;;  %v327_v59 = vmul.f32 %v3369_v45, %v4584_v35  ;;  %v464_v20 = vshll.u32 %v4847_v4, 16  ;;  %v462_v25 = vshrl.u32 %v4847_v4, 16 }
  0x50   : > { %v472_v27 = vshll.u32 %v4763_v57, 16  ;;  %v480_v29 = vshll.u32 %v4793_v17, 16  ;;  %v478_v36 = vshrl.u32 %v4793_v17, 16  ;;  %v488_v47 = vshll.u32 %v4822_v49, 16 }
  0x51   : > { %3621 = vmatpush3.bf16.msra.mxu0 %v4344_v1  ;;  %v4354_v1 = vld [vmem:[%s5629_s1 + $0x204] ss:$16 sps:$4 sm:$0xff]   ;;  %v366_v10 = vadd.f32 %v4592_v43, %v327_v59  ;;  %v466_v26 = vrot.slane %v464_v20, 1 }
  0x52   : > { %3733 = vmatpush3.bf16.msra.mxu1 %v4346_v9  ;;  %3622 = vmatprep.subr.bf16.mxu0 %v4347_v12  ;;  %v328_v9 = vmul.f32 %v3370_v52, %v4584_v35  ;;  %v4857_v12 = vpack.c.bf16 %v365_v0, %v364_v58  ;;  %v4863_v35 = vsel %vm384_vm0, %v443_v61, %v4625_v15  ;;  %v474_v34 = vrot.slane %v472_v27, 1  ;;  %v4360_v27 = vld [vmem:[%s5629_s1 + $0xc8] ss:$16 sps:$4 sm:$0xff]  }
  0x53   : > { %3734 = vmatprep.subr.bf16.mxu1 %v4349_v23  ;;  %1019 = vmatmul.mubr.bf16.gmra.mxu1 %v4654_v41  ;;  %v458_v23 = vrot.slane %v456_v19, 1  ;;  %v482_v37 = vrot.slane %v480_v29, 1  ;;  %v486_v52 = vshrl.u32 %v4822_v49, 16  ;;  %v496_v58 = vshll.u32 %v4830_v54, 16  ;;  %v4362_v29 = vld [vmem:[%s5629_s1 + $0x2c8] ss:$16 sps:$4 sm:$0xff]  }
  0x54   : > { %858 = vmatmul.mubr.bf16.gmra.mxu0 %v4618_v7  ;;  %1026 = vmatprep.mubr.bf16.mxu1 %v4781_v5  ;;  %v367_v16 = vadd.f32 %v4592_v43, %v328_v9  ;;  %v451_v43 = vor.u32 %v450_v18, %v446_v13 }
  0x55   : > { %865 = vmatprep.mubr.bf16.mxu0 %v4751_v48  ;;  %3623 = vmatpush3.bf16.msra.mxu0 %v4348_v33  ;;  %v459_v31 = vor.u32 %v458_v23, %v454_v22  ;;  %v470_v33 = vshrl.u32 %v4763_v57, 16  ;;  %v483_v50 = vor.u32 %v482_v37, %v478_v36  ;;  %v498_v61 = vrot.slane %v496_v58, 1  ;;  %v4356_v22 = vld [vmem:[%s5629_s1 + $0xe8] ss:$16 sps:$4 sm:$0xff]  }
  0x56   : > { %3735 = vmatpush3.bf16.msra.mxu1 %v4350_v38  ;;  %3624 = vmatprep.subr.bf16.mxu0 %v4351_v46  ;;  %v4867_v21 = vpack.c.bf16 %v367_v16, %v366_v10  ;;  %v4879_v30 = vsel %vm384_vm0, %v451_v43, %v4625_v15  ;;  %v467_v38 = vor.u32 %v466_v26, %v462_v25  ;;  %v502_v10 = vshrl.u32 %v4857_v12, 16  ;;  %v4358_v23 = vld [vmem:[%s5629_s1 + $0x2e8] ss:$16 sps:$4 sm:$0xff]  }
  0x57   : > { %3736 = vmatprep.subr.bf16.mxu1 %v4353_v53  ;;  %v4887_v32 = vsel %vm384_vm0, %v459_v31, %v4625_v15  ;;  %v475_v45 = vor.u32 %v474_v34, %v470_v33  ;;  %v490_v53 = vrot.slane %v488_v47, 1  ;;  %v4915_v55 = vsel %vm384_vm0, %v483_v50, %v4625_v15  ;;  %v4359_v25 = vld [vmem:[%s5629_s1 + $0x1c8] ss:$16 sps:$4 sm:$0xff]  }
  0x58   : > { %v4897_v42 = vsel %vm384_vm0, %v467_v38, %v4625_v15  ;;  %v512_v13 = vshll.u32 %v4867_v21, 16  ;;  %v510_v18 = vshrl.u32 %v4867_v21, 16  ;;  %v4361_v26 = vld [vmem:[%s5629_s1 + $0x3c8] ss:$16 sps:$4 sm:$0xff]  }
  0x59   : > { %3625 = vmatpush3.bf16.msra.mxu0 %v4352_v60  ;;  %v4905_v46 = vsel %vm384_vm0, %v475_v45, %v4625_v15  ;;  %v491_v56 = vor.u32 %v490_v53, %v486_v52  ;;  %v494_v60 = vshrl.u32 %v4830_v54, 16  ;;  %v4363_v31 = vld [vmem:[%s5629_s1 + $0x1a8] ss:$16 sps:$4 sm:$0xff]  }
  0x5a   : > { %3737 = vmatpush3.bf16.msra.mxu1 %v4354_v1  ;;  %3834 = vmatprep.subr.bf16.mxu0 %v4355_v8  ;;  %v504_v1 = vshll.u32 %v4857_v12, 16  ;;  %v514_v19 = vrot.slane %v512_v13, 1  ;;  %v4365_v33 = vld [vmem:[%s5629_s1 + $0x3a8] ss:$16 sps:$4 sm:$0xff]  }
  0x5b   : > { %3946 = vmatprep.subr.bf16.mxu1 %v4357_v11  ;;  %1027 = vmatmul.mubr.bf16.gmra.mxu1 %v4676_v51  ;;  %v4924_v59 = vsel %vm384_vm0, %v491_v56, %v4625_v15  ;;  %v499_v0 = vor.u32 %v498_v61, %v494_v60  ;;  %v4364_v34 = vld [vmem:[%s5629_s1 + $0xa8] ss:$16 sps:$4 sm:$0xff]  }
  0x5c   : > { %866 = vmatmul.mubr.bf16.gmra.mxu0 %v4654_v41  ;;  %1034 = vmatprep.mubr.bf16.mxu1 %v4863_v35  ;;  %v506_v8 = vrot.slane %v504_v1, 1  ;;  %v515_v20 = vor.u32 %v514_v19, %v510_v18  ;;  %v4366_v36 = vld [vmem:[%s5629_s1 + $0x2a8] ss:$16 sps:$4 sm:$0xff]  }
  0x5d   : > { %873 = vmatprep.mubr.bf16.mxu0 %v4781_v5  ;;  %v4934_v9 = vsel %vm384_vm0, %v499_v0, %v4625_v15  ;;  %v4367_v37 = vld [vmem:[%s5629_s1 + $0x188] ss:$16 sps:$4 sm:$0xff]  }
  0x5e   : > { %v507_v11 = vor.u32 %v506_v8, %v502_v10  ;;  %v4953_v43 = vsel %vm384_vm0, %v515_v20, %v4625_v15  ;;  %v4369_v38 = vld [vmem:[%s5629_s1 + $0x388] ss:$16 sps:$4 sm:$0xff]  }
  0x5f   : > { %v4368_v45 = vld [vmem:[%s5629_s1 + $0x88] ss:$16 sps:$4 sm:$0xff]  }
  0x60   : > { %v4944_v16 = vsel %vm384_vm0, %v507_v11, %v4625_v15  ;;  %v4370_v47 = vld [vmem:[%s5629_s1 + $0x288] ss:$16 sps:$4 sm:$0xff]  }
  0x61   : > { %v4371_v50 = vld [vmem:[%s5629_s1 + $0x168] ss:$16 sps:$4 sm:$0xff]  }
  0x62   : > { %v4373_v52 = vld [vmem:[%s5629_s1 + $0x368] ss:$16 sps:$4 sm:$0xff]  }
  0x63   : > { %1035 = vmatmul.mubr.bf16.gmra.mxu1 %v4728_v24  ;;  %v4372_v53 = vld [vmem:[%s5629_s1 + $0x68] ss:$16 sps:$4 sm:$0xff]  }
  0x64   : > { %874 = vmatmul.mubr.bf16.gmra.mxu0 %v4676_v51  ;;  %1042 = vmatprep.mubr.bf16.mxu1 %v4879_v30  ;;  %v4374_v56 = vld [vmem:[%s5629_s1 + $0x268] ss:$16 sps:$4 sm:$0xff]  }
  0x65   : > { %881 = vmatprep.mubr.bf16.mxu0 %v4863_v35  ;;  %v4375_v58 = vld [vmem:[%s5629_s1 + $0x148] ss:$16 sps:$4 sm:$0xff]  }
  0x66   : > { %v4377_v60 = vld [vmem:[%s5629_s1 + $0x348] ss:$16 sps:$4 sm:$0xff]  }
  0x67   : > { %v4376_v61 = vld [vmem:[%s5629_s1 + $0x48] ss:$16 sps:$4 sm:$0xff]  }
  0x68   : > { %v4378_v0 = vld [vmem:[%s5629_s1 + $0x248] ss:$16 sps:$4 sm:$0xff]  }
  0x69   : > { %v4379_v1 = vld [vmem:[%s5629_s1 + $0x128] ss:$16 sps:$4 sm:$0xff]  }
  0x6a   : > { %v4381_v10 = vld [vmem:[%s5629_s1 + $0x328] ss:$16 sps:$4 sm:$0xff]  }
  0x6b   : > { %1043 = vmatmul.mubr.bf16.gmra.mxu1 %v4804_v28  ;;  %v4380_v8 = vld [vmem:[%s5629_s1 + $0x28] ss:$16 sps:$4 sm:$0xff]  }
  0x6c   : > { %882 = vmatmul.mubr.bf16.gmra.mxu0 %v4728_v24  ;;  %1050 = vmatprep.mubr.bf16.mxu1 %v4887_v32  ;;  %v4382_v11 = vld [vmem:[%s5629_s1 + $0x228] ss:$16 sps:$4 sm:$0xff]  }
  0x6d   : > { %889 = vmatprep.mubr.bf16.mxu0 %v4879_v30  ;;  %v4383_v13 = vld [vmem:[%s5629_s1 + $0x108] ss:$16 sps:$4 sm:$0xff]  }
  0x6e   : > { %v4385_v18 = vld [vmem:[%s5629_s1 + $0x308] ss:$16 sps:$4 sm:$0xff]  }
  0x6f   : > { %v4384_v19 = vld [vmem:[%s5629_s1 + $0x8] ss:$16 sps:$4 sm:$0xff]  }
  0x70   : > { %v4386_v20 = vld [vmem:[%s5629_s1 + $0x208] ss:$16 sps:$4 sm:$0xff]  }
  0x73   : > { %1051 = vmatmul.mubr.bf16.gmra.mxu1 %v4841_v63 }
  0x74   : > { %890 = vmatmul.mubr.bf16.gmra.mxu0 %v4804_v28  ;;  %1058 = vmatprep.mubr.bf16.mxu1 %v4897_v42 }
  0x75   : > { %897 = vmatprep.mubr.bf16.mxu0 %v4887_v32 }
  0x7b   : > { %1059 = vmatmul.mubr.bf16.gmra.mxu1 %v4847_v4 }
  0x7c   : > { %898 = vmatmul.mubr.bf16.gmra.mxu0 %v4841_v63  ;;  %1066 = vmatprep.mubr.bf16.mxu1 %v4905_v46 }
  0x7d   : > { %905 = vmatprep.mubr.bf16.mxu0 %v4897_v42 }
  0x83   : > { %1067 = vmatmul.mubr.bf16.gmra.mxu1 %v4763_v57 }
  0x84   : > { %906 = vmatmul.mubr.bf16.gmra.mxu0 %v4847_v4  ;;  %1074 = vmatprep.mubr.bf16.mxu1 %v4915_v55 }
  0x85   : > { %913 = vmatprep.mubr.bf16.mxu0 %v4905_v46 }
  0x8b   : > { %1075 = vmatmul.mubr.bf16.gmra.mxu1 %v4793_v17 }
  0x8c   : > { %914 = vmatmul.mubr.bf16.gmra.mxu0 %v4763_v57  ;;  %1082 = vmatprep.mubr.bf16.mxu1 %v4924_v59 }
  0x8d   : > { %921 = vmatprep.mubr.bf16.mxu0 %v4915_v55 }
  0x93   : > { %1083 = vmatmul.mubr.bf16.gmra.mxu1 %v4822_v49 }
  0x94   : > { %922 = vmatmul.mubr.bf16.gmra.mxu0 %v4793_v17  ;;  %1090 = vmatprep.mubr.bf16.mxu1 %v4934_v9 }
  0x95   : > { %929 = vmatprep.mubr.bf16.mxu0 %v4924_v59 }
  0x9b   : > { %1091 = vmatmul.mubr.bf16.gmra.mxu1 %v4830_v54 }
  0x9c   : > { %930 = vmatmul.mubr.bf16.gmra.mxu0 %v4822_v49  ;;  %1098 = vmatprep.mubr.bf16.mxu1 %v4944_v16 }
  0x9d   : > { %937 = vmatprep.mubr.bf16.mxu0 %v4934_v9 }
  0xa3   : > { %1099 = vmatmul.mubr.bf16.gmra.mxu1 %v4857_v12 }
  0xa4   : > { %938 = vmatmul.mubr.bf16.gmra.mxu0 %v4830_v54  ;;  %1106 = vmatprep.mubr.bf16.mxu1 %v4953_v43 }
  0xa5   : > { %945 = vmatprep.mubr.bf16.mxu0 %v4944_v16 }
  0xab   : > { %1107 = vmatmul.mubr.bf16.gmra.mxu1 %v4867_v21 }
  0xac   : > { %946 = vmatmul.mubr.bf16.gmra.mxu0 %v4857_v12  ;;  %1114 = vmatprep.mubr.bf16.mxu1 %v4625_v15 }
  0xad   : > { %953 = vmatprep.mubr.bf16.mxu0 %v4953_v43 }
  0xb3   : > { %1115 = vmatmul.mubr.bf16.gmra.mxu1 %v4427_v14 }
  0xb4   : > { %954 = vmatmul.mubr.bf16.gmra.mxu0 %v4867_v21  ;;  %1611 = vmatprep.mubr.bf16.mxu1 %v4652_v40 }
  0xb5   : > { %1450 = vmatprep.mubr.bf16.mxu0 %v4648_v39 }
  0xbb   : > { %1612 = vmatmul.mubr.bf16.vlgmr.msra.gmra.mxu1 %v4614_v3 }
  0xbc   : > { %1451 = vmatmul.mubr.bf16.vlgmr.msra.gmra.mxu0 %v4612_v2  ;;  %3947 = vmatpush3.bf16.msra.mxu1 %v4358_v23  ;;  %v4389_v23 = vld [vmem:[%s5629_s1 + $0x3ec] ss:$16 sps:$4 sm:$0xff]  }
  0xbd   : > { %3835 = vmatpush3.bf16.msra.mxu0 %v4356_v22  ;;  %1458 = vmatprep.mubr.bf16.mxu0 %v4652_v40  ;;  %v4387_v22 = vld [vmem:[%s5629_s1 + $0x1ec] ss:$16 sps:$4 sm:$0xff]  }
  0xbe   : > { %1619 = vmatprep.mubr.bf16.mxu1 %v4660_v44  ;;  %3836 = vmatprep.subr.bf16.mxu0 %v4359_v25 }
  0xbf   : > { %3948 = vmatprep.subr.bf16.mxu1 %v4361_v26 }
  0xc0   : > { %3949 = vmatpush3.bf16.msra.mxu1 %v4362_v29 }
  0xc1   : > { %3837 = vmatpush3.bf16.msra.mxu0 %v4360_v27  ;;  %3950 = vmatprep.subr.bf16.mxu1 %v4365_v33  ;;  %v5102_v27 = vld [vmem:[%s5630_s2] ss:$0 sm:$0xff] }
  0xc2   : > { %3838 = vmatprep.subr.bf16.mxu0 %v4363_v31 }
  0xc3   : > { %1620 = vmatmul.mubr.bf16.gmra.mxu1 %v4616_v6 }
  0xc4   : > { %1459 = vmatmul.mubr.bf16.gmra.mxu0 %v4614_v3  ;;  %1627 = vmatprep.mubr.bf16.mxu1 %v4702_v62 }
  0xc5   : > { %1466 = vmatprep.mubr.bf16.mxu0 %v4660_v44  ;;  %3839 = vmatpush3.bf16.msra.mxu0 %v4364_v34 }
  0xc6   : > { %3951 = vmatpush3.bf16.msra.mxu1 %v4366_v36  ;;  %3840 = vmatprep.subr.bf16.mxu0 %v4367_v37 }
  0xc7   : > { %3952 = vmatprep.subr.bf16.mxu1 %v4369_v38 }
  0xc9   : > { %3841 = vmatpush3.bf16.msra.mxu0 %v4368_v45 }
  0xca   : > { %3953 = vmatpush3.bf16.msra.mxu1 %v4370_v47  ;;  %3842 = vmatprep.subr.bf16.mxu0 %v4371_v50 }
  0xcb   : > { %3954 = vmatprep.subr.bf16.mxu1 %v4373_v52  ;;  %1628 = vmatmul.mubr.bf16.gmra.mxu1 %v4618_v7 }
  0xcc   : > { %1467 = vmatmul.mubr.bf16.gmra.mxu0 %v4616_v6  ;;  %1635 = vmatprep.mubr.bf16.mxu1 %v4751_v48 }
  0xcd   : > { %1474 = vmatprep.mubr.bf16.mxu0 %v4702_v62  ;;  %3843 = vmatpush3.bf16.msra.mxu0 %v4372_v53 }
  0xce   : > { %3955 = vmatpush3.bf16.msra.mxu1 %v4374_v56  ;;  %3844 = vmatprep.subr.bf16.mxu0 %v4375_v58 }
  0xcf   : > { %3956 = vmatprep.subr.bf16.mxu1 %v4377_v60 }
  0xd1   : > { %3845 = vmatpush3.bf16.msra.mxu0 %v4376_v61 }
  0xd2   : > { %3957 = vmatpush3.bf16.msra.mxu1 %v4378_v0  ;;  %3846 = vmatprep.subr.bf16.mxu0 %v4379_v1 }
  0xd3   : > { %3958 = vmatprep.subr.bf16.mxu1 %v4381_v10  ;;  %1636 = vmatmul.mubr.bf16.gmra.mxu1 %v4654_v41 }
  0xd4   : > { %1475 = vmatmul.mubr.bf16.gmra.mxu0 %v4618_v7  ;;  %1643 = vmatprep.mubr.bf16.mxu1 %v4781_v5 }
  0xd5   : > { %1482 = vmatprep.mubr.bf16.mxu0 %v4751_v48  ;;  %3847 = vmatpush3.bf16.msra.mxu0 %v4380_v8 }
  0xd6   : > { %3959 = vmatpush3.bf16.msra.mxu1 %v4382_v11  ;;  %3848 = vmatprep.subr.bf16.mxu0 %v4383_v13 }
  0xd7   : > { %3960 = vmatprep.subr.bf16.mxu1 %v4385_v18 }
  0xd9   : > { %3849 = vmatpush3.bf16.msra.mxu0 %v4384_v19 }
  0xda   : > { %3961 = vmatpush3.bf16.msra.mxu1 %v4386_v20  ;;  %4058 = vmatprep.subr.bf16.mxu0 %v4387_v22 }
  0xdb   : > { %4170 = vmatprep.subr.bf16.mxu1 %v4389_v23  ;;  %1644 = vmatmul.mubr.bf16.gmra.mxu1 %v4676_v51 }
  0xdc   : > { %1483 = vmatmul.mubr.bf16.gmra.mxu0 %v4654_v41  ;;  %1651 = vmatprep.mubr.bf16.mxu1 %v4863_v35 }
  0xdd   : > { %1490 = vmatprep.mubr.bf16.mxu0 %v4781_v5 }
  0xe3   : > { %1652 = vmatmul.mubr.bf16.gmra.mxu1 %v4728_v24 }
  0xe4   : > { %1491 = vmatmul.mubr.bf16.gmra.mxu0 %v4676_v51  ;;  %1659 = vmatprep.mubr.bf16.mxu1 %v4879_v30 }
  0xe5   : > { %1498 = vmatprep.mubr.bf16.mxu0 %v4863_v35 }
  0xeb   : > { %1660 = vmatmul.mubr.bf16.gmra.mxu1 %v4804_v28 }
  0xec   : > { %1499 = vmatmul.mubr.bf16.gmra.mxu0 %v4728_v24  ;;  %1667 = vmatprep.mubr.bf16.mxu1 %v4887_v32 }
  0xed   : > { %1506 = vmatprep.mubr.bf16.mxu0 %v4879_v30 }
  0xf3   : > { %1668 = vmatmul.mubr.bf16.gmra.mxu1 %v4841_v63 }
  0xf4   : > { %1507 = vmatmul.mubr.bf16.gmra.mxu0 %v4804_v28  ;;  %1675 = vmatprep.mubr.bf16.mxu1 %v4897_v42 }
  0xf5   : > { %1514 = vmatprep.mubr.bf16.mxu0 %v4887_v32 }
  0xfb   : > { %v3514_v26 = vpop.f32.mrf.mxu1  ;;  %1676 = vmatmul.mubr.bf16.gmra.mxu1 %v4847_v4 }
  0xfc   : > { %v3402_v25 = vpop.f32.mrf.mxu0  ;;  %1515 = vmatmul.mubr.bf16.gmra.mxu0 %v4841_v63  ;;  %1683 = vmatprep.mubr.bf16.mxu1 %v4905_v46 }
  0xfd   : > { %1522 = vmatprep.mubr.bf16.mxu0 %v4897_v42  ;;  %v3515_v31 = vpop.f32.mrf.mxu1 }
  0xfe   : > { %v3403_v29 = vpop.f32.mrf.mxu0  ;;  %v3516_v38 = vadd.f32 %v3515_v31, %v3514_v26 }
  0xff   : > { %v3404_v33 = vadd.f32 %v3403_v29, %v3402_v25  ;;  %v3517_v36 = vpop.f32.mrf.mxu1 }
 0x100   : > { %v3405_v34 = vpop.f32.mrf.mxu0 }
 0x101   : > { %v836_v37 = vadd.f32 %v3404_v33, %v5102_v27  ;;  %v3518_v47 = vpop.f32.mrf.mxu1 }
 0x102   : > { %v3406_v45 = vpop.f32.mrf.mxu0  ;;  %v3519_v60 = vadd.f32 %v3518_v47, %v3517_v36 }
 0x103   : > { %v997_v50 = vadd.f32 %v3516_v38, %v836_v37  ;;  %v3407_v52 = vadd.f32 %v3406_v45, %v3405_v34  ;;  %v3520_v56 = vpop.f32.mrf.mxu1  ;;  %1684 = vmatmul.mubr.bf16.gmra.mxu1 %v4763_v57 }
 0x104   : > { %v3408_v53 = vpop.f32.mrf.mxu0  ;;  %1523 = vmatmul.mubr.bf16.gmra.mxu0 %v4847_v4  ;;  %1691 = vmatprep.mubr.bf16.mxu1 %v4915_v55 }
 0x105   : > { %1123 = vst [vmem:[%s5109_s24] sm:$0xff] %v997_v50  ;;  %v839_v58 = vadd.f32 %v3407_v52, %v5102_v27  ;;  %1530 = vmatprep.mubr.bf16.mxu0 %v4905_v46  ;;  %v3521_v0 = vpop.f32.mrf.mxu1 }
 0x106   : > { %v3409_v61 = vpop.f32.mrf.mxu0  ;;  %v3522_v18 = vadd.f32 %v3521_v0, %v3520_v56 }
 0x107   : > { %v1000_v1 = vadd.f32 %v3519_v60, %v839_v58  ;;  %v3410_v10 = vadd.f32 %v3409_v61, %v3408_v53  ;;  %v3523_v11 = vpop.f32.mrf.mxu1 }
 0x108   : > { %v3411_v8 = vpop.f32.mrf.mxu0 }
 0x109   : > { %1124 = vst [vmem:[%s5109_s24 + $0x8] sm:$0xff] %v1000_v1  ;;  %v844_v13 = vadd.f32 %v3410_v10, %v5102_v27  ;;  %v3524_v20 = vpop.f32.mrf.mxu1 }
 0x10a   : > { %v3412_v19 = vpop.f32.mrf.mxu0  ;;  %v3525_v31 = vadd.f32 %v3524_v20, %v3523_v11 }
 0x10b   : > { %v1005_v22 = vadd.f32 %v3522_v18, %v844_v13  ;;  %v3413_v23 = vadd.f32 %v3412_v19, %v3411_v8  ;;  %v3526_v26 = vpop.f32.mrf.mxu1  ;;  %1692 = vmatmul.mubr.bf16.gmra.mxu1 %v4793_v17 }
 0x10c   : > { %v3414_v25 = vpop.f32.mrf.mxu0  ;;  %1531 = vmatmul.mubr.bf16.gmra.mxu0 %v4763_v57  ;;  %1699 = vmatprep.mubr.bf16.mxu1 %v4924_v59 }
 0x10d   : > { %1125 = vst [vmem:[%s5109_s24 + $0x10] sm:$0xff] %v1005_v22  ;;  %v847_v29 = vadd.f32 %v3413_v23, %v5102_v27  ;;  %1538 = vmatprep.mubr.bf16.mxu0 %v4915_v55  ;;  %v3527_v34 = vpop.f32.mrf.mxu1 }
 0x10e   : > { %v3415_v33 = vpop.f32.mrf.mxu0  ;;  %v3528_v50 = vadd.f32 %v3527_v34, %v3526_v26 }
 0x10f   : > { %v1008_v36 = vadd.f32 %v3525_v31, %v847_v29  ;;  %v3416_v37 = vadd.f32 %v3415_v33, %v3414_v25  ;;  %v3529_v45 = vpop.f32.mrf.mxu1 }
 0x110   : > { %v3417_v38 = vpop.f32.mrf.mxu0 }
 0x111   : > { %1126 = vst [vmem:[%s5109_s24 + $0x18] sm:$0xff] %v1008_v36  ;;  %v852_v47 = vadd.f32 %v3416_v37, %v5102_v27  ;;  %v3530_v53 = vpop.f32.mrf.mxu1 }
 0x112   : > { %v3418_v52 = vpop.f32.mrf.mxu0  ;;  %v3531_v1 = vadd.f32 %v3530_v53, %v3529_v45 }
 0x113   : > { %v1013_v56 = vadd.f32 %v3528_v50, %v852_v47  ;;  %v3419_v58 = vadd.f32 %v3418_v52, %v3417_v38  ;;  %v3532_v61 = vpop.f32.mrf.mxu1  ;;  %1700 = vmatmul.mubr.bf16.gmra.mxu1 %v4822_v49 }
 0x114   : > { %v3420_v60 = vpop.f32.mrf.mxu0  ;;  %1539 = vmatmul.mubr.bf16.gmra.mxu0 %v4793_v17  ;;  %1707 = vmatprep.mubr.bf16.mxu1 %v4934_v9 }
 0x115   : > { %1127 = vst [vmem:[%s5109_s24 + $0x20] sm:$0xff] %v1013_v56  ;;  %v855_v0 = vadd.f32 %v3419_v58, %v5102_v27  ;;  %1546 = vmatprep.mubr.bf16.mxu0 %v4924_v59  ;;  %v3533_v8 = vpop.f32.mrf.mxu1 }
 0x116   : > { %v3421_v10 = vpop.f32.mrf.mxu0  ;;  %v3534_v22 = vadd.f32 %v3533_v8, %v3532_v61 }
 0x117   : > { %v1016_v11 = vadd.f32 %v3531_v1, %v855_v0  ;;  %v3422_v13 = vadd.f32 %v3421_v10, %v3420_v60  ;;  %v3535_v19 = vpop.f32.mrf.mxu1 }
 0x118   : > { %v3423_v18 = vpop.f32.mrf.mxu0 }
 0x119   : > { %1128 = vst [vmem:[%s5109_s24 + $0x28] sm:$0xff] %v1016_v11  ;;  %v860_v20 = vadd.f32 %v3422_v13, %v5102_v27  ;;  %v3536_v25 = vpop.f32.mrf.mxu1 }
 0x11a   : > { %v3424_v23 = vpop.f32.mrf.mxu0  ;;  %v3537_v36 = vadd.f32 %v3536_v25, %v3535_v19 }
 0x11b   : > { %v1021_v26 = vadd.f32 %v3534_v22, %v860_v20  ;;  %v3425_v29 = vadd.f32 %v3424_v23, %v3423_v18  ;;  %v3538_v33 = vpop.f32.mrf.mxu1  ;;  %1708 = vmatmul.mubr.bf16.gmra.mxu1 %v4830_v54 }
 0x11c   : > { %v3426_v31 = vpop.f32.mrf.mxu0  ;;  %1547 = vmatmul.mubr.bf16.gmra.mxu0 %v4822_v49  ;;  %1715 = vmatprep.mubr.bf16.mxu1 %v4944_v16 }
 0x11d   : > { %1129 = vst [vmem:[%s5109_s24 + $0x30] sm:$0xff] %v1021_v26  ;;  %v863_v34 = vadd.f32 %v3425_v29, %v5102_v27  ;;  %1554 = vmatprep.mubr.bf16.mxu0 %v4934_v9  ;;  %v3539_v38 = vpop.f32.mrf.mxu1 }
 0x11e   : > { %v3427_v37 = vpop.f32.mrf.mxu0  ;;  %v3540_v56 = vadd.f32 %v3539_v38, %v3538_v33 }
 0x11f   : > { %v1024_v45 = vadd.f32 %v3537_v36, %v863_v34  ;;  %v3428_v47 = vadd.f32 %v3427_v37, %v3426_v31  ;;  %v3541_v52 = vpop.f32.mrf.mxu1 }
 0x120   : > { %v3429_v50 = vpop.f32.mrf.mxu0 }
 0x121   : > { %1130 = vst [vmem:[%s5109_s24 + $0x38] sm:$0xff] %v1024_v45  ;;  %v868_v53 = vadd.f32 %v3428_v47, %v5102_v27  ;;  %v3542_v60 = vpop.f32.mrf.mxu1 }
 0x122   : > { %v3430_v58 = vpop.f32.mrf.mxu0  ;;  %v3543_v11 = vadd.f32 %v3542_v60, %v3541_v52 }
 0x123   : > { %v1029_v61 = vadd.f32 %v3540_v56, %v868_v53  ;;  %v3431_v0 = vadd.f32 %v3430_v58, %v3429_v50  ;;  %v3544_v10 = vpop.f32.mrf.mxu1  ;;  %1716 = vmatmul.mubr.bf16.gmra.mxu1 %v4857_v12 }
 0x124   : > { %v3432_v1 = vpop.f32.mrf.mxu0  ;;  %1555 = vmatmul.mubr.bf16.gmra.mxu0 %v4830_v54  ;;  %1723 = vmatprep.mubr.bf16.mxu1 %v4953_v43 }
 0x125   : > { %1131 = vst [vmem:[%s5109_s24 + $0x40] sm:$0xff] %v1029_v61  ;;  %v871_v8 = vadd.f32 %v3431_v0, %v5102_v27  ;;  %1562 = vmatprep.mubr.bf16.mxu0 %v4944_v16  ;;  %v3545_v18 = vpop.f32.mrf.mxu1 }
 0x126   : > { %v3433_v13 = vpop.f32.mrf.mxu0  ;;  %v3546_v26 = vadd.f32 %v3545_v18, %v3544_v10 }
 0x127   : > { %v1032_v19 = vadd.f32 %v3543_v11, %v871_v8  ;;  %v3434_v20 = vadd.f32 %v3433_v13, %v3432_v1  ;;  %v3547_v23 = vpop.f32.mrf.mxu1 }
 0x128   : > { %v3435_v22 = vpop.f32.mrf.mxu0 }
 0x129   : > { %1132 = vst [vmem:[%s5109_s24 + $0x48] sm:$0xff] %v1032_v19  ;;  %v876_v25 = vadd.f32 %v3434_v20, %v5102_v27  ;;  %v3548_v31 = vpop.f32.mrf.mxu1 }
 0x12a   : > { %v3436_v29 = vpop.f32.mrf.mxu0  ;;  %v3549_v45 = vadd.f32 %v3548_v31, %v3547_v23 }
 0x12b   : > { %v1037_v33 = vadd.f32 %v3546_v26, %v876_v25  ;;  %v3437_v34 = vadd.f32 %v3436_v29, %v3435_v22  ;;  %v3550_v37 = vpop.f32.mrf.mxu1  ;;  %1724 = vmatmul.mubr.bf16.gmra.mxu1 %v4867_v21 }
 0x12c   : > { %v3438_v36 = vpop.f32.mrf.mxu0  ;;  %1563 = vmatmul.mubr.bf16.gmra.mxu0 %v4857_v12  ;;  %1731 = vmatprep.mubr.bf16.mxu1 %v4625_v15 }
 0x12d   : > { %1133 = vst [vmem:[%s5109_s24 + $0x50] sm:$0xff] %v1037_v33  ;;  %v879_v38 = vadd.f32 %v3437_v34, %v5102_v27  ;;  %1570 = vmatprep.mubr.bf16.mxu0 %v4953_v43  ;;  %v3551_v50 = vpop.f32.mrf.mxu1  ;;  %v4388_v34 = vld [vmem:[%s5629_s1 + $0xec] ss:$16 sps:$4 sm:$0xff]  }
 0x12e   : > { %v3439_v47 = vpop.f32.mrf.mxu0  ;;  %v3552_v61 = vadd.f32 %v3551_v50, %v3550_v37  ;;  %v4391_v50 = vld [vmem:[%s5629_s1 + $0x1cc] ss:$16 sps:$4 sm:$0xff]  }
 0x12f   : > { %v1040_v52 = vadd.f32 %v3549_v45, %v879_v38  ;;  %v3440_v53 = vadd.f32 %v3439_v47, %v3438_v36  ;;  %v3553_v58 = vpop.f32.mrf.mxu1  ;;  %v4390_v36 = vld [vmem:[%s5629_s1 + $0x2ec] ss:$16 sps:$4 sm:$0xff]  }
 0x130   : > { %v3441_v56 = vpop.f32.mrf.mxu0 }
 0x131   : > { %1134 = vst [vmem:[%s5109_s24 + $0x58] sm:$0xff] %v1040_v52  ;;  %v884_v60 = vadd.f32 %v3440_v53, %v5102_v27  ;;  %v3554_v1 = vpop.f32.mrf.mxu1  ;;  %v4393_v52 = vld [vmem:[%s5629_s1 + $0x3cc] ss:$16 sps:$4 sm:$0xff]  }
 0x132   : > { %v3442_v0 = vpop.f32.mrf.mxu0  ;;  %v3555_v19 = vadd.f32 %v3554_v1, %v3553_v58 }
 0x133   : > { %v1045_v10 = vadd.f32 %v3552_v61, %v884_v60  ;;  %v3443_v8 = vadd.f32 %v3442_v0, %v3441_v56  ;;  %v3556_v13 = vpop.f32.mrf.mxu1  ;;  %1732 = vmatmul.mubr.bf16.gmra.mxu1 %v4427_v14  ;;  %v4392_v61 = vld [vmem:[%s5629_s1 + $0xcc] ss:$16 sps:$4 sm:$0xff]  }
 0x134   : > { %v3444_v11 = vpop.f32.mrf.mxu0  ;;  %1571 = vmatmul.mubr.bf16.gmra.mxu0 %v4867_v21  ;;  %2229 = vmatprep.mubr.bf16.mxu1 %v4652_v40  ;;  %v4394_v0 = vld [vmem:[%s5629_s1 + $0x2cc] ss:$16 sps:$4 sm:$0xff]  }
 0x135   : > { %1135 = vst [vmem:[%s5109_s24 + $0x60] sm:$0xff] %v1045_v10  ;;  %v887_v18 = vadd.f32 %v3443_v8, %v5102_v27  ;;  %2068 = vmatprep.mubr.bf16.mxu0 %v4648_v39  ;;  %v3557_v22 = vpop.f32.mrf.mxu1  ;;  %v4395_v8 = vld [vmem:[%s5629_s1 + $0x1ac] ss:$16 sps:$4 sm:$0xff]  }
 0x136   : > { %v3445_v20 = vpop.f32.mrf.mxu0  ;;  %v3558_v33 = vadd.f32 %v3557_v22, %v3556_v13 }
 0x137   : > { %v1048_v23 = vadd.f32 %v3555_v19, %v887_v18  ;;  %v3446_v25 = vadd.f32 %v3445_v20, %v3444_v11  ;;  %v3559_v29 = vpop.f32.mrf.mxu1  ;;  %v4397_v11 = vld [vmem:[%s5629_s1 + $0x3ac] ss:$16 sps:$4 sm:$0xff]  }
 0x138   : > { %v3447_v26 = vpop.f32.mrf.mxu0 }
 0x139   : > { %1136 = vst [vmem:[%s5109_s24 + $0x68] sm:$0xff] %v1048_v23  ;;  %v892_v31 = vadd.f32 %v3446_v25, %v5102_v27  ;;  %v3560_v38 = vpop.f32.mrf.mxu1 }
 0x13a   : > { %v3448_v37 = vpop.f32.mrf.mxu0  ;;  %v3561_v60 = vadd.f32 %v3560_v38, %v3559_v29  ;;  %v4396_v29 = vld [vmem:[%s5629_s1 + $0xac] ss:$16 sps:$4 sm:$0xff]  }
 0x13b   : > { %v1053_v45 = vadd.f32 %v3558_v33, %v892_v31  ;;  %v3449_v47 = vadd.f32 %v3448_v37, %v3447_v26  ;;  %v3562_v56 = vpop.f32.mrf.mxu1  ;;  %2230 = vmatmul.mubr.bf16.vlgmr.msra.gmra.mxu1 %v4614_v3  ;;  %v4398_v31 = vld [vmem:[%s5629_s1 + $0x2ac] ss:$16 sps:$4 sm:$0xff]  }
 0x13c   : > { %v3450_v53 = vpop.f32.mrf.mxu0  ;;  %2069 = vmatmul.mubr.bf16.vlgmr.msra.gmra.mxu0 %v4612_v2  ;;  %4171 = vmatpush3.bf16.msra.mxu1 %v4390_v36  ;;  %v4399_v36 = vld [vmem:[%s5629_s1 + $0x18c] ss:$16 sps:$4 sm:$0xff]  }
 0x13d   : > { %1137 = vst [vmem:[%s5109_s24 + $0x70] sm:$0xff] %v1053_v45  ;;  %v895_v58 = vadd.f32 %v3449_v47, %v5102_v27  ;;  %4059 = vmatpush3.bf16.msra.mxu0 %v4388_v34  ;;  %v3563_v10 = vpop.f32.mrf.mxu1  ;;  %2076 = vmatprep.mubr.bf16.mxu0 %v4652_v40  ;;  %v4401_v37 = vld [vmem:[%s5629_s1 + $0x38c] ss:$16 sps:$4 sm:$0xff]  }
 0x13e   : > { %v3451_v1 = vpop.f32.mrf.mxu0  ;;  %2237 = vmatprep.mubr.bf16.mxu1 %v4660_v44  ;;  %4060 = vmatprep.subr.bf16.mxu0 %v4391_v50  ;;  %v3564_v23 = vadd.f32 %v3563_v10, %v3562_v56  ;;  %v4400_v56 = vld [vmem:[%s5629_s1 + $0x8c] ss:$16 sps:$4 sm:$0xff]  }
 0x13f   : > { %v1056_v13 = vadd.f32 %v3561_v60, %v895_v58  ;;  %v3452_v18 = vadd.f32 %v3451_v1, %v3450_v53  ;;  %4172 = vmatprep.subr.bf16.mxu1 %v4393_v52  ;;  %v3565_v20 = vpop.f32.mrf.mxu1  ;;  %v4402_v58 = vld [vmem:[%s5629_s1 + $0x28c] ss:$16 sps:$4 sm:$0xff]  }
 0x140   : > { %v3453_v19 = vpop.f32.mrf.mxu0  ;;  %4173 = vmatpush3.bf16.msra.mxu1 %v4394_v0  ;;  %v4403_v0 = vld [vmem:[%s5629_s1 + $0x16c] ss:$16 sps:$4 sm:$0xff]  }
 0x141   : > { %1138 = vst [vmem:[%s5109_s24 + $0x78] sm:$0xff] %v1056_v13  ;;  %v900_v22 = vadd.f32 %v3452_v18, %v5102_v27  ;;  %4061 = vmatpush3.bf16.msra.mxu0 %v4392_v61  ;;  %v3566_v26 = vpop.f32.mrf.mxu1  ;;  %4174 = vmatprep.subr.bf16.mxu1 %v4397_v11  ;;  %v4405_v1 = vld [vmem:[%s5629_s1 + $0x36c] ss:$16 sps:$4 sm:$0xff]  }
 0x142   : > { %v3454_v25 = vpop.f32.mrf.mxu0  ;;  %4062 = vmatprep.subr.bf16.mxu0 %v4395_v8  ;;  %v3567_v50 = vadd.f32 %v3566_v26, %v3565_v20  ;;  %v4404_v20 = vld [vmem:[%s5629_s1 + $0x6c] ss:$16 sps:$4 sm:$0xff]  }
 0x143   : > { %v1061_v33 = vadd.f32 %v3564_v23, %v900_v22  ;;  %v3455_v34 = vadd.f32 %v3454_v25, %v3453_v19  ;;  %v3568_v45 = vpop.f32.mrf.mxu1  ;;  %2238 = vmatmul.mubr.bf16.gmra.mxu1 %v4616_v6  ;;  %v4406_v22 = vld [vmem:[%s5629_s1 + $0x26c] ss:$16 sps:$4 sm:$0xff]  }
 0x144   : > { %v3456_v38 = vpop.f32.mrf.mxu0  ;;  %2077 = vmatmul.mubr.bf16.gmra.mxu0 %v4614_v3  ;;  %2245 = vmatprep.mubr.bf16.mxu1 %v4702_v62  ;;  %v4407_v26 = vld [vmem:[%s5629_s1 + $0x14c] ss:$16 sps:$4 sm:$0xff]  }
 0x145   : > { %1139 = vst [vmem:[%s5109_s24 + $0x80] sm:$0xff] %v1061_v33  ;;  %v903_v47 = vadd.f32 %v3455_v34, %v5102_v27  ;;  %2084 = vmatprep.mubr.bf16.mxu0 %v4660_v44  ;;  %v3569_v53 = vpop.f32.mrf.mxu1  ;;  %4063 = vmatpush3.bf16.msra.mxu0 %v4396_v29  ;;  %v4409_v29 = vld [vmem:[%s5629_s1 + $0x34c] ss:$16 sps:$4 sm:$0xff]  }
 0x146   : > { %v3457_v52 = vpop.f32.mrf.mxu0  ;;  %4175 = vmatpush3.bf16.msra.mxu1 %v4398_v31  ;;  %4064 = vmatprep.subr.bf16.mxu0 %v4399_v36  ;;  %v3570_v13 = vadd.f32 %v3569_v53, %v3568_v45  ;;  %v4408_v45 = vld [vmem:[%s5629_s1 + $0x4c] ss:$16 sps:$4 sm:$0xff]  }
 0x147   : > { %v1064_v60 = vadd.f32 %v3567_v50, %v903_v47  ;;  %v3458_v61 = vadd.f32 %v3457_v52, %v3456_v38  ;;  %4176 = vmatprep.subr.bf16.mxu1 %v4401_v37  ;;  %v3571_v8 = vpop.f32.mrf.mxu1  ;;  %v4410_v47 = vld [vmem:[%s5629_s1 + $0x24c] ss:$16 sps:$4 sm:$0xff]  }
 0x148   : > { %v3459_v10 = vpop.f32.mrf.mxu0  ;;  %v4411_v53 = vld [vmem:[%s5629_s1 + $0x12c] ss:$16 sps:$4 sm:$0xff]  }
 0x149   : > { %1140 = vst [vmem:[%s5109_s24 + $0x88] sm:$0xff] %v1064_v60  ;;  %v908_v11 = vadd.f32 %v3458_v61, %v5102_v27  ;;  %v3572_v19 = vpop.f32.mrf.mxu1  ;;  %4065 = vmatpush3.bf16.msra.mxu0 %v4400_v56  ;;  %v4413_v56 = vld [vmem:[%s5629_s1 + $0x32c] ss:$16 sps:$4 sm:$0xff]  }
 0x14a   : > { %v3460_v18 = vpop.f32.mrf.mxu0  ;;  %4177 = vmatpush3.bf16.msra.mxu1 %v4402_v58  ;;  %4066 = vmatprep.subr.bf16.mxu0 %v4403_v0  ;;  %v3573_v36 = vadd.f32 %v3572_v19, %v3571_v8  ;;  %v4412_v8 = vld [vmem:[%s5629_s1 + $0x2c] ss:$16 sps:$4 sm:$0xff]  }
 0x14b   : > { %v1069_v23 = vadd.f32 %v3570_v13, %v908_v11  ;;  %v3461_v25 = vadd.f32 %v3460_v18, %v3459_v10  ;;  %4178 = vmatprep.subr.bf16.mxu1 %v4405_v1  ;;  %v3574_v33 = vpop.f32.mrf.mxu1  ;;  %2246 = vmatmul.mubr.bf16.gmra.mxu1 %v4618_v7  ;;  %v4414_v11 = vld [vmem:[%s5629_s1 + $0x22c] ss:$16 sps:$4 sm:$0xff]  }
 0x14c   : > { %v3462_v31 = vpop.f32.mrf.mxu0  ;;  %2085 = vmatmul.mubr.bf16.gmra.mxu0 %v4616_v6  ;;  %2253 = vmatprep.mubr.bf16.mxu1 %v4751_v48  ;;  %v4415_v19 = vld [vmem:[%s5629_s1 + $0x10c] ss:$16 sps:$4 sm:$0xff]  }
 0x14d   : > { %1141 = vst [vmem:[%s5109_s24 + $0x90] sm:$0xff] %v1069_v23  ;;  %v911_v34 = vadd.f32 %v3461_v25, %v5102_v27  ;;  %2092 = vmatprep.mubr.bf16.mxu0 %v4702_v62  ;;  %v3575_v38 = vpop.f32.mrf.mxu1  ;;  %4067 = vmatpush3.bf16.msra.mxu0 %v4404_v20  ;;  %v4417_v20 = vld [vmem:[%s5629_s1 + $0x30c] ss:$16 sps:$4 sm:$0xff]  }
 0x14e   : > { %v3463_v37 = vpop.f32.mrf.mxu0  ;;  %4179 = vmatpush3.bf16.msra.mxu1 %v4406_v22  ;;  %4068 = vmatprep.subr.bf16.mxu0 %v4407_v26  ;;  %v3576_v0 = vadd.f32 %v3575_v38, %v3574_v33  ;;  %v4416_v33 = vld [vmem:[%s5629_s1 + $0xc] ss:$16 sps:$4 sm:$0xff]  }
 0x14f   : > { %v1072_v50 = vadd.f32 %v3573_v36, %v911_v34  ;;  %v3464_v52 = vadd.f32 %v3463_v37, %v3462_v31  ;;  %4180 = vmatprep.subr.bf16.mxu1 %v4409_v29  ;;  %v3577_v60 = vpop.f32.mrf.mxu1  ;;  %v4418_v34 = vld [vmem:[%s5629_s1 + $0x20c] ss:$16 sps:$4 sm:$0xff]  }
 0x150   : > { %v3465_v58 = vpop.f32.mrf.mxu0 }
 0x151   : > { %1142 = vst [vmem:[%s5109_s24 + $0x98] sm:$0xff] %v1072_v50  ;;  %v916_v61 = vadd.f32 %v3464_v52, %v5102_v27  ;;  %v3578_v10 = vpop.f32.mrf.mxu1  ;;  %4069 = vmatpush3.bf16.msra.mxu0 %v4408_v45 }
 0x152   : > { %v3466_v1 = vpop.f32.mrf.mxu0  ;;  %4181 = vmatpush3.bf16.msra.mxu1 %v4410_v47  ;;  %4070 = vmatprep.subr.bf16.mxu0 %v4411_v53  ;;  %v3579_v26 = vadd.f32 %v3578_v10, %v3577_v60 }
 0x153   : > { %v1077_v13 = vadd.f32 %v3576_v0, %v916_v61  ;;  %v3467_v18 = vadd.f32 %v3466_v1, %v3465_v58  ;;  %4182 = vmatprep.subr.bf16.mxu1 %v4413_v56  ;;  %v3580_v23 = vpop.f32.mrf.mxu1  ;;  %2254 = vmatmul.mubr.bf16.gmra.mxu1 %v4654_v41 }
 0x154   : > { %v3468_v22 = vpop.f32.mrf.mxu0  ;;  %2093 = vmatmul.mubr.bf16.gmra.mxu0 %v4618_v7  ;;  %2261 = vmatprep.mubr.bf16.mxu1 %v4781_v5 }
 0x155   : > { %1143 = vst [vmem:[%s5109_s24 + $0xa0] sm:$0xff] %v1077_v13  ;;  %v919_v25 = vadd.f32 %v3467_v18, %v5102_v27  ;;  %2100 = vmatprep.mubr.bf16.mxu0 %v4751_v48  ;;  %v3581_v31 = vpop.f32.mrf.mxu1  ;;  %4071 = vmatpush3.bf16.msra.mxu0 %v4412_v8 }
 0x156   : > { %v3469_v29 = vpop.f32.mrf.mxu0  ;;  %4183 = vmatpush3.bf16.msra.mxu1 %v4414_v11  ;;  %4072 = vmatprep.subr.bf16.mxu0 %v4415_v19  ;;  %v3582_v50 = vadd.f32 %v3581_v31, %v3580_v23 }
 0x157   : > { %v1080_v36 = vadd.f32 %v3579_v26, %v919_v25  ;;  %v3470_v37 = vadd.f32 %v3469_v29, %v3468_v22  ;;  %4184 = vmatprep.subr.bf16.mxu1 %v4417_v20  ;;  %v3583_v45 = vpop.f32.mrf.mxu1 }
 0x158   : > { %v3471_v38 = vpop.f32.mrf.mxu0 }
 0x159   : > { %1144 = vst [vmem:[%s5109_s24 + $0xa8] sm:$0xff] %v1080_v36  ;;  %v924_v47 = vadd.f32 %v3470_v37, %v5102_v27  ;;  %v3584_v53 = vpop.f32.mrf.mxu1  ;;  %4073 = vmatpush3.bf16.msra.mxu0 %v4416_v33 }
 0x15a   : > { %v3472_v52 = vpop.f32.mrf.mxu0  ;;  %4185 = vmatpush3.bf16.msra.mxu1 %v4418_v34  ;;  %v3585_v1 = vadd.f32 %v3584_v53, %v3583_v45 }
 0x15b   : > { %v1085_v56 = vadd.f32 %v3582_v50, %v924_v47  ;;  %v3473_v58 = vadd.f32 %v3472_v52, %v3471_v38  ;;  %v3586_v61 = vpop.f32.mrf.mxu1  ;;  %2262 = vmatmul.mubr.bf16.gmra.mxu1 %v4676_v51 }
 0x15c   : > { %v3474_v60 = vpop.f32.mrf.mxu0  ;;  %2101 = vmatmul.mubr.bf16.gmra.mxu0 %v4654_v41  ;;  %2269 = vmatprep.mubr.bf16.mxu1 %v4863_v35 }
 0x15d   : > { %1145 = vst [vmem:[%s5109_s24 + $0xb0] sm:$0xff] %v1085_v56  ;;  %v927_v0 = vadd.f32 %v3473_v58, %v5102_v27  ;;  %2108 = vmatprep.mubr.bf16.mxu0 %v4781_v5  ;;  %v3587_v8 = vpop.f32.mrf.mxu1 }
 0x15e   : > { %v3475_v10 = vpop.f32.mrf.mxu0  ;;  %v3588_v22 = vadd.f32 %v3587_v8, %v3586_v61 }
 0x15f   : > { %v1088_v11 = vadd.f32 %v3585_v1, %v927_v0  ;;  %v3476_v13 = vadd.f32 %v3475_v10, %v3474_v60  ;;  %v3589_v19 = vpop.f32.mrf.mxu1 }
 0x160   : > { %v3477_v18 = vpop.f32.mrf.mxu0 }
 0x161   : > { %1146 = vst [vmem:[%s5109_s24 + $0xb8] sm:$0xff] %v1088_v11  ;;  %v932_v20 = vadd.f32 %v3476_v13, %v5102_v27  ;;  %v3590_v25 = vpop.f32.mrf.mxu1 }
 0x162   : > { %v3478_v23 = vpop.f32.mrf.mxu0  ;;  %v3591_v36 = vadd.f32 %v3590_v25, %v3589_v19 }
 0x163   : > { %v1093_v26 = vadd.f32 %v3588_v22, %v932_v20  ;;  %v3479_v29 = vadd.f32 %v3478_v23, %v3477_v18  ;;  %v3592_v33 = vpop.f32.mrf.mxu1  ;;  %2270 = vmatmul.mubr.bf16.gmra.mxu1 %v4728_v24 }
 0x164   : > { %v3480_v31 = vpop.f32.mrf.mxu0  ;;  %2109 = vmatmul.mubr.bf16.gmra.mxu0 %v4676_v51  ;;  %2277 = vmatprep.mubr.bf16.mxu1 %v4879_v30 }
 0x165   : > { %1147 = vst [vmem:[%s5109_s24 + $0xc0] sm:$0xff] %v1093_v26  ;;  %v935_v34 = vadd.f32 %v3479_v29, %v5102_v27  ;;  %2116 = vmatprep.mubr.bf16.mxu0 %v4863_v35  ;;  %v3593_v38 = vpop.f32.mrf.mxu1 }
 0x166   : > { %v3481_v37 = vpop.f32.mrf.mxu0  ;;  %v3594_v56 = vadd.f32 %v3593_v38, %v3592_v33 }
 0x167   : > { %v1096_v45 = vadd.f32 %v3591_v36, %v935_v34  ;;  %v3482_v47 = vadd.f32 %v3481_v37, %v3480_v31  ;;  %v3595_v52 = vpop.f32.mrf.mxu1 }
 0x168   : > { %v3483_v50 = vpop.f32.mrf.mxu0 }
 0x169   : > { %1148 = vst [vmem:[%s5109_s24 + $0xc8] sm:$0xff] %v1096_v45  ;;  %v940_v53 = vadd.f32 %v3482_v47, %v5102_v27  ;;  %v3596_v60 = vpop.f32.mrf.mxu1 }
 0x16a   : > { %v3484_v58 = vpop.f32.mrf.mxu0  ;;  %v3597_v11 = vadd.f32 %v3596_v60, %v3595_v52 }
 0x16b   : > { %v1101_v61 = vadd.f32 %v3594_v56, %v940_v53  ;;  %v3485_v0 = vadd.f32 %v3484_v58, %v3483_v50  ;;  %v3598_v10 = vpop.f32.mrf.mxu1  ;;  %2278 = vmatmul.mubr.bf16.gmra.mxu1 %v4804_v28 }
 0x16c   : > { %v3486_v1 = vpop.f32.mrf.mxu0  ;;  %2117 = vmatmul.mubr.bf16.gmra.mxu0 %v4728_v24  ;;  %2285 = vmatprep.mubr.bf16.mxu1 %v4887_v32 }
 0x16d   : > { %1149 = vst [vmem:[%s5109_s24 + $0xd0] sm:$0xff] %v1101_v61  ;;  %v943_v8 = vadd.f32 %v3485_v0, %v5102_v27  ;;  %2124 = vmatprep.mubr.bf16.mxu0 %v4879_v30  ;;  %v3599_v18 = vpop.f32.mrf.mxu1 }
 0x16e   : > { %v3487_v13 = vpop.f32.mrf.mxu0  ;;  %v3600_v26 = vadd.f32 %v3599_v18, %v3598_v10 }
 0x16f   : > { %v1104_v19 = vadd.f32 %v3597_v11, %v943_v8  ;;  %v3488_v20 = vadd.f32 %v3487_v13, %v3486_v1  ;;  %v3601_v23 = vpop.f32.mrf.mxu1 }
 0x170   : > { %v3489_v22 = vpop.f32.mrf.mxu0 }
 0x171   : > { %1150 = vst [vmem:[%s5109_s24 + $0xd8] sm:$0xff] %v1104_v19  ;;  %v948_v25 = vadd.f32 %v3488_v20, %v5102_v27  ;;  %v3602_v31 = vpop.f32.mrf.mxu1  ;;  %v5330_v20 = vld [vmem:[%s5630_s2 + $0x1] ss:$0 sm:$0xff] }
 0x172   : > { %v3490_v29 = vpop.f32.mrf.mxu0  ;;  %v3603_v45 = vadd.f32 %v3602_v31, %v3601_v23 }
 0x173   : > { %v1109_v33 = vadd.f32 %v3600_v26, %v948_v25  ;;  %v3491_v34 = vadd.f32 %v3490_v29, %v3489_v22  ;;  %v3604_v37 = vpop.f32.mrf.mxu1  ;;  %2286 = vmatmul.mubr.bf16.gmra.mxu1 %v4841_v63 }
 0x174   : > { %v3492_v36 = vpop.f32.mrf.mxu0  ;;  %2125 = vmatmul.mubr.bf16.gmra.mxu0 %v4804_v28  ;;  %2293 = vmatprep.mubr.bf16.mxu1 %v4897_v42 }
 0x175   : > { %1151 = vst [vmem:[%s5109_s24 + $0xe0] sm:$0xff] %v1109_v33  ;;  %v951_v38 = vadd.f32 %v3491_v34, %v5102_v27  ;;  %2132 = vmatprep.mubr.bf16.mxu0 %v4887_v32  ;;  %v3605_v50 = vpop.f32.mrf.mxu1 }
 0x176   : > { %v3493_v47 = vpop.f32.mrf.mxu0  ;;  %v3606_v61 = vadd.f32 %v3605_v50, %v3604_v37 }
 0x177   : > { %v1112_v52 = vadd.f32 %v3603_v45, %v951_v38  ;;  %v3494_v53 = vadd.f32 %v3493_v47, %v3492_v36  ;;  %v3607_v58 = vpop.f32.mrf.mxu1 }
 0x178   : > { %v3495_v56 = vpop.f32.mrf.mxu0 }
 0x179   : > { %1152 = vst [vmem:[%s5109_s24 + $0xe8] sm:$0xff] %v1112_v52  ;;  %v956_v60 = vadd.f32 %v3494_v53, %v5102_v27  ;;  %v3608_v1 = vpop.f32.mrf.mxu1 }
 0x17a   : > { %v3496_v0 = vpop.f32.mrf.mxu0  ;;  %v3609_v19 = vadd.f32 %v3608_v1, %v3607_v58 }
 0x17b   : > { %v1117_v10 = vadd.f32 %v3606_v61, %v956_v60  ;;  %v3497_v8 = vadd.f32 %v3496_v0, %v3495_v56  ;;  %v3738_v13 = vpop.f32.mrf.mxu1  ;;  %2294 = vmatmul.mubr.bf16.gmra.mxu1 %v4847_v4 }
 0x17c   : > { %v3626_v11 = vpop.f32.mrf.mxu0  ;;  %2133 = vmatmul.mubr.bf16.gmra.mxu0 %v4841_v63  ;;  %2301 = vmatprep.mubr.bf16.mxu1 %v4905_v46 }
 0x17d   : > { %1153 = vst [vmem:[%s5109_s24 + $0xf0] sm:$0xff] %v1117_v10  ;;  %v959_v18 = vadd.f32 %v3497_v8, %v5102_v27  ;;  %2140 = vmatprep.mubr.bf16.mxu0 %v4897_v42  ;;  %v3739_v23 = vpop.f32.mrf.mxu1 }
 0x17e   : > { %v3627_v22 = vpop.f32.mrf.mxu0  ;;  %v3740_v33 = vadd.f32 %v3739_v23, %v3738_v13 }
 0x17f   : > { %v1120_v25 = vadd.f32 %v3609_v19, %v959_v18  ;;  %v3628_v26 = vadd.f32 %v3627_v22, %v3626_v11  ;;  %v3741_v31 = vpop.f32.mrf.mxu1 }
 0x180   : > { %v3629_v29 = vpop.f32.mrf.mxu0 }
 0x181   : > { %1154 = vst [vmem:[%s5109_s24 + $0xf8] sm:$0xff] %v1120_v25  ;;  %v1453_v27 = vadd.f32 %v3628_v26, %v5330_v20  ;;  %v3742_v36 = vpop.f32.mrf.mxu1 }
 0x182   : > { %v3630_v34 = vpop.f32.mrf.mxu0  ;;  %v3743_v52 = vadd.f32 %v3742_v36, %v3741_v31 }
 0x183   : > { %v1614_v37 = vadd.f32 %v3740_v33, %v1453_v27  ;;  %v3631_v38 = vadd.f32 %v3630_v34, %v3629_v29  ;;  %v3744_v47 = vpop.f32.mrf.mxu1  ;;  %2302 = vmatmul.mubr.bf16.gmra.mxu1 %v4763_v57 }
 0x184   : > { %v3632_v45 = vpop.f32.mrf.mxu0  ;;  %2141 = vmatmul.mubr.bf16.gmra.mxu0 %v4847_v4  ;;  %2309 = vmatprep.mubr.bf16.mxu1 %v4915_v55 }
 0x185   : > { %3141 = vst [vmem:[%s5109_s24 + $0x100] sm:$0xff] %v1614_v37  ;;  %v1456_v50 = vadd.f32 %v3631_v38, %v5330_v20  ;;  %2148 = vmatprep.mubr.bf16.mxu0 %v4905_v46  ;;  %v3745_v56 = vpop.f32.mrf.mxu1 }
 0x186   : > { %v3633_v53 = vpop.f32.mrf.mxu0  ;;  %v3746_v10 = vadd.f32 %v3745_v56, %v3744_v47 }
 0x187   : > { %v1617_v58 = vadd.f32 %v3743_v52, %v1456_v50  ;;  %v3634_v60 = vadd.f32 %v3633_v53, %v3632_v45  ;;  %v3747_v0 = vpop.f32.mrf.mxu1 }
 0x188   : > { %v3635_v61 = vpop.f32.mrf.mxu0 }
 0x189   : > { %3142 = vst [vmem:[%s5109_s24 + $0x108] sm:$0xff] %v1617_v58  ;;  %v1461_v1 = vadd.f32 %v3634_v60, %v5330_v20  ;;  %v3748_v11 = vpop.f32.mrf.mxu1 }
 0x18a   : > { %v3636_v8 = vpop.f32.mrf.mxu0  ;;  %v3749_v25 = vadd.f32 %v3748_v11, %v3747_v0 }
 0x18b   : > { %v1622_v13 = vadd.f32 %v3746_v10, %v1461_v1  ;;  %v3637_v18 = vadd.f32 %v3636_v8, %v3635_v61  ;;  %v3750_v22 = vpop.f32.mrf.mxu1  ;;  %2310 = vmatmul.mubr.bf16.gmra.mxu1 %v4793_v17 }
 0x18c   : > { %v3638_v19 = vpop.f32.mrf.mxu0  ;;  %2149 = vmatmul.mubr.bf16.gmra.mxu0 %v4763_v57  ;;  %2317 = vmatprep.mubr.bf16.mxu1 %v4924_v59 }
 0x18d   : > { %3143 = vst [vmem:[%s5109_s24 + $0x110] sm:$0xff] %v1622_v13  ;;  %v1464_v23 = vadd.f32 %v3637_v18, %v5330_v20  ;;  %2156 = vmatprep.mubr.bf16.mxu0 %v4915_v55  ;;  %v3751_v29 = vpop.f32.mrf.mxu1 }
 0x18e   : > { %v3639_v26 = vpop.f32.mrf.mxu0  ;;  %v3752_v37 = vadd.f32 %v3751_v29, %v3750_v22 }
 0x18f   : > { %v1625_v31 = vadd.f32 %v3749_v25, %v1464_v23  ;;  %v3640_v27 = vadd.f32 %v3639_v26, %v3638_v19  ;;  %v3753_v34 = vpop.f32.mrf.mxu1 }
 0x190   : > { %v3641_v33 = vpop.f32.mrf.mxu0 }
 0x191   : > { %3144 = vst [vmem:[%s5109_s24 + $0x118] sm:$0xff] %v1625_v31  ;;  %v1469_v36 = vadd.f32 %v3640_v27, %v5330_v20  ;;  %v3754_v45 = vpop.f32.mrf.mxu1 }
 0x192   : > { %v3642_v38 = vpop.f32.mrf.mxu0  ;;  %v3755_v58 = vadd.f32 %v3754_v45, %v3753_v34 }
 0x193   : > { %v1630_v47 = vadd.f32 %v3752_v37, %v1469_v36  ;;  %v3643_v50 = vadd.f32 %v3642_v38, %v3641_v33  ;;  %v3756_v53 = vpop.f32.mrf.mxu1  ;;  %2318 = vmatmul.mubr.bf16.gmra.mxu1 %v4822_v49 }
 0x194   : > { %v3644_v52 = vpop.f32.mrf.mxu0  ;;  %2157 = vmatmul.mubr.bf16.gmra.mxu0 %v4793_v17  ;;  %2325 = vmatprep.mubr.bf16.mxu1 %v4934_v9 }
 0x195   : > { %3145 = vst [vmem:[%s5109_s24 + $0x120] sm:$0xff] %v1630_v47  ;;  %v1472_v56 = vadd.f32 %v3643_v50, %v5330_v20  ;;  %2164 = vmatprep.mubr.bf16.mxu0 %v4924_v59  ;;  %v3757_v61 = vpop.f32.mrf.mxu1 }
 0x196   : > { %v3645_v60 = vpop.f32.mrf.mxu0  ;;  %v3758_v13 = vadd.f32 %v3757_v61, %v3756_v53 }
 0x197   : > { %v1633_v0 = vadd.f32 %v3755_v58, %v1472_v56  ;;  %v3646_v1 = vadd.f32 %v3645_v60, %v3644_v52  ;;  %v3759_v8 = vpop.f32.mrf.mxu1 }
 0x198   : > { %v3647_v10 = vpop.f32.mrf.mxu0 }
 0x199   : > { %3146 = vst [vmem:[%s5109_s24 + $0x128] sm:$0xff] %v1633_v0  ;;  %v1477_v11 = vadd.f32 %v3646_v1, %v5330_v20  ;;  %v3760_v19 = vpop.f32.mrf.mxu1 }
 0x19a   : > { %v3648_v18 = vpop.f32.mrf.mxu0  ;;  %v3761_v31 = vadd.f32 %v3760_v19, %v3759_v8 }
 0x19b   : > { %v1638_v22 = vadd.f32 %v3758_v13, %v1477_v11  ;;  %v3649_v23 = vadd.f32 %v3648_v18, %v3647_v10  ;;  %v3762_v26 = vpop.f32.mrf.mxu1  ;;  %2326 = vmatmul.mubr.bf16.gmra.mxu1 %v4830_v54 }
 0x19c   : > { %v3650_v25 = vpop.f32.mrf.mxu0  ;;  %2165 = vmatmul.mubr.bf16.gmra.mxu0 %v4822_v49  ;;  %2333 = vmatprep.mubr.bf16.mxu1 %v4944_v16 }
 0x19d   : > { %3147 = vst [vmem:[%s5109_s24 + $0x130] sm:$0xff] %v1638_v22  ;;  %v1480_v29 = vadd.f32 %v3649_v23, %v5330_v20  ;;  %2172 = vmatprep.mubr.bf16.mxu0 %v4934_v9  ;;  %v3763_v33 = vpop.f32.mrf.mxu1 }
 0x19e   : > { %v3651_v27 = vpop.f32.mrf.mxu0  ;;  %v3764_v47 = vadd.f32 %v3763_v33, %v3762_v26 }
 0x19f   : > { %v1641_v34 = vadd.f32 %v3761_v31, %v1480_v29  ;;  %v3652_v36 = vadd.f32 %v3651_v27, %v3650_v25  ;;  %v3765_v38 = vpop.f32.mrf.mxu1 }
 0x1a0   : > { %v3653_v37 = vpop.f32.mrf.mxu0 }
 0x1a1   : > { %3148 = vst [vmem:[%s5109_s24 + $0x138] sm:$0xff] %v1641_v34  ;;  %v1485_v45 = vadd.f32 %v3652_v36, %v5330_v20  ;;  %v3766_v52 = vpop.f32.mrf.mxu1 }
 0x1a2   : > { %v3654_v50 = vpop.f32.mrf.mxu0  ;;  %v3767_v0 = vadd.f32 %v3766_v52, %v3765_v38 }
 0x1a3   : > { %v1646_v53 = vadd.f32 %v3764_v47, %v1485_v45  ;;  %v3655_v56 = vadd.f32 %v3654_v50, %v3653_v37  ;;  %v3768_v60 = vpop.f32.mrf.mxu1  ;;  %2334 = vmatmul.mubr.bf16.gmra.mxu1 %v4857_v12 }
 0x1a4   : > { %v3656_v58 = vpop.f32.mrf.mxu0  ;;  %2173 = vmatmul.mubr.bf16.gmra.mxu0 %v4830_v54  ;;  %2341 = vmatprep.mubr.bf16.mxu1 %v4953_v43 }
 0x1a5   : > { %3149 = vst [vmem:[%s5109_s24 + $0x140] sm:$0xff] %v1646_v53  ;;  %v1488_v61 = vadd.f32 %v3655_v56, %v5330_v20  ;;  %2180 = vmatprep.mubr.bf16.mxu0 %v4944_v16  ;;  %v3769_v10 = vpop.f32.mrf.mxu1 }
 0x1a6   : > { %v3657_v1 = vpop.f32.mrf.mxu0  ;;  %v3770_v22 = vadd.f32 %v3769_v10, %v3768_v60 }
 0x1a7   : > { %v1649_v8 = vadd.f32 %v3767_v0, %v1488_v61  ;;  %v3658_v11 = vadd.f32 %v3657_v1, %v3656_v58  ;;  %v3771_v18 = vpop.f32.mrf.mxu1 }
 0x1a8   : > { %v3659_v13 = vpop.f32.mrf.mxu0 }
 0x1a9   : > { %3150 = vst [vmem:[%s5109_s24 + $0x148] sm:$0xff] %v1649_v8  ;;  %v1493_v19 = vadd.f32 %v3658_v11, %v5330_v20  ;;  %v3772_v25 = vpop.f32.mrf.mxu1 }
 0x1aa   : > { %v3660_v23 = vpop.f32.mrf.mxu0  ;;  %v3773_v34 = vadd.f32 %v3772_v25, %v3771_v18 }
 0x1ab   : > { %v1654_v26 = vadd.f32 %v3770_v22, %v1493_v19  ;;  %v3661_v29 = vadd.f32 %v3660_v23, %v3659_v13  ;;  %v3774_v27 = vpop.f32.mrf.mxu1  ;;  %2342 = vmatmul.mubr.bf16.gmra.mxu1 %v4867_v21 }
 0x1ac   : > { %v3662_v31 = vpop.f32.mrf.mxu0  ;;  %2181 = vmatmul.mubr.bf16.gmra.mxu0 %v4857_v12  ;;  %2349 = vmatprep.mubr.bf16.mxu1 %v4625_v15 }
 0x1ad   : > { %3151 = vst [vmem:[%s5109_s24 + $0x150] sm:$0xff] %v1654_v26  ;;  %v1496_v33 = vadd.f32 %v3661_v29, %v5330_v20  ;;  %2188 = vmatprep.mubr.bf16.mxu0 %v4953_v43  ;;  %v3775_v37 = vpop.f32.mrf.mxu1 }
 0x1ae   : > { %v3663_v36 = vpop.f32.mrf.mxu0  ;;  %v3776_v53 = vadd.f32 %v3775_v37, %v3774_v27 }
 0x1af   : > { %v1657_v38 = vadd.f32 %v3773_v34, %v1496_v33  ;;  %v3664_v45 = vadd.f32 %v3663_v36, %v3662_v31  ;;  %v3777_v50 = vpop.f32.mrf.mxu1 }
 0x1b0   : > { %v3665_v47 = vpop.f32.mrf.mxu0 }
 0x1b1   : > { %3152 = vst [vmem:[%s5109_s24 + $0x158] sm:$0xff] %v1657_v38  ;;  %v1501_v52 = vadd.f32 %v3664_v45, %v5330_v20  ;;  %v3778_v58 = vpop.f32.mrf.mxu1 }
 0x1b2   : > { %v3666_v56 = vpop.f32.mrf.mxu0  ;;  %v3779_v8 = vadd.f32 %v3778_v58, %v3777_v50 }
 0x1b3   : > { %v1662_v60 = vadd.f32 %v3776_v53, %v1501_v52  ;;  %v3667_v61 = vadd.f32 %v3666_v56, %v3665_v47  ;;  %v3780_v1 = vpop.f32.mrf.mxu1  ;;  %2350 = vmatmul.mubr.bf16.gmra.mxu1 %v4427_v14 }
 0x1b4   : > { %v3668_v0 = vpop.f32.mrf.mxu0  ;;  %2189 = vmatmul.mubr.bf16.gmra.mxu0 %v4867_v21  ;;  %2847 = vmatprep.mubr.bf16.mxu1 %v4652_v40 }
 0x1b5   : > { %3153 = vst [vmem:[%s5109_s24 + $0x160] sm:$0xff] %v1662_v60  ;;  %v1504_v10 = vadd.f32 %v3667_v61, %v5330_v20  ;;  %2686 = vmatprep.mubr.bf16.mxu0 %v4648_v39  ;;  %v3781_v13 = vpop.f32.mrf.mxu1 }
 0x1b6   : > { %v3669_v11 = vpop.f32.mrf.mxu0  ;;  %v3782_v26 = vadd.f32 %v3781_v13, %v3780_v1 }
 0x1b7   : > { %v1665_v18 = vadd.f32 %v3779_v8, %v1504_v10  ;;  %v3670_v19 = vadd.f32 %v3669_v11, %v3668_v0  ;;  %v3783_v23 = vpop.f32.mrf.mxu1 }
 0x1b8   : > { %v3671_v22 = vpop.f32.mrf.mxu0 }
 0x1b9   : > { %3154 = vst [vmem:[%s5109_s24 + $0x168] sm:$0xff] %v1665_v18  ;;  %v1509_v25 = vadd.f32 %v3670_v19, %v5330_v20  ;;  %v3784_v31 = vpop.f32.mrf.mxu1 }
 0x1ba   : > { %v3672_v29 = vpop.f32.mrf.mxu0  ;;  %v3785_v37 = vadd.f32 %v3784_v31, %v3783_v23 }
 0x1bb   : > { %v1670_v27 = vadd.f32 %v3782_v26, %v1509_v25  ;;  %v3673_v33 = vadd.f32 %v3672_v29, %v3671_v22  ;;  %v3786_v39 = vpop.f32.mrf.mxu1  ;;  %2848 = vmatmul.mubr.bf16.vlgmr.msra.gmra.mxu1 %v4614_v3 }
 0x1bc   : > { %v3674_v34 = vpop.f32.mrf.mxu0  ;;  %2687 = vmatmul.mubr.bf16.vlgmr.msra.gmra.mxu0 %v4612_v2  ;;  %2855 = vmatprep.mubr.bf16.mxu1 %v4660_v44 }
 0x1bd   : > { %3155 = vst [vmem:[%s5109_s24 + $0x170] sm:$0xff] %v1670_v27  ;;  %v1512_v36 = vadd.f32 %v3673_v33, %v5330_v20  ;;  %2694 = vmatprep.mubr.bf16.mxu0 %v4652_v40  ;;  %v3787_v45 = vpop.f32.mrf.mxu1 }
 0x1be   : > { %v3675_v38 = vpop.f32.mrf.mxu0  ;;  %v3788_v56 = vadd.f32 %v3787_v45, %v3786_v39 }
 0x1bf   : > { %v1673_v47 = vadd.f32 %v3785_v37, %v1512_v36  ;;  %v3676_v50 = vadd.f32 %v3675_v38, %v3674_v34  ;;  %v3789_v53 = vpop.f32.mrf.mxu1 }
 0x1c0   : > { %v3677_v52 = vpop.f32.mrf.mxu0 }
 0x1c1   : > { %3156 = vst [vmem:[%s5109_s24 + $0x178] sm:$0xff] %v1673_v47  ;;  %v1517_v2 = vadd.f32 %v3676_v50, %v5330_v20  ;;  %v3790_v60 = vpop.f32.mrf.mxu1 }
 0x1c2   : > { %v3678_v58 = vpop.f32.mrf.mxu0  ;;  %v3791_v8 = vadd.f32 %v3790_v60, %v3789_v53 }
 0x1c3   : > { %v1678_v61 = vadd.f32 %v3788_v56, %v1517_v2  ;;  %v3679_v0 = vadd.f32 %v3678_v58, %v3677_v52  ;;  %v3792_v40 = vpop.f32.mrf.mxu1  ;;  %2856 = vmatmul.mubr.bf16.gmra.mxu1 %v4616_v6 }
 0x1c4   : > { %v3680_v1 = vpop.f32.mrf.mxu0  ;;  %2695 = vmatmul.mubr.bf16.gmra.mxu0 %v4614_v3  ;;  %2863 = vmatprep.mubr.bf16.mxu1 %v4702_v62 }
 0x1c5   : > { %3157 = vst [vmem:[%s5109_s24 + $0x180] sm:$0xff] %v1678_v61  ;;  %v1520_v10 = vadd.f32 %v3679_v0, %v5330_v20  ;;  %2702 = vmatprep.mubr.bf16.mxu0 %v4660_v44  ;;  %v3793_v13 = vpop.f32.mrf.mxu1 }
 0x1c6   : > { %v3681_v11 = vpop.f32.mrf.mxu0  ;;  %v3794_v25 = vadd.f32 %v3793_v13, %v3792_v40 }
 0x1c7   : > { %v1681_v18 = vadd.f32 %v3791_v8, %v1520_v10  ;;  %v3682_v19 = vadd.f32 %v3681_v11, %v3680_v1  ;;  %v3795_v23 = vpop.f32.mrf.mxu1 }
 0x1c8   : > { %v3683_v22 = vpop.f32.mrf.mxu0 }
 0x1c9   : > { %3158 = vst [vmem:[%s5109_s24 + $0x188] sm:$0xff] %v1681_v18  ;;  %v1525_v3 = vadd.f32 %v3682_v19, %v5330_v20  ;;  %v3796_v29 = vpop.f32.mrf.mxu1 }
 0x1ca   : > { %v3684_v26 = vpop.f32.mrf.mxu0  ;;  %v3797_v39 = vadd.f32 %v3796_v29, %v3795_v23 }
 0x1cb   : > { %v1686_v31 = vadd.f32 %v3794_v25, %v1525_v3  ;;  %v3685_v27 = vadd.f32 %v3684_v26, %v3683_v22  ;;  %v3798_v44 = vpop.f32.mrf.mxu1  ;;  %2864 = vmatmul.mubr.bf16.gmra.mxu1 %v4618_v7 }
 0x1cc   : > { %v3686_v33 = vpop.f32.mrf.mxu0  ;;  %2703 = vmatmul.mubr.bf16.gmra.mxu0 %v4616_v6  ;;  %2871 = vmatprep.mubr.bf16.mxu1 %v4751_v48 }
 0x1cd   : > { %3159 = vst [vmem:[%s5109_s24 + $0x190] sm:$0xff] %v1686_v31  ;;  %v1528_v34 = vadd.f32 %v3685_v27, %v5330_v20  ;;  %2710 = vmatprep.mubr.bf16.mxu0 %v4702_v62  ;;  %v3799_v37 = vpop.f32.mrf.mxu1 }
 0x1ce   : > { %v3687_v36 = vpop.f32.mrf.mxu0  ;;  %v3800_v52 = vadd.f32 %v3799_v37, %v3798_v44 }
 0x1cf   : > { %v1689_v38 = vadd.f32 %v3797_v39, %v1528_v34  ;;  %v3688_v45 = vadd.f32 %v3687_v36, %v3686_v33  ;;  %v3801_v50 = vpop.f32.mrf.mxu1 }
 0x1d0   : > { %v3689_v47 = vpop.f32.mrf.mxu0 }
 0x1d1   : > { %3160 = vst [vmem:[%s5109_s24 + $0x198] sm:$0xff] %v1689_v38  ;;  %v1533_v6 = vadd.f32 %v3688_v45, %v5330_v20  ;;  %v3802_v2 = vpop.f32.mrf.mxu1 }
 0x1d2   : > { %v3690_v53 = vpop.f32.mrf.mxu0  ;;  %v3803_v0 = vadd.f32 %v3802_v2, %v3801_v50 }
 0x1d3   : > { %v1694_v56 = vadd.f32 %v3800_v52, %v1533_v6  ;;  %v3691_v58 = vadd.f32 %v3690_v53, %v3689_v47  ;;  %v3804_v62 = vpop.f32.mrf.mxu1  ;;  %2872 = vmatmul.mubr.bf16.gmra.mxu1 %v4654_v41 }
 0x1d4   : > { %v3692_v60 = vpop.f32.mrf.mxu0  ;;  %2711 = vmatmul.mubr.bf16.gmra.mxu0 %v4618_v7  ;;  %2879 = vmatprep.mubr.bf16.mxu1 %v4781_v5 }
 0x1d5   : > { %3161 = vst [vmem:[%s5109_s24 + $0x1a0] sm:$0xff] %v1694_v56  ;;  %v1536_v61 = vadd.f32 %v3691_v58, %v5330_v20  ;;  %2718 = vmatprep.mubr.bf16.mxu0 %v4751_v48  ;;  %v3805_v40 = vpop.f32.mrf.mxu1 }
 0x1d6   : > { %v3693_v1 = vpop.f32.mrf.mxu0  ;;  %v3806_v18 = vadd.f32 %v3805_v40, %v3804_v62 }
 0x1d7   : > { %v1697_v10 = vadd.f32 %v3803_v0, %v1536_v61  ;;  %v3694_v8 = vadd.f32 %v3693_v1, %v3692_v60  ;;  %v3807_v13 = vpop.f32.mrf.mxu1 }
 0x1d8   : > { %v3695_v11 = vpop.f32.mrf.mxu0 }
 0x1d9   : > { %3162 = vst [vmem:[%s5109_s24 + $0x1a8] sm:$0xff] %v1697_v10  ;;  %v1541_v7 = vadd.f32 %v3694_v8, %v5330_v20  ;;  %v3808_v22 = vpop.f32.mrf.mxu1 }
 0x1da   : > { %v3696_v19 = vpop.f32.mrf.mxu0  ;;  %v3809_v29 = vadd.f32 %v3808_v22, %v3807_v13 }
 0x1db   : > { %v1702_v23 = vadd.f32 %v3806_v18, %v1541_v7  ;;  %v3697_v3 = vadd.f32 %v3696_v19, %v3695_v11  ;;  %v3810_v48 = vpop.f32.mrf.mxu1  ;;  %2880 = vmatmul.mubr.bf16.gmra.mxu1 %v4676_v51 }
 0x1dc   : > { %v3698_v25 = vpop.f32.mrf.mxu0  ;;  %2719 = vmatmul.mubr.bf16.gmra.mxu0 %v4654_v41  ;;  %2887 = vmatprep.mubr.bf16.mxu1 %v4863_v35 }
 0x1dd   : > { %3163 = vst [vmem:[%s5109_s24 + $0x1b0] sm:$0xff] %v1702_v23  ;;  %v1544_v26 = vadd.f32 %v3697_v3, %v5330_v20  ;;  %2726 = vmatprep.mubr.bf16.mxu0 %v4781_v5  ;;  %v3811_v27 = vpop.f32.mrf.mxu1 }
 0x1de   : > { %v3699_v31 = vpop.f32.mrf.mxu0  ;;  %v3812_v36 = vadd.f32 %v3811_v27, %v3810_v48 }
 0x1df   : > { %v1705_v33 = vadd.f32 %v3809_v29, %v1544_v26  ;;  %v3700_v44 = vadd.f32 %v3699_v31, %v3698_v25  ;;  %v3813_v39 = vpop.f32.mrf.mxu1 }
 0x1e0   : > { %v3701_v34 = vpop.f32.mrf.mxu0 }
 0x1e1   : > { %3164 = vst [vmem:[%s5109_s24 + $0x1b8] sm:$0xff] %v1705_v33  ;;  %v1549_v41 = vadd.f32 %v3700_v44, %v5330_v20  ;;  %v3814_v38 = vpop.f32.mrf.mxu1 }
 0x1e2   : > { %v3702_v37 = vpop.f32.mrf.mxu0  ;;  %v3815_v52 = vadd.f32 %v3814_v38, %v3813_v39 }
 0x1e3   : > { %v1710_v45 = vadd.f32 %v3812_v36, %v1549_v41  ;;  %v3703_v47 = vadd.f32 %v3702_v37, %v3701_v34  ;;  %v3816_v5 = vpop.f32.mrf.mxu1  ;;  %2888 = vmatmul.mubr.bf16.gmra.mxu1 %v4728_v24 }
 0x1e4   : > { %v3704_v50 = vpop.f32.mrf.mxu0  ;;  %2727 = vmatmul.mubr.bf16.gmra.mxu0 %v4676_v51  ;;  %2895 = vmatprep.mubr.bf16.mxu1 %v4879_v30 }
 0x1e5   : > { %3165 = vst [vmem:[%s5109_s24 + $0x1c0] sm:$0xff] %v1710_v45  ;;  %v1552_v6 = vadd.f32 %v3703_v47, %v5330_v20  ;;  %2734 = vmatprep.mubr.bf16.mxu0 %v4863_v35  ;;  %v3817_v2 = vpop.f32.mrf.mxu1 }
 0x1e6   : > { %v3705_v53 = vpop.f32.mrf.mxu0  ;;  %v3818_v61 = vadd.f32 %v3817_v2, %v3816_v5 }
 0x1e7   : > { %v1713_v56 = vadd.f32 %v3815_v52, %v1552_v6  ;;  %v3706_v58 = vadd.f32 %v3705_v53, %v3704_v50  ;;  %v3819_v62 = vpop.f32.mrf.mxu1 }
 0x1e8   : > { %v3707_v60 = vpop.f32.mrf.mxu0 }
 0x1e9   : > { %3166 = vst [vmem:[%s5109_s24 + $0x1c8] sm:$0xff] %v1713_v56  ;;  %v1557_v51 = vadd.f32 %v3706_v58, %v5330_v20  ;;  %v3820_v1 = vpop.f32.mrf.mxu1  ;;  %v5463_v56 = vld [vmem:[%s5630_s2 + $0x2] ss:$0 sm:$0xff] }
 0x1ea   : > { %v3708_v0 = vpop.f32.mrf.mxu0  ;;  %v3821_v13 = vadd.f32 %v3820_v1, %v3819_v62 }
 0x1eb   : > { %v1718_v40 = vadd.f32 %v3818_v61, %v1557_v51  ;;  %v3709_v10 = vadd.f32 %v3708_v0, %v3707_v60  ;;  %v3822_v35 = vpop.f32.mrf.mxu1  ;;  %2896 = vmatmul.mubr.bf16.gmra.mxu1 %v4804_v28 }
 0x1ec   : > { %v3710_v8 = vpop.f32.mrf.mxu0  ;;  %2735 = vmatmul.mubr.bf16.gmra.mxu0 %v4728_v24  ;;  %2903 = vmatprep.mubr.bf16.mxu1 %v4887_v32 }
 0x1ed   : > { %3167 = vst [vmem:[%s5109_s24 + $0x1d0] sm:$0xff] %v1718_v40  ;;  %v1560_v11 = vadd.f32 %v3709_v10, %v5330_v20  ;;  %2742 = vmatprep.mubr.bf16.mxu0 %v4879_v30  ;;  %v3823_v18 = vpop.f32.mrf.mxu1 }
 0x1ee   : > { %v3711_v7 = vpop.f32.mrf.mxu0  ;;  %v3824_v25 = vadd.f32 %v3823_v18, %v3822_v35 }
 0x1ef   : > { %v1721_v19 = vadd.f32 %v3821_v13, %v1560_v11  ;;  %v3712_v22 = vadd.f32 %v3711_v7, %v3710_v8  ;;  %v3825_v3 = vpop.f32.mrf.mxu1 }
 0x1f0   : > { %v3713_v23 = vpop.f32.mrf.mxu0 }
 0x1f1   : > { %3168 = vst [vmem:[%s5109_s24 + $0x1d8] sm:$0xff] %v1721_v19  ;;  %v1565_v24 = vadd.f32 %v3712_v22, %v5330_v20  ;;  %v3826_v26 = vpop.f32.mrf.mxu1 }
 0x1f2   : > { %v3714_v48 = vpop.f32.mrf.mxu0  ;;  %v3827_v44 = vadd.f32 %v3826_v26, %v3825_v3 }
 0x1f3   : > { %v1726_v29 = vadd.f32 %v3824_v25, %v1565_v24  ;;  %v3715_v31 = vadd.f32 %v3714_v48, %v3713_v23  ;;  %v3828_v30 = vpop.f32.mrf.mxu1  ;;  %2904 = vmatmul.mubr.bf16.gmra.mxu1 %v4841_v63 }
 0x1f4   : > { %v3716_v27 = vpop.f32.mrf.mxu0  ;;  %2743 = vmatmul.mubr.bf16.gmra.mxu0 %v4804_v28  ;;  %2911 = vmatprep.mubr.bf16.mxu1 %v4897_v42 }
 0x1f5   : > { %3169 = vst [vmem:[%s5109_s24 + $0x1e0] sm:$0xff] %v1726_v29  ;;  %v1568_v33 = vadd.f32 %v3715_v31, %v5330_v20  ;;  %2750 = vmatprep.mubr.bf16.mxu0 %v4887_v32  ;;  %v3829_v39 = vpop.f32.mrf.mxu1 }
 0x1f6   : > { %v3717_v34 = vpop.f32.mrf.mxu0  ;;  %v3830_v45 = vadd.f32 %v3829_v39, %v3828_v30 }
 0x1f7   : > { %v1729_v41 = vadd.f32 %v3827_v44, %v1568_v33  ;;  %v3718_v36 = vadd.f32 %v3717_v34, %v3716_v27  ;;  %v3831_v38 = vpop.f32.mrf.mxu1 }
 0x1f8   : > { %v3719_v37 = vpop.f32.mrf.mxu0 }
 0x1f9   : > { %3170 = vst [vmem:[%s5109_s24 + $0x1e8] sm:$0xff] %v1729_v41  ;;  %v1573_v28 = vadd.f32 %v3718_v36, %v5330_v20  ;;  %v3832_v50 = vpop.f32.mrf.mxu1 }
 0x1fa   : > { %v3720_v47 = vpop.f32.mrf.mxu0  ;;  %v3833_v2 = vadd.f32 %v3832_v50, %v3831_v38 }
 0x1fb   : > { %v1734_v5 = vadd.f32 %v3830_v45, %v1573_v28  ;;  %v3721_v6 = vadd.f32 %v3720_v47, %v3719_v37  ;;  %v3962_v32 = vpop.f32.mrf.mxu1  ;;  %2912 = vmatmul.mubr.bf16.gmra.mxu1 %v4847_v4 }
 0x1fc   : > { %v3850_v52 = vpop.f32.mrf.mxu0  ;;  %2751 = vmatmul.mubr.bf16.gmra.mxu0 %v4841_v63  ;;  %2919 = vmatprep.mubr.bf16.mxu1 %v4905_v46 }
 0x1fd   : > { %3171 = vst [vmem:[%s5109_s24 + $0x1f0] sm:$0xff] %v1734_v5  ;;  %v1576_v53 = vadd.f32 %v3721_v6, %v5330_v20  ;;  %2758 = vmatprep.mubr.bf16.mxu0 %v4897_v42  ;;  %v3963_v60 = vpop.f32.mrf.mxu1 }
 0x1fe   : > { %v3851_v58 = vpop.f32.mrf.mxu0  ;;  %v3964_v0 = vadd.f32 %v3963_v60, %v3962_v32 }
 0x1ff   : > { %v1737_v62 = vadd.f32 %v3833_v2, %v1576_v53  ;;  %v3852_v63 = vadd.f32 %v3851_v58, %v3850_v52  ;;  %v3965_v61 = vpop.f32.mrf.mxu1 }
 0x200   : > { %v3853_v51 = vpop.f32.mrf.mxu0 }
 0x201   : > { %3172 = vst [vmem:[%s5109_s24 + $0x1f8] sm:$0xff] %v1737_v62  ;;  %v2071_v20 = vadd.f32 %v3852_v63, %v5463_v56  ;;  %v3966_v42 = vpop.f32.mrf.mxu1 }
 0x202   : > { %v3854_v1 = vpop.f32.mrf.mxu0  ;;  %v3967_v13 = vadd.f32 %v3966_v42, %v3965_v61 }
 0x203   : > { %v2232_v40 = vadd.f32 %v3964_v0, %v2071_v20  ;;  %v3855_v10 = vadd.f32 %v3854_v1, %v3853_v51  ;;  %v3968_v35 = vpop.f32.mrf.mxu1  ;;  %2920 = vmatmul.mubr.bf16.gmra.mxu1 %v4763_v57 }
 0x204   : > { %v3856_v8 = vpop.f32.mrf.mxu0  ;;  %2759 = vmatmul.mubr.bf16.gmra.mxu0 %v4847_v4  ;;  %2927 = vmatprep.mubr.bf16.mxu1 %v4915_v55 }
 0x205   : > { %3206 = vst [vmem:[%s5109_s24 + $0x200] sm:$0xff] %v2232_v40  ;;  %v2074_v11 = vadd.f32 %v3855_v10, %v5463_v56  ;;  %2766 = vmatprep.mubr.bf16.mxu0 %v4905_v46  ;;  %v3969_v18 = vpop.f32.mrf.mxu1 }
 0x206   : > { %v3857_v7 = vpop.f32.mrf.mxu0  ;;  %v3970_v24 = vadd.f32 %v3969_v18, %v3968_v35 }
 0x207   : > { %v2235_v19 = vadd.f32 %v3967_v13, %v2074_v11  ;;  %v3858_v22 = vadd.f32 %v3857_v7, %v3856_v8  ;;  %v3971_v3 = vpop.f32.mrf.mxu1 }
 0x208   : > { %v3859_v23 = vpop.f32.mrf.mxu0 }
 0x209   : > { %3207 = vst [vmem:[%s5109_s24 + $0x208] sm:$0xff] %v2235_v19  ;;  %v2079_v4 = vadd.f32 %v3858_v22, %v5463_v56  ;;  %v3972_v48 = vpop.f32.mrf.mxu1 }
 0x20a   : > { %v3860_v25 = vpop.f32.mrf.mxu0  ;;  %v3973_v30 = vadd.f32 %v3972_v48, %v3971_v3 }
 0x20b   : > { %v2240_v26 = vadd.f32 %v3970_v24, %v2079_v4  ;;  %v3861_v29 = vadd.f32 %v3860_v25, %v3859_v23  ;;  %v3974_v46 = vpop.f32.mrf.mxu1  ;;  %2928 = vmatmul.mubr.bf16.gmra.mxu1 %v4793_v17 }
 0x20c   : > { %v3862_v31 = vpop.f32.mrf.mxu0  ;;  %2767 = vmatmul.mubr.bf16.gmra.mxu0 %v4763_v57  ;;  %2935 = vmatprep.mubr.bf16.mxu1 %v4924_v59 }
 0x20d   : > { %3208 = vst [vmem:[%s5109_s24 + $0x210] sm:$0xff] %v2240_v26  ;;  %v2082_v27 = vadd.f32 %v3861_v29, %v5463_v56  ;;  %2774 = vmatprep.mubr.bf16.mxu0 %v4915_v55  ;;  %v3975_v44 = vpop.f32.mrf.mxu1 }
 0x20e   : > { %v3863_v33 = vpop.f32.mrf.mxu0  ;;  %v3976_v37 = vadd.f32 %v3975_v44, %v3974_v46 }
 0x20f   : > { %v2243_v34 = vadd.f32 %v3973_v30, %v2082_v27  ;;  %v3864_v39 = vadd.f32 %v3863_v33, %v3862_v31  ;;  %v3977_v36 = vpop.f32.mrf.mxu1 }
 0x210   : > { %v3865_v41 = vpop.f32.mrf.mxu0 }
 0x211   : > { %3209 = vst [vmem:[%s5109_s24 + $0x218] sm:$0xff] %v2243_v34  ;;  %v2087_v57 = vadd.f32 %v3864_v39, %v5463_v56  ;;  %v3978_v28 = vpop.f32.mrf.mxu1 }
 0x212   : > { %v3866_v38 = vpop.f32.mrf.mxu0  ;;  %v3979_v6 = vadd.f32 %v3978_v28, %v3977_v36 }
 0x213   : > { %v2248_v45 = vadd.f32 %v3976_v37, %v2087_v57  ;;  %v3867_v47 = vadd.f32 %v3866_v38, %v3865_v41  ;;  %v3980_v55 = vpop.f32.mrf.mxu1  ;;  %2936 = vmatmul.mubr.bf16.gmra.mxu1 %v4822_v49 }
 0x214   : > { %v3868_v50 = vpop.f32.mrf.mxu0  ;;  %2775 = vmatmul.mubr.bf16.gmra.mxu0 %v4793_v17  ;;  %2943 = vmatprep.mubr.bf16.mxu1 %v4934_v9 }
 0x215   : > { %3210 = vst [vmem:[%s5109_s24 + $0x220] sm:$0xff] %v2248_v45  ;;  %v2090_v5 = vadd.f32 %v3867_v47, %v5463_v56  ;;  %2782 = vmatprep.mubr.bf16.mxu0 %v4924_v59  ;;  %v3981_v32 = vpop.f32.mrf.mxu1 }
 0x216   : > { %v3869_v52 = vpop.f32.mrf.mxu0  ;;  %v3982_v62 = vadd.f32 %v3981_v32, %v3980_v55 }
 0x217   : > { %v2251_v53 = vadd.f32 %v3979_v6, %v2090_v5  ;;  %v3870_v2 = vadd.f32 %v3869_v52, %v3868_v50  ;;  %v3983_v60 = vpop.f32.mrf.mxu1 }
 0x218   : > { %v3871_v58 = vpop.f32.mrf.mxu0 }
 0x219   : > { %3211 = vst [vmem:[%s5109_s24 + $0x228] sm:$0xff] %v2251_v53  ;;  %v2095_v17 = vadd.f32 %v3870_v2, %v5463_v56  ;;  %v3984_v51 = vpop.f32.mrf.mxu1 }
 0x21a   : > { %v3872_v63 = vpop.f32.mrf.mxu0  ;;  %v3985_v42 = vadd.f32 %v3984_v51, %v3983_v60 }
 0x21b   : > { %v2256_v61 = vadd.f32 %v3982_v62, %v2095_v17  ;;  %v3873_v20 = vadd.f32 %v3872_v63, %v3871_v58  ;;  %v3986_v59 = vpop.f32.mrf.mxu1  ;;  %2944 = vmatmul.mubr.bf16.gmra.mxu1 %v4830_v54 }
 0x21c   : > { %v3874_v0 = vpop.f32.mrf.mxu0  ;;  %2783 = vmatmul.mubr.bf16.gmra.mxu0 %v4822_v49  ;;  %2951 = vmatprep.mubr.bf16.mxu1 %v4944_v16 }
 0x21d   : > { %3212 = vst [vmem:[%s5109_s24 + $0x230] sm:$0xff] %v2256_v61  ;;  %v2098_v1 = vadd.f32 %v3873_v20, %v5463_v56  ;;  %2790 = vmatprep.mubr.bf16.mxu0 %v4934_v9  ;;  %v3987_v10 = vpop.f32.mrf.mxu1 }
 0x21e   : > { %v3875_v40 = vpop.f32.mrf.mxu0  ;;  %v3988_v7 = vadd.f32 %v3987_v10, %v3986_v59 }
 0x21f   : > { %v2259_v8 = vadd.f32 %v3985_v42, %v2098_v1  ;;  %v3876_v35 = vadd.f32 %v3875_v40, %v3874_v0  ;;  %v3989_v13 = vpop.f32.mrf.mxu1 }
 0x220   : > { %v3877_v11 = vpop.f32.mrf.mxu0 }
 0x221   : > { %3213 = vst [vmem:[%s5109_s24 + $0x238] sm:$0xff] %v2259_v8  ;;  %v2103_v49 = vadd.f32 %v3876_v35, %v5463_v56  ;;  %v3990_v19 = vpop.f32.mrf.mxu1 }
 0x222   : > { %v3878_v18 = vpop.f32.mrf.mxu0  ;;  %v3991_v24 = vadd.f32 %v3990_v19, %v3989_v13 }
 0x223   : > { %v2264_v22 = vadd.f32 %v3988_v7, %v2103_v49  ;;  %v3879_v23 = vadd.f32 %v3878_v18, %v3877_v11  ;;  %v3992_v9 = vpop.f32.mrf.mxu1  ;;  %2952 = vmatmul.mubr.bf16.gmra.mxu1 %v4857_v12 }
 0x224   : > { %v3880_v3 = vpop.f32.mrf.mxu0  ;;  %2791 = vmatmul.mubr.bf16.gmra.mxu0 %v4830_v54  ;;  %2959 = vmatprep.mubr.bf16.mxu1 %v4953_v43 }
 0x225   : > { %3214 = vst [vmem:[%s5109_s24 + $0x240] sm:$0xff] %v2264_v22  ;;  %v2106_v4 = vadd.f32 %v3879_v23, %v5463_v56  ;;  %2798 = vmatprep.mubr.bf16.mxu0 %v4944_v16  ;;  %v3993_v48 = vpop.f32.mrf.mxu1 }
 0x226   : > { %v3881_v25 = vpop.f32.mrf.mxu0  ;;  %v3994_v27 = vadd.f32 %v3993_v48, %v3992_v9 }
 0x227   : > { %v2267_v26 = vadd.f32 %v3991_v24, %v2106_v4  ;;  %v3882_v29 = vadd.f32 %v3881_v25, %v3880_v3  ;;  %v3995_v46 = vpop.f32.mrf.mxu1 }
 0x228   : > { %v3883_v31 = vpop.f32.mrf.mxu0 }
 0x229   : > { %3215 = vst [vmem:[%s5109_s24 + $0x248] sm:$0xff] %v2267_v26  ;;  %v2111_v54 = vadd.f32 %v3882_v29, %v5463_v56  ;;  %v3996_v33 = vpop.f32.mrf.mxu1 }
 0x22a   : > { %v3884_v30 = vpop.f32.mrf.mxu0  ;;  %v3997_v36 = vadd.f32 %v3996_v33, %v3995_v46 }
 0x22b   : > { %v2272_v44 = vadd.f32 %v3994_v27, %v2111_v54  ;;  %v3885_v34 = vadd.f32 %v3884_v30, %v3883_v31  ;;  %v3998_v16 = vpop.f32.mrf.mxu1  ;;  %2960 = vmatmul.mubr.bf16.gmra.mxu1 %v4867_v21 }
 0x22c   : > { %v3886_v39 = vpop.f32.mrf.mxu0  ;;  %2799 = vmatmul.mubr.bf16.gmra.mxu0 %v4857_v12  ;;  %2967 = vmatprep.mubr.bf16.mxu1 %v4625_v15 }
 0x22d   : > { %3216 = vst [vmem:[%s5109_s24 + $0x250] sm:$0xff] %v2272_v44  ;;  %v2114_v41 = vadd.f32 %v3885_v34, %v5463_v56  ;;  %2806 = vmatprep.mubr.bf16.mxu0 %v4953_v43  ;;  %v3999_v37 = vpop.f32.mrf.mxu1 }
 0x22e   : > { %v3887_v57 = vpop.f32.mrf.mxu0  ;;  %v4000_v50 = vadd.f32 %v3999_v37, %v3998_v16 }
 0x22f   : > { %v2275_v38 = vadd.f32 %v3997_v36, %v2114_v41  ;;  %v3888_v28 = vadd.f32 %v3887_v57, %v3886_v39  ;;  %v4001_v47 = vpop.f32.mrf.mxu1 }
 0x230   : > { %v3889_v45 = vpop.f32.mrf.mxu0 }
 0x231   : > { %3217 = vst [vmem:[%s5109_s24 + $0x258] sm:$0xff] %v2275_v38  ;;  %v2119_v12 = vadd.f32 %v3888_v28, %v5463_v56  ;;  %v4002_v5 = vpop.f32.mrf.mxu1 }
 0x232   : > { %v3890_v55 = vpop.f32.mrf.mxu0  ;;  %v4003_v53 = vadd.f32 %v4002_v5, %v4001_v47 }
 0x233   : > { %v2280_v6 = vadd.f32 %v4000_v50, %v2119_v12  ;;  %v3891_v52 = vadd.f32 %v3890_v55, %v3889_v45  ;;  %v4004_v43 = vpop.f32.mrf.mxu1  ;;  %2968 = vmatmul.mubr.bf16.gmra.mxu1 %v4427_v14 }
 0x234   : > { %v3892_v32 = vpop.f32.mrf.mxu0  ;;  %2807 = vmatmul.mubr.bf16.gmra.mxu0 %v4867_v21 }
 0x235   : > { %3218 = vst [vmem:[%s5109_s24 + $0x260] sm:$0xff] %v2280_v6  ;;  %v2122_v15 = vadd.f32 %v3891_v52, %v5463_v56  ;;  %v4005_v58 = vpop.f32.mrf.mxu1 }
 0x236   : > { %v3893_v2 = vpop.f32.mrf.mxu0  ;;  %v4006_v61 = vadd.f32 %v4005_v58, %v4004_v43 }
 0x237   : > { %v2283_v60 = vadd.f32 %v4003_v53, %v2122_v15  ;;  %v3894_v17 = vadd.f32 %v3893_v2, %v3892_v32  ;;  %v4007_v63 = vpop.f32.mrf.mxu1 }
 0x238   : > { %v3895_v62 = vpop.f32.mrf.mxu0 }
 0x239   : > { %3219 = vst [vmem:[%s5109_s24 + $0x268] sm:$0xff] %v2283_v60  ;;  %v2127_v51 = vadd.f32 %v3894_v17, %v5463_v56  ;;  %v4008_v21 = vpop.f32.mrf.mxu1 }
 0x23a   : > { %v3896_v20 = vpop.f32.mrf.mxu0  ;;  %v4009_v40 = vadd.f32 %v4008_v21, %v4007_v63 }
 0x23b   : > { %v2288_v0 = vadd.f32 %v4006_v61, %v2127_v51  ;;  %v3897_v14 = vadd.f32 %v3896_v20, %v3895_v62  ;;  %v4010_v1 = vpop.f32.mrf.mxu1 }
 0x23c   : > { %v3898_v59 = vpop.f32.mrf.mxu0 }
 0x23d   : > { %3220 = vst [vmem:[%s5109_s24 + $0x270] sm:$0xff] %v2288_v0  ;;  %v2130_v42 = vadd.f32 %v3897_v14, %v5463_v56  ;;  %v4011_v8 = vpop.f32.mrf.mxu1 }
 0x23e   : > { %v3899_v10 = vpop.f32.mrf.mxu0  ;;  %v4012_v18 = vadd.f32 %v4011_v8, %v4010_v1 }
 0x23f   : > { %v2291_v35 = vadd.f32 %v4009_v40, %v2130_v42  ;;  %v3900_v11 = vadd.f32 %v3899_v10, %v3898_v59  ;;  %v4013_v49 = vpop.f32.mrf.mxu1 }
 0x240   : > { %v3901_v13 = vpop.f32.mrf.mxu0 }
 0x241   : > { %3221 = vst [vmem:[%s5109_s24 + $0x278] sm:$0xff] %v2291_v35  ;;  %v2135_v7 = vadd.f32 %v3900_v11, %v5463_v56  ;;  %v4014_v22 = vpop.f32.mrf.mxu1 }
 0x242   : > { %v3902_v19 = vpop.f32.mrf.mxu0  ;;  %v4015_v25 = vadd.f32 %v4014_v22, %v4013_v49 }
 0x243   : > { %v2296_v23 = vadd.f32 %v4012_v18, %v2135_v7  ;;  %v3903_v3 = vadd.f32 %v3902_v19, %v3901_v13  ;;  %v4016_v4 = vpop.f32.mrf.mxu1 }
 0x244   : > { %v3904_v9 = vpop.f32.mrf.mxu0 }
 0x245   : > { %3222 = vst [vmem:[%s5109_s24 + $0x280] sm:$0xff] %v2296_v23  ;;  %v2138_v24 = vadd.f32 %v3903_v3, %v5463_v56  ;;  %v4017_v26 = vpop.f32.mrf.mxu1 }
 0x246   : > { %v3905_v48 = vpop.f32.mrf.mxu0  ;;  %v4018_v30 = vadd.f32 %v4017_v26, %v4016_v4 }
 0x247   : > { %v2299_v29 = vadd.f32 %v4015_v25, %v2138_v24  ;;  %v3906_v31 = vadd.f32 %v3905_v48, %v3904_v9  ;;  %v4019_v54 = vpop.f32.mrf.mxu1 }
 0x248   : > { %v3907_v46 = vpop.f32.mrf.mxu0 }
 0x249   : > { %3223 = vst [vmem:[%s5109_s24 + $0x288] sm:$0xff] %v2299_v29  ;;  %v2143_v27 = vadd.f32 %v3906_v31, %v5463_v56  ;;  %v4020_v44 = vpop.f32.mrf.mxu1 }
 0x24a   : > { %v3908_v33 = vpop.f32.mrf.mxu0  ;;  %v4021_v57 = vadd.f32 %v4020_v44, %v4019_v54 }
 0x24b   : > { %v2304_v34 = vadd.f32 %v4018_v30, %v2143_v27  ;;  %v3909_v39 = vadd.f32 %v3908_v33, %v3907_v46  ;;  %v4022_v41 = vpop.f32.mrf.mxu1 }
 0x24c   : > { %v3910_v16 = vpop.f32.mrf.mxu0 }
 0x24d   : > { %3224 = vst [vmem:[%s5109_s24 + $0x290] sm:$0xff] %v2304_v34  ;;  %v2146_v36 = vadd.f32 %v3909_v39, %v5463_v56  ;;  %v4023_v38 = vpop.f32.mrf.mxu1 }
 0x24e   : > { %v3911_v37 = vpop.f32.mrf.mxu0  ;;  %v4024_v55 = vadd.f32 %v4023_v38, %v4022_v41 }
 0x24f   : > { %v2307_v28 = vadd.f32 %v4021_v57, %v2146_v36  ;;  %v3912_v45 = vadd.f32 %v3911_v37, %v3910_v16  ;;  %v4025_v12 = vpop.f32.mrf.mxu1 }
 0x250   : > { %v3913_v47 = vpop.f32.mrf.mxu0 }
 0x251   : > { %3225 = vst [vmem:[%s5109_s24 + $0x298] sm:$0xff] %v2307_v28  ;;  %v2151_v50 = vadd.f32 %v3912_v45, %v5463_v56  ;;  %v4026_v6 = vpop.f32.mrf.mxu1 }
 0x252   : > { %v3914_v5 = vpop.f32.mrf.mxu0  ;;  %v4027_v2 = vadd.f32 %v4026_v6, %v4025_v12 }
 0x253   : > { %v2312_v52 = vadd.f32 %v4024_v55, %v2151_v50  ;;  %v3915_v32 = vadd.f32 %v3914_v5, %v3913_v47  ;;  %v4028_v15 = vpop.f32.mrf.mxu1 }
 0x254   : > { %v3916_v43 = vpop.f32.mrf.mxu0 }
 0x255   : > { %3226 = vst [vmem:[%s5109_s24 + $0x2a0] sm:$0xff] %v2312_v52  ;;  %v2154_v53 = vadd.f32 %v3915_v32, %v5463_v56  ;;  %v4029_v60 = vpop.f32.mrf.mxu1 }
 0x256   : > { %v3917_v58 = vpop.f32.mrf.mxu0  ;;  %v4030_v20 = vadd.f32 %v4029_v60, %v4028_v15 }
 0x257   : > { %v2315_v17 = vadd.f32 %v4027_v2, %v2154_v53  ;;  %v3918_v62 = vadd.f32 %v3917_v58, %v3916_v43  ;;  %v4031_v51 = vpop.f32.mrf.mxu1 }
 0x258   : > { %v3919_v63 = vpop.f32.mrf.mxu0 }
 0x259   : > { %3227 = vst [vmem:[%s5109_s24 + $0x2a8] sm:$0xff] %v2315_v17  ;;  %v2159_v61 = vadd.f32 %v3918_v62, %v5463_v56  ;;  %v4032_v0 = vpop.f32.mrf.mxu1 }
 0x25a   : > { %v3920_v21 = vpop.f32.mrf.mxu0  ;;  %v4033_v10 = vadd.f32 %v4032_v0, %v4031_v51 }
 0x25b   : > { %v2320_v14 = vadd.f32 %v4030_v20, %v2159_v61  ;;  %v3921_v59 = vadd.f32 %v3920_v21, %v3919_v63  ;;  %v4034_v42 = vpop.f32.mrf.mxu1 }
 0x25c   : > { %v3922_v1 = vpop.f32.mrf.mxu0 }
 0x25d   : > { %3228 = vst [vmem:[%s5109_s24 + $0x2b0] sm:$0xff] %v2320_v14  ;;  %v2162_v40 = vadd.f32 %v3921_v59, %v5463_v56  ;;  %v4035_v35 = vpop.f32.mrf.mxu1 }
 0x25e   : > { %v3923_v8 = vpop.f32.mrf.mxu0  ;;  %v4036_v19 = vadd.f32 %v4035_v35, %v4034_v42  ;;  %v5558_v35 = vld [vmem:[%s5630_s2 + $0x3] ss:$0 sm:$0xff] }
 0x25f   : > { %v2323_v11 = vadd.f32 %v4033_v10, %v2162_v40  ;;  %v3924_v13 = vadd.f32 %v3923_v8, %v3922_v1  ;;  %v4037_v7 = vpop.f32.mrf.mxu1 }
 0x260   : > { %v3925_v49 = vpop.f32.mrf.mxu0 }
 0x261   : > { %3229 = vst [vmem:[%s5109_s24 + $0x2b8] sm:$0xff] %v2323_v11  ;;  %v2167_v18 = vadd.f32 %v3924_v13, %v5463_v56  ;;  %v4038_v23 = vpop.f32.mrf.mxu1 }
 0x262   : > { %v3926_v22 = vpop.f32.mrf.mxu0  ;;  %v4039_v48 = vadd.f32 %v4038_v23, %v4037_v7 }
 0x263   : > { %v2328_v3 = vadd.f32 %v4036_v19, %v2167_v18  ;;  %v3927_v9 = vadd.f32 %v3926_v22, %v3925_v49  ;;  %v4040_v24 = vpop.f32.mrf.mxu1 }
 0x264   : > { %v3928_v4 = vpop.f32.mrf.mxu0 }
 0x265   : > { %3230 = vst [vmem:[%s5109_s24 + $0x2c0] sm:$0xff] %v2328_v3  ;;  %v2170_v25 = vadd.f32 %v3927_v9, %v5463_v56  ;;  %v4041_v29 = vpop.f32.mrf.mxu1 }
 0x266   : > { %v3929_v26 = vpop.f32.mrf.mxu0  ;;  %v4042_v33 = vadd.f32 %v4041_v29, %v4040_v24 }
 0x267   : > { %v2331_v31 = vadd.f32 %v4039_v48, %v2170_v25  ;;  %v3930_v46 = vadd.f32 %v3929_v26, %v3928_v4  ;;  %v4043_v27 = vpop.f32.mrf.mxu1 }
 0x268   : > { %v3931_v54 = vpop.f32.mrf.mxu0 }
 0x269   : > { %3231 = vst [vmem:[%s5109_s24 + $0x2c8] sm:$0xff] %v2331_v31  ;;  %v2175_v30 = vadd.f32 %v3930_v46, %v5463_v56  ;;  %v4044_v34 = vpop.f32.mrf.mxu1 }
 0x26a   : > { %v3932_v44 = vpop.f32.mrf.mxu0  ;;  %v4045_v37 = vadd.f32 %v4044_v34, %v4043_v27 }
 0x26b   : > { %v2336_v39 = vadd.f32 %v4042_v33, %v2175_v30  ;;  %v3933_v16 = vadd.f32 %v3932_v44, %v3931_v54  ;;  %v4046_v36 = vpop.f32.mrf.mxu1 }
 0x26c   : > { %v3934_v41 = vpop.f32.mrf.mxu0 }
 0x26d   : > { %3232 = vst [vmem:[%s5109_s24 + $0x2d0] sm:$0xff] %v2336_v39  ;;  %v2178_v57 = vadd.f32 %v3933_v16, %v5463_v56  ;;  %v4047_v28 = vpop.f32.mrf.mxu1 }
 0x26e   : > { %v3935_v38 = vpop.f32.mrf.mxu0  ;;  %v4048_v5 = vadd.f32 %v4047_v28, %v4046_v36 }
 0x26f   : > { %v2339_v45 = vadd.f32 %v4045_v37, %v2178_v57  ;;  %v3936_v47 = vadd.f32 %v3935_v38, %v3934_v41  ;;  %v4049_v50 = vpop.f32.mrf.mxu1 }
 0x270   : > { %v3937_v12 = vpop.f32.mrf.mxu0 }
 0x271   : > { %3233 = vst [vmem:[%s5109_s24 + $0x2d8] sm:$0xff] %v2339_v45  ;;  %v2183_v55 = vadd.f32 %v3936_v47, %v5463_v56  ;;  %v4050_v52 = vpop.f32.mrf.mxu1 }
 0x272   : > { %v3938_v6 = vpop.f32.mrf.mxu0  ;;  %v4051_v58 = vadd.f32 %v4050_v52, %v4049_v50 }
 0x273   : > { %v2344_v32 = vadd.f32 %v4048_v5, %v2183_v55  ;;  %v3939_v43 = vadd.f32 %v3938_v6, %v3937_v12  ;;  %v4052_v53 = vpop.f32.mrf.mxu1 }
 0x274   : > { %v3940_v15 = vpop.f32.mrf.mxu0 }
 0x275   : > { %3234 = vst [vmem:[%s5109_s24 + $0x2e0] sm:$0xff] %v2344_v32  ;;  %v2186_v2 = vadd.f32 %v3939_v43, %v5463_v56  ;;  %v4053_v17 = vpop.f32.mrf.mxu1 }
 0x276   : > { %v3941_v60 = vpop.f32.mrf.mxu0  ;;  %v4054_v21 = vadd.f32 %v4053_v17, %v4052_v53 }
 0x277   : > { %v2347_v62 = vadd.f32 %v4051_v58, %v2186_v2  ;;  %v3942_v63 = vadd.f32 %v3941_v60, %v3940_v15  ;;  %v4055_v61 = vpop.f32.mrf.mxu1 }
 0x278   : > { %v3943_v51 = vpop.f32.mrf.mxu0 }
 0x279   : > { %3235 = vst [vmem:[%s5109_s24 + $0x2e8] sm:$0xff] %v2347_v62  ;;  %v2191_v20 = vadd.f32 %v3942_v63, %v5463_v56  ;;  %v4056_v14 = vpop.f32.mrf.mxu1 }
 0x27a   : > { %v3944_v0 = vpop.f32.mrf.mxu0  ;;  %v4057_v8 = vadd.f32 %v4056_v14, %v4055_v61 }
 0x27b   : > { %v2352_v59 = vadd.f32 %v4054_v21, %v2191_v20  ;;  %v3945_v1 = vadd.f32 %v3944_v0, %v3943_v51  ;;  %v4186_v40 = vpop.f32.mrf.mxu1 }
 0x27c   : > { %v4074_v42 = vpop.f32.mrf.mxu0 }
 0x27d   : > { %3236 = vst [vmem:[%s5109_s24 + $0x2f0] sm:$0xff] %v2352_v59  ;;  %v2194_v10 = vadd.f32 %v3945_v1, %v5463_v56  ;;  %v4187_v13 = vpop.f32.mrf.mxu1 }
 0x27e   : > { %v4075_v11 = vpop.f32.mrf.mxu0  ;;  %v4188_v23 = vadd.f32 %v4187_v13, %v4186_v40 }
 0x27f   : > { %v2355_v49 = vadd.f32 %v4057_v8, %v2194_v10  ;;  %v4076_v7 = vadd.f32 %v4075_v11, %v4074_v42  ;;  %v4189_v19 = vpop.f32.mrf.mxu1 }
 0x280   : > { %v4077_v18 = vpop.f32.mrf.mxu0 }
 0x281   : > { %3237 = vst [vmem:[%s5109_s24 + $0x2f8] sm:$0xff] %v2355_v49  ;;  %v2689_v22 = vadd.f32 %v4076_v7, %v5558_v35  ;;  %v4190_v56 = vpop.f32.mrf.mxu1 }
 0x282   : > { %v4078_v3 = vpop.f32.mrf.mxu0  ;;  %v4191_v26 = vadd.f32 %v4190_v56, %v4189_v19 }
 0x283   : > { %v2850_v9 = vadd.f32 %v4188_v23, %v2689_v22  ;;  %v4079_v4 = vadd.f32 %v4078_v3, %v4077_v18  ;;  %v4192_v25 = vpop.f32.mrf.mxu1 }
 0x284   : > { %v4080_v24 = vpop.f32.mrf.mxu0 }
 0x285   : > { %3271 = vst [vmem:[%s5109_s24 + $0x300] sm:$0xff] %v2850_v9  ;;  %v2692_v48 = vadd.f32 %v4079_v4, %v5558_v35  ;;  %v4193_v31 = vpop.f32.mrf.mxu1 }
 0x286   : > { %v4081_v29 = vpop.f32.mrf.mxu0  ;;  %v4194_v44 = vadd.f32 %v4193_v31, %v4192_v25 }
 0x287   : > { %v2853_v46 = vadd.f32 %v4191_v26, %v2692_v48  ;;  %v4082_v54 = vadd.f32 %v4081_v29, %v4080_v24  ;;  %v4195_v30 = vpop.f32.mrf.mxu1 }
 0x288   : > { %v4083_v27 = vpop.f32.mrf.mxu0 }
 0x289   : > { %3272 = vst [vmem:[%s5109_s24 + $0x308] sm:$0xff] %v2853_v46  ;;  %v2697_v33 = vadd.f32 %v4082_v54, %v5558_v35  ;;  %v4196_v39 = vpop.f32.mrf.mxu1 }
 0x28a   : > { %v4084_v34 = vpop.f32.mrf.mxu0  ;;  %v4197_v38 = vadd.f32 %v4196_v39, %v4195_v30 }
 0x28b   : > { %v2858_v16 = vadd.f32 %v4194_v44, %v2697_v33  ;;  %v4085_v41 = vadd.f32 %v4084_v34, %v4083_v27  ;;  %v4198_v57 = vpop.f32.mrf.mxu1 }
 0x28c   : > { %v4086_v36 = vpop.f32.mrf.mxu0 }
 0x28d   : > { %3273 = vst [vmem:[%s5109_s24 + $0x310] sm:$0xff] %v2858_v16  ;;  %v2700_v37 = vadd.f32 %v4085_v41, %v5558_v35  ;;  %v4199_v45 = vpop.f32.mrf.mxu1 }
 0x28e   : > { %v4087_v28 = vpop.f32.mrf.mxu0  ;;  %v4200_v6 = vadd.f32 %v4199_v45, %v4198_v57 }
 0x28f   : > { %v2861_v47 = vadd.f32 %v4197_v38, %v2700_v37  ;;  %v4088_v12 = vadd.f32 %v4087_v28, %v4086_v36  ;;  %v4201_v55 = vpop.f32.mrf.mxu1 }
 0x290   : > { %v4089_v50 = vpop.f32.mrf.mxu0 }
 0x291   : > { %3274 = vst [vmem:[%s5109_s24 + $0x318] sm:$0xff] %v2861_v47  ;;  %v2705_v5 = vadd.f32 %v4088_v12, %v5558_v35  ;;  %v4202_v32 = vpop.f32.mrf.mxu1 }
 0x292   : > { %v4090_v52 = vpop.f32.mrf.mxu0  ;;  %v4203_v60 = vadd.f32 %v4202_v32, %v4201_v55 }
 0x293   : > { %v2866_v43 = vadd.f32 %v4200_v6, %v2705_v5  ;;  %v4091_v15 = vadd.f32 %v4090_v52, %v4089_v50  ;;  %v4204_v2 = vpop.f32.mrf.mxu1 }
 0x294   : > { %v4092_v53 = vpop.f32.mrf.mxu0 }
 0x295   : > { %3275 = vst [vmem:[%s5109_s24 + $0x320] sm:$0xff] %v2866_v43  ;;  %v2708_v58 = vadd.f32 %v4091_v15, %v5558_v35  ;;  %v4205_v62 = vpop.f32.mrf.mxu1 }
 0x296   : > { %v4093_v17 = vpop.f32.mrf.mxu0  ;;  %v4206_v0 = vadd.f32 %v4205_v62, %v4204_v2 }
 0x297   : > { %v2869_v63 = vadd.f32 %v4203_v60, %v2708_v58  ;;  %v4094_v51 = vadd.f32 %v4093_v17, %v4092_v53  ;;  %v4207_v20 = vpop.f32.mrf.mxu1 }
 0x298   : > { %v4095_v61 = vpop.f32.mrf.mxu0 }
 0x299   : > { %3276 = vst [vmem:[%s5109_s24 + $0x328] sm:$0xff] %v2869_v63  ;;  %v2713_v21 = vadd.f32 %v4094_v51, %v5558_v35  ;;  %v4208_v59 = vpop.f32.mrf.mxu1 }
 0x29a   : > { %v4096_v14 = vpop.f32.mrf.mxu0  ;;  %v4209_v11 = vadd.f32 %v4208_v59, %v4207_v20 }
 0x29b   : > { %v2874_v1 = vadd.f32 %v4206_v0, %v2713_v21  ;;  %v4097_v42 = vadd.f32 %v4096_v14, %v4095_v61  ;;  %v4210_v10 = vpop.f32.mrf.mxu1 }
 0x29c   : > { %v4098_v40 = vpop.f32.mrf.mxu0 }
 0x29d   : > { %3277 = vst [vmem:[%s5109_s24 + $0x330] sm:$0xff] %v2874_v1  ;;  %v2716_v8 = vadd.f32 %v4097_v42, %v5558_v35  ;;  %v4211_v49 = vpop.f32.mrf.mxu1 }
 0x29e   : > { %v4099_v13 = vpop.f32.mrf.mxu0  ;;  %v4212_v3 = vadd.f32 %v4211_v49, %v4210_v10 }
 0x29f   : > { %v2877_v7 = vadd.f32 %v4209_v11, %v2716_v8  ;;  %v4100_v18 = vadd.f32 %v4099_v13, %v4098_v40  ;;  %v4213_v22 = vpop.f32.mrf.mxu1 }
 0x2a0   : > { %v4101_v19 = vpop.f32.mrf.mxu0 }
 0x2a1   : > { %3278 = vst [vmem:[%s5109_s24 + $0x338] sm:$0xff] %v2877_v7  ;;  %v2721_v23 = vadd.f32 %v4100_v18, %v5558_v35  ;;  %v4214_v9 = vpop.f32.mrf.mxu1 }
 0x2a2   : > { %v4102_v56 = vpop.f32.mrf.mxu0  ;;  %v4215_v29 = vadd.f32 %v4214_v9, %v4213_v22 }
 0x2a3   : > { %v2882_v4 = vadd.f32 %v4212_v3, %v2721_v23  ;;  %v4103_v24 = vadd.f32 %v4102_v56, %v4101_v19  ;;  %v4216_v48 = vpop.f32.mrf.mxu1 }
 0x2a4   : > { %v4104_v25 = vpop.f32.mrf.mxu0 }
 0x2a5   : > { %3279 = vst [vmem:[%s5109_s24 + $0x340] sm:$0xff] %v2882_v4  ;;  %v2724_v26 = vadd.f32 %v4103_v24, %v5558_v35  ;;  %v4217_v46 = vpop.f32.mrf.mxu1 }
 0x2a6   : > { %v4105_v31 = vpop.f32.mrf.mxu0  ;;  %v4218_v34 = vadd.f32 %v4217_v46, %v4216_v48 }
 0x2a7   : > { %v2885_v54 = vadd.f32 %v4215_v29, %v2724_v26  ;;  %v4106_v27 = vadd.f32 %v4105_v31, %v4104_v25  ;;  %v4219_v33 = vpop.f32.mrf.mxu1 }
 0x2a8   : > { %v4107_v30 = vpop.f32.mrf.mxu0 }
 0x2a9   : > { %3280 = vst [vmem:[%s5109_s24 + $0x348] sm:$0xff] %v2885_v54  ;;  %v2729_v44 = vadd.f32 %v4106_v27, %v5558_v35  ;;  %v4220_v16 = vpop.f32.mrf.mxu1 }
 0x2aa   : > { %v4108_v39 = vpop.f32.mrf.mxu0  ;;  %v4221_v28 = vadd.f32 %v4220_v16, %v4219_v33 }
 0x2ab   : > { %v2890_v41 = vadd.f32 %v4218_v34, %v2729_v44  ;;  %v4109_v36 = vadd.f32 %v4108_v39, %v4107_v30  ;;  %v4222_v37 = vpop.f32.mrf.mxu1 }
 0x2ac   : > { %v4110_v57 = vpop.f32.mrf.mxu0 }
 0x2ad   : > { %3281 = vst [vmem:[%s5109_s24 + $0x350] sm:$0xff] %v2890_v41  ;;  %v2732_v38 = vadd.f32 %v4109_v36, %v5558_v35  ;;  %v4223_v47 = vpop.f32.mrf.mxu1 }
 0x2ae   : > { %v4111_v45 = vpop.f32.mrf.mxu0  ;;  %v4224_v52 = vadd.f32 %v4223_v47, %v4222_v37 }
 0x2af   : > { %v2893_v12 = vadd.f32 %v4221_v28, %v2732_v38  ;;  %v4112_v50 = vadd.f32 %v4111_v45, %v4110_v57  ;;  %v4225_v5 = vpop.f32.mrf.mxu1 }
 0x2b0   : > { %v4113_v55 = vpop.f32.mrf.mxu0 }
 0x2b1   : > { %3282 = vst [vmem:[%s5109_s24 + $0x358] sm:$0xff] %v2893_v12  ;;  %v2737_v6 = vadd.f32 %v4112_v50, %v5558_v35  ;;  %v4226_v43 = vpop.f32.mrf.mxu1 }
 0x2b2   : > { %v4114_v32 = vpop.f32.mrf.mxu0  ;;  %v4227_v17 = vadd.f32 %v4226_v43, %v4225_v5 }
 0x2b3   : > { %v2898_v15 = vadd.f32 %v4224_v52, %v2737_v6  ;;  %v4115_v53 = vadd.f32 %v4114_v32, %v4113_v55  ;;  %v4228_v58 = vpop.f32.mrf.mxu1 }
 0x2b4   : > { %v4116_v2 = vpop.f32.mrf.mxu0 }
 0x2b5   : > { %3283 = vst [vmem:[%s5109_s24 + $0x360] sm:$0xff] %v2898_v15  ;;  %v2740_v60 = vadd.f32 %v4115_v53, %v5558_v35  ;;  %v4229_v63 = vpop.f32.mrf.mxu1 }
 0x2b6   : > { %v4117_v62 = vpop.f32.mrf.mxu0  ;;  %v4230_v14 = vadd.f32 %v4229_v63, %v4228_v58 }
 0x2b7   : > { %v2901_v51 = vadd.f32 %v4227_v17, %v2740_v60  ;;  %v4118_v61 = vadd.f32 %v4117_v62, %v4116_v2  ;;  %v4231_v21 = vpop.f32.mrf.mxu1 }
 0x2b8   : > { %v4119_v20 = vpop.f32.mrf.mxu0 }
 0x2b9   : > { %3284 = vst [vmem:[%s5109_s24 + $0x368] sm:$0xff] %v2901_v51  ;;  %v2745_v0 = vadd.f32 %v4118_v61, %v5558_v35  ;;  %v4232_v1 = vpop.f32.mrf.mxu1 }
 0x2ba   : > { %v4120_v59 = vpop.f32.mrf.mxu0  ;;  %v4233_v13 = vadd.f32 %v4232_v1, %v4231_v21 }
 0x2bb   : > { %v2906_v42 = vadd.f32 %v4230_v14, %v2745_v0  ;;  %v4121_v40 = vadd.f32 %v4120_v59, %v4119_v20  ;;  %v4234_v8 = vpop.f32.mrf.mxu1 }
 0x2bc   : > { %v4122_v10 = vpop.f32.mrf.mxu0 }
 0x2bd   : > { %3285 = vst [vmem:[%s5109_s24 + $0x370] sm:$0xff] %v2906_v42  ;;  %v2748_v11 = vadd.f32 %v4121_v40, %v5558_v35  ;;  %v4235_v7 = vpop.f32.mrf.mxu1 }
 0x2be   : > { %v4123_v49 = vpop.f32.mrf.mxu0  ;;  %v4236_v56 = vadd.f32 %v4235_v7, %v4234_v8 }
 0x2bf   : > { %v2909_v18 = vadd.f32 %v4233_v13, %v2748_v11  ;;  %v4124_v19 = vadd.f32 %v4123_v49, %v4122_v10  ;;  %v4237_v23 = vpop.f32.mrf.mxu1 }
 0x2c0   : > { %v4125_v22 = vpop.f32.mrf.mxu0 }
 0x2c1   : > { %3286 = vst [vmem:[%s5109_s24 + $0x378] sm:$0xff] %v2909_v18  ;;  %v2753_v3 = vadd.f32 %v4124_v19, %v5558_v35  ;;  %v4238_v4 = vpop.f32.mrf.mxu1 }
 0x2c2   : > { %v4126_v9 = vpop.f32.mrf.mxu0  ;;  %v4239_v31 = vadd.f32 %v4238_v4, %v4237_v23 }
 0x2c3   : > { %v2914_v24 = vadd.f32 %v4236_v56, %v2753_v3  ;;  %v4127_v25 = vadd.f32 %v4126_v9, %v4125_v22  ;;  %v4240_v26 = vpop.f32.mrf.mxu1 }
 0x2c4   : > { %v4128_v48 = vpop.f32.mrf.mxu0 }
 0x2c5   : > { %3287 = vst [vmem:[%s5109_s24 + $0x380] sm:$0xff] %v2914_v24  ;;  %v2756_v29 = vadd.f32 %v4127_v25, %v5558_v35  ;;  %v4241_v54 = vpop.f32.mrf.mxu1 }
 0x2c6   : > { %v4129_v46 = vpop.f32.mrf.mxu0  ;;  %v4242_v39 = vadd.f32 %v4241_v54, %v4240_v26 }
 0x2c7   : > { %v2917_v27 = vadd.f32 %v4239_v31, %v2756_v29  ;;  %v4130_v30 = vadd.f32 %v4129_v46, %v4128_v48  ;;  %v4243_v44 = vpop.f32.mrf.mxu1 }
 0x2c8   : > { %v4131_v33 = vpop.f32.mrf.mxu0 }
 0x2c9   : > { %3288 = vst [vmem:[%s5109_s24 + $0x388] sm:$0xff] %v2917_v27  ;;  %v2761_v34 = vadd.f32 %v4130_v30, %v5558_v35  ;;  %v4244_v41 = vpop.f32.mrf.mxu1 }
 0x2ca   : > { %v4132_v16 = vpop.f32.mrf.mxu0  ;;  %v4245_v45 = vadd.f32 %v4244_v41, %v4243_v44 }
 0x2cb   : > { %v2922_v36 = vadd.f32 %v4242_v39, %v2761_v34  ;;  %v4133_v57 = vadd.f32 %v4132_v16, %v4131_v33  ;;  %v4246_v38 = vpop.f32.mrf.mxu1 }
 0x2cc   : > { %v4134_v37 = vpop.f32.mrf.mxu0 }
 0x2cd   : > { %3289 = vst [vmem:[%s5109_s24 + $0x390] sm:$0xff] %v2922_v36  ;;  %v2764_v28 = vadd.f32 %v4133_v57, %v5558_v35  ;;  %v4247_v12 = vpop.f32.mrf.mxu1 }
 0x2ce   : > { %v4135_v47 = vpop.f32.mrf.mxu0  ;;  %v4248_v32 = vadd.f32 %v4247_v12, %v4246_v38 }
 0x2cf   : > { %v2925_v50 = vadd.f32 %v4245_v45, %v2764_v28  ;;  %v4136_v55 = vadd.f32 %v4135_v47, %v4134_v37  ;;  %v4249_v6 = vpop.f32.mrf.mxu1 }
 0x2d0   : > { %v4137_v5 = vpop.f32.mrf.mxu0 }
 0x2d1   : > { %3290 = vst [vmem:[%s5109_s24 + $0x398] sm:$0xff] %v2925_v50  ;;  %v2769_v52 = vadd.f32 %v4136_v55, %v5558_v35  ;;  %v4250_v15 = vpop.f32.mrf.mxu1 }
 0x2d2   : > { %v4138_v43 = vpop.f32.mrf.mxu0  ;;  %v4251_v62 = vadd.f32 %v4250_v15, %v4249_v6 }
 0x2d3   : > { %v2930_v53 = vadd.f32 %v4248_v32, %v2769_v52  ;;  %v4139_v2 = vadd.f32 %v4138_v43, %v4137_v5  ;;  %v4252_v60 = vpop.f32.mrf.mxu1 }
 0x2d4   : > { %v4140_v58 = vpop.f32.mrf.mxu0 }
 0x2d5   : > { %3291 = vst [vmem:[%s5109_s24 + $0x3a0] sm:$0xff] %v2930_v53  ;;  %v2772_v17 = vadd.f32 %v4139_v2, %v5558_v35  ;;  %v4253_v51 = vpop.f32.mrf.mxu1 }
 0x2d6   : > { %v4141_v63 = vpop.f32.mrf.mxu0  ;;  %v4254_v59 = vadd.f32 %v4253_v51, %v4252_v60 }
 0x2d7   : > { %v2933_v61 = vadd.f32 %v4251_v62, %v2772_v17  ;;  %v4142_v20 = vadd.f32 %v4141_v63, %v4140_v58  ;;  %v4255_v0 = vpop.f32.mrf.mxu1 }
 0x2d8   : > { %v4143_v21 = vpop.f32.mrf.mxu0 }
 0x2d9   : > { %3292 = vst [vmem:[%s5109_s24 + $0x3a8] sm:$0xff] %v2933_v61  ;;  %v2777_v14 = vadd.f32 %v4142_v20, %v5558_v35  ;;  %v4256_v42 = vpop.f32.mrf.mxu1 }
 0x2da   : > { %v4144_v1 = vpop.f32.mrf.mxu0  ;;  %v4257_v49 = vadd.f32 %v4256_v42, %v4255_v0 }
 0x2db   : > { %v2938_v40 = vadd.f32 %v4254_v59, %v2777_v14  ;;  %v4145_v10 = vadd.f32 %v4144_v1, %v4143_v21  ;;  %v4258_v11 = vpop.f32.mrf.mxu1 }
 0x2dc   : > { %v4146_v8 = vpop.f32.mrf.mxu0 }
 0x2dd   : > { %3293 = vst [vmem:[%s5109_s24 + $0x3b0] sm:$0xff] %v2938_v40  ;;  %v2780_v13 = vadd.f32 %v4145_v10, %v5558_v35  ;;  %v4259_v18 = vpop.f32.mrf.mxu1 }
 0x2de   : > { %v4147_v7 = vpop.f32.mrf.mxu0  ;;  %v4260_v9 = vadd.f32 %v4259_v18, %v4258_v11 }
 0x2df   : > { %v2941_v19 = vadd.f32 %v4257_v49, %v2780_v13  ;;  %v4148_v22 = vadd.f32 %v4147_v7, %v4146_v8  ;;  %v4261_v3 = vpop.f32.mrf.mxu1 }
 0x2e0   : > { %v4149_v23 = vpop.f32.mrf.mxu0 }
 0x2e1   : > { %3294 = vst [vmem:[%s5109_s24 + $0x3b8] sm:$0xff] %v2941_v19  ;;  %v2785_v56 = vadd.f32 %v4148_v22, %v5558_v35  ;;  %v4262_v24 = vpop.f32.mrf.mxu1 }
 0x2e2   : > { %v4150_v4 = vpop.f32.mrf.mxu0  ;;  %v4263_v46 = vadd.f32 %v4262_v24, %v4261_v3 }
 0x2e3   : > { %v2946_v25 = vadd.f32 %v4260_v9, %v2785_v56  ;;  %v4151_v48 = vadd.f32 %v4150_v4, %v4149_v23  ;;  %v4264_v29 = vpop.f32.mrf.mxu1 }
 0x2e4   : > { %v4152_v26 = vpop.f32.mrf.mxu0 }
 0x2e5   : > { %3295 = vst [vmem:[%s5109_s24 + $0x3c0] sm:$0xff] %v2946_v25  ;;  %v2788_v31 = vadd.f32 %v4151_v48, %v5558_v35  ;;  %v4265_v27 = vpop.f32.mrf.mxu1 }
 0x2e6   : > { %v4153_v54 = vpop.f32.mrf.mxu0  ;;  %v4266_v16 = vadd.f32 %v4265_v27, %v4264_v29 }
 0x2e7   : > { %v2949_v30 = vadd.f32 %v4263_v46, %v2788_v31  ;;  %v4154_v33 = vadd.f32 %v4153_v54, %v4152_v26  ;;  %v4267_v34 = vpop.f32.mrf.mxu1 }
 0x2e8   : > { %v4155_v44 = vpop.f32.mrf.mxu0 }
 0x2e9   : > { %3296 = vst [vmem:[%s5109_s24 + $0x3c8] sm:$0xff] %v2949_v30  ;;  %v2793_v39 = vadd.f32 %v4154_v33, %v5558_v35  ;;  %v4268_v36 = vpop.f32.mrf.mxu1 }
 0x2ea   : > { %v4156_v41 = vpop.f32.mrf.mxu0  ;;  %v4269_v47 = vadd.f32 %v4268_v36, %v4267_v34 }
 0x2eb   : > { %v2954_v57 = vadd.f32 %v4266_v16, %v2793_v39  ;;  %v4157_v37 = vadd.f32 %v4156_v41, %v4155_v44  ;;  %v4270_v28 = vpop.f32.mrf.mxu1 }
 0x2ec   : > { %v4158_v38 = vpop.f32.mrf.mxu0 }
 0x2ed   : > { %3297 = vst [vmem:[%s5109_s24 + $0x3d0] sm:$0xff] %v2954_v57  ;;  %v2796_v45 = vadd.f32 %v4157_v37, %v5558_v35  ;;  %v4271_v50 = vpop.f32.mrf.mxu1 }
 0x2ee   : > { %v4159_v12 = vpop.f32.mrf.mxu0  ;;  %v4272_v43 = vadd.f32 %v4271_v50, %v4270_v28 }
 0x2ef   : > { %v2957_v55 = vadd.f32 %v4269_v47, %v2796_v45  ;;  %v4160_v5 = vadd.f32 %v4159_v12, %v4158_v38  ;;  %v4273_v52 = vpop.f32.mrf.mxu1 }
 0x2f0   : > { %v4161_v6 = vpop.f32.mrf.mxu0 }
 0x2f1   : > { %3298 = vst [vmem:[%s5109_s24 + $0x3d8] sm:$0xff] %v2957_v55  ;;  %v2801_v32 = vadd.f32 %v4160_v5, %v5558_v35  ;;  %v4274_v53 = vpop.f32.mrf.mxu1 }
 0x2f2   : > { %v4162_v15 = vpop.f32.mrf.mxu0  ;;  %v4275_v63 = vadd.f32 %v4274_v53, %v4273_v52 }
 0x2f3   : > { %v2962_v2 = vadd.f32 %v4272_v43, %v2801_v32  ;;  %v4163_v58 = vadd.f32 %v4162_v15, %v4161_v6  ;;  %v4276_v17 = vpop.f32.mrf.mxu1 }
 0x2f4   : > { %v4164_v60 = vpop.f32.mrf.mxu0 }
 0x2f5   : > { %3299 = vst [vmem:[%s5109_s24 + $0x3e0] sm:$0xff] %v2962_v2  ;;  %v2804_v62 = vadd.f32 %v4163_v58, %v5558_v35  ;;  %v4277_v61 = vpop.f32.mrf.mxu1 }
 0x2f6   : > { %v4165_v51 = vpop.f32.mrf.mxu0  ;;  %v4278_v1 = vadd.f32 %v4277_v61, %v4276_v17 }
 0x2f7   : > { %v2965_v20 = vadd.f32 %v4275_v63, %v2804_v62  ;;  %v4166_v21 = vadd.f32 %v4165_v51, %v4164_v60  ;;  %v4279_v14 = vpop.f32.mrf.mxu1 }
 0x2f8   : > { %v4167_v0 = vpop.f32.mrf.mxu0 }
 0x2f9   : > { %3300 = vst [vmem:[%s5109_s24 + $0x3e8] sm:$0xff] %v2965_v20  ;;  %v2809_v59 = vadd.f32 %v4166_v21, %v5558_v35  ;;  %v4280_v40 = vpop.f32.mrf.mxu1 }
 0x2fa   : > { %v4168_v42 = vpop.f32.mrf.mxu0  ;;  %v4281_v13 = vadd.f32 %v4280_v40, %v4279_v14 }
 0x2fb   : > { %v2970_v10 = vadd.f32 %v4278_v1, %v2809_v59  ;;  %v4169_v8 = vadd.f32 %v4168_v42, %v4167_v0 }
 0x2fd   : > { %3301 = vst [vmem:[%s5109_s24 + $0x3f0] sm:$0xff] %v2970_v10  ;;  %v2812_v11 = vadd.f32 %v4169_v8, %v5558_v35 }
 0x2ff   : > { %v2973_v49 = vadd.f32 %v4281_v13, %v2812_v11 }
 0x301   : > { %3302 = vst [vmem:[%s5109_s24 + $0x3f8] sm:$0xff] %v2973_v49 }
 0x302 PF: > { %s15_s18 = sadd.s32 1, %s4425_s18  }
 0x303   : > { %p12_p4 = scmp.ge.s32.totalorder %s15_s18, 4  }
 0x305   :  { %14 = sbr.rel (!%p12_p4) target bundleno = 1 (0x1), region = 73 }

</bundles_post_ra>
